<compile_context>
chip_gen: v5e
topology: v5e:2x2
jax: 0.10.0
libtpu: 0.0.40
codegen_flags: <defaults>
</compile_context>

<pallas_src>
import jax
import jax.numpy as jnp
from jax.experimental import pallas as pl
from jax.experimental.pallas import tpu as pltpu

IN_DIM, H1, H2, H3, OUT_DIM = 784, 800, 130, 80, 10
# Lane-dense (multiple-of-128) padded sizes for the ragged dims.
H1P, H2P, H3P, OUTP = 896, 256, 128, 128


def _mlp_kernel(x_ref,
                w1_ref, b1_ref,
                w2_ref, b2_ref,
                w3_ref, b3_ref,
                w4_ref, b4_ref,
                o_ref):
    # layer 1: [TB, 784]bf16 @ [784, 896]bf16 -> f32 acc, +bias, ReLU
    h = jnp.dot(x_ref[...], w1_ref[...], preferred_element_type=jnp.float32)
    h = jnp.maximum(h + b1_ref[...], 0.0).astype(jnp.bfloat16)
    # layer 2: [TB, 896] @ [896, 256]  (130 zero-padded to 256)
    h = jnp.dot(h, w2_ref[...], preferred_element_type=jnp.float32)
    h = jnp.maximum(h + b2_ref[...], 0.0).astype(jnp.bfloat16)
    # layer 3: [TB, 256] @ [256, 128]  (80 zero-padded to 128)
    h = jnp.dot(h, w3_ref[...], preferred_element_type=jnp.float32)
    h = jnp.maximum(h + b3_ref[...], 0.0).astype(jnp.bfloat16)
    # TODO(synk): Dropout(p=0.5) is identity in eval mode; training-mode
    # masking would use pltpu.prng_seed + pltpu.prng_random_bits.
    # output layer: [TB, 128] @ [128, 128]  (10 zero-padded to 128), no act.
    o = jnp.dot(h, w4_ref[...], preferred_element_type=jnp.float32)
    o_ref[...] = (o + b4_ref[...]).astype(o_ref.dtype)


def _zero_pad(a, shape):
    pads = [(0, t - s) for s, t in zip(a.shape, shape)]
    return jnp.pad(a, pads)


def prepare_params(params):
    """Cast weights to bf16 and zero-pad ragged dims to lane-dense sizes.

    params: dict {"l1","l2","l3","out"} -> (w [in, out], b [1, out]) in f32,
    where w is the transpose of PyTorch's Linear.weight.
    """
    (w1, b1), (w2, b2), (w3, b3), (w4, b4) = (
        params["l1"], params["l2"], params["l3"], params["out"])
    w1p = _zero_pad(w1, (IN_DIM, H1P)).astype(jnp.bfloat16)    # [784, 896]
    b1p = _zero_pad(b1, (1, H1P)).astype(jnp.float32)
    w2p = _zero_pad(w2, (H1P, H2P)).astype(jnp.bfloat16)       # [896, 256]
    b2p = _zero_pad(b2, (1, H2P)).astype(jnp.float32)
    w3p = _zero_pad(w3, (H2P, H3P)).astype(jnp.bfloat16)       # [256, 128]
    b3p = _zero_pad(b3, (1, H3P)).astype(jnp.float32)
    w4p = _zero_pad(w4, (H3P, OUTP)).astype(jnp.bfloat16)      # [128, 128]
    b4p = _zero_pad(b4, (1, OUTP)).astype(jnp.float32)
    return (w1p, b1p, w2p, b2p, w3p, b3p, w4p, b4p)


def _build_pallas_call(padded_batch, batch_tile):
    def const_spec(shape):
        # Weights/biases never change across the grid.
        return pl.BlockSpec(shape, lambda i: (0, 0))

    in_specs = [
        pl.BlockSpec((batch_tile, IN_DIM), lambda i: (i, 0)),
        const_spec((IN_DIM, H1P)), const_spec((1, H1P)),
        const_spec((H1P, H2P)),    const_spec((1, H2P)),
        const_spec((H2P, H3P)),    const_spec((1, H3P)),
        const_spec((H3P, OUTP)),   const_spec((1, OUTP)),
    ]
    return pl.pallas_call(
        _mlp_kernel,
        out_shape=jax.ShapeDtypeStruct((padded_batch, OUTP), jnp.float32),
        grid_spec=pltpu.PrefetchScalarGridSpec(
            num_scalar_prefetch=0,
            grid=(padded_batch // batch_tile,),
            in_specs=in_specs,
            out_specs=pl.BlockSpec((batch_tile, OUTP), lambda i: (i, 0)),
        ),
        compiler_params=pltpu.CompilerParams(
            dimension_semantics=("parallel",),
            vmem_limit_bytes=32 * 1024 * 1024,
        ),
    )


def mnist_mlp_forward(x, params, *, batch_tile=128):
    """x: [B, 784] float32.  Returns [B, 10] float32 logits."""
    assert batch_tile % 16 == 0, "bf16 sublane packing needs multiple-of-16 tiles"
    B = x.shape[0]
    padded_B = ((B + batch_tile - 1) // batch_tile) * batch_tile

    packed = prepare_params(params)
    x_bf16 = x.astype(jnp.bfloat16)
    if padded_B != B:
        x_bf16 = jnp.pad(x_bf16, ((0, padded_B - B), (0, 0)))
    # NOTE: IN_DIM=784 left unpadded (ragged final K tile on layer 1 is a
    # ~2-3% effect; pad x to 896 cols only if the bundle dump shows it matters).

    call = _build_pallas_call(padded_B, batch_tile)
    out = call(x_bf16, *packed)
    return out[:B, :OUT_DIM]


def init_params(key):
    """Deterministic init mimicking PyTorch Linear's U(-1/sqrt(fan_in), +...)."""
    dims = [(IN_DIM, H1), (H1, H2), (H2, H3), (H3, OUT_DIM)]
    names = ["l1", "l2", "l3", "out"]
    params = {}
    for name, (fan_in, fan_out) in zip(names, dims):
        key, kw, kb = jax.random.split(key, 3)
        bound = 1.0 / jnp.sqrt(fan_in)
        w = jax.random.uniform(kw, (fan_in, fan_out), jnp.float32,
                               minval=-bound, maxval=bound)
        b = jax.random.uniform(kb, (1, fan_out), jnp.float32,
                               minval=-bound, maxval=bound)
        params[name] = (w, b)
    return params


def reference_forward(x, params, *, matmul_dtype=jnp.float32):
    """Pure-JAX reference (eval-mode dropout = identity)."""
    h = x
    for name in ["l1", "l2", "l3"]:
        w, b = params[name]
        h = jnp.dot(h.astype(matmul_dtype), w.astype(matmul_dtype),
                    preferred_element_type=jnp.float32)
        h = jnp.maximum(h + b, 0.0)
    w, b = params["out"]
    return jnp.dot(h.astype(matmul_dtype), w.astype(matmul_dtype),
                   preferred_element_type=jnp.float32) + b


if __name__ == "__main__":
    key = jax.random.PRNGKey(0)
    key, kx = jax.random.split(key)
    # Small demo shapes: B=8 exercises the batch-padding path (padded to one
    # 128-row tile / single grid step).
    B = 8
    x = jax.random.normal(kx, (B, IN_DIM), jnp.float32)
    params = init_params(key)

    out = mnist_mlp_forward(x, params, batch_tile=128)
    out = jax.block_until_ready(out)
    assert out.shape == (B, OUT_DIM)

    # Check against a bf16-matmul reference (same precision as the kernel)...
    ref_bf16 = reference_forward(x, params, matmul_dtype=jnp.bfloat16)
    assert jnp.allclose(out, ref_bf16, atol=2e-2, rtol=2e-2), \
        "mismatch vs bf16 reference"
    # ...and loosely against the full-f32 reference (covers bf16 quantization).
    ref_f32 = reference_forward(x, params, matmul_dtype=jnp.float32)
    assert jnp.allclose(out, ref_f32, atol=8e-2, rtol=8e-2), \
        "mismatch vs f32 reference"

    print("KERNEL_OK")
</pallas_src>

<mosaic_0001>
module attributes {stable_mosaic.version = 11 : i64} {
  func.func @_mlp_kernel(%arg0: i32, %arg1: memref<128x784xbf16, #tpu.memory_space<vmem>>, %arg2: memref<784x896xbf16, #tpu.memory_space<vmem>>, %arg3: memref<1x896xf32, #tpu.memory_space<vmem>>, %arg4: memref<896x256xbf16, #tpu.memory_space<vmem>>, %arg5: memref<1x256xf32, #tpu.memory_space<vmem>>, %arg6: memref<256x128xbf16, #tpu.memory_space<vmem>>, %arg7: memref<1x128xf32, #tpu.memory_space<vmem>>, %arg8: memref<128x128xbf16, #tpu.memory_space<vmem>>, %arg9: memref<1x128xf32, #tpu.memory_space<vmem>>, %arg10: memref<128x128xf32, #tpu.memory_space<vmem>>) attributes {dimension_semantics = [#tpu.dimension_semantics<parallel>], iteration_bounds = array<i64: 1>, scalar_prefetch = 0 : i64, scratch_operands = 0 : i64, tpu.core_type = #tpu.core_type<tc>, window_params = [{transform_indices = @transform_0, window_bounds = array<i64: 128, 784>}, {pipeline_mode = #tpu.pipeline_mode<synchronous>, transform_indices = @transform_1, window_bounds = array<i64: 784, 896>}, {pipeline_mode = #tpu.pipeline_mode<synchronous>, transform_indices = @transform_2, window_bounds = array<i64: 1, 896>}, {pipeline_mode = #tpu.pipeline_mode<synchronous>, transform_indices = @transform_3, window_bounds = array<i64: 896, 256>}, {pipeline_mode = #tpu.pipeline_mode<synchronous>, transform_indices = @transform_4, window_bounds = array<i64: 1, 256>}, {pipeline_mode = #tpu.pipeline_mode<synchronous>, transform_indices = @transform_5, window_bounds = array<i64: 256, 128>}, {pipeline_mode = #tpu.pipeline_mode<synchronous>, transform_indices = @transform_6, window_bounds = array<i64: 1, 128>}, {pipeline_mode = #tpu.pipeline_mode<synchronous>, transform_indices = @transform_7, window_bounds = array<i64: 128, 128>}, {pipeline_mode = #tpu.pipeline_mode<synchronous>, transform_indices = @transform_8, window_bounds = array<i64: 1, 128>}, {transform_indices = @transform_9, window_bounds = array<i64: 128, 128>}]} {
    %c0 = arith.constant 0 : index
    %c0_0 = arith.constant 0 : index
    %0 = vector.load %arg1[%c0, %c0_0] : memref<128x784xbf16, #tpu.memory_space<vmem>>, vector<128x784xbf16>
    %c0_1 = arith.constant 0 : index
    %c0_2 = arith.constant 0 : index
    %1 = vector.load %arg2[%c0_1, %c0_2] : memref<784x896xbf16, #tpu.memory_space<vmem>>, vector<784x896xbf16>
    %cst = arith.constant dense<0.000000e+00> : vector<128x896xf32>
    %2 = tpu.matmul %0, %1, %cst {dimension_numbers = #tpu.dot_dimension_numbers<[1], [0], [0], [1], [0, 0, 1, 1], [], []>} : vector<128x784xbf16>, vector<784x896xbf16>, vector<128x896xf32> -> vector<128x896xf32>
    %c0_3 = arith.constant 0 : index
    %c0_4 = arith.constant 0 : index
    %3 = vector.load %arg3[%c0_3, %c0_4] : memref<1x896xf32, #tpu.memory_space<vmem>>, vector<1x896xf32>
    %4 = vector.broadcast %3 : vector<1x896xf32> to vector<128x896xf32>
    %5 = arith.addf %2, %4 : vector<128x896xf32>
    %cst_5 = arith.constant 0.000000e+00 : f32
    %6 = vector.broadcast %cst_5 : f32 to vector<128x896xf32>
    %7 = arith.maximumf %5, %6 : vector<128x896xf32>
    %8 = arith.truncf %7 : vector<128x896xf32> to vector<128x896xbf16>
    %c0_6 = arith.constant 0 : index
    %c0_7 = arith.constant 0 : index
    %9 = vector.load %arg4[%c0_6, %c0_7] : memref<896x256xbf16, #tpu.memory_space<vmem>>, vector<896x256xbf16>
    %cst_8 = arith.constant dense<0.000000e+00> : vector<128x256xf32>
    %10 = tpu.matmul %8, %9, %cst_8 {dimension_numbers = #tpu.dot_dimension_numbers<[1], [0], [0], [1], [0, 0, 1, 1], [], []>} : vector<128x896xbf16>, vector<896x256xbf16>, vector<128x256xf32> -> vector<128x256xf32>
    %c0_9 = arith.constant 0 : index
    %c0_10 = arith.constant 0 : index
    %11 = vector.load %arg5[%c0_9, %c0_10] : memref<1x256xf32, #tpu.memory_space<vmem>>, vector<1x256xf32>
    %12 = vector.broadcast %11 : vector<1x256xf32> to vector<128x256xf32>
    %13 = arith.addf %10, %12 : vector<128x256xf32>
    %cst_11 = arith.constant 0.000000e+00 : f32
    %14 = vector.broadcast %cst_11 : f32 to vector<128x256xf32>
    %15 = arith.maximumf %13, %14 : vector<128x256xf32>
    %16 = arith.truncf %15 : vector<128x256xf32> to vector<128x256xbf16>
    %c0_12 = arith.constant 0 : index
    %c0_13 = arith.constant 0 : index
    %17 = vector.load %arg6[%c0_12, %c0_13] : memref<256x128xbf16, #tpu.memory_space<vmem>>, vector<256x128xbf16>
    %cst_14 = arith.constant dense<0.000000e+00> : vector<128x128xf32>
    %18 = tpu.matmul %16, %17, %cst_14 {dimension_numbers = #tpu.dot_dimension_numbers<[1], [0], [0], [1], [0, 0, 1, 1], [], []>} : vector<128x256xbf16>, vector<256x128xbf16>, vector<128x128xf32> -> vector<128x128xf32>
    %c0_15 = arith.constant 0 : index
    %c0_16 = arith.constant 0 : index
    %19 = vector.load %arg7[%c0_15, %c0_16] : memref<1x128xf32, #tpu.memory_space<vmem>>, vector<1x128xf32>
    %20 = vector.broadcast %19 : vector<1x128xf32> to vector<128x128xf32>
    %21 = arith.addf %18, %20 : vector<128x128xf32>
    %cst_17 = arith.constant 0.000000e+00 : f32
    %22 = vector.broadcast %cst_17 : f32 to vector<128x128xf32>
    %23 = arith.maximumf %21, %22 : vector<128x128xf32>
    %24 = arith.truncf %23 : vector<128x128xf32> to vector<128x128xbf16>
    %c0_18 = arith.constant 0 : index
    %c0_19 = arith.constant 0 : index
    %25 = vector.load %arg8[%c0_18, %c0_19] : memref<128x128xbf16, #tpu.memory_space<vmem>>, vector<128x128xbf16>
    %cst_20 = arith.constant dense<0.000000e+00> : vector<128x128xf32>
    %26 = tpu.matmul %24, %25, %cst_20 {dimension_numbers = #tpu.dot_dimension_numbers<[1], [0], [0], [1], [0, 0, 1, 1], [], []>} : vector<128x128xbf16>, vector<128x128xbf16>, vector<128x128xf32> -> vector<128x128xf32>
    %c0_21 = arith.constant 0 : index
    %c0_22 = arith.constant 0 : index
    %27 = vector.load %arg9[%c0_21, %c0_22] : memref<1x128xf32, #tpu.memory_space<vmem>>, vector<1x128xf32>
    %28 = vector.broadcast %27 : vector<1x128xf32> to vector<128x128xf32>
    %29 = arith.addf %26, %28 : vector<128x128xf32>
    %c0_23 = arith.constant 0 : index
    %c0_24 = arith.constant 0 : index
    %30 = vector.load %arg10[%c0_23, %c0_24] : memref<128x128xf32, #tpu.memory_space<vmem>>, vector<128x128xf32>
    tpu.vector_store %arg10[%c0_23, %c0_24], %29 {strides = array<i32>} : memref<128x128xf32, #tpu.memory_space<vmem>>, vector<128x128xf32>,
    return
  }
  func.func @transform_0(%arg0: i32) -> (i32, i32) {
    %c0_i32 = arith.constant 0 : i32
    %c0_i32_0 = arith.constant 0 : i32
    return %arg0, %c0_i32 : i32, i32
  }
  func.func @transform_1(%arg0: i32) -> (i32, i32) {
    %c0_i32 = arith.constant 0 : i32
    %c0_i32_0 = arith.constant 0 : i32
    %c0_i32_1 = arith.constant 0 : i32
    return %c0_i32, %c0_i32_0 : i32, i32
  }
  func.func @transform_2(%arg0: i32) -> (i32, i32) {
    %c0_i32 = arith.constant 0 : i32
    %c0_i32_0 = arith.constant 0 : i32
    %c0_i32_1 = arith.constant 0 : i32
    return %c0_i32, %c0_i32_0 : i32, i32
  }
  func.func @transform_3(%arg0: i32) -> (i32, i32) {
    %c0_i32 = arith.constant 0 : i32
    %c0_i32_0 = arith.constant 0 : i32
    %c0_i32_1 = arith.constant 0 : i32
    return %c0_i32, %c0_i32_0 : i32, i32
  }
  func.func @transform_4(%arg0: i32) -> (i32, i32) {
    %c0_i32 = arith.constant 0 : i32
    %c0_i32_0 = arith.constant 0 : i32
    %c0_i32_1 = arith.constant 0 : i32
    return %c0_i32, %c0_i32_0 : i32, i32
  }
  func.func @transform_5(%arg0: i32) -> (i32, i32) {
    %c0_i32 = arith.constant 0 : i32
    %c0_i32_0 = arith.constant 0 : i32
    %c0_i32_1 = arith.constant 0 : i32
    return %c0_i32, %c0_i32_0 : i32, i32
  }
  func.func @transform_6(%arg0: i32) -> (i32, i32) {
    %c0_i32 = arith.constant 0 : i32
    %c0_i32_0 = arith.constant 0 : i32
    %c0_i32_1 = arith.constant 0 : i32
    return %c0_i32, %c0_i32_0 : i32, i32
  }
  func.func @transform_7(%arg0: i32) -> (i32, i32) {
    %c0_i32 = arith.constant 0 : i32
    %c0_i32_0 = arith.constant 0 : i32
    %c0_i32_1 = arith.constant 0 : i32
    return %c0_i32, %c0_i32_0 : i32, i32
  }
  func.func @transform_8(%arg0: i32) -> (i32, i32) {
    %c0_i32 = arith.constant 0 : i32
    %c0_i32_0 = arith.constant 0 : i32
    %c0_i32_1 = arith.constant 0 : i32
    return %c0_i32, %c0_i32_0 : i32, i32
  }
  func.func @transform_9(%arg0: i32) -> (i32, i32) {
    %c0_i32 = arith.constant 0 : i32
    %c0_i32_0 = arith.constant 0 : i32
    return %arg0, %c0_i32 : i32, i32
  }
}

</mosaic_0001>

<bundles_post_ra>
// kernel: tpu_custom_call.1
= control target key start
LH: loop header
LB: loop body
LE: loop exit
PB: predicated region body
PF: predicated region fallthrough
CT: control target
= control target key end

     0   :  { %14 = vsyncpa [#allocation3], 0  ;;  %s12290_s0 = inlined_call_operand.vmem [shape: bf16[128,784], index: 0, kind: input, shape index: {}]   ;;  %s12291_s1 = inlined_call_operand.hbm [shape: bf16[784,896], index: 1, kind: input, shape index: {}]   ;;  %s12292_s2 = inlined_call_operand.hbm [shape: f32[1,896], index: 2, kind: input, shape index: {}]   ;;  %s12293_s3 = inlined_call_operand.hbm [shape: bf16[896,256], index: 3, kind: input, shape index: {}]   ;;  %s12294_s4 = inlined_call_operand.hbm [shape: f32[1,256], index: 4, kind: input, shape index: {}]   ;;  %s12295_s5 = inlined_call_operand.hbm [shape: bf16[256,128], index: 5, kind: input, shape index: {}]   ;;  %s12296_s6 = inlined_call_operand.hbm [shape: f32[1,128], index: 6, kind: input, shape index: {}]   ;;  %s12297_s7 = inlined_call_operand.hbm [shape: bf16[128,128], index: 7, kind: input, shape index: {}]   ;;  %s12298_s8 = inlined_call_operand.hbm [shape: f32[1,128], index: 8, kind: input, shape index: {}]   ;;  %s12299_s9 = inlined_call_operand.hbm [shape: f32[128,128], index: 9, kind: output, shape index: {}]  }
   0x1   :  { %15 = vsyncpa [#allocation6], 0 }
   0x2   :  { %16 = vsyncpa [#allocation9], 0 }
   0x3   :  { %17 = vsyncpa [#allocation12], 0 }
   0x4   :  { %18 = vsyncpa [#allocation15], 0  ;;  %s40_s11 = sshll.u32 %s12292_s2, 4  ;;  %s41_s11 = int_to_ptr.hbm [resolvable:$true] %s40_s11 }
   0x5   :  { %19 = vsyncpa [#allocation4], 0  ;;  %s10080_s12 = smov [#allocation5]   ;;  %s64_s16 = sshll.u32 %s12294_s4, 4  ;;  %s65_s16 = int_to_ptr.hbm [resolvable:$true] %s64_s16 }
   0x6   :  { %s42_s13 = sshll.u32 %s10080_s12, 4  ;;  %s10081_s17 = smov [#allocation8]   ;;  %s43_s13 = int_to_ptr.vmem [resolvable:$true] %s42_s13 }
   0x7   :  { %45 = dma.hbm_to_vmem [thread:$0]  %s41_s11, 112, %s43_s13, [#allocation6]  }
   0x8   :  { %s66_s18 = sshll.u32 %s10081_s17, 4  ;;  %s88_s21 = sshll.u32 %s12296_s6, 4  ;;  %s67_s18 = int_to_ptr.vmem [resolvable:$true] %s66_s18  ;;  %s89_s21 = int_to_ptr.hbm [resolvable:$true] %s88_s21 }
   0x9   :  { %69 = dma.hbm_to_vmem [thread:$0]  %s65_s16, 32, %s67_s18, [#allocation9]  }
   0xa   :  { %s26_s23 = sshll.u32 %s12291_s1, 4  ;;  %s10082_s24 = smov [#allocation11]   ;;  %s27_s23 = int_to_ptr.hbm [resolvable:$true] %s26_s23 }
   0xb   :  { %s90_s25 = sshll.u32 %s10082_s24, 4  ;;  %s10083_s4 = smov [#allocation2]   ;;  %s91_s25 = int_to_ptr.vmem [resolvable:$true] %s90_s25 }
   0xc   :  { %93 = dma.hbm_to_vmem [thread:$0]  %s89_s21, 16, %s91_s25, [#allocation12]  }
   0xd   :  { %s28_s26 = sshll.u32 %s10083_s4, 4  ;;  %s10084_s27 = smov 448   ;;  %s29_s26 = int_to_ptr.vmem [resolvable:$true] %s28_s26 }
   0xe   :  { %s10085_s28 = smov 28   ;;  %s50_s30 = sshll.u32 %s12293_s3, 4  ;;  %s51_s30 = int_to_ptr.hbm [resolvable:$true] %s50_s30 }
   0xf   :  { %34 = dma.hbm_to_vmem [thread:$0]  %s27_s23, 43904, %s29_s26, [#allocation3], %s10084_s27, %s10084_s27, %s10085_s28  }
  0x10   :  { %s10086_s10 = smov [#allocation7]   ;;  %s74_s13 = sshll.u32 %s12295_s5, 4  ;;  %s75_s13 = int_to_ptr.hbm [resolvable:$true] %s74_s13 }
  0x11   :  { %s52_s11 = sshll.u32 %s10086_s10, 4  ;;  %s10087_s14 = smov 128   ;;  %s53_s11 = int_to_ptr.vmem [resolvable:$true] %s52_s11 }
  0x12   :  { %s10088_s15 = smov 8   ;;  %s10089_s16 = smov [#allocation10]  }
  0x13   :  { %58 = dma.hbm_to_vmem [thread:$0]  %s51_s30, 14336, %s53_s11, [#allocation6], %s10087_s14, %s10087_s14, %s10088_s15  }
  0x14   :  { %s76_s17 = sshll.u32 %s10089_s16, 4  ;;  %s10090_s18 = smov 64   ;;  %s77_s17 = int_to_ptr.vmem [resolvable:$true] %s76_s17 }
  0x15   :  { %s10091_s3 = smov 4   ;;  %s98_s21 = sshll.u32 %s12297_s7, 4  ;;  %s99_s21 = int_to_ptr.hbm [resolvable:$true] %s98_s21 }
  0x16   :  { %82 = dma.hbm_to_vmem [thread:$0]  %s75_s13, 2048, %s77_s17, [#allocation9], %s10090_s18, %s10090_s18, %s10091_s3  }
  0x17   :  { %s10092_s2 = smov [#allocation13]   ;;  %s112_s24 = sshll.u32 %s12298_s8, 4  ;;  %s113_s24 = int_to_ptr.hbm [resolvable:$true] %s112_s24 }
  0x18   :  { %s100_s5 = sshll.u32 %s10092_s2, 4  ;;  %s10093_s25 = smov [#allocation14]   ;;  %s101_s5 = int_to_ptr.vmem [resolvable:$true] %s100_s5 }
  0x19   :  { %106 = dma.hbm_to_vmem [thread:$0]  %s99_s21, 1024, %s101_s5, [#allocation12], %s10090_s18, %s10090_s18, %s10091_s3  }
  0x1a   :  { %s114_s4 = sshll.u32 %s10093_s25, 4  ;;  %s115_s4 = int_to_ptr.vmem [resolvable:$true] %s114_s4 }
  0x1b   :  { %117 = dma.hbm_to_vmem [thread:$0]  %s113_s24, 16, %s115_s4, [#allocation15]  }
  0x1c   :  { %10068 = dma.done.wait [#allocation3], 43904  }
  0x1d   :  { %10069 = vsyncadd [#allocation3], 4294923392 }
  0x1e   :  { %10070 = dma.done.wait [#allocation6], 14448  }
  0x1f   :  { %10071 = vsyncadd [#allocation6], 4294952848 }
  0x20   :  { %10072 = dma.done.wait [#allocation9], 2080  }
  0x21   :  { %10073 = vsyncadd [#allocation9], 4294965216 }
  0x22   :  { %10074 = dma.done.wait [#allocation12], 1040  }
  0x23   :  { %10075 = vsyncadd [#allocation12], 4294966256 }
  0x24   :  { %10076 = dma.done.wait [#allocation15], 16  }
  0x25   :  { %10077 = vsyncadd [#allocation15], 4294967280  ;;  %v7505_v0 = vld [vmem:[#allocation2 + $0x188] sm:$0xf]  ;;  %v9387_v1 = vld [vmem:[#allocation2 + $0x1a0] sm:$0xf0] }
  0x26   :  { %v7729_v2 = vld [vmem:[#allocation2 + $0x348] sm:$0xf]  ;;  %v7506_v3 = vor.u32 %v9387_v1, %v7505_v0  ;;  %v9443_v4 = vld [vmem:[#allocation2 + $0x360] sm:$0xf0]  ;;  %v7477_v5 = vld [vmem:[#allocation2 + $0x150] sm:$0xf] }
  0x27   :  { %v9380_v6 = vld [vmem:[#allocation2 + $0x168] sm:$0xf0]  ;;  %v7730_v7 = vor.u32 %v9443_v4, %v7729_v2  ;;  %v7701_v8 = vld [vmem:[#allocation2 + $0x310] sm:$0xf]  ;;  %v7449_v12 = vld [vmem:[#allocation2 + $0x118] sm:$0xf] }
  0x28   :  { %v9436_v9 = vld [vmem:[#allocation2 + $0x328] sm:$0xf0]  ;;  %2692 = vmatpush.bf16.msra.mxu0 %v7506_v3  ;;  %9814 = vmatpush.bf16.msra.mxu2 %v7506_v3  ;;  %v7478_v10 = vor.u32 %v9380_v6, %v7477_v5  ;;  %v9373_v13 = vld [vmem:[#allocation2 + $0x130] sm:$0xf0]  ;;  %v7673_v14 = vld [vmem:[#allocation2 + $0x2d8] sm:$0xf] }
  0x29   :  { %2741 = vmatpush.bf16.msra.mxu1 %v7730_v7  ;;  %9822 = vmatpush.bf16.msra.mxu3 %v7730_v7  ;;  %v7702_v11 = vor.u32 %v9436_v9, %v7701_v8  ;;  %v9429_v15 = vld [vmem:[#allocation2 + $0x2f0] sm:$0xf0]  ;;  %v7450_v16 = vor.u32 %v9373_v13, %v7449_v12  ;;  %v7421_v18 = vld [vmem:[#allocation2 + $0xe0] sm:$0xf]  ;;  %v9366_v19 = vld [vmem:[#allocation2 + $0xf8] sm:$0xf0] }
  0x2a   :  { %v7674_v17 = vor.u32 %v9429_v15, %v7673_v14  ;;  %v7645_v20 = vld [vmem:[#allocation2 + $0x2a0] sm:$0xf]  ;;  %v9422_v21 = vld [vmem:[#allocation2 + $0x2b8] sm:$0xf0]  ;;  %v7422_v22 = vor.u32 %v9366_v19, %v7421_v18  ;;  %v7393_v24 = vld [vmem:[#allocation2 + $0xa8] sm:$0xf] }
  0x2b   :  { %v7646_v23 = vor.u32 %v9422_v21, %v7645_v20  ;;  %v9359_v25 = vld [vmem:[#allocation2 + $0xc0] sm:$0xf0]  ;;  %v7617_v26 = vld [vmem:[#allocation2 + $0x268] sm:$0xf]  ;;  %v7365_v30 = vld [vmem:[#allocation2 + $0x70] sm:$0xf] }
  0x2c   :  { %2693 = vmatpush.bf16.msra.mxu0 %v7478_v10  ;;  %9815 = vmatpush.bf16.msra.mxu2 %v7478_v10  ;;  %v9415_v27 = vld [vmem:[#allocation2 + $0x280] sm:$0xf0]  ;;  %v7394_v28 = vor.u32 %v9359_v25, %v7393_v24  ;;  %v9352_v31 = vld [vmem:[#allocation2 + $0x88] sm:$0xf0]  ;;  %v7589_v32 = vld [vmem:[#allocation2 + $0x230] sm:$0xf] }
  0x2d   :  { %2742 = vmatpush.bf16.msra.mxu1 %v7702_v11  ;;  %9823 = vmatpush.bf16.msra.mxu3 %v7702_v11  ;;  %v7618_v29 = vor.u32 %v9415_v27, %v7617_v26  ;;  %v9408_v33 = vld [vmem:[#allocation2 + $0x248] sm:$0xf0]  ;;  %v7366_v34 = vor.u32 %v9352_v31, %v7365_v30  ;;  %v7337_v36 = vld [vmem:[#allocation2 + $0x38] sm:$0xf]  ;;  %v9345_v37 = vld [vmem:[#allocation2 + $0x50] sm:$0xf0] }
  0x2e   :  { %v7590_v35 = vor.u32 %v9408_v33, %v7589_v32  ;;  %v7561_v38 = vld [vmem:[#allocation2 + $0x1f8] sm:$0xf]  ;;  %v9401_v39 = vld [vmem:[#allocation2 + $0x210] sm:$0xf0]  ;;  %v7338_v40 = vor.u32 %v9345_v37, %v7337_v36  ;;  %v7309_v42 = vld [vmem:[#allocation2] sm:$0xf] }
  0x2f   :  { %v7562_v41 = vor.u32 %v9401_v39, %v7561_v38  ;;  %v9338_v43 = vld [vmem:[#allocation2 + $0x18] sm:$0xf0]  ;;  %v7533_v44 = vld [vmem:[#allocation2 + $0x1c0] sm:$0xf]  ;;  %v7953_v48 = vld [vmem:[#allocation2 + $0x508] sm:$0xf] }
  0x30   :  { %2694 = vmatpush.bf16.msra.mxu0 %v7450_v16  ;;  %9816 = vmatpush.bf16.msra.mxu2 %v7450_v16  ;;  %v9394_v45 = vld [vmem:[#allocation2 + $0x1d8] sm:$0xf0]  ;;  %v7085_v46 = vld [vmem:[%s12290_s0] sm:$0xf]  ;;  %v9499_v49 = vld [vmem:[#allocation2 + $0x520] sm:$0xf0]  ;;  %v7310_v50 = vor.u32 %v9338_v43, %v7309_v42 }
  0x31   :  { %2743 = vmatpush.bf16.msra.mxu1 %v7674_v17  ;;  %9824 = vmatpush.bf16.msra.mxu3 %v7674_v17  ;;  %v9282_v47 = vld [vmem:[%s12290_s0 + $0x18] sm:$0xf0]  ;;  %v7197_v51 = vld [vmem:[%s12290_s0 + $0xe0] sm:$0xf]  ;;  %v9279_v53 = vld [vmem:[%s12290_s0 + $0x4] sm:$0xf]  ;;  %v7534_v54 = vor.u32 %v9394_v45, %v7533_v44  ;;  %v7954_v58 = vor.u32 %v9499_v49, %v7953_v48 }
  0x32   :  { %v9310_v52 = vld [vmem:[%s12290_s0 + $0xf8] sm:$0xf0]  ;;  %v7087_v55 = vld [vmem:[%s12290_s0 + $0x1c] sm:$0xf0]  ;;  %v9307_v56 = vld [vmem:[%s12290_s0 + $0xe4] sm:$0xf]  ;;  %v10196_v59 = vor.u32 %v9282_v47, %v7085_v46 }
  0x33   :  { %v7199_v57 = vld [vmem:[%s12290_s0 + $0xfc] sm:$0xf0]  ;;  %v10198_v60 = vor.u32 %v9310_v52, %v7197_v51  ;;  %v7925_v61 = vld [vmem:[#allocation2 + $0x4d0] sm:$0xf]  ;;  %v9492_v62 = vld [vmem:[#allocation2 + $0x4e8] sm:$0xf0]  ;;  %v10200_v63 = vor.u32 %v9279_v53, %v7087_v55 }
  0x34   :  { %2695 = vmatpush.bf16.msra.mxu0 %v7422_v22  ;;  %9817 = vmatpush.bf16.msra.mxu2 %v7422_v22  ;;  %12493 = vst [vmem:[#allocation23_spill] sm:$0xff] %v10196_v59  ;;  %v10202_v0 = vor.u32 %v9307_v56, %v7199_v57  ;;  %v7926_v1 = vor.u32 %v9492_v62, %v7925_v61  ;;  %v7897_v2 = vld [vmem:[#allocation2 + $0x498] sm:$0xf]  ;;  %v9485_v3 = vld [vmem:[#allocation2 + $0x4b0] sm:$0xf0]  ;;  %vm2667_vm0 = vcmask 130048  }
  0x35   :  { %2744 = vmatpush.bf16.msra.mxu1 %v7646_v23  ;;  %9825 = vmatpush.bf16.msra.mxu3 %v7646_v23  ;;  %12494 = vst [vmem:[#allocation24_spill] sm:$0xff] %v10198_v60  ;;  %v8177_v4 = vld [vmem:[#allocation2 + $0x6c8] sm:$0xf]  ;;  %v9555_v5 = vld [vmem:[#allocation2 + $0x6e0] sm:$0xf0]  ;;  %v7898_v14 = vor.u32 %v9485_v3, %v7897_v2  ;;  %s7066_s12 = sshll.u32 %s12299_s9, 4  ;;  %s7067_s12 = int_to_ptr.hbm [resolvable:$true] %s7066_s12 }
  0x36   :  { %12495 = vst [vmem:[#allocation25_spill] sm:$0xff] %v10200_v63  ;;  %v8401_v6 = vld [vmem:[#allocation2 + $0x888] sm:$0xf]  ;;  %v8178_v7 = vor.u32 %v9555_v5, %v8177_v4  ;;  %v9611_v8 = vld [vmem:[#allocation2 + $0x8a0] sm:$0xf0] }
  0x37   :  { %12496 = vst [vmem:[#allocation26_spill] sm:$0xff] %v10202_v0  ;;  %v7869_v9 = vld [vmem:[#allocation2 + $0x460] sm:$0xf]  ;;  %v8402_v10 = vor.u32 %v9611_v8, %v8401_v6  ;;  %v8625_v11 = vld [vmem:[#allocation2 + $0xa48] sm:$0xf] }
  0x38   :  { %2696 = vmatpush.bf16.msra.mxu0 %v7394_v28  ;;  %9818 = vmatpush.bf16.msra.mxu2 %v7394_v28  ;;  %v9667_v12 = vld [vmem:[#allocation2 + $0xa60] sm:$0xf0]  ;;  %v8149_v13 = vld [vmem:[#allocation2 + $0x690] sm:$0xf]  ;;  %v9548_v16 = vld [vmem:[#allocation2 + $0x6a8] sm:$0xf0] }
  0x39   :  { %2745 = vmatpush.bf16.msra.mxu1 %v7618_v29  ;;  %9826 = vmatpush.bf16.msra.mxu3 %v7618_v29  ;;  %v8626_v15 = vor.u32 %v9667_v12, %v8625_v11  ;;  %v8373_v17 = vld [vmem:[#allocation2 + $0x850] sm:$0xf]  ;;  %v9604_v18 = vld [vmem:[#allocation2 + $0x868] sm:$0xf0]  ;;  %v9478_v19 = vld [vmem:[#allocation2 + $0x478] sm:$0xf0]  ;;  %v8150_v20 = vor.u32 %v9548_v16, %v8149_v13 }
  0x3a   :  { %v8374_v21 = vor.u32 %v9604_v18, %v8373_v17  ;;  %v8597_v22 = vld [vmem:[#allocation2 + $0xa10] sm:$0xf]  ;;  %v9660_v23 = vld [vmem:[#allocation2 + $0xa28] sm:$0xf0]  ;;  %v8121_v25 = vld [vmem:[#allocation2 + $0x658] sm:$0xf]  ;;  %v7870_v33 = vor.u32 %v9478_v19, %v7869_v9 }
  0x3b   :  { %v8598_v24 = vor.u32 %v9660_v23, %v8597_v22  ;;  %v9541_v26 = vld [vmem:[#allocation2 + $0x670] sm:$0xf0]  ;;  %v8345_v27 = vld [vmem:[#allocation2 + $0x818] sm:$0xf]  ;;  %v9471_v37 = vld [vmem:[#allocation2 + $0x440] sm:$0xf0] }
  0x3c   :  { %2697 = vmatpush.bf16.msra.mxu0 %v7366_v34  ;;  %9819 = vmatpush.bf16.msra.mxu2 %v7366_v34  ;;  %v9597_v28 = vld [vmem:[#allocation2 + $0x830] sm:$0xf0]  ;;  %v8569_v29 = vld [vmem:[#allocation2 + $0x9d8] sm:$0xf]  ;;  %v7841_v34 = vld [vmem:[#allocation2 + $0x428] sm:$0xf] }
  0x3d   :  { %2746 = vmatpush.bf16.msra.mxu1 %v7590_v35  ;;  %9827 = vmatpush.bf16.msra.mxu3 %v7590_v35  ;;  %v7113_v30 = vld [vmem:[%s12290_s0 + $0x38] sm:$0xf]  ;;  %v9289_v31 = vld [vmem:[%s12290_s0 + $0x50] sm:$0xf0]  ;;  %v8122_v35 = vor.u32 %v9541_v26, %v8121_v25  ;;  %v8346_v38 = vor.u32 %v9597_v28, %v8345_v27  ;;  %v8093_v39 = vld [vmem:[#allocation2 + $0x620] sm:$0xf]  ;;  %v7842_v48 = vor.u32 %v9471_v37, %v7841_v34 }
  0x3e   :  { %v7225_v32 = vld [vmem:[%s12290_s0 + $0x118] sm:$0xf]  ;;  %v9653_v36 = vld [vmem:[#allocation2 + $0x9f0] sm:$0xf0]  ;;  %v9286_v42 = vld [vmem:[%s12290_s0 + $0x3c] sm:$0xf]  ;;  %v10232_v53 = vor.u32 %v9289_v31, %v7113_v30 }
  0x3f   :  { %v7115_v43 = vld [vmem:[%s12290_s0 + $0x54] sm:$0xf0]  ;;  %v8570_v44 = vor.u32 %v9653_v36, %v8569_v29  ;;  %v9314_v45 = vld [vmem:[%s12290_s0 + $0x11c] sm:$0xf]  ;;  %v8317_v47 = vld [vmem:[#allocation2 + $0x7e0] sm:$0xf] }
  0x40   :  { %2698 = vmatpush.bf16.msra.mxu0 %v7338_v40  ;;  %9820 = vmatpush.bf16.msra.mxu2 %v7338_v40  ;;  %v9534_v40 = vld [vmem:[#allocation2 + $0x638] sm:$0xf0]  ;;  %v7227_v46 = vld [vmem:[%s12290_s0 + $0x134] sm:$0xf0]  ;;  %v8541_v51 = vld [vmem:[#allocation2 + $0x9a0] sm:$0xf]  ;;  %v10236_v57 = vor.u32 %v9286_v42, %v7115_v43 }
  0x41   :  { %2747 = vmatpush.bf16.msra.mxu1 %v7562_v41  ;;  %9828 = vmatpush.bf16.msra.mxu3 %v7562_v41  ;;  %v9317_v41 = vld [vmem:[%s12290_s0 + $0x130] sm:$0xf0]  ;;  %v8094_v49 = vor.u32 %v9534_v40, %v8093_v39  ;;  %v9646_v52 = vld [vmem:[#allocation2 + $0x9b8] sm:$0xf0]  ;;  %12497 = vst [vmem:[#allocation27_spill] sm:$0xff] %v10232_v53 }
  0x42   :  { %v7813_v55 = vld [vmem:[#allocation2 + $0x3f0] sm:$0xf]  ;;  %v9464_v56 = vld [vmem:[#allocation2 + $0x408] sm:$0xf0]  ;;  %12499 = vst [vmem:[#allocation29_spill] sm:$0xff] %v10236_v57  ;;  %v8542_v62 = vor.u32 %v9646_v52, %v8541_v51 }
  0x43   :  { %v8065_v2 = vld [vmem:[#allocation2 + $0x5e8] sm:$0xf]  ;;  %v9527_v3 = vld [vmem:[#allocation2 + $0x600] sm:$0xf0]  ;;  %v7785_v5 = vld [vmem:[#allocation2 + $0x3b8] sm:$0xf] }
  0x44   :  { %2699 = vmatpush.bf16.msra.mxu0 %v7310_v50  ;;  %9821 = vmatpush.bf16.msra.mxu2 %v7310_v50  ;;  %v9590_v50 = vld [vmem:[#allocation2 + $0x7f8] sm:$0xf0]  ;;  %v8289_v4 = vld [vmem:[#allocation2 + $0x7a8] sm:$0xf]  ;;  %v9457_v6 = vld [vmem:[#allocation2 + $0x3d0] sm:$0xf0] }
  0x45   :  { %2748 = vmatpush.bf16.msra.mxu1 %v7534_v54  ;;  %9829 = vmatpush.bf16.msra.mxu3 %v7534_v54  ;;  %v10234_v54 = vor.u32 %v9317_v41, %v7225_v32  ;;  %v8318_v61 = vor.u32 %v9590_v50, %v8317_v47  ;;  %v9583_v8 = vld [vmem:[#allocation2 + $0x7c0] sm:$0xf0]  ;;  %v8037_v12 = vld [vmem:[#allocation2 + $0x5b0] sm:$0xf]  ;;  %v7786_v13 = vor.u32 %v9457_v6, %v7785_v5  ;;  %v9576_v17 = vld [vmem:[#allocation2 + $0x788] sm:$0xf0] }
  0x46   :  { %v8290_v9 = vor.u32 %v9583_v8, %v8289_v4  ;;  %v9639_v11 = vld [vmem:[#allocation2 + $0x980] sm:$0xf0]  ;;  %v8261_v16 = vld [vmem:[#allocation2 + $0x770] sm:$0xf]  ;;  %v9450_v22 = vld [vmem:[#allocation2 + $0x398] sm:$0xf0] }
  0x47   :  { %2700 = vmatmul.bf16.vlgmr.msra.gmra.mxu0 %v10196_v59  ;;  %2720 = vmatmul.bf16.vlgmr.msra.gmra.mxu2 %v10198_v60  ;;  %12498 = vst [vmem:[#allocation28_spill] sm:$0xff] %v10234_v54  ;;  %v8485_v19 = vld [vmem:[#allocation2 + $0x930] sm:$0xf]  ;;  %v8009_v23 = vld [vmem:[#allocation2 + $0x578] sm:$0xf]  ;;  %v8262_v25 = vor.u32 %v9576_v17, %v8261_v16 }
  0x48   :  { %2790 = vmatpush.bf16.msrb.mxu2 %v7954_v58  ;;  %2749 = vmatmul.bf16.vlgmr.msra.gmra.mxu1 %v10200_v63  ;;  %v10238_v58 = vor.u32 %v9314_v45, %v7227_v46  ;;  %v8233_v27 = vld [vmem:[#allocation2 + $0x738] sm:$0xf]  ;;  %v7141_v28 = vld [vmem:[%s12290_s0 + $0x70] sm:$0xf]  ;;  %v9296_v29 = vld [vmem:[%s12290_s0 + $0x88] sm:$0xf0] }
  0x49   :  { %2769 = vmatmul.bf16.vlgmr.msra.gmra.mxu3 %v10202_v0  ;;  %2888 = vmatpush.bf16.msrb.mxu0 %v8402_v10  ;;  %v8513_v10 = vld [vmem:[#allocation2 + $0x968] sm:$0xf]  ;;  %v9569_v32 = vld [vmem:[#allocation2 + $0x750] sm:$0xf0]  ;;  %v7981_v36 = vld [vmem:[#allocation2 + $0x540] sm:$0xf]  ;;  %v10268_v50 = vor.u32 %v9296_v29, %v7141_v28 }
  0x4a   :  { %2839 = vmatpush.bf16.msrb.mxu3 %v8178_v7  ;;  %2937 = vmatpush.bf16.msrb.mxu1 %v8626_v15  ;;  %12500 = vst [vmem:[#allocation30_spill] sm:$0xff] %v10238_v58  ;;  %v8066_v7 = vor.u32 %v9527_v3, %v8065_v2  ;;  %v9520_v15 = vld [vmem:[#allocation2 + $0x5c8] sm:$0xf0]  ;;  %v9625_v34 = vld [vmem:[#allocation2 + $0x910] sm:$0xf0]  ;;  %v8234_v43 = vor.u32 %v9569_v32, %v8233_v27 }
  0x4b   :  { %v8038_v18 = vor.u32 %v9520_v15, %v8037_v12  ;;  %v9506_v37 = vld [vmem:[#allocation2 + $0x558] sm:$0xf0]  ;;  %v9293_v39 = vld [vmem:[%s12290_s0 + $0x74] sm:$0xf]  ;;  %v7143_v40 = vld [vmem:[%s12290_s0 + $0x8c] sm:$0xf0] }
  0x4c   :  { %2791 = vmatpush.bf16.msrb.mxu2 %v7926_v1  ;;  %v7814_v1 = vor.u32 %v9464_v56, %v7813_v55  ;;  %v9321_v41 = vld [vmem:[%s12290_s0 + $0x154] sm:$0xf]  ;;  %v7255_v42 = vld [vmem:[%s12290_s0 + $0x16c] sm:$0xf0]  ;;  %v8205_v45 = vld [vmem:[#allocation2 + $0x700] sm:$0xf]  ;;  %v7982_v46 = vor.u32 %v9506_v37, %v7981_v36  ;;  %v10272_v52 = vor.u32 %v9293_v39, %v7143_v40 }
  0x4d   :  { %2889 = vmatpush.bf16.msrb.mxu0 %v8374_v21  ;;  %v7757_v21 = vld [vmem:[#allocation2 + $0x380] sm:$0xf]  ;;  %v9562_v47 = vld [vmem:[#allocation2 + $0x718] sm:$0xf0]  ;;  %12501 = vst [vmem:[#allocation31_spill] sm:$0xff] %v10268_v50  ;;  %v10274_v55 = vor.u32 %v9321_v41, %v7255_v42 }
  0x4e   :  { %2840 = vmatpush.bf16.msrb.mxu3 %v8150_v20  ;;  %2938 = vmatpush.bf16.msrb.mxu1 %v8598_v24  ;;  %v9632_v20 = vld [vmem:[#allocation2 + $0x948] sm:$0xf0]  ;;  %v9513_v24 = vld [vmem:[#allocation2 + $0x590] sm:$0xf0]  ;;  %v7758_v30 = vor.u32 %v9450_v22, %v7757_v21  ;;  %12503 = vst [vmem:[#allocation33_spill] sm:$0xff] %v10272_v52  ;;  %v8206_v56 = vor.u32 %v9562_v47, %v8205_v45 }
  0x4f   :  { %v8486_v26 = vor.u32 %v9632_v20, %v8485_v19  ;;  %v8010_v31 = vor.u32 %v9513_v24, %v8009_v23  ;;  %12504 = vst [vmem:[#allocation34_spill] sm:$0xff] %v10274_v55  ;;  %v7169_v3 = vld [vmem:[%s12290_s0 + $0xa8] sm:$0xf]  ;;  %v9303_v4 = vld [vmem:[%s12290_s0 + $0xc0] sm:$0xf0] }
  0x50   :  { %2792 = vmatpush.bf16.msrb.mxu2 %v7898_v14  ;;  %v8514_v14 = vor.u32 %v9639_v11, %v8513_v10  ;;  %v7281_v5 = vld [vmem:[%s12290_s0 + $0x188] sm:$0xf]  ;;  %v9331_v6 = vld [vmem:[%s12290_s0 + $0x1a0] sm:$0xf0]  ;;  %v10304_v11 = vor.u32 %v9303_v4, %v7169_v3  ;;  %v9280_v17 = vld [vmem:[%s12290_s0 + $0xc] sm:$0xf] }
  0x51   :  { %2890 = vmatpush.bf16.msrb.mxu0 %v8346_v38  ;;  %v9324_v38 = vld [vmem:[%s12290_s0 + $0x168] sm:$0xf0]  ;;  %v7171_v8 = vld [vmem:[%s12290_s0 + $0xc4] sm:$0xf0]  ;;  %v10306_v12 = vor.u32 %v9331_v6, %v7281_v5  ;;  %v9283_v16 = vld [vmem:[%s12290_s0 + $0x20] sm:$0xf0] }
  0x52   :  { %2841 = vmatpush.bf16.msrb.mxu3 %v8122_v35  ;;  %2939 = vmatpush.bf16.msrb.mxu1 %v8570_v44  ;;  %v7253_v35 = vld [vmem:[%s12290_s0 + $0x150] sm:$0xf]  ;;  %v7283_v10 = vld [vmem:[%s12290_s0 + $0x1a4] sm:$0xf0]  ;;  %12505 = vst [vmem:[#allocation35_spill] sm:$0xff] %v10304_v11 }
  0x53   :  { %v10270_v51 = vor.u32 %v9324_v38, %v7253_v35  ;;  %12506 = vst [vmem:[#allocation36_spill] sm:$0xff] %v10306_v12  ;;  %v7093_v15 = vld [vmem:[%s12290_s0 + $0x8] sm:$0xf]  ;;  %v9284_v19 = vld [vmem:[%s12290_s0 + $0x28] sm:$0xf0] }
  0x54   :  { %2793 = vmatpush.bf16.msrb.mxu2 %v7870_v33  ;;  %v8457_v33 = vld [vmem:[#allocation2 + $0x8f8] sm:$0xf]  ;;  %v7095_v20 = vld [vmem:[%s12290_s0 + $0x24] sm:$0xf0]  ;;  %v9281_v21 = vld [vmem:[%s12290_s0 + $0x14] sm:$0xf]  ;;  %v10340_v23 = vor.u32 %v9283_v16, %v7093_v15 }
  0x55   :  { %2891 = vmatpush.bf16.msrb.mxu0 %v8318_v61  ;;  %v8458_v44 = vor.u32 %v9625_v34, %v8457_v33  ;;  %12502 = vst [vmem:[#allocation32_spill] sm:$0xff] %v10270_v51  ;;  %v7103_v22 = vld [vmem:[%s12290_s0 + $0x2c] sm:$0xf0]  ;;  %v7121_v27 = vld [vmem:[%s12290_s0 + $0x40] sm:$0xf]  ;;  %v607_v15 = vld [vmem:[#allocation5] sm:$0xff] }
  0x56   :  { %2842 = vmatpush.bf16.msrb.mxu3 %v8094_v49  ;;  %2940 = vmatpush.bf16.msrb.mxu1 %v8542_v62  ;;  %v9618_v49 = vld [vmem:[#allocation2 + $0x8d8] sm:$0xf0]  ;;  %v8653_v62 = vld [vmem:[#allocation2 + $0xa80] sm:$0xf]  ;;  %12509 = vst [vmem:[#allocation39_spill] sm:$0xff] %v10340_v23 }
  0x57   :  { %2705 = vmatmul.bf16.gmra.mxu0 %v10232_v53  ;;  %2725 = vmatmul.bf16.gmra.mxu2 %v10234_v54  ;;  %v9290_v28 = vld [vmem:[%s12290_s0 + $0x58] sm:$0xf0]  ;;  %v9287_v29 = vld [vmem:[%s12290_s0 + $0x44] sm:$0xf]  ;;  %v7123_v32 = vld [vmem:[%s12290_s0 + $0x5c] sm:$0xf0] }
  0x58   :  { %2794 = vmatpush.bf16.msrb.mxu2 %v7842_v48  ;;  %2754 = vmatmul.bf16.gmra.mxu1 %v10236_v57  ;;  %v8429_v48 = vld [vmem:[#allocation2 + $0x8c0] sm:$0xf]  ;;  %v9288_v33 = vld [vmem:[%s12290_s0 + $0x4c] sm:$0xf]  ;;  %v7131_v34 = vld [vmem:[%s12290_s0 + $0x64] sm:$0xf0]  ;;  %v10376_v35 = vor.u32 %v9290_v28, %v7121_v27  ;;  %v10380_v37 = vor.u32 %v9287_v29, %v7123_v32 }
  0x59   :  { %2774 = vmatmul.bf16.gmra.mxu3 %v10238_v58  ;;  %2892 = vmatpush.bf16.msrb.mxu0 %v8290_v9  ;;  %v8430_v61 = vor.u32 %v9618_v49, %v8429_v48  ;;  %v9328_v9 = vld [vmem:[%s12290_s0 + $0x18c] sm:$0xf]  ;;  %v10382_v38 = vor.u32 %v9288_v33, %v7131_v34  ;;  %v7149_v39 = vld [vmem:[%s12290_s0 + $0x78] sm:$0xf]  ;;  %v9297_v40 = vld [vmem:[%s12290_s0 + $0x90] sm:$0xf0] }
  0x5a   :  { %2843 = vmatpush.bf16.msrb.mxu3 %v8066_v7  ;;  %2941 = vmatpush.bf16.msrb.mxu1 %v8514_v14  ;;  %v9300_v7 = vld [vmem:[%s12290_s0 + $0xac] sm:$0xf]  ;;  %v10310_v14 = vor.u32 %v9328_v9, %v7283_v10  ;;  %12513 = vst [vmem:[#allocation43_spill] sm:$0xff] %v10376_v35  ;;  %v9294_v41 = vld [vmem:[%s12290_s0 + $0x7c] sm:$0xf]  ;;  %v10412_v47 = vor.u32 %v9297_v40, %v7149_v39  ;;  %v10484_v28 = vperm.slane %v607_v15, 0 }
  0x5b   :  { %12515 = vst [vmem:[#allocation45_spill] sm:$0xff] %v10380_v37  ;;  %v7157_v42 = vld [vmem:[%s12290_s0 + $0x80] sm:$0xf]  ;;  %v9295_v45 = vld [vmem:[%s12290_s0 + $0x84] sm:$0xf] }
  0x5c   :  { %2795 = vmatpush.bf16.msrb.mxu2 %v7814_v1  ;;  %v9674_v1 = vld [vmem:[#allocation2 + $0xa98] sm:$0xf0]  ;;  %12508 = vst [vmem:[#allocation38_spill] sm:$0xff] %v10310_v14  ;;  %v9305_v3 = vld [vmem:[%s12290_s0 + $0xd0] sm:$0xf0] }
  0x5d   :  { %2893 = vmatpush.bf16.msrb.mxu0 %v8262_v25  ;;  %v8654_v2 = vor.u32 %v9674_v1, %v8653_v62  ;;  %v10344_v25 = vor.u32 %v9280_v17, %v7095_v20  ;;  %12516 = vst [vmem:[#allocation46_spill] sm:$0xff] %v10382_v38  ;;  %v9304_v62 = vld [vmem:[%s12290_s0 + $0xc8] sm:$0xf0]  ;;  %v9301_v1 = vld [vmem:[%s12290_s0 + $0xb4] sm:$0xf] }
  0x5e   :  { %2844 = vmatpush.bf16.msrb.mxu3 %v8038_v18  ;;  %2942 = vmatpush.bf16.msrb.mxu1 %v8486_v26  ;;  %v7101_v18 = vld [vmem:[%s12290_s0 + $0x10] sm:$0xf]  ;;  %v10346_v26 = vor.u32 %v9281_v21, %v7103_v22  ;;  %12517 = vst [vmem:[#allocation47_spill] sm:$0xff] %v10412_v47  ;;  %v9302_v5 = vld [vmem:[%s12290_s0 + $0xbc] sm:$0xf] }
  0x5f   :  { %v10342_v24 = vor.u32 %v9284_v19, %v7101_v18  ;;  %12511 = vst [vmem:[#allocation41_spill] sm:$0xff] %v10344_v25  ;;  %v7179_v4 = vld [vmem:[%s12290_s0 + $0xcc] sm:$0xf0]  ;;  %v7187_v6 = vld [vmem:[%s12290_s0 + $0xd4] sm:$0xf0] }
  0x60   :  { %2796 = vmatpush.bf16.msrb.mxu2 %v7786_v13  ;;  %v10308_v13 = vor.u32 %v9300_v7, %v7171_v8  ;;  %12512 = vst [vmem:[#allocation42_spill] sm:$0xff] %v10346_v26  ;;  %v10452_v9 = vor.u32 %v9301_v1, %v7179_v4  ;;  %v10454_v10 = vor.u32 %v9302_v5, %v7187_v6  ;;  %v7205_v16 = vld [vmem:[%s12290_s0 + $0xe8] sm:$0xf]  ;;  %v9311_v17 = vld [vmem:[%s12290_s0 + $0x100] sm:$0xf0] }
  0x61   :  { %2894 = vmatpush.bf16.msrb.mxu0 %v8234_v43  ;;  %12510 = vst [vmem:[#allocation40_spill] sm:$0xff] %v10342_v24  ;;  %v9298_v43 = vld [vmem:[%s12290_s0 + $0x98] sm:$0xf0]  ;;  %v9308_v18 = vld [vmem:[%s12290_s0 + $0xec] sm:$0xf]  ;;  %v10486_v29 = vor.u32 %v9311_v17, %v7205_v16 }
  0x62   :  { %2845 = vmatpush.bf16.msrb.mxu3 %v8010_v31  ;;  %2943 = vmatpush.bf16.msrb.mxu1 %v8458_v44  ;;  %12507 = vst [vmem:[#allocation37_spill] sm:$0xff] %v10308_v13  ;;  %v9291_v31 = vld [vmem:[%s12290_s0 + $0x60] sm:$0xf0]  ;;  %v7151_v44 = vld [vmem:[%s12290_s0 + $0x94] sm:$0xf0]  ;;  %v10414_v48 = vor.u32 %v9298_v43, %v7157_v42 }
  0x63   :  { %v10416_v49 = vor.u32 %v9294_v41, %v7151_v44  ;;  %12523 = vst [vmem:[#allocation53_spill] sm:$0xff] %v10452_v9  ;;  %v7213_v19 = vld [vmem:[%s12290_s0 + $0xf0] sm:$0xf]  ;;  %v9312_v20 = vld [vmem:[%s12290_s0 + $0x108] sm:$0xf0] }
  0x64   :  { %2797 = vmatpush.bf16.msrb.mxu2 %v7758_v30  ;;  %v7129_v30 = vld [vmem:[%s12290_s0 + $0x48] sm:$0xf]  ;;  %12518 = vst [vmem:[#allocation48_spill] sm:$0xff] %v10414_v48  ;;  %v9309_v22 = vld [vmem:[%s12290_s0 + $0xf4] sm:$0xf] }
  0x65   :  { %2895 = vmatpush.bf16.msrb.mxu0 %v8206_v56  ;;  %v10378_v36 = vor.u32 %v9291_v31, %v7129_v30  ;;  %12519 = vst [vmem:[#allocation49_spill] sm:$0xff] %v10416_v49  ;;  %v7207_v21 = vld [vmem:[%s12290_s0 + $0x104] sm:$0xf0]  ;;  %v7215_v27 = vld [vmem:[%s12290_s0 + $0x10c] sm:$0xf0]  ;;  %v10488_v30 = vor.u32 %v9312_v20, %v7213_v19 }
  0x66   :  { %2846 = vmatpush.bf16.msrb.mxu3 %v7982_v46  ;;  %2944 = vmatpush.bf16.msrb.mxu1 %v8430_v61  ;;  %v7159_v46 = vld [vmem:[%s12290_s0 + $0x9c] sm:$0xf0]  ;;  %v7177_v61 = vld [vmem:[%s12290_s0 + $0xb0] sm:$0xf]  ;;  %12524 = vst [vmem:[#allocation54_spill] sm:$0xff] %v10454_v10  ;;  %v10490_v32 = vor.u32 %v9308_v18, %v7207_v21  ;;  %v10492_v33 = vor.u32 %v9309_v22, %v7215_v27 }
  0x67   :  { %2710 = vmatmul.bf16.gmra.mxu0 %v10268_v50  ;;  %2730 = vmatmul.bf16.gmra.mxu2 %v10270_v51  ;;  %12514 = vst [vmem:[#allocation44_spill] sm:$0xff] %v10378_v36  ;;  %v10418_v56 = vor.u32 %v9295_v45, %v7159_v46  ;;  %v10448_v7 = vor.u32 %v9304_v62, %v7177_v61  ;;  %v9384_v41 = vld [vmem:[#allocation2 + $0x18c] sm:$0xf]  ;;  %v7507_v42 = vld [vmem:[#allocation2 + $0x1a4] sm:$0xf0] }
  0x68   :  { %2759 = vmatmul.bf16.gmra.mxu1 %v10272_v52  ;;  %2993 = vmatpush.bf16.msra.mxu2 %v8654_v2  ;;  %v7185_v2 = vld [vmem:[%s12290_s0 + $0xb8] sm:$0xf]  ;;  %12525 = vst [vmem:[#allocation55_spill] sm:$0xff] %v10486_v29  ;;  %v9440_v43 = vld [vmem:[#allocation2 + $0x34c] sm:$0xf]  ;;  %v7510_v45 = vor.u32 %v9384_v41, %v7507_v42 }
  0x69   :  { %2779 = vmatmul.bf16.gmra.mxu3 %v10274_v55  ;;  %12520 = vst [vmem:[#allocation50_spill] sm:$0xff] %v10418_v56  ;;  %v10450_v8 = vor.u32 %v9305_v3, %v7185_v2  ;;  %v7731_v44 = vld [vmem:[#allocation2 + $0x364] sm:$0xf0]  ;;  %v9496_v61 = vld [vmem:[#allocation2 + $0x50c] sm:$0xf] }
  0x6a   :  { %12521 = vst [vmem:[#allocation51_spill] sm:$0xff] %v10448_v7  ;;  %v7734_v46 = vor.u32 %v9440_v43, %v7731_v44  ;;  %v7955_v62 = vld [vmem:[#allocation2 + $0x524] sm:$0xf0]  ;;  %v9377_v3 = vld [vmem:[#allocation2 + $0x154] sm:$0xf]  ;;  %3035 = vmatpush.bf16.msra.mxu3 %v7510_v45 }
  0x6b   :  { %12522 = vst [vmem:[#allocation52_spill] sm:$0xff] %v10450_v8  ;;  %v7958_v2 = vor.u32 %v9496_v61, %v7955_v62  ;;  %v7479_v4 = vld [vmem:[#allocation2 + $0x16c] sm:$0xf0]  ;;  %v9433_v5 = vld [vmem:[#allocation2 + $0x314] sm:$0xf] }
  0x6c   :  { %12526 = vst [vmem:[#allocation56_spill] sm:$0xff] %v10488_v30  ;;  %3084 = vmatpush.bf16.msra.mxu0 %v7734_v46  ;;  %v7482_v16 = vor.u32 %v9377_v3, %v7479_v4  ;;  %v7703_v17 = vld [vmem:[#allocation2 + $0x32c] sm:$0xf0]  ;;  %v9489_v18 = vld [vmem:[#allocation2 + $0x4d4] sm:$0xf] }
  0x6d   :  { %12527 = vst [vmem:[#allocation57_spill] sm:$0xff] %v10490_v32  ;;  %v7927_v19 = vld [vmem:[#allocation2 + $0x4ec] sm:$0xf0]  ;;  %3133 = vmatpush.bf16.msra.mxu1 %v7958_v2  ;;  %v7706_v21 = vor.u32 %v9433_v5, %v7703_v17  ;;  %v9318_v41 = vld [vmem:[%s12290_s0 + $0x138] sm:$0xf0] }
  0x6e   :  { %12528 = vst [vmem:[#allocation58_spill] sm:$0xff] %v10492_v33  ;;  %v7930_v22 = vor.u32 %v9489_v18, %v7927_v19  ;;  %v9370_v42 = vld [vmem:[#allocation2 + $0x11c] sm:$0xf]  ;;  %v7451_v43 = vld [vmem:[#allocation2 + $0x134] sm:$0xf0]  ;;  %3036 = vmatpush.bf16.msra.mxu3 %v7482_v16 }
  0x6f   :  { %v9426_v44 = vld [vmem:[#allocation2 + $0x2dc] sm:$0xf]  ;;  %v7454_v46 = vor.u32 %v9370_v42, %v7451_v43  ;;  %v7675_v61 = vld [vmem:[#allocation2 + $0x2f4] sm:$0xf0]  ;;  %v9315_v2 = vld [vmem:[%s12290_s0 + $0x124] sm:$0xf] }
  0x70   :  { %3085 = vmatpush.bf16.msra.mxu0 %v7706_v21  ;;  %v9482_v62 = vld [vmem:[#allocation2 + $0x49c] sm:$0xf]  ;;  %v7241_v3 = vld [vmem:[%s12290_s0 + $0x128] sm:$0xf]  ;;  %v9319_v4 = vld [vmem:[%s12290_s0 + $0x140] sm:$0xf0]  ;;  %v7678_v5 = vor.u32 %v9426_v44, %v7675_v61 }
  0x71   :  { %3134 = vmatpush.bf16.msra.mxu1 %v7930_v22  ;;  %v9316_v16 = vld [vmem:[%s12290_s0 + $0x12c] sm:$0xf]  ;;  %v7243_v17 = vld [vmem:[%s12290_s0 + $0x144] sm:$0xf0]  ;;  %v9363_v19 = vld [vmem:[#allocation2 + $0xe4] sm:$0xf]  ;;  %v10534_v42 = vor.u32 %v9319_v4, %v7241_v3 }
  0x72   :  { %v9419_v21 = vld [vmem:[#allocation2 + $0x2a4] sm:$0xf]  ;;  %3037 = vmatpush.bf16.msra.mxu3 %v7454_v46  ;;  %v7647_v43 = vld [vmem:[#allocation2 + $0x2bc] sm:$0xf0]  ;;  %v9356_v46 = vld [vmem:[#allocation2 + $0xac] sm:$0xf] }
  0x73   :  { %12530 = vst [vmem:[#allocation60_spill] sm:$0xff] %v10534_v42  ;;  %v9475_v44 = vld [vmem:[#allocation2 + $0x464] sm:$0xf]  ;;  %v7871_v61 = vld [vmem:[#allocation2 + $0x47c] sm:$0xf0] }
  0x74   :  { %3086 = vmatpush.bf16.msra.mxu0 %v7678_v5  ;;  %v7874_v3 = vor.u32 %v9475_v44, %v7871_v61  ;;  %v9412_v5 = vld [vmem:[#allocation2 + $0x26c] sm:$0xf]  ;;  %v7591_v61 = vld [vmem:[#allocation2 + $0x24c] sm:$0xf0] }
  0x77   :  { %2715 = vmatmul.bf16.gmra.mxu0 %v10304_v11  ;;  %2735 = vmatmul.bf16.gmra.mxu2 %v10306_v12 }
  0x78   :  { %2764 = vmatmul.bf16.gmra.mxu1 %v10308_v13 }
  0x79   :  { %2784 = vmatmul.bf16.gmra.mxu3 %v10310_v14 }
  0x87   :  { %2798 = vmatmul.bf16.vlgmr.msrb.gmra.mxu2 %v10340_v23  ;;  %2896 = vmatmul.bf16.vlgmr.msrb.gmra.mxu0 %v10342_v24 }
  0x88   :  { %2945 = vmatmul.bf16.vlgmr.msrb.gmra.mxu1 %v10346_v26 }
  0x89   :  { %2847 = vmatmul.bf16.vlgmr.msrb.gmra.mxu3 %v10344_v25 }
  0x97   :  { %2803 = vmatmul.bf16.gmra.mxu2 %v10376_v35  ;;  %2901 = vmatmul.bf16.gmra.mxu0 %v10378_v36  ;;  %v7535_v36 = vld [vmem:[#allocation2 + $0x1dc] sm:$0xf0] }
  0x98   :  { %2950 = vmatmul.bf16.gmra.mxu1 %v10382_v38  ;;  %v9447_v38 = vld [vmem:[#allocation2 + $0x384] sm:$0xf] }
  0x99   :  { %2852 = vmatmul.bf16.gmra.mxu3 %v10380_v37  ;;  %v7759_v37 = vld [vmem:[#allocation2 + $0x39c] sm:$0xf0] }
  0xa7   :  { %2808 = vmatmul.bf16.gmra.mxu2 %v10412_v47  ;;  %2906 = vmatmul.bf16.gmra.mxu0 %v10414_v48 }
  0xa8   :  { %2955 = vmatmul.bf16.gmra.mxu1 %v10418_v56 }
  0xa9   :  { %2857 = vmatmul.bf16.gmra.mxu3 %v10416_v49 }
  0xb7   :  { %2813 = vmatmul.bf16.gmra.mxu2 %v10448_v7  ;;  %2911 = vmatmul.bf16.gmra.mxu0 %v10450_v8  ;;  %v7311_v8 = vld [vmem:[#allocation2 + $0x1c] sm:$0xf0] }
  0xb8   :  { %2960 = vmatmul.bf16.gmra.mxu1 %v10454_v10  ;;  %v9391_v10 = vld [vmem:[#allocation2 + $0x1c4] sm:$0xf] }
  0xb9   :  { %2862 = vmatmul.bf16.gmra.mxu3 %v10452_v9 }
  0xc4   :  { %v2701_v31 = vpop.f32.mrf.mxu0 }
  0xc5   :  { %v2702_v34 = vadd.f32 %v2701_v31, %v10484_v28  ;;  %v2750_v39 = vpop.f32.mrf.mxu1 }
  0xc7   :  { %v10495_v40 = vadd.f32 %v2750_v39, %v2702_v34  ;;  %2818 = vmatmul.bf16.gmra.mxu2 %v10486_v29  ;;  %2916 = vmatmul.bf16.gmra.mxu0 %v10488_v30  ;;  %v7233_v39 = vld [vmem:[%s12290_s0 + $0x120] sm:$0xf]  ;;  %v10538_v30 = vor.u32 %v9316_v16, %v7243_v17  ;;  %v9468_v17 = vld [vmem:[#allocation2 + $0x42c] sm:$0xf] }
  0xc8   :  { %2965 = vmatmul.bf16.gmra.mxu1 %v10492_v33 }
  0xc9   :  { %2867 = vmatmul.bf16.gmra.mxu3 %v10490_v32  ;;  %12532 = vst [vmem:[#allocation62_spill] sm:$0xff] %v10538_v30 }
  0xca   :  { %v2721_v1 = vpop.f32.mrf.mxu2 }
  0xcb   :  { %v2722_v6 = vadd.f32 %v2721_v1, %v10484_v28  ;;  %v7899_v1 = vld [vmem:[#allocation2 + $0x4b4] sm:$0xf0] }
  0xcc   :  { %v2770_v15 = vpop.f32.mrf.mxu3  ;;  %v2703_v20 = vpop.f32.mrf.mxu0 }
  0xcd   :  { %v10502_v27 = vadd.f32 %v2770_v15, %v2722_v6  ;;  %v2704_v31 = vadd.f32 %v2703_v20, %v10484_v28  ;;  %v2752_v34 = vpop.f32.mrf.mxu1  ;;  %v7902_v6 = vor.u32 %v9482_v62, %v7899_v1  ;;  %v7235_v15 = vld [vmem:[%s12290_s0 + $0x13c] sm:$0xf0] }
  0xce   :  { %v7423_v20 = vld [vmem:[#allocation2 + $0xfc] sm:$0xf0]  ;;  %v10536_v1 = vor.u32 %v9315_v2, %v7235_v15  ;;  %v7395_v2 = vld [vmem:[#allocation2 + $0xc4] sm:$0xf0] }
  0xcf   :  { %v10511_v45 = vadd.f32 %v2752_v34, %v2704_v31  ;;  %v10532_v34 = vor.u32 %v9318_v41, %v7233_v39  ;;  %3135 = vmatpush.bf16.msra.mxu1 %v7902_v6  ;;  %v7426_v39 = vor.u32 %v9363_v19, %v7423_v20  ;;  %v7650_v41 = vor.u32 %v9419_v21, %v7647_v43  ;;  %v7619_v6 = vld [vmem:[#allocation2 + $0x284] sm:$0xf0]  ;;  %v9349_v21 = vld [vmem:[#allocation2 + $0x74] sm:$0xf] }
  0xd0   :  { %12531 = vst [vmem:[#allocation61_spill] sm:$0xff] %v10536_v1  ;;  %v7398_v15 = vor.u32 %v9356_v46, %v7395_v2  ;;  %v7622_v16 = vor.u32 %v9412_v5, %v7619_v6  ;;  %v7843_v19 = vld [vmem:[#allocation2 + $0x444] sm:$0xf0]  ;;  %v7261_v2 = vld [vmem:[%s12290_s0 + $0x158] sm:$0xf] }
  0xd1   :  { %12529 = vst [vmem:[#allocation59_spill] sm:$0xff] %v10532_v34  ;;  %3038 = vmatpush.bf16.msra.mxu3 %v7426_v39  ;;  %3087 = vmatpush.bf16.msra.mxu0 %v7650_v41  ;;  %v7846_v20 = vor.u32 %v9468_v17, %v7843_v19  ;;  %v9325_v5 = vld [vmem:[%s12290_s0 + $0x170] sm:$0xf0]  ;;  %v9342_v17 = vld [vmem:[#allocation2 + $0x3c] sm:$0xf] }
  0xd2   :  { %v2723_v18 = vpop.f32.mrf.mxu2  ;;  %v7339_v19 = vld [vmem:[#allocation2 + $0x54] sm:$0xf0]  ;;  %v10580_v56 = vor.u32 %v9325_v5, %v7261_v2  ;;  %v7538_v2 = vor.u32 %v9391_v10, %v7535_v36  ;;  %v7762_v5 = vor.u32 %v9447_v38, %v7759_v37 }
  0xd3   :  { %v2724_v22 = vadd.f32 %v2723_v18, %v10484_v28  ;;  %3136 = vmatpush.bf16.msra.mxu1 %v7874_v3 }
  0xd4   :  { %v2772_v31 = vpop.f32.mrf.mxu3  ;;  %v2706_v62 = vpop.f32.mrf.mxu0  ;;  %12533 = vst [vmem:[#allocation63_spill] sm:$0xff] %v10580_v56 }
  0xd5   :  { %v10540_v33 = vadd.f32 %v2772_v31, %v2724_v22  ;;  %v2707_v18 = vadd.f32 %v2706_v62, %v10484_v28  ;;  %v2755_v32 = vpop.f32.mrf.mxu1  ;;  %v7367_v22 = vld [vmem:[#allocation2 + $0x8c] sm:$0xf0]  ;;  %v9405_v31 = vld [vmem:[#allocation2 + $0x234] sm:$0xf]  ;;  %3039 = vmatpush.bf16.msra.mxu3 %v7398_v15  ;;  %3088 = vmatpush.bf16.msra.mxu0 %v7622_v16  ;;  %v7787_v15 = vld [vmem:[#allocation2 + $0x3d4] sm:$0xf0] }
  0xd6   :  { %v9461_v62 = vld [vmem:[#allocation2 + $0x3f4] sm:$0xf]  ;;  %v7594_v3 = vor.u32 %v9405_v31, %v7591_v61  ;;  %v9322_v16 = vld [vmem:[%s12290_s0 + $0x15c] sm:$0xf]  ;;  %v7269_v31 = vld [vmem:[%s12290_s0 + $0x160] sm:$0xf] }
  0xd7   :  { %v10543_v4 = vadd.f32 %v2755_v32, %v2707_v18  ;;  %2823 = vmatmul.bf16.gmra.mxu2 %v10532_v34  ;;  %2921 = vmatmul.bf16.gmra.mxu0 %v10534_v42  ;;  %v7815_v18 = vld [vmem:[#allocation2 + $0x40c] sm:$0xf0]  ;;  %v7271_v61 = vld [vmem:[%s12290_s0 + $0x17c] sm:$0xf0] }
  0xd8   :  { %2970 = vmatmul.bf16.gmra.mxu1 %v10538_v30  ;;  %v7370_v30 = vor.u32 %v9349_v21, %v7367_v22  ;;  %v7818_v6 = vor.u32 %v9461_v62, %v7815_v18  ;;  %v9454_v22 = vld [vmem:[#allocation2 + $0x3bc] sm:$0xf]  ;;  %v7342_v62 = vor.u32 %v9342_v17, %v7339_v19 }
  0xd9   :  { %2872 = vmatmul.bf16.gmra.mxu3 %v10536_v1  ;;  %3137 = vmatpush.bf16.msra.mxu1 %v7846_v20  ;;  %v9326_v20 = vld [vmem:[%s12290_s0 + $0x178] sm:$0xf0]  ;;  %v9335_v1 = vld [vmem:[#allocation2 + $0x4] sm:$0xf] }
  0xda   :  { %v2726_v32 = vpop.f32.mrf.mxu2  ;;  %3040 = vmatpush.bf16.msra.mxu3 %v7370_v30  ;;  %3089 = vmatpush.bf16.msra.mxu0 %v7594_v3  ;;  %v10582_v49 = vor.u32 %v9326_v20, %v7269_v31  ;;  %v7289_v20 = vld [vmem:[%s12290_s0 + $0x190] sm:$0xf] }
  0xdb   :  { %v2727_v43 = vadd.f32 %v2726_v32, %v10484_v28  ;;  %v9398_v32 = vld [vmem:[#allocation2 + $0x1fc] sm:$0xf] }
  0xdc   :  { %v2775_v44 = vpop.f32.mrf.mxu3  ;;  %v2708_v42 = vpop.f32.mrf.mxu0  ;;  %12534 = vst [vmem:[#allocation64_spill] sm:$0xff] %v10582_v49 }
  0xdd   :  { %v10550_v39 = vadd.f32 %v2775_v44, %v2727_v43  ;;  %v2709_v41 = vadd.f32 %v2708_v42, %v10484_v28  ;;  %v2757_v46 = vpop.f32.mrf.mxu1  ;;  %v7563_v42 = vld [vmem:[#allocation2 + $0x214] sm:$0xf0]  ;;  %v9323_v44 = vld [vmem:[%s12290_s0 + $0x164] sm:$0xf]  ;;  %3138 = vmatpush.bf16.msra.mxu1 %v7818_v6  ;;  %v7314_v6 = vor.u32 %v9335_v1, %v7311_v8  ;;  %v8179_v8 = vld [vmem:[#allocation2 + $0x6e4] sm:$0xf0] }
  0xde   :  { %v7263_v43 = vld [vmem:[%s12290_s0 + $0x174] sm:$0xf0]  ;;  %v7566_v18 = vor.u32 %v9398_v32, %v7563_v42  ;;  %v10586_v17 = vor.u32 %v9323_v44, %v7271_v61  ;;  %3041 = vmatpush.bf16.msra.mxu3 %v7342_v62  ;;  %v9329_v44 = vld [vmem:[%s12290_s0 + $0x194] sm:$0xf] }
  0xdf   :  { %v10559_v21 = vadd.f32 %v2757_v46, %v2709_v41  ;;  %v7790_v46 = vor.u32 %v9454_v22, %v7787_v15  ;;  %v10584_v3 = vor.u32 %v9322_v16, %v7263_v43  ;;  %v9332_v43 = vld [vmem:[%s12290_s0 + $0x1a8] sm:$0xf0]  ;;  %v7297_v61 = vld [vmem:[%s12290_s0 + $0x198] sm:$0xf]  ;;  %v9333_v62 = vld [vmem:[%s12290_s0 + $0x1b0] sm:$0xf0] }
  0xe0   :  { %12536 = vst [vmem:[#allocation66_spill] sm:$0xff] %v10586_v17  ;;  %3090 = vmatpush.bf16.msra.mxu0 %v7566_v18  ;;  %v7291_v18 = vld [vmem:[%s12290_s0 + $0x1ac] sm:$0xf0] }
  0xe1   :  { %12535 = vst [vmem:[#allocation65_spill] sm:$0xff] %v10584_v3  ;;  %3139 = vmatpush.bf16.msra.mxu1 %v7790_v46  ;;  %v7299_v46 = vld [vmem:[%s12290_s0 + $0x1b4] sm:$0xf0] }
  0xe2   :  { %v2728_v41 = vpop.f32.mrf.mxu2  ;;  %3042 = vmatpush.bf16.msra.mxu3 %v7314_v6 }
  0xe3   :  { %v2729_v9 = vadd.f32 %v2728_v41, %v10484_v28  ;;  %v9330_v41 = vld [vmem:[%s12290_s0 + $0x19c] sm:$0xf] }
  0xe4   :  { %v2777_v48 = vpop.f32.mrf.mxu3  ;;  %v2711_v30 = vpop.f32.mrf.mxu0  ;;  %3091 = vmatpush.bf16.msra.mxu0 %v7538_v2  ;;  %v10630_v2 = vor.u32 %v9333_v62, %v7297_v61 }
  0xe5   :  { %v10588_v19 = vadd.f32 %v2777_v48, %v2729_v9  ;;  %v2712_v32 = vadd.f32 %v2711_v30, %v10484_v28  ;;  %v2760_v42 = vpop.f32.mrf.mxu1  ;;  %v9552_v48 = vld [vmem:[#allocation2 + $0x6cc] sm:$0xf]  ;;  %3140 = vmatpush.bf16.msra.mxu1 %v7762_v5 }
  0xe6   :  { %v8182_v9 = vor.u32 %v9552_v48, %v8179_v8  ;;  %12538 = vst [vmem:[#allocation68_spill] sm:$0xff] %v10630_v2  ;;  %v10632_v48 = vor.u32 %v9329_v44, %v7291_v18  ;;  %v10634_v8 = vor.u32 %v9330_v41, %v7299_v46 }
  0xe7   :  { %v10591_v22 = vadd.f32 %v2760_v42, %v2712_v32  ;;  %2828 = vmatmul.bf16.gmra.mxu2 %v10580_v56  ;;  %2926 = vmatmul.bf16.gmra.mxu0 %v10582_v49  ;;  %v10628_v42 = vor.u32 %v9332_v43, %v7289_v20 }
  0xe8   :  { %2975 = vmatmul.bf16.gmra.mxu1 %v10586_v17  ;;  %3182 = vmatpush.bf16.msrb.mxu2 %v8182_v9  ;;  %12539 = vst [vmem:[#allocation69_spill] sm:$0xff] %v10632_v48 }
  0xe9   :  { %2877 = vmatmul.bf16.gmra.mxu3 %v10584_v3  ;;  %12537 = vst [vmem:[#allocation67_spill] sm:$0xff] %v10628_v42 }
  0xea   :  { %v2731_v1 = vpop.f32.mrf.mxu2  ;;  %12540 = vst [vmem:[#allocation70_spill] sm:$0xff] %v10634_v8 }
  0xeb   :  { %v2732_v36 = vadd.f32 %v2731_v1, %v10484_v28 }
  0xec   :  { %v2780_v37 = vpop.f32.mrf.mxu3  ;;  %v2713_v38 = vpop.f32.mrf.mxu0 }
  0xed   :  { %v10598_v10 = vadd.f32 %v2780_v37, %v2732_v36  ;;  %v2714_v15 = vadd.f32 %v2713_v38, %v10484_v28  ;;  %v2762_v16 = vpop.f32.mrf.mxu1  ;;  %v9545_v38 = vld [vmem:[#allocation2 + $0x694] sm:$0xf] }
  0xef   :  { %v10601_v31 = vadd.f32 %v2762_v16, %v2714_v15  ;;  %v8151_v15 = vld [vmem:[#allocation2 + $0x6ac] sm:$0xf0] }
  0xf0   :  { %v8154_v16 = vor.u32 %v9545_v38, %v8151_v15 }
  0xf2   :  { %v2733_v30 = vpop.f32.mrf.mxu2  ;;  %3183 = vmatpush.bf16.msrb.mxu2 %v8154_v16 }
  0xf3   :  { %v2734_v6 = vadd.f32 %v2733_v30, %v10484_v28  ;;  %v7109_v30 = vld [vmem:[%s12290_s0 + $0x18] sm:$0xf] }
  0xf4   :  { %v2782_v32 = vpop.f32.mrf.mxu3  ;;  %v2716_v5 = vpop.f32.mrf.mxu0 }
  0xf5   :  { %v10636_v9 = vadd.f32 %v2782_v32, %v2734_v6  ;;  %v2717_v1 = vadd.f32 %v2716_v5, %v10484_v28  ;;  %v2765_v36 = vpop.f32.mrf.mxu1  ;;  %v9285_v6 = vld [vmem:[%s12290_s0 + $0x30] sm:$0xf0] }
  0xf7   :  { %v10639_v37 = vadd.f32 %v2765_v36, %v2717_v1  ;;  %2833 = vmatmul.bf16.gmra.mxu2 %v10628_v42  ;;  %2931 = vmatmul.bf16.gmra.mxu0 %v10630_v2  ;;  %v10658_v36 = vor.u32 %v9285_v6, %v7109_v30 }
  0xf8   :  { %2980 = vmatmul.bf16.gmra.mxu1 %v10634_v8 }
  0xf9   :  { %2882 = vmatmul.bf16.gmra.mxu3 %v10632_v48  ;;  %12541 = vst [vmem:[#allocation71_spill] sm:$0xff] %v10658_v36 }
  0xfa   :  { %v2736_v20 = vpop.f32.mrf.mxu2 }
  0xfb   :  { %v2737_v43 = vadd.f32 %v2736_v20, %v10484_v28  ;;  %v9538_v20 = vld [vmem:[#allocation2 + $0x65c] sm:$0xf] }
  0xfc   :  { %v2785_v44 = vpop.f32.mrf.mxu3  ;;  %v2718_v61 = vpop.f32.mrf.mxu0 }
  0xfd   :  { %v10646_v62 = vadd.f32 %v2785_v44, %v2737_v43  ;;  %v2719_v18 = vadd.f32 %v2718_v61, %v10484_v28  ;;  %v2767_v41 = vpop.f32.mrf.mxu1  ;;  %v8123_v43 = vld [vmem:[#allocation2 + $0x674] sm:$0xf0] }
  0xff   :  { %v10649_v46 = vadd.f32 %v2767_v41, %v2719_v18 }
 0x102   :  { %v2738_v32 = vpop.f32.mrf.mxu2 }
 0x103   :  { %v2739_v5 = vadd.f32 %v2738_v32, %v10484_v28  ;;  %v8126_v28 = vor.u32 %v9538_v20, %v8123_v43 }
 0x104   :  { %v2787_v1 = vpop.f32.mrf.mxu3  ;;  %v2897_v38 = vpop.f32.mrf.mxu0 }
 0x105   :  { %v10660_v15 = vadd.f32 %v2787_v1, %v2739_v5  ;;  %v2946_v16 = vpop.f32.mrf.mxu1  ;;  %3184 = vmatpush.bf16.msrb.mxu2 %v8126_v28  ;;  %v7137_v5 = vld [vmem:[%s12290_s0 + $0x50] sm:$0xf]  ;;  %v9292_v1 = vld [vmem:[%s12290_s0 + $0x68] sm:$0xf0] }
 0x107   :  { %8679 = vmatmul.msk.bf16.vlgmr.msra.gmra.mxu2 %vm2667_vm0, %v10658_v36  ;;  %3092 = vmatmul.bf16.vlgmr.msra.gmra.mxu0 %v10200_v63 }
 0x108   :  { %3141 = vmatmul.bf16.vlgmr.msra.gmra.mxu1 %v10340_v23 }
 0x109   :  { %3043 = vmatmul.bf16.vlgmr.msra.gmra.mxu3 %v10196_v59 }
 0x10a   :  { %v2799_v44 = vpop.f32.mrf.mxu2 }
 0x10b   :  { %v2800_v61 = vadd.f32 %v2799_v44, %v10495_v40  ;;  %v10677_v44 = vor.u32 %v9292_v1, %v7137_v5 }
 0x10c   :  { %v2848_v18 = vpop.f32.mrf.mxu3  ;;  %v2899_v41 = vpop.f32.mrf.mxu0 }
 0x10d   :  { %v2849_v30 = vadd.f32 %v2848_v18, %v2800_v61  ;;  %v2948_v6 = vpop.f32.mrf.mxu1  ;;  %12542 = vst [vmem:[#allocation72_spill] sm:$0xff] %v10677_v44 }
 0x10f   :  { %v2898_v32 = vadd.f32 %v2897_v38, %v2849_v30  ;;  %v8095_v30 = vld [vmem:[#allocation2 + $0x63c] sm:$0xf0] }
 0x111   :  { %v10674_v63 = vadd.f32 %v2946_v16, %v2898_v32  ;;  %v9531_v16 = vld [vmem:[#allocation2 + $0x624] sm:$0xf] }
 0x112   :  { %v2801_v20 = vpop.f32.mrf.mxu2  ;;  %v8098_v32 = vor.u32 %v9531_v16, %v8095_v30 }
 0x113   :  { %v2802_v43 = vadd.f32 %v2801_v20, %v10511_v45 }
 0x114   :  { %v2850_v40 = vpop.f32.mrf.mxu3  ;;  %v2902_v28 = vpop.f32.mrf.mxu0  ;;  %3185 = vmatpush.bf16.msrb.mxu2 %v8098_v32 }
 0x115   :  { %v2851_v61 = vadd.f32 %v2850_v40, %v2802_v43  ;;  %v2951_v18 = vpop.f32.mrf.mxu1 }
 0x117   :  { %v2900_v38 = vadd.f32 %v2899_v41, %v2851_v61  ;;  %8680 = vmatmul.msk.bf16.gmra.mxu2 %vm2667_vm0, %v10677_v44  ;;  %3097 = vmatmul.bf16.gmra.mxu0 %v10236_v57  ;;  %v7165_v57 = vld [vmem:[%s12290_s0 + $0x88] sm:$0xf] }
 0x118   :  { %3146 = vmatmul.bf16.gmra.mxu1 %v10376_v35  ;;  %v9299_v35 = vld [vmem:[%s12290_s0 + $0xa0] sm:$0xf0] }
 0x119   :  { %3048 = vmatmul.bf16.gmra.mxu3 %v10232_v53  ;;  %v10684_v45 = vadd.f32 %v2948_v6, %v2900_v38  ;;  %v10696_v30 = vor.u32 %v9299_v35, %v7165_v57 }
 0x11a   :  { %v2804_v5 = vpop.f32.mrf.mxu2 }
 0x11b   :  { %v2805_v1 = vadd.f32 %v2804_v5, %v10543_v4  ;;  %12543 = vst [vmem:[#allocation73_spill] sm:$0xff] %v10696_v30 }
 0x11c   :  { %v2853_v20 = vpop.f32.mrf.mxu3  ;;  %v2904_v41 = vpop.f32.mrf.mxu0 }
 0x11d   :  { %v2854_v43 = vadd.f32 %v2853_v20, %v2805_v1  ;;  %v2953_v40 = vpop.f32.mrf.mxu1  ;;  %v8067_v20 = vld [vmem:[#allocation2 + $0x604] sm:$0xf0] }
 0x11f   :  { %v2903_v61 = vadd.f32 %v2902_v28, %v2854_v43 }
 0x121   :  { %v10693_v16 = vadd.f32 %v2951_v18, %v2903_v61  ;;  %v9524_v18 = vld [vmem:[#allocation2 + $0x5ec] sm:$0xf] }
 0x122   :  { %v2806_v6 = vpop.f32.mrf.mxu2  ;;  %v8070_v43 = vor.u32 %v9524_v18, %v8067_v20 }
 0x123   :  { %v2807_v38 = vadd.f32 %v2806_v6, %v10559_v21 }
 0x124   :  { %v2855_v4 = vpop.f32.mrf.mxu3  ;;  %v2907_v32 = vpop.f32.mrf.mxu0  ;;  %3186 = vmatpush.bf16.msrb.mxu2 %v8070_v43 }
 0x125   :  { %v2856_v5 = vadd.f32 %v2855_v4, %v2807_v38  ;;  %v2956_v1 = vpop.f32.mrf.mxu1 }
 0x127   :  { %v2905_v28 = vadd.f32 %v2904_v41, %v2856_v5  ;;  %8681 = vmatmul.msk.bf16.gmra.mxu2 %vm2667_vm0, %v10696_v30  ;;  %3102 = vmatmul.bf16.gmra.mxu0 %v10272_v52  ;;  %v7193_v5 = vld [vmem:[%s12290_s0 + $0xc0] sm:$0xf]  ;;  %v9306_v52 = vld [vmem:[%s12290_s0 + $0xd8] sm:$0xf0] }
 0x128   :  { %3151 = vmatmul.bf16.gmra.mxu1 %v10412_v47  ;;  %v10715_v20 = vor.u32 %v9306_v52, %v7193_v5 }
 0x129   :  { %3053 = vmatmul.bf16.gmra.mxu3 %v10268_v50  ;;  %v10703_v21 = vadd.f32 %v2953_v40, %v2905_v28 }
 0x12a   :  { %v2809_v57 = vpop.f32.mrf.mxu2  ;;  %12544 = vst [vmem:[#allocation74_spill] sm:$0xff] %v10715_v20 }
 0x12b   :  { %v2810_v35 = vadd.f32 %v2809_v57, %v10591_v22 }
 0x12c   :  { %v2858_v61 = vpop.f32.mrf.mxu3  ;;  %v2909_v41 = vpop.f32.mrf.mxu0 }
 0x12d   :  { %v2859_v6 = vadd.f32 %v2858_v61, %v2810_v35  ;;  %v2958_v38 = vpop.f32.mrf.mxu1  ;;  %v8039_v61 = vld [vmem:[#allocation2 + $0x5cc] sm:$0xf0] }
 0x12f   :  { %v2908_v4 = vadd.f32 %v2907_v32, %v2859_v6 }
 0x131   :  { %v10712_v18 = vadd.f32 %v2956_v1, %v2908_v4  ;;  %v9517_v1 = vld [vmem:[#allocation2 + $0x5b4] sm:$0xf] }
 0x132   :  { %v2811_v40 = vpop.f32.mrf.mxu2  ;;  %v8042_v6 = vor.u32 %v9517_v1, %v8039_v61 }
 0x133   :  { %v2812_v28 = vadd.f32 %v2811_v40, %v10601_v31 }
 0x134   :  { %v2860_v22 = vpop.f32.mrf.mxu3  ;;  %v2912_v43 = vpop.f32.mrf.mxu0  ;;  %3187 = vmatpush.bf16.msrb.mxu2 %v8042_v6 }
 0x135   :  { %v2861_v57 = vadd.f32 %v2860_v22, %v2812_v28  ;;  %v2961_v35 = vpop.f32.mrf.mxu1 }
 0x137   :  { %v2910_v32 = vadd.f32 %v2909_v41, %v2861_v57  ;;  %8682 = vmatmul.msk.bf16.gmra.mxu2 %vm2667_vm0, %v10715_v20  ;;  %3107 = vmatmul.bf16.gmra.mxu0 %v10308_v13  ;;  %v7221_v57 = vld [vmem:[%s12290_s0 + $0xf8] sm:$0xf]  ;;  %v9313_v13 = vld [vmem:[%s12290_s0 + $0x110] sm:$0xf0] }
 0x138   :  { %3156 = vmatmul.bf16.gmra.mxu1 %v10448_v7  ;;  %v10734_v61 = vor.u32 %v9313_v13, %v7221_v57  ;;  %v9510_v13 = vld [vmem:[#allocation2 + $0x57c] sm:$0xf] }
 0x139   :  { %3058 = vmatmul.bf16.gmra.mxu3 %v10304_v11  ;;  %v10722_v31 = vadd.f32 %v2958_v38, %v2910_v32  ;;  %v9657_v11 = vld [vmem:[#allocation2 + $0xa14] sm:$0xf] }
 0x13a   :  { %v2814_v52 = vpop.f32.mrf.mxu2  ;;  %12545 = vst [vmem:[#allocation75_spill] sm:$0xff] %v10734_v61 }
 0x13b   :  { %v2815_v4 = vadd.f32 %v2814_v52, %v10639_v37 }
 0x13c   :  { %v2863_v5 = vpop.f32.mrf.mxu3  ;;  %v2914_v41 = vpop.f32.mrf.mxu0 }
 0x13d   :  { %v2864_v40 = vadd.f32 %v2863_v5, %v2815_v4  ;;  %v2963_v28 = vpop.f32.mrf.mxu1  ;;  %v8403_v5 = vld [vmem:[#allocation2 + $0x8a4] sm:$0xf0] }
 0x13f   :  { %v2913_v22 = vadd.f32 %v2912_v43, %v2864_v40  ;;  %v9608_v43 = vld [vmem:[#allocation2 + $0x88c] sm:$0xf] }
 0x140   :  { %v9664_v40 = vld [vmem:[#allocation2 + $0xa4c] sm:$0xf] }
 0x141   :  { %v10731_v1 = vadd.f32 %v2961_v35, %v2913_v22  ;;  %v8406_v35 = vor.u32 %v9608_v43, %v8403_v5  ;;  %v8627_v22 = vld [vmem:[#allocation2 + $0xa64] sm:$0xf0] }
 0x142   :  { %v2816_v38 = vpop.f32.mrf.mxu2  ;;  %v8630_v57 = vor.u32 %v9664_v40, %v8627_v22  ;;  %v9594_v40 = vld [vmem:[#allocation2 + $0x81c] sm:$0xf] }
 0x143   :  { %v2817_v32 = vadd.f32 %v2816_v38, %v10649_v46  ;;  %v8011_v46 = vld [vmem:[#allocation2 + $0x594] sm:$0xf0]  ;;  %3231 = vmatpush.bf16.msrb.mxu3 %v8406_v35 }
 0x144   :  { %v2865_v37 = vpop.f32.mrf.mxu3  ;;  %v2917_v6 = vpop.f32.mrf.mxu0  ;;  %v8014_v38 = vor.u32 %v9510_v13, %v8011_v46  ;;  %3280 = vmatpush.bf16.msrb.mxu0 %v8630_v57  ;;  %v8571_v13 = vld [vmem:[#allocation2 + $0x9f4] sm:$0xf0]  ;;  %v9320_v46 = vld [vmem:[%s12290_s0 + $0x148] sm:$0xf0] }
 0x145   :  { %v2866_v52 = vadd.f32 %v2865_v37, %v2817_v32  ;;  %v2966_v4 = vpop.f32.mrf.mxu1 }
 0x146   :  { %3188 = vmatpush.bf16.msrb.mxu2 %v8014_v38  ;;  %v9643_v38 = vld [vmem:[#allocation2 + $0x9a4] sm:$0xf] }
 0x147   :  { %v2915_v7 = vadd.f32 %v2914_v41, %v2866_v52  ;;  %8683 = vmatmul.msk.bf16.gmra.mxu2 %vm2667_vm0, %v10734_v61  ;;  %3112 = vmatmul.bf16.gmra.mxu0 %v10202_v0  ;;  %v9601_v41 = vld [vmem:[#allocation2 + $0x854] sm:$0xf]  ;;  %v8375_v52 = vld [vmem:[#allocation2 + $0x86c] sm:$0xf0] }
 0x148   :  { %3161 = vmatmul.bf16.gmra.mxu1 %v10486_v29  ;;  %v8378_v5 = vor.u32 %v9601_v41, %v8375_v52  ;;  %v8543_v52 = vld [vmem:[#allocation2 + $0x9bc] sm:$0xf0] }
 0x149   :  { %3063 = vmatmul.bf16.gmra.mxu3 %v10198_v60  ;;  %v10741_v32 = vadd.f32 %v2963_v28, %v2915_v7  ;;  %v8599_v60 = vld [vmem:[#allocation2 + $0xa2c] sm:$0xf0]  ;;  %v8347_v7 = vld [vmem:[#allocation2 + $0x834] sm:$0xf0]  ;;  %v9650_v28 = vld [vmem:[#allocation2 + $0x9dc] sm:$0xf] }
 0x14a   :  { %v2819_v37 = vpop.f32.mrf.mxu2  ;;  %v8602_v29 = vor.u32 %v9657_v11, %v8599_v60  ;;  %3232 = vmatpush.bf16.msrb.mxu3 %v8378_v5  ;;  %v8350_v22 = vor.u32 %v9594_v40, %v8347_v7  ;;  %v8574_v57 = vor.u32 %v9650_v28, %v8571_v13  ;;  %v9587_v11 = vld [vmem:[#allocation2 + $0x7e4] sm:$0xf]  ;;  %v8546_v5 = vor.u32 %v9643_v38, %v8543_v52  ;;  %v8291_v28 = vld [vmem:[#allocation2 + $0x7c4] sm:$0xf0]  ;;  %v8263_v38 = vld [vmem:[#allocation2 + $0x78c] sm:$0xf0] }
 0x14b   :  { %v2820_v0 = vadd.f32 %v2819_v37, %v10502_v27  ;;  %v7249_v27 = vld [vmem:[%s12290_s0 + $0x130] sm:$0xf]  ;;  %v8515_v13 = vld [vmem:[#allocation2 + $0x984] sm:$0xf0] }
 0x14c   :  { %v2868_v43 = vpop.f32.mrf.mxu3  ;;  %v2919_v47 = vpop.f32.mrf.mxu0  ;;  %3281 = vmatpush.bf16.msrb.mxu0 %v8602_v29  ;;  %v8319_v29 = vld [vmem:[#allocation2 + $0x7fc] sm:$0xf0]  ;;  %v10753_v37 = vor.u32 %v9320_v46, %v7249_v27  ;;  %v9503_v27 = vld [vmem:[#allocation2 + $0x544] sm:$0xf] }
 0x14d   :  { %v2869_v50 = vadd.f32 %v2868_v43, %v2820_v0  ;;  %v2968_v53 = vpop.f32.mrf.mxu1  ;;  %v8322_v41 = vor.u32 %v9587_v11, %v8319_v29  ;;  %v7983_v46 = vld [vmem:[#allocation2 + $0x55c] sm:$0xf0] }
 0x14e   :  { %3233 = vmatpush.bf16.msrb.mxu3 %v8350_v22  ;;  %12546 = vst [vmem:[#allocation76_spill] sm:$0xff] %v10753_v37 }
 0x14f   :  { %v2918_v35 = vadd.f32 %v2917_v6, %v2869_v50 }
 0x150   :  { %3282 = vmatpush.bf16.msrb.mxu0 %v8574_v57 }
 0x151   :  { %v10750_v60 = vadd.f32 %v2966_v4, %v2918_v35  ;;  %v9580_v4 = vld [vmem:[#allocation2 + $0x7ac] sm:$0xf] }
 0x152   :  { %v2821_v0 = vpop.f32.mrf.mxu2  ;;  %3234 = vmatpush.bf16.msrb.mxu3 %v8322_v41  ;;  %v9636_v35 = vld [vmem:[#allocation2 + $0x96c] sm:$0xf] }
 0x153   :  { %v2822_v50 = vadd.f32 %v2821_v0, %v10540_v33  ;;  %v8294_v33 = vor.u32 %v9580_v4, %v8291_v28  ;;  %v8518_v57 = vor.u32 %v9636_v35, %v8515_v13  ;;  %v7986_v0 = vor.u32 %v9503_v27, %v7983_v46  ;;  %v9566_v35 = vld [vmem:[#allocation2 + $0x73c] sm:$0xf]  ;;  %v8459_v27 = vld [vmem:[#allocation2 + $0x914] sm:$0xf0]  ;;  %v9327_v46 = vld [vmem:[%s12290_s0 + $0x180] sm:$0xf0] }
 0x154   :  { %v2870_v6 = vpop.f32.mrf.mxu3  ;;  %v2922_v43 = vpop.f32.mrf.mxu0  ;;  %3283 = vmatpush.bf16.msrb.mxu0 %v8546_v5  ;;  %v8487_v5 = vld [vmem:[#allocation2 + $0x94c] sm:$0xf0] }
 0x155   :  { %v2871_v40 = vadd.f32 %v2870_v6, %v2822_v50  ;;  %v2971_v7 = vpop.f32.mrf.mxu1  ;;  %v9629_v50 = vld [vmem:[#allocation2 + $0x934] sm:$0xf]  ;;  %3189 = vmatpush.bf16.msrb.mxu2 %v7986_v0 }
 0x156   :  { %3235 = vmatpush.bf16.msrb.mxu3 %v8294_v33  ;;  %v8490_v4 = vor.u32 %v9629_v50, %v8487_v5  ;;  %v9615_v50 = vld [vmem:[#allocation2 + $0x8c4] sm:$0xf]  ;;  %v8431_v5 = vld [vmem:[#allocation2 + $0x8dc] sm:$0xf0] }
 0x157   :  { %v2920_v22 = vadd.f32 %v2919_v47, %v2871_v40  ;;  %8684 = vmatmul.msk.bf16.gmra.mxu2 %vm2667_vm0, %v10753_v37  ;;  %3117 = vmatmul.bf16.gmra.mxu0 %v10238_v58  ;;  %v9573_v47 = vld [vmem:[#allocation2 + $0x774] sm:$0xf] }
 0x158   :  { %3166 = vmatmul.bf16.gmra.mxu1 %v10532_v34  ;;  %3284 = vmatpush.bf16.msrb.mxu0 %v8518_v57  ;;  %v8266_v52 = vor.u32 %v9573_v47, %v8263_v38  ;;  %v9559_v47 = vld [vmem:[#allocation2 + $0x704] sm:$0xf]  ;;  %v8207_v38 = vld [vmem:[#allocation2 + $0x71c] sm:$0xf0]  ;;  %v8157_v34 = vld [vmem:[#allocation2 + $0x698] sm:$0xf] }
 0x159   :  { %3068 = vmatmul.bf16.gmra.mxu3 %v10234_v54  ;;  %v10760_v11 = vadd.f32 %v2968_v53, %v2920_v22  ;;  %v8235_v53 = vld [vmem:[#allocation2 + $0x754] sm:$0xf0]  ;;  %v9622_v22 = vld [vmem:[#allocation2 + $0x8fc] sm:$0xf] }
 0x15a   :  { %v2824_v29 = vpop.f32.mrf.mxu2  ;;  %3236 = vmatpush.bf16.msrb.mxu3 %v8266_v52  ;;  %v8238_v13 = vor.u32 %v9566_v35, %v8235_v53  ;;  %v8462_v57 = vor.u32 %v9622_v22, %v8459_v27  ;;  %v8210_v52 = vor.u32 %v9559_v47, %v8207_v38  ;;  %v8434_v53 = vor.u32 %v9615_v50, %v8431_v5  ;;  %v9388_v27 = vld [vmem:[#allocation2 + $0x1a8] sm:$0xf0] }
 0x15b   :  { %v2825_v6 = vadd.f32 %v2824_v29, %v10550_v39  ;;  %v7277_v39 = vld [vmem:[%s12290_s0 + $0x168] sm:$0xf] }
 0x15c   :  { %v2873_v41 = vpop.f32.mrf.mxu3  ;;  %v2924_v40 = vpop.f32.mrf.mxu0  ;;  %3285 = vmatpush.bf16.msrb.mxu0 %v8490_v4  ;;  %v9671_v4 = vld [vmem:[#allocation2 + $0xa84] sm:$0xf] }
 0x15d   :  { %v2874_v28 = vadd.f32 %v2873_v41, %v2825_v6  ;;  %v2973_v58 = vpop.f32.mrf.mxu1  ;;  %v10772_v41 = vor.u32 %v9327_v46, %v7277_v39 }
 0x15e   :  { %3237 = vmatpush.bf16.msrb.mxu3 %v8238_v13 }
 0x15f   :  { %v2923_v33 = vadd.f32 %v2922_v43, %v2874_v28  ;;  %12547 = vst [vmem:[#allocation77_spill] sm:$0xff] %v10772_v41  ;;  %v8655_v28 = vld [vmem:[#allocation2 + $0xa9c] sm:$0xf0] }
 0x160   :  { %3286 = vmatpush.bf16.msrb.mxu0 %v8462_v57  ;;  %v8658_v22 = vor.u32 %v9671_v4, %v8655_v28 }
 0x161   :  { %v10769_v0 = vadd.f32 %v2971_v7, %v2923_v33 }
 0x162   :  { %v2826_v29 = vpop.f32.mrf.mxu2  ;;  %3238 = vmatpush.bf16.msrb.mxu3 %v8210_v52  ;;  %3336 = vmatpush.bf16.msrb.mxu1 %v8658_v22  ;;  %v9334_v52 = vld [vmem:[%s12290_s0 + $0x1b8] sm:$0xf0] }
 0x163   :  { %v2827_v43 = vadd.f32 %v2826_v29, %v10588_v19  ;;  %v7513_v19 = vld [vmem:[#allocation2 + $0x190] sm:$0xf] }
 0x164   :  { %v2875_v6 = vpop.f32.mrf.mxu3  ;;  %v2927_v35 = vpop.f32.mrf.mxu0  ;;  %3287 = vmatpush.bf16.msrb.mxu0 %v8434_v53  ;;  %v7514_v39 = vor.u32 %v9388_v27, %v7513_v19 }
 0x165   :  { %v2876_v13 = vadd.f32 %v2875_v6, %v2827_v43  ;;  %v2976_v7 = vpop.f32.mrf.mxu1  ;;  %v7305_v6 = vld [vmem:[%s12290_s0 + $0x1a0] sm:$0xf]  ;;  %s10094_s0 = smov [#allocation16]  }
 0x166   :  { %3378 = vmatpush.bf16.msra.mxu2 %v7514_v39  ;;  %v10791_v28 = vor.u32 %v9334_v52, %v7305_v6  ;;  %s7064_s10 = sshll.u32 %s10094_s0, 4  ;;  %s7065_s10 = int_to_ptr.vmem [resolvable:$true] %s7064_s10 }
 0x167   :  { %v2925_v33 = vadd.f32 %v2924_v40, %v2876_v13  ;;  %8685 = vmatmul.msk.bf16.gmra.mxu2 %vm2667_vm0, %v10772_v41  ;;  %3122 = vmatmul.bf16.gmra.mxu0 %v10274_v55 }
 0x168   :  { %3171 = vmatmul.bf16.gmra.mxu1 %v10580_v56  ;;  %12548 = vst [vmem:[#allocation78_spill] sm:$0xff] %v10791_v28 }
 0x169   :  { %3073 = vmatmul.bf16.gmra.mxu3 %v10270_v51  ;;  %v10779_v46 = vadd.f32 %v2973_v58, %v2925_v33  ;;  %v9381_v33 = vld [vmem:[#allocation2 + $0x170] sm:$0xf0] }
 0x16a   :  { %v2829_v57 = vpop.f32.mrf.mxu2 }
 0x16b   :  { %v2830_v29 = vadd.f32 %v2829_v57, %v10598_v10 }
 0x16c   :  { %v2878_v47 = vpop.f32.mrf.mxu3  ;;  %v2929_v40 = vpop.f32.mrf.mxu0 }
 0x16d   :  { %v2879_v38 = vadd.f32 %v2878_v47, %v2830_v29  ;;  %v2978_v50 = vpop.f32.mrf.mxu1 }
 0x16f   :  { %v2928_v43 = vadd.f32 %v2927_v35, %v2879_v38 }
 0x171   :  { %v10788_v5 = vadd.f32 %v2976_v7, %v2928_v43  ;;  %v7485_v7 = vld [vmem:[#allocation2 + $0x158] sm:$0xf] }
 0x172   :  { %v2831_v58 = vpop.f32.mrf.mxu2  ;;  %v7486_v19 = vor.u32 %v9381_v33, %v7485_v7 }
 0x173   :  { %v2832_v4 = vadd.f32 %v2831_v58, %v10636_v9 }
 0x174   :  { %v2880_v10 = vpop.f32.mrf.mxu3  ;;  %v2932_v53 = vpop.f32.mrf.mxu0  ;;  %3379 = vmatpush.bf16.msra.mxu2 %v7486_v19 }
 0x175   :  { %v2881_v22 = vadd.f32 %v2880_v10, %v2832_v4  ;;  %v2981_v13 = vpop.f32.mrf.mxu1 }
 0x177   :  { %v2930_v35 = vadd.f32 %v2929_v40, %v2881_v22  ;;  %8686 = vmatmul.msk.bf16.gmra.mxu2 %vm2667_vm0, %v10791_v28  ;;  %3127 = vmatmul.bf16.gmra.mxu0 %v10310_v14 }
 0x178   :  { %3176 = vmatmul.bf16.gmra.mxu1 %v10628_v42  ;;  %v12561_v42 = vld [vmem:[#allocation57_spill] sm:$0xff] }
 0x179   :  { %3078 = vmatmul.bf16.gmra.mxu3 %v10306_v12  ;;  %v10798_v9 = vadd.f32 %v2978_v50, %v2930_v35  ;;  %v9500_v12 = vld [vmem:[#allocation2 + $0x528] sm:$0xf0] }
 0x17a   :  { %v2834_v27 = vpop.f32.mrf.mxu2 }
 0x17b   :  { %v2835_v39 = vadd.f32 %v2834_v27, %v10646_v62  ;;  %v9847_v62 = vld [vmem:[#allocation5] sm:$0xff] }
 0x17c   :  { %v2883_v57 = vpop.f32.mrf.mxu3  ;;  %v2934_v29 = vpop.f32.mrf.mxu0 }
 0x17d   :  { %v2884_v47 = vadd.f32 %v2883_v57, %v2835_v39  ;;  %v2983_v40 = vpop.f32.mrf.mxu1 }
 0x17f   :  { %v2933_v38 = vadd.f32 %v2932_v53, %v2884_v47  ;;  %v10811_v53 = vperm.slane %v9847_v62, 1 }
 0x181   :  { %v10801_v43 = vadd.f32 %v2981_v13, %v2933_v38  ;;  %v7457_v13 = vld [vmem:[#allocation2 + $0x120] sm:$0xf] }
 0x182   :  { %v2836_v6 = vpop.f32.mrf.mxu2 }
 0x183   :  { %v2837_v52 = vadd.f32 %v2836_v6, %v10660_v15  ;;  %v9374_v15 = vld [vmem:[#allocation2 + $0x138] sm:$0xf0] }
 0x184   :  { %v2885_v58 = vpop.f32.mrf.mxu3  ;;  %v3093_v4 = vpop.f32.mrf.mxu0  ;;  %v7458_v35 = vor.u32 %v9374_v15, %v7457_v13  ;;  %v12550_v15 = vld [vmem:[#allocation45_spill] sm:$0xff] }
 0x185   :  { %v2886_v10 = vadd.f32 %v2885_v58, %v2837_v52  ;;  %v10804_v22 = vpop.f32.mrf.mxu1 }
 0x186   :  { %3380 = vmatpush.bf16.msra.mxu2 %v7458_v35  ;;  %v12551_v35 = vld [vmem:[#allocation46_spill] sm:$0xff] }
 0x187   :  { %v2935_v50 = vadd.f32 %v2934_v29, %v2886_v10  ;;  %3190 = vmatmul.bf16.vlgmr.msrb.gmra.mxu2 %v10344_v25  ;;  %3288 = vmatmul.bf16.vlgmr.msrb.gmra.mxu0 %v10346_v26 }
 0x188   :  { %8687 = vmatmul.msk.bf16.vlgmr.msrb.gmra.mxu1 %vm2667_vm0, %v10658_v36 }
 0x189   :  { %3239 = vmatmul.bf16.vlgmr.msrb.gmra.mxu3 %v10342_v24  ;;  %v10813_v7 = vadd.f32 %v2983_v40, %v2935_v50 }
 0x18a   :  { %v2995_v33 = vpop.f32.mrf.mxu2 }
 0x18b   :  { %v2996_v19 = vadd.f32 %v2995_v33, %v10674_v63  ;;  %v9367_v33 = vld [vmem:[#allocation2 + $0x100] sm:$0xf0] }
 0x18c   :  { %v3044_v27 = vpop.f32.mrf.mxu3  ;;  %v3095_v57 = vpop.f32.mrf.mxu0 }
 0x18d   :  { %v3045_v39 = vadd.f32 %v3044_v27, %v10811_v53  ;;  %v10817_v29 = vpop.f32.mrf.mxu1  ;;  %v5093_v10 = vmax.f32 %v2996_v19, 0.0 }
 0x18f   :  { %v10819_v47 = vadd.f32 %v3093_v4, %v3045_v39  ;;  %v12552_v4 = vld [vmem:[#allocation44_spill] sm:$0xff] }
 0x192   :  { %v2997_v38 = vpop.f32.mrf.mxu2 }
 0x193   :  { %v2998_v6 = vadd.f32 %v2997_v38, %v10684_v45  ;;  %v7429_v45 = vld [vmem:[#allocation2 + $0xe8] sm:$0xf] }
 0x194   :  { %v3046_v52 = vpop.f32.mrf.mxu3  ;;  %v3098_v40 = vpop.f32.mrf.mxu0  ;;  %v7430_v27 = vor.u32 %v9367_v33, %v7429_v45 }
 0x195   :  { %v3047_v58 = vadd.f32 %v3046_v52, %v10811_v53  ;;  %v5100_v50 = vmax.f32 %v2998_v6, 0.0  ;;  %v10823_v62 = vpop.f32.mrf.mxu1 }
 0x196   :  { %3381 = vmatpush.bf16.msra.mxu2 %v7430_v27  ;;  %v12553_v27 = vld [vmem:[#allocation49_spill] sm:$0xff] }
 0x197   :  { %v10825_v63 = vadd.f32 %v3095_v57, %v3047_v58  ;;  %v10827_v13 = vpack.c.bf16 %v5100_v50, %v5093_v10  ;;  %3195 = vmatmul.bf16.gmra.mxu2 %v12550_v15  ;;  %3293 = vmatmul.bf16.gmra.mxu0 %v12551_v35 }
 0x198   :  { %8688 = vmatmul.msk.bf16.gmra.mxu1 %vm2667_vm0, %v10677_v44 }
 0x199   :  { %12549 = vst [vmem:[#allocation79_spill] sm:$0xff] %v10827_v13  ;;  %3244 = vmatmul.bf16.gmra.mxu3 %v12552_v4 }
 0x19a   :  { %v3000_v19 = vpop.f32.mrf.mxu2 }
 0x19b   :  { %v3001_v39 = vadd.f32 %v3000_v19, %v10693_v16  ;;  %v12554_v19 = vld [vmem:[#allocation50_spill] sm:$0xff] }
 0x19c   :  { %v3049_v38 = vpop.f32.mrf.mxu3  ;;  %v3100_v6 = vpop.f32.mrf.mxu0 }
 0x19d   :  { %v3050_v57 = vadd.f32 %v3049_v38, %v10811_v53  ;;  %v10836_v52 = vpop.f32.mrf.mxu1  ;;  %v5107_v45 = vmax.f32 %v3001_v39, 0.0 }
 0x19f   :  { %v10838_v58 = vadd.f32 %v3098_v40, %v3050_v57  ;;  %v12556_v40 = vld [vmem:[#allocation48_spill] sm:$0xff] }
 0x1a2   :  { %v3002_v10 = vpop.f32.mrf.mxu2 }
 0x1a3   :  { %v3003_v50 = vadd.f32 %v3002_v10, %v10703_v21  ;;  %v7401_v21 = vld [vmem:[#allocation2 + $0xb0] sm:$0xf] }
 0x1a4   :  { %v3051_v13 = vpop.f32.mrf.mxu3  ;;  %v3103_v44 = vpop.f32.mrf.mxu0 }
 0x1a5   :  { %v3052_v35 = vadd.f32 %v3051_v13, %v10811_v53  ;;  %v5114_v33 = vmax.f32 %v3003_v50, 0.0  ;;  %v10842_v4 = vpop.f32.mrf.mxu1  ;;  %v9360_v13 = vld [vmem:[#allocation2 + $0xc8] sm:$0xf0] }
 0x1a6   :  { %v7402_v57 = vor.u32 %v9360_v13, %v7401_v21 }
 0x1a7   :  { %v10844_v16 = vadd.f32 %v3100_v6, %v3052_v35  ;;  %3200 = vmatmul.bf16.gmra.mxu2 %v12553_v27  ;;  %3298 = vmatmul.bf16.gmra.mxu0 %v12554_v19  ;;  %v10848_v38 = vpack.c.bf16 %v5114_v33, %v5107_v45 }
 0x1a8   :  { %8689 = vmatmul.msk.bf16.gmra.mxu1 %vm2667_vm0, %v10696_v30  ;;  %3382 = vmatpush.bf16.msra.mxu2 %v7402_v57  ;;  %v12557_v57 = vld [vmem:[#allocation53_spill] sm:$0xff] }
 0x1a9   :  { %12555 = vst [vmem:[#allocation49_spill] sm:$0xff] %v10848_v38  ;;  %3249 = vmatmul.bf16.gmra.mxu3 %v12556_v40 }
 0x1aa   :  { %v3005_v39 = vpop.f32.mrf.mxu2 }
 0x1ab   :  { %v3006_v10 = vadd.f32 %v3005_v39, %v10712_v18  ;;  %v12558_v39 = vld [vmem:[#allocation54_spill] sm:$0xff] }
 0x1ac   :  { %v3054_v50 = vpop.f32.mrf.mxu3  ;;  %v3105_v6 = vpop.f32.mrf.mxu0 }
 0x1ad   :  { %v3055_v35 = vadd.f32 %v3054_v50, %v10811_v53  ;;  %v10855_v26 = vpop.f32.mrf.mxu1  ;;  %v5121_v21 = vmax.f32 %v3006_v10, 0.0 }
 0x1af   :  { %v10857_v45 = vadd.f32 %v3103_v44, %v3055_v35  ;;  %v12560_v44 = vld [vmem:[#allocation52_spill] sm:$0xff] }
 0x1b2   :  { %v3007_v33 = vpop.f32.mrf.mxu2 }
 0x1b3   :  { %v3008_v38 = vadd.f32 %v3007_v33, %v10722_v31  ;;  %v7373_v31 = vld [vmem:[#allocation2 + $0x78] sm:$0xf] }
 0x1b4   :  { %v3056_v19 = vpop.f32.mrf.mxu3  ;;  %v3108_v40 = vpop.f32.mrf.mxu0 }
 0x1b5   :  { %v3057_v30 = vadd.f32 %v3056_v19, %v10811_v53  ;;  %v5128_v13 = vmax.f32 %v3008_v38, 0.0  ;;  %v10861_v36 = vpop.f32.mrf.mxu1  ;;  %v9353_v19 = vld [vmem:[#allocation2 + $0x90] sm:$0xf0] }
 0x1b6   :  { %v7374_v35 = vor.u32 %v9353_v19, %v7373_v31 }
 0x1b7   :  { %v10863_v18 = vadd.f32 %v3105_v6, %v3057_v30  ;;  %3205 = vmatmul.bf16.gmra.mxu2 %v12557_v57  ;;  %3303 = vmatmul.bf16.gmra.mxu0 %v12558_v39  ;;  %v10867_v50 = vpack.c.bf16 %v5128_v13, %v5121_v21 }
 0x1b8   :  { %8690 = vmatmul.msk.bf16.gmra.mxu1 %vm2667_vm0, %v10715_v20  ;;  %3383 = vmatpush.bf16.msra.mxu2 %v7374_v35  ;;  %v7737_v35 = vld [vmem:[#allocation2 + $0x350] sm:$0xf] }
 0x1b9   :  { %12559 = vst [vmem:[#allocation53_spill] sm:$0xff] %v10867_v50  ;;  %3254 = vmatmul.bf16.gmra.mxu3 %v12560_v44 }
 0x1ba   :  { %v3010_v10 = vpop.f32.mrf.mxu2 }
 0x1bb   :  { %v3011_v38 = vadd.f32 %v3010_v10, %v10731_v1  ;;  %v9444_v10 = vld [vmem:[#allocation2 + $0x368] sm:$0xf0] }
 0x1bc   :  { %v3059_v33 = vpop.f32.mrf.mxu3  ;;  %v3110_v6 = vpop.f32.mrf.mxu0 }
 0x1bd   :  { %v3060_v30 = vadd.f32 %v3059_v33, %v10811_v53  ;;  %v10874_v24 = vpop.f32.mrf.mxu1  ;;  %v5135_v31 = vmax.f32 %v3011_v38, 0.0  ;;  %v7961_v33 = vld [vmem:[#allocation2 + $0x510] sm:$0xf] }
 0x1be   :  { %v7962_v38 = vor.u32 %v9500_v12, %v7961_v33 }
 0x1bf   :  { %v10876_v21 = vadd.f32 %v3108_v40, %v3060_v30  ;;  %v12562_v40 = vld [vmem:[#allocation58_spill] sm:$0xff]  ;;  %v7738_v30 = vor.u32 %v9444_v10, %v7737_v35  ;;  %v7709_v35 = vld [vmem:[#allocation2 + $0x318] sm:$0xf]  ;;  %v9437_v10 = vld [vmem:[#allocation2 + $0x330] sm:$0xf0] }
 0x1c0   :  { %3476 = vmatpush.bf16.msra.mxu0 %v7962_v38  ;;  %v8129_v38 = vld [vmem:[#allocation2 + $0x660] sm:$0xf] }
 0x1c1   :  { %3427 = vmatpush.bf16.msra.mxu3 %v7738_v30 }
 0x1c2   :  { %v3012_v13 = vpop.f32.mrf.mxu2 }
 0x1c3   :  { %v3013_v50 = vadd.f32 %v3012_v13, %v10741_v32  ;;  %v8185_v32 = vld [vmem:[#allocation2 + $0x6d0] sm:$0xf]  ;;  %v9556_v13 = vld [vmem:[#allocation2 + $0x6e8] sm:$0xf0] }
 0x1c4   :  { %v3061_v39 = vpop.f32.mrf.mxu3  ;;  %v3113_v44 = vpop.f32.mrf.mxu0 }
 0x1c5   :  { %v3062_v20 = vadd.f32 %v3061_v39, %v10811_v53  ;;  %v5142_v19 = vmax.f32 %v3013_v50, 0.0  ;;  %v10880_v14 = vpop.f32.mrf.mxu1  ;;  %v12564_v39 = vld [vmem:[#allocation56_spill] sm:$0xff]  ;;  %v9346_v50 = vld [vmem:[#allocation2 + $0x58] sm:$0xf0] }
 0x1c7   :  { %v10882_v1 = vadd.f32 %v3110_v6, %v3062_v20  ;;  %3210 = vmatmul.bf16.gmra.mxu2 %v12561_v42  ;;  %3308 = vmatmul.bf16.gmra.mxu0 %v12562_v40  ;;  %v10886_v55 = vpack.c.bf16 %v5142_v19, %v5135_v31  ;;  %v7345_v20 = vld [vmem:[#allocation2 + $0x40] sm:$0xf]  ;;  %v8186_v6 = vor.u32 %v9556_v13, %v8185_v32  ;;  %v7933_v40 = vld [vmem:[#allocation2 + $0x4d8] sm:$0xf] }
 0x1c8   :  { %8691 = vmatmul.msk.bf16.gmra.mxu1 %vm2667_vm0, %v10734_v61  ;;  %v7346_v56 = vor.u32 %v9346_v50, %v7345_v20  ;;  %v9549_v61 = vld [vmem:[#allocation2 + $0x6b0] sm:$0xf0]  ;;  %v7681_v20 = vld [vmem:[#allocation2 + $0x2e0] sm:$0xf]  ;;  %v9486_v50 = vld [vmem:[#allocation2 + $0x4b8] sm:$0xf0] }
 0x1c9   :  { %12563 = vst [vmem:[#allocation80_spill] sm:$0xff] %v10886_v55  ;;  %3259 = vmatmul.bf16.gmra.mxu3 %v12564_v39  ;;  %3525 = vmatpush.bf16.msra.mxu1 %v8186_v6  ;;  %v7710_v55 = vor.u32 %v9437_v10, %v7709_v35  ;;  %v9493_v39 = vld [vmem:[#allocation2 + $0x4f0] sm:$0xf0]  ;;  %v8158_v32 = vor.u32 %v9549_v61, %v8157_v34  ;;  %v9542_v6 = vld [vmem:[#allocation2 + $0x678] sm:$0xf0] }
 0x1ca   :  { %v3015_v51 = vpop.f32.mrf.mxu2  ;;  %3384 = vmatpush.bf16.msra.mxu2 %v7346_v56  ;;  %v7934_v33 = vor.u32 %v9493_v39, %v7933_v40  ;;  %v8130_v10 = vor.u32 %v9542_v6, %v8129_v38  ;;  %v7653_v34 = vld [vmem:[#allocation2 + $0x2a8] sm:$0xf]  ;;  %v9423_v61 = vld [vmem:[#allocation2 + $0x2c0] sm:$0xf0] }
 0x1cb   :  { %v3016_v31 = vadd.f32 %v3015_v51, %v10750_v60  ;;  %3428 = vmatpush.bf16.msra.mxu3 %v7710_v55  ;;  %v9430_v51 = vld [vmem:[#allocation2 + $0x2f8] sm:$0xf0]  ;;  %v7905_v60 = vld [vmem:[#allocation2 + $0x4a0] sm:$0xf]  ;;  %v7877_v55 = vld [vmem:[#allocation2 + $0x468] sm:$0xf]  ;;  %v7654_v40 = vor.u32 %v9423_v61, %v7653_v34 }
 0x1cc   :  { %v3064_v19 = vpop.f32.mrf.mxu3  ;;  %v3115_v12 = vpop.f32.mrf.mxu0  ;;  %3477 = vmatpush.bf16.msra.mxu0 %v7934_v33  ;;  %v7682_v56 = vor.u32 %v9430_v51, %v7681_v20  ;;  %v7906_v35 = vor.u32 %v9486_v50, %v7905_v60  ;;  %v9479_v39 = vld [vmem:[#allocation2 + $0x480] sm:$0xf0]  ;;  %v8101_v33 = vld [vmem:[#allocation2 + $0x628] sm:$0xf] }
 0x1cd   :  { %v3065_v54 = vadd.f32 %v3064_v19, %v10811_v53  ;;  %v10893_v30 = vpop.f32.mrf.mxu1  ;;  %3526 = vmatpush.bf16.msra.mxu1 %v8158_v32  ;;  %v9535_v32 = vld [vmem:[#allocation2 + $0x640] sm:$0xf0]  ;;  %v5149_v50 = vmax.f32 %v3016_v31, 0.0 }
 0x1ce   :  { %12565 = vst [vmem:[#allocation81_spill] sm:$0xff] %v10893_v30  ;;  %v7878_v30 = vor.u32 %v9479_v39, %v7877_v55  ;;  %v8102_v60 = vor.u32 %v9535_v32, %v8101_v33  ;;  %v12567_v34 = vld [vmem:[#allocation62_spill] sm:$0xff]  ;;  %v8073_v55 = vld [vmem:[#allocation2 + $0x5f0] sm:$0xf]  ;;  %v9528_v39 = vld [vmem:[#allocation2 + $0x608] sm:$0xf0] }
 0x1cf   :  { %v10895_v13 = vadd.f32 %v3113_v44, %v3065_v54  ;;  %3429 = vmatpush.bf16.msra.mxu3 %v7682_v56  ;;  %v8074_v33 = vor.u32 %v9528_v39, %v8073_v55 }
 0x1d0   :  { %3478 = vmatpush.bf16.msra.mxu0 %v7906_v35  ;;  %v9416_v35 = vld [vmem:[#allocation2 + $0x288] sm:$0xf0] }
 0x1d1   :  { %3527 = vmatpush.bf16.msra.mxu1 %v8130_v10  ;;  %v7849_v10 = vld [vmem:[#allocation2 + $0x430] sm:$0xf] }
 0x1d2   :  { %v3017_v19 = vpop.f32.mrf.mxu2 }
 0x1d3   :  { %v3018_v54 = vadd.f32 %v3017_v19, %v10760_v11  ;;  %3430 = vmatpush.bf16.msra.mxu3 %v7654_v40  ;;  %v7625_v11 = vld [vmem:[#allocation2 + $0x270] sm:$0xf]  ;;  %v12566_v19 = vld [vmem:[#allocation61_spill] sm:$0xff] }
 0x1d4   :  { %v3066_v44 = vpop.f32.mrf.mxu3  ;;  %v3118_v51 = vpop.f32.mrf.mxu0  ;;  %3479 = vmatpush.bf16.msra.mxu0 %v7878_v30  ;;  %v7626_v61 = vor.u32 %v9416_v35, %v7625_v11  ;;  %v9339_v30 = vld [vmem:[#allocation2 + $0x20] sm:$0xf0]  ;;  %v9409_v11 = vld [vmem:[#allocation2 + $0x250] sm:$0xf0]  ;;  %v7821_v35 = vld [vmem:[#allocation2 + $0x3f8] sm:$0xf] }
 0x1d5   :  { %v3067_v20 = vadd.f32 %v3066_v44, %v10811_v53  ;;  %v5156_v56 = vmax.f32 %v3018_v54, 0.0  ;;  %v10899_v38 = vpop.f32.mrf.mxu1  ;;  %3528 = vmatpush.bf16.msra.mxu1 %v8102_v60  ;;  %v9472_v44 = vld [vmem:[#allocation2 + $0x448] sm:$0xf0]  ;;  %v7597_v60 = vld [vmem:[#allocation2 + $0x238] sm:$0xf] }
 0x1d6   :  { %v12569_v54 = vld [vmem:[#allocation60_spill] sm:$0xff]  ;;  %v7850_v40 = vor.u32 %v9472_v44, %v7849_v10 }
 0x1d7   :  { %v10901_v6 = vadd.f32 %v3115_v12, %v3067_v20  ;;  %3215 = vmatmul.bf16.gmra.mxu2 %v12566_v19  ;;  %3313 = vmatmul.bf16.gmra.mxu0 %v12567_v34  ;;  %v10905_v31 = vpack.c.bf16 %v5156_v56, %v5149_v50  ;;  %v7317_v12 = vld [vmem:[#allocation2 + $0x8] sm:$0xf]  ;;  %v9465_v34 = vld [vmem:[#allocation2 + $0x410] sm:$0xf0] }
 0x1d8   :  { %8692 = vmatmul.msk.bf16.gmra.mxu1 %vm2667_vm0, %v10753_v37  ;;  %v7318_v32 = vor.u32 %v9339_v30, %v7317_v12  ;;  %3431 = vmatpush.bf16.msra.mxu3 %v7626_v61  ;;  %v9521_v37 = vld [vmem:[#allocation2 + $0x5d0] sm:$0xf0]  ;;  %v7822_v44 = vor.u32 %v9465_v34, %v7821_v35  ;;  %v7569_v12 = vld [vmem:[#allocation2 + $0x200] sm:$0xf]  ;;  %v9395_v34 = vld [vmem:[#allocation2 + $0x1e0] sm:$0xf0] }
 0x1d9   :  { %12568 = vst [vmem:[#allocation82_spill] sm:$0xff] %v10905_v31  ;;  %3264 = vmatmul.bf16.gmra.mxu3 %v12569_v54  ;;  %3480 = vmatpush.bf16.msra.mxu0 %v7850_v40  ;;  %v7598_v31 = vor.u32 %v9409_v11, %v7597_v60  ;;  %v8045_v54 = vld [vmem:[#allocation2 + $0x5b8] sm:$0xf]  ;;  %v7793_v30 = vld [vmem:[#allocation2 + $0x3c0] sm:$0xf] }
 0x1da   :  { %v3020_v20 = vpop.f32.mrf.mxu2  ;;  %3529 = vmatpush.bf16.msra.mxu1 %v8074_v33  ;;  %3385 = vmatpush.bf16.msra.mxu2 %v7318_v32  ;;  %v8046_v55 = vor.u32 %v9521_v37, %v8045_v54  ;;  %v9458_v33 = vld [vmem:[#allocation2 + $0x3d8] sm:$0xf0]  ;;  %v8017_v32 = vld [vmem:[#allocation2 + $0x580] sm:$0xf]  ;;  %v7541_v37 = vld [vmem:[#allocation2 + $0x1c8] sm:$0xf] }
 0x1db   :  { %v3021_v50 = vadd.f32 %v3020_v20, %v10769_v0  ;;  %v9402_v0 = vld [vmem:[#allocation2 + $0x218] sm:$0xf0]  ;;  %v7794_v60 = vor.u32 %v9458_v33, %v7793_v30  ;;  %v7542_v54 = vor.u32 %v9395_v34, %v7541_v37  ;;  %v9451_v35 = vld [vmem:[#allocation2 + $0x3a0] sm:$0xf0] }
 0x1dc   :  { %v3069_v56 = vpop.f32.mrf.mxu3  ;;  %v3120_v10 = vpop.f32.mrf.mxu0  ;;  %3432 = vmatpush.bf16.msra.mxu3 %v7598_v31  ;;  %v7570_v40 = vor.u32 %v9402_v0, %v7569_v12  ;;  %v9514_v20 = vld [vmem:[#allocation2 + $0x598] sm:$0xf0]  ;;  %v7765_v31 = vld [vmem:[#allocation2 + $0x388] sm:$0xf] }
 0x1dd   :  { %v3070_v19 = vadd.f32 %v3069_v56, %v10811_v53  ;;  %v10912_v61 = vpop.f32.mrf.mxu1  ;;  %3481 = vmatpush.bf16.msra.mxu0 %v7822_v44  ;;  %v8018_v11 = vor.u32 %v9514_v20, %v8017_v32  ;;  %v7989_v44 = vld [vmem:[#allocation2 + $0x548] sm:$0xf]  ;;  %v5163_v33 = vmax.f32 %v3021_v50, 0.0  ;;  %v8409_v50 = vld [vmem:[#allocation2 + $0x890] sm:$0xf] }
 0x1de   :  { %12570 = vst [vmem:[#allocation83_spill] sm:$0xff] %v10912_v61  ;;  %3530 = vmatpush.bf16.msra.mxu1 %v8046_v55  ;;  %v9507_v55 = vld [vmem:[#allocation2 + $0x560] sm:$0xf0]  ;;  %v7766_v61 = vor.u32 %v9451_v35, %v7765_v31 }
 0x1df   :  { %v10914_v39 = vadd.f32 %v3118_v51, %v3070_v19  ;;  %v7990_v30 = vor.u32 %v9507_v55, %v7989_v44 }
 0x1e0   :  { %3433 = vmatpush.bf16.msra.mxu3 %v7570_v40 }
 0x1e1   :  { %3482 = vmatpush.bf16.msra.mxu0 %v7794_v60  ;;  %v9612_v60 = vld [vmem:[#allocation2 + $0x8a8] sm:$0xf0] }
 0x1e2   :  { %v3022_v56 = vpop.f32.mrf.mxu2  ;;  %3531 = vmatpush.bf16.msra.mxu1 %v8018_v11  ;;  %v8410_v11 = vor.u32 %v9612_v60, %v8409_v50 }
 0x1e3   :  { %v3023_v51 = vadd.f32 %v3022_v56, %v10779_v46 }
 0x1e4   :  { %v3071_v19 = vpop.f32.mrf.mxu3  ;;  %v3123_v0 = vpop.f32.mrf.mxu0  ;;  %3434 = vmatpush.bf16.msra.mxu3 %v7542_v54  ;;  %3574 = vmatpush.bf16.msrb.mxu2 %v8410_v11 }
 0x1e5   :  { %v3072_v12 = vadd.f32 %v3071_v19, %v10811_v53  ;;  %v5170_v40 = vmax.f32 %v3023_v51, 0.0  ;;  %v10918_v32 = vpop.f32.mrf.mxu1  ;;  %3483 = vmatpush.bf16.msra.mxu0 %v7766_v61 }
 0x1e6   :  { %3532 = vmatpush.bf16.msra.mxu1 %v7990_v30 }
 0x1e7   :  { %v10920_v20 = vadd.f32 %v3120_v10, %v3072_v12  ;;  %3220 = vmatmul.bf16.gmra.mxu2 %v10584_v3  ;;  %3318 = vmatmul.bf16.gmra.mxu0 %v10586_v17  ;;  %v10924_v46 = vpack.c.bf16 %v5170_v40, %v5163_v33 }
 0x1e8   :  { %8693 = vmatmul.msk.bf16.gmra.mxu1 %vm2667_vm0, %v10772_v41 }
 0x1e9   :  { %12571 = vst [vmem:[#allocation84_spill] sm:$0xff] %v10924_v46  ;;  %3269 = vmatmul.bf16.gmra.mxu3 %v10582_v49 }
 0x1ea   :  { %v3025_v56 = vpop.f32.mrf.mxu2 }
 0x1eb   :  { %v3026_v10 = vadd.f32 %v3025_v56, %v10788_v5 }
 0x1ec   :  { %v3074_v37 = vpop.f32.mrf.mxu3  ;;  %v3125_v34 = vpop.f32.mrf.mxu0 }
 0x1ed   :  { %v3075_v61 = vadd.f32 %v3074_v37, %v10811_v53  ;;  %v10931_v31 = vpop.f32.mrf.mxu1  ;;  %v5177_v12 = vmax.f32 %v3026_v10, 0.0  ;;  %v8381_v10 = vld [vmem:[#allocation2 + $0x858] sm:$0xf]  ;;  %v9605_v37 = vld [vmem:[#allocation2 + $0x870] sm:$0xf0] }
 0x1ef   :  { %v10933_v51 = vadd.f32 %v3123_v0, %v3075_v61 }
 0x1f2   :  { %v3027_v19 = vpop.f32.mrf.mxu2 }
 0x1f3   :  { %v3028_v54 = vadd.f32 %v3027_v19, %v10798_v9 }
 0x1f4   :  { %v3076_v35 = vpop.f32.mrf.mxu3  ;;  %v3128_v55 = vpop.f32.mrf.mxu0 }
 0x1f5   :  { %v3077_v44 = vadd.f32 %v3076_v35, %v10811_v53  ;;  %v5184_v30 = vmax.f32 %v3028_v54, 0.0  ;;  %v10937_v33 = vpop.f32.mrf.mxu1 }
 0x1f7   :  { %v10939_v5 = vadd.f32 %v3125_v34, %v3077_v44  ;;  %3225 = vmatmul.bf16.gmra.mxu2 %v10632_v48  ;;  %3323 = vmatmul.bf16.gmra.mxu0 %v10634_v8  ;;  %v10943_v40 = vpack.c.bf16 %v5184_v30, %v5177_v12  ;;  %v8382_v34 = vor.u32 %v9605_v37, %v8381_v10  ;;  %v12574_v10 = vld [vmem:[#allocation25_spill] sm:$0xff] }
 0x1f8   :  { %8694 = vmatmul.msk.bf16.gmra.mxu1 %vm2667_vm0, %v10791_v28 }
 0x1f9   :  { %12572 = vst [vmem:[#allocation85_spill] sm:$0xff] %v10943_v40  ;;  %3274 = vmatmul.bf16.gmra.mxu3 %v10630_v2  ;;  %3575 = vmatpush.bf16.msrb.mxu2 %v8382_v34 }
 0x1fa   :  { %v3030_v9 = vpop.f32.mrf.mxu2 }
 0x1fb   :  { %v3031_v0 = vadd.f32 %v3030_v9, %v10801_v43 }
 0x1fc   :  { %v3079_v50 = vpop.f32.mrf.mxu3  ;;  %v3130_v11 = vpop.f32.mrf.mxu0 }
 0x1fd   :  { %v3080_v60 = vadd.f32 %v3079_v50, %v10811_v53  ;;  %v10950_v56 = vpop.f32.mrf.mxu1  ;;  %v5191_v43 = vmax.f32 %v3031_v0, 0.0 }
 0x1ff   :  { %v10952_v61 = vadd.f32 %v3128_v55, %v3080_v60  ;;  %v3143_v55 = vadd.f32 %v10804_v22, %v10819_v47  ;;  %v3145_v22 = vadd.f32 %v10817_v29, %v10825_v63  ;;  %v8325_v29 = vld [vmem:[#allocation2 + $0x7e8] sm:$0xf]  ;;  %v9591_v63 = vld [vmem:[#allocation2 + $0x800] sm:$0xf0] }
 0x202   :  { %v3032_v19 = vpop.f32.mrf.mxu2 }
 0x203   :  { %v3033_v54 = vadd.f32 %v3032_v19, %v10813_v7  ;;  %v9598_v7 = vld [vmem:[#allocation2 + $0x838] sm:$0xf0] }
 0x204   :  { %v3081_v35 = vpop.f32.mrf.mxu3  ;;  %v3289_v12 = vpop.f32.mrf.mxu0 }
 0x205   :  { %v3082_v44 = vadd.f32 %v3081_v35, %v10811_v53  ;;  %v5198_v30 = vmax.f32 %v3033_v54, 0.0  ;;  %v3338_v9 = vpop.f32.mrf.mxu1  ;;  %v8353_v53 = vld [vmem:[#allocation2 + $0x820] sm:$0xf] }
 0x206   :  { %v8354_v37 = vor.u32 %v9598_v7, %v8353_v53  ;;  %v3148_v53 = vadd.f32 %v10823_v62, %v10838_v58  ;;  %v12577_v7 = vld [vmem:[#allocation29_spill] sm:$0xff] }
 0x207   :  { %v10956_v50 = vadd.f32 %v3130_v11, %v3082_v44  ;;  %3386 = vmatmul.bf16.vlgmr.msra.gmra.mxu2 %v10196_v59  ;;  %3484 = vmatmul.bf16.vlgmr.msra.gmra.mxu0 %v10340_v23  ;;  %v10962_v60 = vpack.c.bf16 %v5198_v30, %v5191_v43 }
 0x208   :  { %3533 = vmatmul.bf16.vlgmr.msra.gmra.mxu1 %v10344_v25  ;;  %3576 = vmatpush.bf16.msrb.mxu2 %v8354_v37 }
 0x209   :  { %12573 = vst [vmem:[#allocation86_spill] sm:$0xff] %v10962_v60  ;;  %3435 = vmatmul.bf16.vlgmr.msra.gmra.mxu3 %v12574_v10  ;;  %v12575_v10 = vld [vmem:[#allocation27_spill] sm:$0xff] }
 0x20a   :  { %v3191_v0 = vpop.f32.mrf.mxu2 }
 0x20b   :  { %v3192_v34 = vadd.f32 %v3191_v0, %v3143_v55  ;;  %v12576_v55 = vld [vmem:[#allocation43_spill] sm:$0xff]  ;;  %v8326_v0 = vor.u32 %v9591_v63, %v8325_v29 }
 0x20c   :  { %v3240_v11 = vpop.f32.mrf.mxu3  ;;  %v3291_v19 = vpop.f32.mrf.mxu0  ;;  %v12580_v63 = vld [vmem:[#allocation47_spill] sm:$0xff] }
 0x20d   :  { %v3241_v54 = vadd.f32 %v3240_v11, %v3192_v34  ;;  %v3340_v35 = vpop.f32.mrf.mxu1  ;;  %3577 = vmatpush.bf16.msrb.mxu2 %v8326_v0  ;;  %v12581_v0 = vld [vmem:[#allocation33_spill] sm:$0xff] }
 0x20f   :  { %v3290_v44 = vadd.f32 %v3289_v12, %v3241_v54 }
 0x211   :  { %v3339_v40 = vadd.f32 %v3338_v9, %v3290_v44 }
 0x212   :  { %v3193_v47 = vpop.f32.mrf.mxu2 }
 0x213   :  { %v3194_v43 = vadd.f32 %v3193_v47, %v3145_v22  ;;  %v5094_v37 = vmax.f32 %v3339_v40, 0.0  ;;  %v3150_v47 = vadd.f32 %v10836_v52, %v10844_v16  ;;  %v8297_v52 = vld [vmem:[#allocation2 + $0x7b0] sm:$0xf]  ;;  %v9584_v16 = vld [vmem:[#allocation2 + $0x7c8] sm:$0xf0] }
 0x214   :  { %v3242_v30 = vpop.f32.mrf.mxu3  ;;  %v3294_v60 = vpop.f32.mrf.mxu0 }
 0x215   :  { %v3243_v46 = vadd.f32 %v3242_v30, %v3194_v43  ;;  %v3343_v23 = vpop.f32.mrf.mxu1 }
 0x217   :  { %v3292_v25 = vadd.f32 %v3291_v19, %v3243_v46  ;;  %3391 = vmatmul.bf16.gmra.mxu2 %v12575_v10  ;;  %3489 = vmatmul.bf16.gmra.mxu0 %v12576_v55 }
 0x218   :  { %3538 = vmatmul.bf16.gmra.mxu1 %v12550_v15 }
 0x219   :  { %3440 = vmatmul.bf16.gmra.mxu3 %v12577_v7  ;;  %v3341_v12 = vadd.f32 %v3340_v35, %v3292_v25 }
 0x21a   :  { %v3196_v9 = vpop.f32.mrf.mxu2 }
 0x21b   :  { %v5101_v34 = vmax.f32 %v3341_v12, 0.0  ;;  %v3197_v11 = vadd.f32 %v3196_v9, %v3148_v53  ;;  %v12579_v53 = vld [vmem:[#allocation31_spill] sm:$0xff]  ;;  %v3153_v9 = vadd.f32 %v10842_v4, %v10857_v45 }
 0x21c   :  { %v3245_v46 = vpop.f32.mrf.mxu3  ;;  %v3296_v19 = vpop.f32.mrf.mxu0 }
 0x21d   :  { %v10974_v54 = vpack.c.bf16 %v5101_v34, %v5094_v37  ;;  %v3246_v44 = vadd.f32 %v3245_v46, %v3197_v11  ;;  %v3345_v22 = vpop.f32.mrf.mxu1  ;;  %v8298_v37 = vor.u32 %v9584_v16, %v8297_v52  ;;  %v12583_v16 = vld [vmem:[#allocation35_spill] sm:$0xff] }
 0x21f   :  { %12578 = vst [vmem:[#allocation87_spill] sm:$0xff] %v10974_v54  ;;  %v3295_v62 = vadd.f32 %v3294_v60, %v3246_v44  ;;  %3578 = vmatpush.bf16.msrb.mxu2 %v8298_v37  ;;  %v12585_v37 = vld [vmem:[#allocation37_spill] sm:$0xff] }
 0x221   :  { %v3344_v58 = vadd.f32 %v3343_v23, %v3295_v62 }
 0x222   :  { %v3198_v25 = vpop.f32.mrf.mxu2 }
 0x223   :  { %v3199_v35 = vadd.f32 %v3198_v25, %v3150_v47  ;;  %v5108_v34 = vmax.f32 %v3344_v58, 0.0 }
 0x224   :  { %v3247_v43 = vpop.f32.mrf.mxu3  ;;  %v3299_v30 = vpop.f32.mrf.mxu0 }
 0x225   :  { %v3248_v29 = vadd.f32 %v3247_v43, %v3199_v35  ;;  %v3348_v40 = vpop.f32.mrf.mxu1  ;;  %v3155_v35 = vadd.f32 %v10855_v26, %v10863_v18  ;;  %v8269_v26 = vld [vmem:[#allocation2 + $0x778] sm:$0xf]  ;;  %v9577_v18 = vld [vmem:[#allocation2 + $0x790] sm:$0xf0] }
 0x227   :  { %v3297_v12 = vadd.f32 %v3296_v19, %v3248_v29  ;;  %3396 = vmatmul.bf16.gmra.mxu2 %v12579_v53  ;;  %3494 = vmatmul.bf16.gmra.mxu0 %v12580_v63 }
 0x228   :  { %3543 = vmatmul.bf16.gmra.mxu1 %v12553_v27 }
 0x229   :  { %3445 = vmatmul.bf16.gmra.mxu3 %v12581_v0  ;;  %v3346_v23 = vadd.f32 %v3345_v22, %v3297_v12 }
 0x22a   :  { %v3201_v60 = vpop.f32.mrf.mxu2 }
 0x22b   :  { %v3202_v11 = vadd.f32 %v3201_v60, %v3153_v9  ;;  %v5115_v19 = vmax.f32 %v3346_v23, 0.0  ;;  %v12584_v23 = vld [vmem:[#allocation51_spill] sm:$0xff]  ;;  %v3158_v60 = vadd.f32 %v10861_v36, %v10876_v21 }
 0x22c   :  { %v3250_v46 = vpop.f32.mrf.mxu3  ;;  %v3301_v44 = vpop.f32.mrf.mxu0 }
 0x22d   :  { %v3251_v62 = vadd.f32 %v3250_v46, %v3202_v11  ;;  %v3350_v47 = vpop.f32.mrf.mxu1  ;;  %v10984_v25 = vpack.c.bf16 %v5115_v19, %v5108_v34  ;;  %v8270_v34 = vor.u32 %v9577_v18, %v8269_v26  ;;  %v9668_v18 = vld [vmem:[#allocation2 + $0xa68] sm:$0xf0] }
 0x22f   :  { %12582 = vst [vmem:[#allocation88_spill] sm:$0xff] %v10984_v25  ;;  %v3300_v4 = vadd.f32 %v3299_v30, %v3251_v62  ;;  %3579 = vmatpush.bf16.msrb.mxu2 %v8270_v34  ;;  %v12587_v34 = vld [vmem:[#allocation24_spill] sm:$0xff] }
 0x231   :  { %v3349_v45 = vadd.f32 %v3348_v40, %v3300_v4 }
 0x232   :  { %v3203_v22 = vpop.f32.mrf.mxu2 }
 0x233   :  { %v3204_v43 = vadd.f32 %v3203_v22, %v3155_v35  ;;  %v5122_v11 = vmax.f32 %v3349_v45, 0.0 }
 0x234   :  { %v3252_v29 = vpop.f32.mrf.mxu3  ;;  %v3304_v12 = vpop.f32.mrf.mxu0 }
 0x235   :  { %v3253_v52 = vadd.f32 %v3252_v29, %v3204_v43  ;;  %v3353_v58 = vpop.f32.mrf.mxu1  ;;  %v3160_v43 = vadd.f32 %v10874_v24, %v10882_v1  ;;  %v12589_v24 = vld [vmem:[#allocation26_spill] sm:$0xff] }
 0x237   :  { %v3302_v9 = vadd.f32 %v3301_v44, %v3253_v52  ;;  %3401 = vmatmul.bf16.gmra.mxu2 %v12583_v16  ;;  %3499 = vmatmul.bf16.gmra.mxu0 %v12584_v23 }
 0x238   :  { %3548 = vmatmul.bf16.gmra.mxu1 %v12557_v57 }
 0x239   :  { %3450 = vmatmul.bf16.gmra.mxu3 %v12585_v37  ;;  %v3351_v30 = vadd.f32 %v3350_v47, %v3302_v9 }
 0x23a   :  { %v3206_v40 = vpop.f32.mrf.mxu2 }
 0x23b   :  { %v3207_v46 = vadd.f32 %v3206_v40, %v3158_v60  ;;  %v5129_v44 = vmax.f32 %v3351_v30, 0.0  ;;  %v8633_v60 = vld [vmem:[#allocation2 + $0xa50] sm:$0xf]  ;;  %v9385_v30 = vld [vmem:[#allocation2 + $0x194] sm:$0xf] }
 0x23c   :  { %v3255_v19 = vpop.f32.mrf.mxu3  ;;  %v3306_v62 = vpop.f32.mrf.mxu0 }
 0x23d   :  { %v3256_v4 = vadd.f32 %v3255_v19, %v3207_v46  ;;  %v3355_v35 = vpop.f32.mrf.mxu1  ;;  %v10994_v22 = vpack.c.bf16 %v5129_v44, %v5122_v11  ;;  %v12588_v46 = vld [vmem:[#allocation55_spill] sm:$0xff]  ;;  %v7515_v11 = vld [vmem:[#allocation2 + $0x1ac] sm:$0xf0]  ;;  %v8241_v44 = vld [vmem:[#allocation2 + $0x740] sm:$0xf] }
 0x23e   :  { %v7518_v1 = vor.u32 %v9385_v30, %v7515_v11  ;;  %v9654_v11 = vld [vmem:[#allocation2 + $0x9f8] sm:$0xf0] }
 0x23f   :  { %12586 = vst [vmem:[#allocation89_spill] sm:$0xff] %v10994_v22  ;;  %v3305_v36 = vadd.f32 %v3304_v12, %v3256_v4  ;;  %v3163_v12 = vadd.f32 %v10880_v14, %v10895_v13  ;;  %v9570_v4 = vld [vmem:[#allocation2 + $0x758] sm:$0xf0] }
 0x240   :  { %3721 = vmatpush.bf16.msrb.mxu1 %v7518_v1  ;;  %v9371_v1 = vld [vmem:[#allocation2 + $0x124] sm:$0xf] }
 0x241   :  { %v3354_v21 = vadd.f32 %v3353_v58, %v3305_v36  ;;  %v8634_v58 = vor.u32 %v9668_v18, %v8633_v60  ;;  %v7487_v60 = vld [vmem:[#allocation2 + $0x174] sm:$0xf0] }
 0x242   :  { %v3208_v47 = vpop.f32.mrf.mxu2 }
 0x243   :  { %v3209_v29 = vadd.f32 %v3208_v47, %v3160_v43  ;;  %3623 = vmatpush.bf16.msrb.mxu3 %v8634_v58  ;;  %v8605_v43 = vld [vmem:[#allocation2 + $0xa18] sm:$0xf]  ;;  %v9661_v47 = vld [vmem:[#allocation2 + $0xa30] sm:$0xf0]  ;;  %v8577_v58 = vld [vmem:[#allocation2 + $0x9e0] sm:$0xf] }
 0x244   :  { %v3257_v52 = vpop.f32.mrf.mxu3  ;;  %v3309_v9 = vpop.f32.mrf.mxu0  ;;  %v8606_v13 = vor.u32 %v9661_v47, %v8605_v43  ;;  %v12591_v43 = vld [vmem:[#allocation81_spill] sm:$0xff]  ;;  %v8549_v47 = vld [vmem:[#allocation2 + $0x9a8] sm:$0xf] }
 0x245   :  { %v3258_v26 = vadd.f32 %v3257_v52, %v3209_v29  ;;  %v3358_v45 = vpop.f32.mrf.mxu1  ;;  %v9378_v29 = vld [vmem:[#allocation2 + $0x15c] sm:$0xf]  ;;  %v5136_v52 = vmax.f32 %v3354_v21, 0.0  ;;  %v7459_v21 = vld [vmem:[#allocation2 + $0x13c] sm:$0xf0] }
 0x246   :  { %v7490_v25 = vor.u32 %v9378_v29, %v7487_v60  ;;  %v9647_v29 = vld [vmem:[#allocation2 + $0x9c0] sm:$0xf0] }
 0x247   :  { %v3307_v40 = vadd.f32 %v3306_v62, %v3258_v26  ;;  %3406 = vmatmul.bf16.gmra.mxu2 %v12587_v34  ;;  %3504 = vmatmul.bf16.gmra.mxu0 %v12588_v46  ;;  %v8242_v62 = vor.u32 %v9570_v4, %v8241_v44  ;;  %v8578_v4 = vor.u32 %v9654_v11, %v8577_v58  ;;  %v9640_v58 = vld [vmem:[#allocation2 + $0x988] sm:$0xf0]  ;;  %v9357_v11 = vld [vmem:[#allocation2 + $0xb4] sm:$0xf] }
 0x248   :  { %3553 = vmatmul.bf16.gmra.mxu1 %v12561_v42  ;;  %3624 = vmatpush.bf16.msrb.mxu3 %v8606_v13  ;;  %v7431_v13 = vld [vmem:[#allocation2 + $0x104] sm:$0xf0] }
 0x249   :  { %3455 = vmatmul.bf16.gmra.mxu3 %v12589_v24  ;;  %v3356_v19 = vadd.f32 %v3355_v35, %v3307_v40  ;;  %3580 = vmatpush.bf16.msrb.mxu2 %v8242_v62 }
 0x24a   :  { %v3211_v36 = vpop.f32.mrf.mxu2  ;;  %3722 = vmatpush.bf16.msrb.mxu1 %v7490_v25  ;;  %v8550_v25 = vor.u32 %v9647_v29, %v8549_v47  ;;  %v8213_v29 = vld [vmem:[#allocation2 + $0x708] sm:$0xf] }
 0x24b   :  { %v3212_v26 = vadd.f32 %v3211_v36, %v3163_v12  ;;  %v5143_v18 = vmax.f32 %v3356_v19, 0.0  ;;  %v7462_v12 = vor.u32 %v9371_v1, %v7459_v21  ;;  %v3165_v19 = vadd.f32 %v12591_v43, %v10901_v6  ;;  %v12592_v1 = vld [vmem:[#allocation28_spill] sm:$0xff]  ;;  %v12594_v43 = vld [vmem:[#allocation30_spill] sm:$0xff] }
 0x24c   :  { %v3260_v14 = vpop.f32.mrf.mxu3  ;;  %v3311_v22 = vpop.f32.mrf.mxu0  ;;  %3625 = vmatpush.bf16.msrb.mxu3 %v8578_v4  ;;  %v3168_v4 = vadd.f32 %v10899_v38, %v10914_v39 }
 0x24d   :  { %v3261_v30 = vadd.f32 %v3260_v14, %v3212_v26  ;;  %v3360_v35 = vpop.f32.mrf.mxu1  ;;  %v11004_v40 = vpack.c.bf16 %v5143_v18, %v5136_v52  ;;  %v9364_v26 = vld [vmem:[#allocation2 + $0xec] sm:$0xf] }
 0x24e   :  { %3723 = vmatpush.bf16.msrb.mxu1 %v7462_v12  ;;  %v7434_v18 = vor.u32 %v9364_v26, %v7431_v13  ;;  %v7403_v12 = vld [vmem:[#allocation2 + $0xcc] sm:$0xf0]  ;;  %v9563_v26 = vld [vmem:[#allocation2 + $0x720] sm:$0xf0]  ;;  %v9350_v13 = vld [vmem:[#allocation2 + $0x7c] sm:$0xf] }
 0x24f   :  { %12590 = vst [vmem:[#allocation90_spill] sm:$0xff] %v11004_v40  ;;  %v3310_v44 = vadd.f32 %v3309_v9, %v3261_v30 }
 0x250   :  { %3626 = vmatpush.bf16.msrb.mxu3 %v8550_v25  ;;  %v9633_v25 = vld [vmem:[#allocation2 + $0x950] sm:$0xf0] }
 0x251   :  { %v3359_v36 = vadd.f32 %v3358_v45, %v3310_v44  ;;  %v8521_v45 = vld [vmem:[#allocation2 + $0x970] sm:$0xf]  ;;  %v12593_v44 = vld [vmem:[#allocation59_spill] sm:$0xff] }
 0x252   :  { %v3213_v62 = vpop.f32.mrf.mxu2  ;;  %3724 = vmatpush.bf16.msrb.mxu1 %v7434_v18  ;;  %v8522_v21 = vor.u32 %v9640_v58, %v8521_v45  ;;  %v7375_v45 = vld [vmem:[#allocation2 + $0x94] sm:$0xf0] }
 0x253   :  { %v3214_v52 = vadd.f32 %v3213_v62, %v3165_v19  ;;  %v12595_v19 = vld [vmem:[#allocation61_spill] sm:$0xff]  ;;  %v7406_v62 = vor.u32 %v9357_v11, %v7403_v12  ;;  %v5150_v18 = vmax.f32 %v3359_v36, 0.0  ;;  %v7378_v54 = vor.u32 %v9350_v13, %v7375_v45  ;;  %v7347_v36 = vld [vmem:[#allocation2 + $0x5c] sm:$0xf0]  ;;  %v9619_v13 = vld [vmem:[#allocation2 + $0x8e0] sm:$0xf0] }
 0x254   :  { %v3262_v14 = vpop.f32.mrf.mxu3  ;;  %v3314_v60 = vpop.f32.mrf.mxu0  ;;  %3627 = vmatpush.bf16.msrb.mxu3 %v8522_v21  ;;  %v8465_v21 = vld [vmem:[#allocation2 + $0x900] sm:$0xf]  ;;  %v9626_v12 = vld [vmem:[#allocation2 + $0x918] sm:$0xf0]  ;;  %v9336_v45 = vld [vmem:[#allocation2 + $0xc] sm:$0xf] }
 0x255   :  { %v3263_v9 = vadd.f32 %v3262_v14, %v3214_v52  ;;  %v3363_v30 = vpop.f32.mrf.mxu1  ;;  %v8493_v14 = vld [vmem:[#allocation2 + $0x938] sm:$0xf] }
 0x256   :  { %3725 = vmatpush.bf16.msrb.mxu1 %v7406_v62  ;;  %v8494_v39 = vor.u32 %v9633_v25, %v8493_v14  ;;  %v9343_v62 = vld [vmem:[#allocation2 + $0x44] sm:$0xf]  ;;  %v8437_v25 = vld [vmem:[#allocation2 + $0x8c8] sm:$0xf] }
 0x257   :  { %v3312_v6 = vadd.f32 %v3311_v22, %v3263_v9  ;;  %3411 = vmatmul.bf16.gmra.mxu2 %v12592_v1  ;;  %3509 = vmatmul.bf16.gmra.mxu0 %v12593_v44  ;;  %v8214_v22 = vor.u32 %v9563_v26, %v8213_v29  ;;  %v8466_v26 = vor.u32 %v9626_v12, %v8465_v21  ;;  %v12597_v14 = vld [vmem:[#allocation83_spill] sm:$0xff] }
 0x258   :  { %3558 = vmatmul.bf16.gmra.mxu1 %v12595_v19  ;;  %3628 = vmatpush.bf16.msrb.mxu3 %v8494_v39  ;;  %v9675_v39 = vld [vmem:[#allocation2 + $0xaa0] sm:$0xf0] }
 0x259   :  { %3460 = vmatmul.bf16.gmra.mxu3 %v12594_v43  ;;  %v3361_v47 = vadd.f32 %v3360_v35, %v3312_v6  ;;  %3581 = vmatpush.bf16.msrb.mxu2 %v8214_v22 }
 0x25a   :  { %v3216_v52 = vpop.f32.mrf.mxu2  ;;  %3726 = vmatpush.bf16.msrb.mxu1 %v7378_v54  ;;  %v8438_v54 = vor.u32 %v9619_v13, %v8437_v25 }
 0x25b   :  { %v3217_v9 = vadd.f32 %v3216_v52, %v3168_v4  ;;  %v5157_v58 = vmax.f32 %v3361_v47, 0.0  ;;  %v7350_v4 = vor.u32 %v9343_v62, %v7347_v36  ;;  %v3170_v47 = vadd.f32 %v12597_v14, %v10920_v20  ;;  %v12598_v62 = vld [vmem:[#allocation32_spill] sm:$0xff]  ;;  %v12600_v36 = vld [vmem:[#allocation34_spill] sm:$0xff] }
 0x25c   :  { %v3265_v38 = vpop.f32.mrf.mxu3  ;;  %v3316_v40 = vpop.f32.mrf.mxu0  ;;  %3629 = vmatpush.bf16.msrb.mxu3 %v8466_v26  ;;  %v3173_v26 = vadd.f32 %v10918_v32, %v10933_v51  ;;  %v9441_v14 = vld [vmem:[#allocation2 + $0x354] sm:$0xf] }
 0x25d   :  { %v3266_v11 = vadd.f32 %v3265_v38, %v3217_v9  ;;  %v3365_v35 = vpop.f32.mrf.mxu1  ;;  %v11014_v6 = vpack.c.bf16 %v5157_v58, %v5150_v18  ;;  %v8661_v9 = vld [vmem:[#allocation2 + $0xa88] sm:$0xf] }
 0x25e   :  { %3727 = vmatpush.bf16.msrb.mxu1 %v7350_v4 }
 0x25f   :  { %12596 = vst [vmem:[#allocation81_spill] sm:$0xff] %v11014_v6  ;;  %v3315_v29 = vadd.f32 %v3314_v60, %v3266_v11  ;;  %v8662_v60 = vor.u32 %v9675_v39, %v8661_v9  ;;  %v7319_v11 = vld [vmem:[#allocation2 + $0x24] sm:$0xf0] }
 0x260   :  { %3630 = vmatpush.bf16.msrb.mxu3 %v8438_v54 }
 0x261   :  { %v3364_v52 = vadd.f32 %v3363_v30, %v3315_v29  ;;  %v7322_v30 = vor.u32 %v9336_v45, %v7319_v11  ;;  %3679 = vmatpush.bf16.msrb.mxu0 %v8662_v60  ;;  %v12599_v29 = vld [vmem:[#allocation63_spill] sm:$0xff] }
 0x262   :  { %v3218_v22 = vpop.f32.mrf.mxu2 }
 0x263   :  { %v3219_v18 = vadd.f32 %v3218_v22, %v3170_v47  ;;  %3728 = vmatpush.bf16.msrb.mxu1 %v7322_v30  ;;  %v7739_v47 = vld [vmem:[#allocation2 + $0x36c] sm:$0xf0]  ;;  %v5164_v13 = vmax.f32 %v3364_v52, 0.0 }
 0x264   :  { %v3267_v38 = vpop.f32.mrf.mxu3  ;;  %v3319_v58 = vpop.f32.mrf.mxu0  ;;  %v7742_v25 = vor.u32 %v9441_v14, %v7739_v47  ;;  %v12602_v14 = vld [vmem:[#allocation36_spill] sm:$0xff]  ;;  %v3178_v47 = vadd.f32 %v10937_v33, %v10952_v61 }
 0x265   :  { %v3268_v21 = vadd.f32 %v3267_v38, %v3219_v18  ;;  %v3368_v12 = vpop.f32.mrf.mxu1 }
 0x266   :  { %3770 = vmatpush.bf16.msra.mxu2 %v7742_v25 }
 0x267   :  { %v3317_v20 = vadd.f32 %v3316_v40, %v3268_v21  ;;  %3416 = vmatmul.bf16.gmra.mxu2 %v12598_v62  ;;  %3514 = vmatmul.bf16.gmra.mxu0 %v12599_v29  ;;  %v8383_v29 = vld [vmem:[#allocation2 + $0x874] sm:$0xf0] }
 0x268   :  { %3563 = vmatmul.bf16.gmra.mxu1 %v10584_v3 }
 0x269   :  { %3465 = vmatmul.bf16.gmra.mxu3 %v12600_v36  ;;  %v3366_v4 = vadd.f32 %v3365_v35, %v3317_v20  ;;  %v3175_v35 = vadd.f32 %v10931_v31, %v10939_v5  ;;  %v7711_v31 = vld [vmem:[#allocation2 + $0x334] sm:$0xf0] }
 0x26a   :  { %v3221_v22 = vpop.f32.mrf.mxu2  ;;  %v8271_v36 = vld [vmem:[#allocation2 + $0x794] sm:$0xf0] }
 0x26b   :  { %v3222_v9 = vadd.f32 %v3221_v22, %v3173_v26  ;;  %v5171_v18 = vmax.f32 %v3366_v4, 0.0  ;;  %v12603_v4 = vld [vmem:[#allocation67_spill] sm:$0xff]  ;;  %v12604_v22 = vld [vmem:[#allocation38_spill] sm:$0xff] }
 0x26c   :  { %v3270_v40 = vpop.f32.mrf.mxu3  ;;  %v3321_v38 = vpop.f32.mrf.mxu0 }
 0x26d   :  { %v3271_v54 = vadd.f32 %v3270_v40, %v3222_v9  ;;  %v3370_v39 = vpop.f32.mrf.mxu1  ;;  %v11024_v45 = vpack.c.bf16 %v5171_v18, %v5164_v13 }
 0x26f   :  { %12601 = vst [vmem:[#allocation83_spill] sm:$0xff] %v11024_v45  ;;  %v3320_v32 = vadd.f32 %v3319_v58, %v3271_v54  ;;  %v9434_v58 = vld [vmem:[#allocation2 + $0x31c] sm:$0xf] }
 0x271   :  { %v3369_v51 = vadd.f32 %v3368_v12, %v3320_v32  ;;  %v7714_v12 = vor.u32 %v9434_v58, %v7711_v31  ;;  %v12606_v58 = vld [vmem:[#allocation40_spill] sm:$0xff]  ;;  %v12607_v31 = vld [vmem:[#allocation71_spill] sm:$0xff] }
 0x272   :  { %v3223_v60 = vpop.f32.mrf.mxu2 }
 0x273   :  { %v3224_v11 = vadd.f32 %v3223_v60, %v3175_v35  ;;  %v5178_v13 = vmax.f32 %v3369_v51, 0.0  ;;  %3771 = vmatpush.bf16.msra.mxu2 %v7714_v12  ;;  %v3180_v60 = vadd.f32 %v10950_v56, %v10956_v50  ;;  %v9427_v56 = vld [vmem:[#allocation2 + $0x2e4] sm:$0xf]  ;;  %v7683_v50 = vld [vmem:[#allocation2 + $0x2fc] sm:$0xf0] }
 0x274   :  { %v3272_v21 = vpop.f32.mrf.mxu3  ;;  %v3324_v30 = vpop.f32.mrf.mxu0 }
 0x275   :  { %v3273_v20 = vadd.f32 %v3272_v21, %v3224_v11  ;;  %v3373_v52 = vpop.f32.mrf.mxu1 }
 0x277   :  { %v3322_v26 = vadd.f32 %v3321_v38, %v3273_v20  ;;  %3421 = vmatmul.bf16.gmra.mxu2 %v12602_v14  ;;  %3519 = vmatmul.bf16.gmra.mxu0 %v12603_v4 }
 0x278   :  { %3568 = vmatmul.bf16.gmra.mxu1 %v10632_v48 }
 0x279   :  { %3470 = vmatmul.bf16.gmra.mxu3 %v12604_v22  ;;  %v3371_v5 = vadd.f32 %v3370_v39, %v3322_v26  ;;  %v9602_v22 = vld [vmem:[#allocation2 + $0x85c] sm:$0xf] }
 0x27a   :  { %v3226_v25 = vpop.f32.mrf.mxu2 }
 0x27b   :  { %v3227_v9 = vadd.f32 %v3226_v25, %v3178_v47  ;;  %v5185_v18 = vmax.f32 %v3371_v5, 0.0  ;;  %v9848_v5 = vld [vmem:[#allocation5] sm:$0xff]  ;;  %v7686_v25 = vor.u32 %v9427_v56, %v7683_v50 }
 0x27c   :  { %v3275_v40 = vpop.f32.mrf.mxu3  ;;  %v3326_v38 = vpop.f32.mrf.mxu0  ;;  %v11041_v12 = vperm.slane %v9848_v5, 2 }
 0x27d   :  { %v3276_v54 = vadd.f32 %v3275_v40, %v3227_v9  ;;  %v3375_v32 = vpop.f32.mrf.mxu1  ;;  %v11034_v35 = vpack.c.bf16 %v5185_v18, %v5178_v13  ;;  %3772 = vmatpush.bf16.msra.mxu2 %v7686_v25  ;;  %v12611_v25 = vld [vmem:[#allocation72_spill] sm:$0xff] }
 0x27f   :  { %12605 = vst [vmem:[#allocation32_spill] sm:$0xff] %v11034_v35  ;;  %v3325_v33 = vadd.f32 %v3324_v30, %v3276_v54  ;;  %v12608_v30 = vld [vmem:[#allocation42_spill] sm:$0xff] }
 0x281   :  { %v3374_v61 = vadd.f32 %v3373_v52, %v3325_v33 }
 0x282   :  { %v3228_v11 = vpop.f32.mrf.mxu2 }
 0x283   :  { %v3229_v21 = vadd.f32 %v3228_v11, %v3180_v60  ;;  %v5192_v9 = vmax.f32 %v3374_v61, 0.0 }
 0x284   :  { %v3277_v39 = vpop.f32.mrf.mxu3  ;;  %v3485_v20 = vpop.f32.mrf.mxu0 }
 0x285   :  { %v3278_v26 = vadd.f32 %v3277_v39, %v3229_v21  ;;  %v3534_v51 = vpop.f32.mrf.mxu1 }
 0x287   :  { %v3327_v47 = vadd.f32 %v3326_v38, %v3278_v26  ;;  %3582 = vmatmul.bf16.vlgmr.msrb.gmra.mxu2 %v12606_v58  ;;  %8695 = vmatmul.msk.bf16.vlgmr.msrb.gmra.mxu0 %vm2667_vm0, %v12607_v31 }
 0x288   :  { %3729 = vmatmul.bf16.vlgmr.msrb.gmra.mxu1 %v10196_v59 }
 0x289   :  { %3631 = vmatmul.bf16.vlgmr.msrb.gmra.mxu3 %v12608_v30  ;;  %v3376_v52 = vadd.f32 %v3375_v32, %v3327_v47 }
 0x28a   :  { %v3387_v13 = vpop.f32.mrf.mxu2 }
 0x28b   :  { %v3388_v40 = vadd.f32 %v3387_v13, %v11041_v12  ;;  %v5199_v38 = vmax.f32 %v3376_v52, 0.0  ;;  %v12610_v13 = vld [vmem:[#allocation44_spill] sm:$0xff]  ;;  %v12612_v52 = vld [vmem:[#allocation46_spill] sm:$0xff] }
 0x28c   :  { %v3436_v18 = vpop.f32.mrf.mxu3  ;;  %v3487_v54 = vpop.f32.mrf.mxu0 }
 0x28d   :  { %v3437_v33 = vadd.f32 %v3436_v18, %v3388_v40  ;;  %v3536_v60 = vpop.f32.mrf.mxu1  ;;  %v11046_v11 = vpack.c.bf16 %v5199_v38, %v5192_v9 }
 0x28f   :  { %12609 = vst [vmem:[#allocation36_spill] sm:$0xff] %v11046_v11  ;;  %v3486_v21 = vadd.f32 %v3485_v20, %v3437_v33  ;;  %v9420_v20 = vld [vmem:[#allocation2 + $0x2ac] sm:$0xf] }
 0x291   :  { %v11048_v39 = vadd.f32 %v3534_v51, %v3486_v21  ;;  %v7655_v51 = vld [vmem:[#allocation2 + $0x2c4] sm:$0xf0] }
 0x292   :  { %v3389_v26 = vpop.f32.mrf.mxu2  ;;  %v7658_v9 = vor.u32 %v9420_v20, %v7655_v51  ;;  %v12614_v51 = vld [vmem:[#allocation73_spill] sm:$0xff] }
 0x293   :  { %v3390_v5 = vadd.f32 %v3389_v26, %v11041_v12 }
 0x294   :  { %v3438_v32 = vpop.f32.mrf.mxu3  ;;  %v3490_v47 = vpop.f32.mrf.mxu0  ;;  %3773 = vmatpush.bf16.msra.mxu2 %v7658_v9  ;;  %v12615_v9 = vld [vmem:[#allocation50_spill] sm:$0xff] }
 0x295   :  { %v3439_v56 = vadd.f32 %v3438_v32, %v3390_v5  ;;  %v3539_v61 = vpop.f32.mrf.mxu1 }
 0x297   :  { %v3488_v50 = vadd.f32 %v3487_v54, %v3439_v56  ;;  %3587 = vmatmul.bf16.gmra.mxu2 %v12610_v13  ;;  %8696 = vmatmul.msk.bf16.gmra.mxu0 %vm2667_vm0, %v12611_v25 }
 0x298   :  { %3734 = vmatmul.bf16.gmra.mxu1 %v12575_v10 }
 0x299   :  { %3636 = vmatmul.bf16.gmra.mxu3 %v12612_v52  ;;  %v11056_v40 = vadd.f32 %v3536_v60, %v3488_v50  ;;  %v12613_v50 = vld [vmem:[#allocation48_spill] sm:$0xff] }
 0x29a   :  { %v3392_v18 = vpop.f32.mrf.mxu2 }
 0x29b   :  { %v3393_v38 = vadd.f32 %v3392_v18, %v11041_v12 }
 0x29c   :  { %v3441_v33 = vpop.f32.mrf.mxu3  ;;  %v3492_v54 = vpop.f32.mrf.mxu0 }
 0x29d   :  { %v3442_v21 = vadd.f32 %v3441_v33, %v3393_v38  ;;  %v3541_v26 = vpop.f32.mrf.mxu1 }
 0x29f   :  { %v3491_v5 = vadd.f32 %v3490_v47, %v3442_v21  ;;  %v9413_v47 = vld [vmem:[#allocation2 + $0x274] sm:$0xf] }
 0x2a1   :  { %v11059_v32 = vadd.f32 %v3539_v61, %v3491_v5  ;;  %v7627_v61 = vld [vmem:[#allocation2 + $0x28c] sm:$0xf0] }
 0x2a2   :  { %v3394_v56 = vpop.f32.mrf.mxu2  ;;  %v7630_v18 = vor.u32 %v9413_v47, %v7627_v61  ;;  %v12617_v61 = vld [vmem:[#allocation74_spill] sm:$0xff] }
 0x2a3   :  { %v3395_v11 = vadd.f32 %v3394_v56, %v11041_v12 }
 0x2a4   :  { %v3443_v35 = vpop.f32.mrf.mxu3  ;;  %v3495_v45 = vpop.f32.mrf.mxu0  ;;  %3774 = vmatpush.bf16.msra.mxu2 %v7630_v18  ;;  %v12618_v18 = vld [vmem:[#allocation54_spill] sm:$0xff] }
 0x2a5   :  { %v3444_v6 = vadd.f32 %v3443_v35, %v3395_v11  ;;  %v3544_v20 = vpop.f32.mrf.mxu1 }
 0x2a7   :  { %v3493_v60 = vadd.f32 %v3492_v54, %v3444_v6  ;;  %3592 = vmatmul.bf16.gmra.mxu2 %v12613_v50  ;;  %8697 = vmatmul.msk.bf16.gmra.mxu0 %vm2667_vm0, %v12614_v51 }
 0x2a8   :  { %3739 = vmatmul.bf16.gmra.mxu1 %v12579_v53 }
 0x2a9   :  { %3641 = vmatmul.bf16.gmra.mxu3 %v12615_v9  ;;  %v11067_v38 = vadd.f32 %v3541_v26, %v3493_v60  ;;  %v12616_v60 = vld [vmem:[#allocation52_spill] sm:$0xff] }
 0x2aa   :  { %v3397_v33 = vpop.f32.mrf.mxu2 }
 0x2ab   :  { %v3398_v21 = vadd.f32 %v3397_v33, %v11041_v12 }
 0x2ac   :  { %v3446_v35 = vpop.f32.mrf.mxu3  ;;  %v3497_v6 = vpop.f32.mrf.mxu0 }
 0x2ad   :  { %v3447_v11 = vadd.f32 %v3446_v35, %v3398_v21  ;;  %v3546_v54 = vpop.f32.mrf.mxu1 }
 0x2af   :  { %v3496_v5 = vadd.f32 %v3495_v45, %v3447_v11  ;;  %v9406_v45 = vld [vmem:[#allocation2 + $0x23c] sm:$0xf] }
 0x2b1   :  { %v11070_v56 = vadd.f32 %v3544_v20, %v3496_v5  ;;  %v7599_v20 = vld [vmem:[#allocation2 + $0x254] sm:$0xf0] }
 0x2b2   :  { %v3399_v51 = vpop.f32.mrf.mxu2  ;;  %v7602_v33 = vor.u32 %v9406_v45, %v7599_v20  ;;  %v9553_v20 = vld [vmem:[#allocation2 + $0x6d4] sm:$0xf] }
 0x2b3   :  { %v3400_v9 = vadd.f32 %v3399_v51, %v11041_v12 }
 0x2b4   :  { %v3448_v53 = vpop.f32.mrf.mxu3  ;;  %v3500_v25 = vpop.f32.mrf.mxu0  ;;  %3775 = vmatpush.bf16.msra.mxu2 %v7602_v33  ;;  %v12620_v33 = vld [vmem:[#allocation75_spill] sm:$0xff] }
 0x2b5   :  { %v3449_v10 = vadd.f32 %v3448_v53, %v3400_v9  ;;  %v3549_v47 = vpop.f32.mrf.mxu1 }
 0x2b7   :  { %v3498_v26 = vadd.f32 %v3497_v6, %v3449_v10  ;;  %3597 = vmatmul.bf16.gmra.mxu2 %v12616_v60  ;;  %8698 = vmatmul.msk.bf16.gmra.mxu0 %vm2667_vm0, %v12617_v61 }
 0x2b8   :  { %3744 = vmatmul.bf16.gmra.mxu1 %v12583_v16 }
 0x2b9   :  { %3646 = vmatmul.bf16.gmra.mxu3 %v12618_v18  ;;  %v11078_v21 = vadd.f32 %v3546_v54, %v3498_v26  ;;  %v9497_v54 = vld [vmem:[#allocation2 + $0x514] sm:$0xf]  ;;  %v7963_v26 = vld [vmem:[#allocation2 + $0x52c] sm:$0xf0] }
 0x2ba   :  { %v3402_v51 = vpop.f32.mrf.mxu2 }
 0x2bb   :  { %v3403_v35 = vadd.f32 %v3402_v51, %v11041_v12  ;;  %v12619_v51 = vld [vmem:[#allocation56_spill] sm:$0xff] }
 0x2bc   :  { %v3451_v53 = vpop.f32.mrf.mxu3  ;;  %v3502_v10 = vpop.f32.mrf.mxu0 }
 0x2bd   :  { %v3452_v9 = vadd.f32 %v3451_v53, %v3403_v35  ;;  %v3551_v6 = vpop.f32.mrf.mxu1  ;;  %v7966_v35 = vor.u32 %v9497_v54, %v7963_v26  ;;  %v8411_v53 = vld [vmem:[#allocation2 + $0x8ac] sm:$0xf0]  ;;  %v7935_v54 = vld [vmem:[#allocation2 + $0x4f4] sm:$0xf0]  ;;  %v9546_v26 = vld [vmem:[#allocation2 + $0x69c] sm:$0xf] }
 0x2bf   :  { %v3501_v11 = vadd.f32 %v3500_v25, %v3452_v9  ;;  %v8187_v25 = vld [vmem:[#allocation2 + $0x6ec] sm:$0xf0]  ;;  %v12621_v9 = vld [vmem:[#allocation58_spill] sm:$0xff]  ;;  %3819 = vmatpush.bf16.msra.mxu3 %v7966_v35 }
 0x2c1   :  { %v11081_v5 = vadd.f32 %v3549_v47, %v3501_v11  ;;  %v9609_v47 = vld [vmem:[#allocation2 + $0x894] sm:$0xf] }
 0x2c2   :  { %v3404_v61 = vpop.f32.mrf.mxu2  ;;  %v8414_v11 = vor.u32 %v9609_v47, %v8411_v53  ;;  %v8386_v47 = vor.u32 %v9602_v22, %v8383_v29  ;;  %v7907_v53 = vld [vmem:[#allocation2 + $0x4bc] sm:$0xf0]  ;;  %v7879_v29 = vld [vmem:[#allocation2 + $0x484] sm:$0xf0] }
 0x2c3   :  { %v3405_v18 = vadd.f32 %v3404_v61, %v11041_v12  ;;  %v9399_v61 = vld [vmem:[#allocation2 + $0x204] sm:$0xf] }
 0x2c4   :  { %v3453_v16 = vpop.f32.mrf.mxu3  ;;  %v3505_v52 = vpop.f32.mrf.mxu0  ;;  %3917 = vmatpush.bf16.msra.mxu1 %v8414_v11  ;;  %v8131_v11 = vld [vmem:[#allocation2 + $0x67c] sm:$0xf0] }
 0x2c5   :  { %v3454_v31 = vadd.f32 %v3453_v16, %v3405_v18  ;;  %v3554_v45 = vpop.f32.mrf.mxu1  ;;  %v7571_v16 = vld [vmem:[#allocation2 + $0x21c] sm:$0xf0]  ;;  %v8190_v18 = vor.u32 %v9553_v20, %v8187_v25 }
 0x2c6   :  { %v7574_v30 = vor.u32 %v9399_v61, %v7571_v16  ;;  %v9539_v61 = vld [vmem:[#allocation2 + $0x664] sm:$0xf] }
 0x2c7   :  { %v3503_v59 = vadd.f32 %v3502_v10, %v3454_v31  ;;  %3602 = vmatmul.bf16.gmra.mxu2 %v12619_v51  ;;  %8699 = vmatmul.msk.bf16.gmra.mxu0 %vm2667_vm0, %v12620_v33  ;;  %v9490_v33 = vld [vmem:[#allocation2 + $0x4dc] sm:$0xf] }
 0x2c8   :  { %3749 = vmatmul.bf16.gmra.mxu1 %v12587_v34  ;;  %3868 = vmatpush.bf16.msra.mxu0 %v8190_v18  ;;  %v8159_v34 = vld [vmem:[#allocation2 + $0x6b4] sm:$0xf0] }
 0x2c9   :  { %3651 = vmatmul.bf16.gmra.mxu3 %v12621_v9  ;;  %v11089_v31 = vadd.f32 %v3551_v6, %v3503_v59  ;;  %3776 = vmatpush.bf16.msra.mxu2 %v7574_v30  ;;  %v7938_v9 = vor.u32 %v9490_v33, %v7935_v54  ;;  %v8162_v25 = vor.u32 %v9546_v26, %v8159_v34  ;;  %v9483_v6 = vld [vmem:[#allocation2 + $0x4a4] sm:$0xf]  ;;  %v8355_v30 = vld [vmem:[#allocation2 + $0x83c] sm:$0xf0] }
 0x2ca   :  { %v3407_v10 = vpop.f32.mrf.mxu2  ;;  %3918 = vmatpush.bf16.msra.mxu1 %v8386_v47  ;;  %v7910_v18 = vor.u32 %v9483_v6, %v7907_v53  ;;  %v8134_v33 = vor.u32 %v9539_v61, %v8131_v11  ;;  %v8327_v47 = vld [vmem:[#allocation2 + $0x804] sm:$0xf0]  ;;  %v9525_v11 = vld [vmem:[#allocation2 + $0x5f4] sm:$0xf] }
 0x2cb   :  { %v3408_v4 = vadd.f32 %v3407_v10, %v11041_v12  ;;  %3820 = vmatpush.bf16.msra.mxu3 %v7938_v9  ;;  %v9595_v10 = vld [vmem:[#allocation2 + $0x824] sm:$0xf] }
 0x2cc   :  { %v3456_v48 = vpop.f32.mrf.mxu3  ;;  %v3507_v20 = vpop.f32.mrf.mxu0  ;;  %3869 = vmatpush.bf16.msra.mxu0 %v8162_v25  ;;  %v8358_v54 = vor.u32 %v9595_v10, %v8355_v30  ;;  %v9588_v25 = vld [vmem:[#allocation2 + $0x7ec] sm:$0xf] }
 0x2cd   :  { %v3457_v35 = vadd.f32 %v3456_v48, %v3408_v4  ;;  %v3556_v59 = vpop.f32.mrf.mxu1  ;;  %v9476_v48 = vld [vmem:[#allocation2 + $0x46c] sm:$0xf]  ;;  %v8330_v53 = vor.u32 %v9588_v25, %v8327_v47 }
 0x2ce   :  { %3919 = vmatpush.bf16.msra.mxu1 %v8358_v54  ;;  %v9532_v4 = vld [vmem:[#allocation2 + $0x62c] sm:$0xf]  ;;  %v7882_v26 = vor.u32 %v9476_v48, %v7879_v29  ;;  %v9581_v48 = vld [vmem:[#allocation2 + $0x7b4] sm:$0xf]  ;;  %v8299_v29 = vld [vmem:[#allocation2 + $0x7cc] sm:$0xf0] }
 0x2cf   :  { %v3506_v16 = vadd.f32 %v3505_v52, %v3457_v35  ;;  %3821 = vmatpush.bf16.msra.mxu3 %v7910_v18  ;;  %v8103_v52 = vld [vmem:[#allocation2 + $0x644] sm:$0xf0]  ;;  %v12622_v30 = vld [vmem:[#allocation60_spill] sm:$0xff] }
 0x2d0   :  { %3870 = vmatpush.bf16.msra.mxu0 %v8134_v33  ;;  %v8106_v6 = vor.u32 %v9532_v4, %v8103_v52  ;;  %v12623_v33 = vld [vmem:[#allocation76_spill] sm:$0xff]  ;;  %v12624_v4 = vld [vmem:[#allocation62_spill] sm:$0xff]  ;;  %v8302_v52 = vor.u32 %v9581_v48, %v8299_v29 }
 0x2d1   :  { %v11092_v3 = vadd.f32 %v3554_v45, %v3506_v16  ;;  %v9469_v45 = vld [vmem:[#allocation2 + $0x434] sm:$0xf]  ;;  %v7851_v16 = vld [vmem:[#allocation2 + $0x44c] sm:$0xf0]  ;;  %v7795_v29 = vld [vmem:[#allocation2 + $0x3dc] sm:$0xf0] }
 0x2d2   :  { %v3409_v34 = vpop.f32.mrf.mxu2  ;;  %3920 = vmatpush.bf16.msra.mxu1 %v8330_v53  ;;  %v7854_v54 = vor.u32 %v9469_v45, %v7851_v16  ;;  %v7823_v53 = vld [vmem:[#allocation2 + $0x414] sm:$0xf0] }
 0x2d3   :  { %v3410_v22 = vadd.f32 %v3409_v34, %v11041_v12  ;;  %3822 = vmatpush.bf16.msra.mxu3 %v7882_v26  ;;  %v8075_v34 = vld [vmem:[#allocation2 + $0x60c] sm:$0xf0] }
 0x2d4   :  { %v3458_v9 = vpop.f32.mrf.mxu3  ;;  %v3510_v35 = vpop.f32.mrf.mxu0  ;;  %3871 = vmatpush.bf16.msra.mxu0 %v8106_v6  ;;  %v8078_v26 = vor.u32 %v9525_v11, %v8075_v34  ;;  %v9462_v6 = vld [vmem:[#allocation2 + $0x3fc] sm:$0xf] }
 0x2d5   :  { %v3459_v61 = vadd.f32 %v3458_v9, %v3410_v22  ;;  %v3559_v18 = vpop.f32.mrf.mxu1  ;;  %v9392_v22 = vld [vmem:[#allocation2 + $0x1cc] sm:$0xf]  ;;  %v7543_v9 = vld [vmem:[#allocation2 + $0x1e4] sm:$0xf0] }
 0x2d6   :  { %v7546_v25 = vor.u32 %v9392_v22, %v7543_v9  ;;  %3921 = vmatpush.bf16.msra.mxu1 %v8302_v52  ;;  %v9511_v22 = vld [vmem:[#allocation2 + $0x584] sm:$0xf]  ;;  %v8019_v52 = vld [vmem:[#allocation2 + $0x59c] sm:$0xf0] }
 0x2d7   :  { %v3508_v10 = vadd.f32 %v3507_v20, %v3459_v61  ;;  %3607 = vmatmul.bf16.gmra.mxu2 %v12622_v30  ;;  %8700 = vmatmul.msk.bf16.gmra.mxu0 %vm2667_vm0, %v12623_v33  ;;  %v9518_v61 = vld [vmem:[#allocation2 + $0x5bc] sm:$0xf]  ;;  %v7826_v33 = vor.u32 %v9462_v6, %v7823_v53  ;;  %v8022_v6 = vor.u32 %v9511_v22, %v8019_v52  ;;  %v8635_v52 = vld [vmem:[#allocation2 + $0xa6c] sm:$0xf0] }
 0x2d8   :  { %3754 = vmatmul.bf16.gmra.mxu1 %v12592_v1  ;;  %3823 = vmatpush.bf16.msra.mxu3 %v7854_v54  ;;  %v8047_v1 = vld [vmem:[#allocation2 + $0x5d4] sm:$0xf0] }
 0x2d9   :  { %3656 = vmatmul.bf16.gmra.mxu3 %v12624_v4  ;;  %v11100_v20 = vadd.f32 %v3556_v59, %v3508_v10  ;;  %3872 = vmatpush.bf16.msra.mxu0 %v8078_v26  ;;  %v9574_v4 = vld [vmem:[#allocation2 + $0x77c] sm:$0xf]  ;;  %v8050_v34 = vor.u32 %v9518_v61, %v8047_v1  ;;  %v9455_v10 = vld [vmem:[#allocation2 + $0x3c4] sm:$0xf] }
 0x2da   :  { %v3412_v47 = vpop.f32.mrf.mxu2  ;;  %3777 = vmatpush.bf16.msra.mxu2 %v7546_v25  ;;  %v8274_v48 = vor.u32 %v9574_v4, %v8271_v36  ;;  %v7798_v26 = vor.u32 %v9455_v10, %v7795_v29  ;;  %v8243_v25 = vld [vmem:[#allocation2 + $0x75c] sm:$0xf0]  ;;  %v9448_v36 = vld [vmem:[#allocation2 + $0x38c] sm:$0xf] }
 0x2db   :  { %v3413_v45 = vadd.f32 %v3412_v47, %v11041_v12  ;;  %v9567_v47 = vld [vmem:[#allocation2 + $0x744] sm:$0xf]  ;;  %v9504_v4 = vld [vmem:[#allocation2 + $0x54c] sm:$0xf] }
 0x2dc   :  { %v3461_v16 = vpop.f32.mrf.mxu3  ;;  %v3512_v11 = vpop.f32.mrf.mxu0  ;;  %3824 = vmatpush.bf16.msra.mxu3 %v7826_v33  ;;  %3922 = vmatpush.bf16.msra.mxu1 %v8274_v48  ;;  %v8246_v53 = vor.u32 %v9567_v47, %v8243_v25  ;;  %v7767_v33 = vld [vmem:[#allocation2 + $0x3a4] sm:$0xf0] }
 0x2dd   :  { %v3462_v54 = vadd.f32 %v3461_v16, %v3413_v45  ;;  %v3561_v59 = vpop.f32.mrf.mxu1  ;;  %3873 = vmatpush.bf16.msra.mxu0 %v8050_v34  ;;  %v7770_v16 = vor.u32 %v9448_v36, %v7767_v33  ;;  %v9560_v34 = vld [vmem:[#allocation2 + $0x70c] sm:$0xf]  ;;  %v8215_v48 = vld [vmem:[#allocation2 + $0x724] sm:$0xf0] }
 0x2de   :  { %v8218_v29 = vor.u32 %v9560_v34, %v8215_v48 }
 0x2df   :  { %v3511_v9 = vadd.f32 %v3510_v35, %v3462_v54  ;;  %v7991_v35 = vld [vmem:[#allocation2 + $0x564] sm:$0xf0] }
 0x2e0   :  { %3825 = vmatpush.bf16.msra.mxu3 %v7798_v26  ;;  %3923 = vmatpush.bf16.msra.mxu1 %v8246_v53  ;;  %v7994_v10 = vor.u32 %v9504_v4, %v7991_v35 }
 0x2e1   :  { %v11103_v30 = vadd.f32 %v3559_v18, %v3511_v9  ;;  %3874 = vmatpush.bf16.msra.mxu0 %v8022_v6  ;;  %v9665_v9 = vld [vmem:[#allocation2 + $0xa54] sm:$0xf] }
 0x2e2   :  { %v3414_v1 = vpop.f32.mrf.mxu2  ;;  %v8638_v47 = vor.u32 %v9665_v9, %v8635_v52  ;;  %v8607_v9 = vld [vmem:[#allocation2 + $0xa34] sm:$0xf0] }
 0x2e3   :  { %v3415_v61 = vadd.f32 %v3414_v1, %v11041_v12 }
 0x2e4   :  { %v3463_v45 = vpop.f32.mrf.mxu3  ;;  %v3515_v54 = vpop.f32.mrf.mxu0  ;;  %3826 = vmatpush.bf16.msra.mxu3 %v7770_v16  ;;  %3924 = vmatpush.bf16.msra.mxu1 %v8218_v29 }
 0x2e5   :  { %v3464_v22 = vadd.f32 %v3463_v45, %v3415_v61  ;;  %v3564_v26 = vpop.f32.mrf.mxu1  ;;  %3875 = vmatpush.bf16.msra.mxu0 %v7994_v10  ;;  %3966 = vmatpush.bf16.msrb.mxu2 %v8638_v47 }
 0x2e7   :  { %v3513_v18 = vadd.f32 %v3512_v11, %v3464_v22  ;;  %3612 = vmatmul.bf16.gmra.mxu2 %v10582_v49  ;;  %8701 = vmatmul.msk.bf16.gmra.mxu0 %vm2667_vm0, %v10772_v41 }
 0x2e8   :  { %3759 = vmatmul.bf16.gmra.mxu1 %v12598_v62 }
 0x2e9   :  { %3661 = vmatmul.bf16.gmra.mxu3 %v10586_v17  ;;  %v11111_v25 = vadd.f32 %v3561_v59, %v3513_v18  ;;  %v9658_v18 = vld [vmem:[#allocation2 + $0xa1c] sm:$0xf] }
 0x2ea   :  { %v3417_v6 = vpop.f32.mrf.mxu2  ;;  %v8610_v47 = vor.u32 %v9658_v18, %v8607_v9  ;;  %v12627_v18 = vld [vmem:[#allocation39_spill] sm:$0xff] }
 0x2eb   :  { %v3418_v53 = vadd.f32 %v3417_v6, %v11041_v12 }
 0x2ec   :  { %v3466_v1 = vpop.f32.mrf.mxu3  ;;  %v3517_v11 = vpop.f32.mrf.mxu0  ;;  %3967 = vmatpush.bf16.msrb.mxu2 %v8610_v47 }
 0x2ed   :  { %v3467_v36 = vadd.f32 %v3466_v1, %v3418_v53  ;;  %v3566_v33 = vpop.f32.mrf.mxu1 }
 0x2ef   :  { %v3516_v4 = vadd.f32 %v3515_v54, %v3467_v36 }
 0x2f1   :  { %v11114_v61 = vadd.f32 %v3564_v26, %v3516_v4 }
 0x2f2   :  { %v3419_v45 = vpop.f32.mrf.mxu2 }
 0x2f3   :  { %v3420_v16 = vadd.f32 %v3419_v45, %v11041_v12 }
 0x2f4   :  { %v3468_v35 = vpop.f32.mrf.mxu3  ;;  %v3520_v34 = vpop.f32.mrf.mxu0 }
 0x2f5   :  { %v3469_v48 = vadd.f32 %v3468_v35, %v3420_v16  ;;  %v3569_v10 = vpop.f32.mrf.mxu1 }
 0x2f7   :  { %v3518_v59 = vadd.f32 %v3517_v11, %v3469_v48  ;;  %3617 = vmatmul.bf16.gmra.mxu2 %v10630_v2  ;;  %8702 = vmatmul.msk.bf16.gmra.mxu0 %vm2667_vm0, %v10791_v28 }
 0x2f8   :  { %3764 = vmatmul.bf16.gmra.mxu1 %v12602_v14 }
 0x2f9   :  { %3666 = vmatmul.bf16.gmra.mxu3 %v10634_v8  ;;  %v11122_v54 = vadd.f32 %v3566_v33, %v3518_v59  ;;  %v12625_v59 = vld [vmem:[#allocation25_spill] sm:$0xff] }
 0x2fa   :  { %v3422_v29 = vpop.f32.mrf.mxu2 }
 0x2fb   :  { %v3423_v22 = vadd.f32 %v3422_v29, %v11041_v12  ;;  %v12626_v29 = vld [vmem:[#allocation41_spill] sm:$0xff] }
 0x2fc   :  { %v3471_v26 = vpop.f32.mrf.mxu3  ;;  %v3522_v52 = vpop.f32.mrf.mxu0 }
 0x2fd   :  { %v3472_v6 = vadd.f32 %v3471_v26, %v3423_v22  ;;  %v3571_v53 = vpop.f32.mrf.mxu1 }
 0x2ff   :  { %v3521_v1 = vadd.f32 %v3520_v34, %v3472_v6  ;;  %v9651_v34 = vld [vmem:[#allocation2 + $0x9e4] sm:$0xf] }
 0x301   :  { %v11125_v11 = vadd.f32 %v3569_v10, %v3521_v1  ;;  %v8579_v10 = vld [vmem:[#allocation2 + $0x9fc] sm:$0xf0] }
 0x302   :  { %v3424_v36 = vpop.f32.mrf.mxu2 }
 0x303   :  { %v3425_v4 = vadd.f32 %v3424_v36, %v11041_v12  ;;  %v8582_v12 = vor.u32 %v9651_v34, %v8579_v10  ;;  %v8551_v34 = vld [vmem:[#allocation2 + $0x9c4] sm:$0xf0] }
 0x304   :  { %v3473_v45 = vpop.f32.mrf.mxu3  ;;  %v3681_v33 = vpop.f32.mrf.mxu0 }
 0x305   :  { %v3474_v16 = vadd.f32 %v3473_v45, %v3425_v4  ;;  %v11128_v35 = vpop.f32.mrf.mxu1  ;;  %3968 = vmatpush.bf16.msrb.mxu2 %v8582_v12 }
 0x307   :  { %v3523_v48 = vadd.f32 %v3522_v52, %v3474_v16  ;;  %3778 = vmatmul.bf16.vlgmr.msra.gmra.mxu2 %v12625_v59  ;;  %3876 = vmatmul.bf16.vlgmr.msra.gmra.mxu0 %v12626_v29 }
 0x308   :  { %3925 = vmatmul.bf16.vlgmr.msra.gmra.mxu1 %v12606_v58 }
 0x309   :  { %3827 = vmatmul.bf16.vlgmr.msra.gmra.mxu3 %v12627_v18  ;;  %v11134_v22 = vadd.f32 %v3571_v53, %v3523_v48 }
 0x30a   :  { %v3583_v26 = vpop.f32.mrf.mxu2 }
 0x30b   :  { %v3584_v9 = vadd.f32 %v3583_v26, %v11048_v39 }
 0x30c   :  { %v3632_v47 = vpop.f32.mrf.mxu3  ;;  %v3683_v6 = vpop.f32.mrf.mxu0 }
 0x30d   :  { %v3633_v52 = vadd.f32 %v3632_v47, %v3584_v9  ;;  %v11137_v1 = vpop.f32.mrf.mxu1 }
 0x30f   :  { %v3682_v36 = vadd.f32 %v3681_v33, %v3633_v52  ;;  %v9644_v33 = vld [vmem:[#allocation2 + $0x9ac] sm:$0xf] }
 0x311   :  { %v5095_v39 = vmax.f32 %v3682_v36, 0.0 }
 0x312   :  { %v3585_v4 = vpop.f32.mrf.mxu2 }
 0x313   :  { %v3586_v45 = vadd.f32 %v3585_v4, %v11056_v40  ;;  %v8554_v40 = vor.u32 %v9644_v33, %v8551_v34 }
 0x314   :  { %v3634_v16 = vpop.f32.mrf.mxu3  ;;  %v3686_v29 = vpop.f32.mrf.mxu0 }
 0x315   :  { %v3635_v58 = vadd.f32 %v3634_v16, %v3586_v45  ;;  %v11140_v18 = vpop.f32.mrf.mxu1  ;;  %3969 = vmatpush.bf16.msrb.mxu2 %v8554_v40 }
 0x317   :  { %v3684_v53 = vadd.f32 %v3683_v6, %v3635_v58  ;;  %3783 = vmatmul.bf16.gmra.mxu2 %v12577_v7  ;;  %3881 = vmatmul.bf16.gmra.mxu0 %v12550_v15 }
 0x318   :  { %3930 = vmatmul.bf16.gmra.mxu1 %v12610_v13 }
 0x319   :  { %3832 = vmatmul.bf16.gmra.mxu3 %v12576_v55  ;;  %v5102_v48 = vmax.f32 %v3684_v53, 0.0 }
 0x31a   :  { %v3588_v10 = vpop.f32.mrf.mxu2 }
 0x31b   :  { %v11146_v26 = vpack.c.bf16 %v5102_v48, %v5095_v39  ;;  %v3589_v12 = vadd.f32 %v3588_v10, %v11059_v32  ;;  %v8523_v48 = vld [vmem:[#allocation2 + $0x98c] sm:$0xf0] }
 0x31c   :  { %v3637_v9 = vpop.f32.mrf.mxu3  ;;  %v3688_v58 = vpop.f32.mrf.mxu0 }
 0x31d   :  { %12628 = vst [vmem:[#allocation91_spill] sm:$0xff] %v11146_v26  ;;  %v3638_v47 = vadd.f32 %v3637_v9, %v3589_v12  ;;  %v11149_v6 = vpop.f32.mrf.mxu1 }
 0x31f   :  { %v3687_v52 = vadd.f32 %v3686_v29, %v3638_v47  ;;  %v9637_v29 = vld [vmem:[#allocation2 + $0x974] sm:$0xf] }
 0x321   :  { %v5109_v32 = vmax.f32 %v3687_v52, 0.0 }
 0x322   :  { %v3590_v4 = vpop.f32.mrf.mxu2 }
 0x323   :  { %v3591_v45 = vadd.f32 %v3590_v4, %v11067_v38  ;;  %v8526_v38 = vor.u32 %v9637_v29, %v8523_v48 }
 0x324   :  { %v3639_v36 = vpop.f32.mrf.mxu3  ;;  %v3691_v16 = vpop.f32.mrf.mxu0 }
 0x325   :  { %v3640_v53 = vadd.f32 %v3639_v36, %v3591_v45  ;;  %v11152_v15 = vpop.f32.mrf.mxu1  ;;  %3970 = vmatpush.bf16.msrb.mxu2 %v8526_v38 }
 0x327   :  { %v3689_v33 = vadd.f32 %v3688_v58, %v3640_v53  ;;  %3788 = vmatmul.bf16.gmra.mxu2 %v12581_v0  ;;  %3886 = vmatmul.bf16.gmra.mxu0 %v12553_v27 }
 0x328   :  { %3935 = vmatmul.bf16.gmra.mxu1 %v12613_v50 }
 0x329   :  { %3837 = vmatmul.bf16.gmra.mxu3 %v12580_v63  ;;  %v5116_v39 = vmax.f32 %v3689_v33, 0.0 }
 0x32a   :  { %v3593_v34 = vpop.f32.mrf.mxu2 }
 0x32b   :  { %v3594_v10 = vadd.f32 %v3593_v34, %v11070_v56  ;;  %v11159_v12 = vpack.c.bf16 %v5116_v39, %v5109_v32  ;;  %v8495_v39 = vld [vmem:[#allocation2 + $0x954] sm:$0xf0] }
 0x32c   :  { %v3642_v40 = vpop.f32.mrf.mxu3  ;;  %v3693_v9 = vpop.f32.mrf.mxu0 }
 0x32d   :  { %12629 = vst [vmem:[#allocation92_spill] sm:$0xff] %v11159_v12  ;;  %v3643_v58 = vadd.f32 %v3642_v40, %v3594_v10  ;;  %v11161_v47 = vpop.f32.mrf.mxu1 }
 0x32f   :  { %v3692_v4 = vadd.f32 %v3691_v16, %v3643_v58  ;;  %v9630_v16 = vld [vmem:[#allocation2 + $0x93c] sm:$0xf] }
 0x331   :  { %v5123_v56 = vmax.f32 %v3692_v4, 0.0 }
 0x332   :  { %v3595_v45 = vpop.f32.mrf.mxu2 }
 0x333   :  { %v3596_v36 = vadd.f32 %v3595_v45, %v11078_v21  ;;  %v8498_v21 = vor.u32 %v9630_v16, %v8495_v39  ;;  %v7521_v16 = vld [vmem:[#allocation2 + $0x198] sm:$0xf]  ;;  %v9389_v39 = vld [vmem:[#allocation2 + $0x1b0] sm:$0xf0] }
 0x334   :  { %v3644_v52 = vpop.f32.mrf.mxu3  ;;  %v3696_v53 = vpop.f32.mrf.mxu0 }
 0x335   :  { %v3645_v33 = vadd.f32 %v3644_v52, %v3596_v36  ;;  %v11164_v26 = vpop.f32.mrf.mxu1  ;;  %3971 = vmatpush.bf16.msrb.mxu2 %v8498_v21 }
 0x337   :  { %v3694_v29 = vadd.f32 %v3693_v9, %v3645_v33  ;;  %3793 = vmatmul.bf16.gmra.mxu2 %v12585_v37  ;;  %3891 = vmatmul.bf16.gmra.mxu0 %v12557_v57 }
 0x338   :  { %3940 = vmatmul.bf16.gmra.mxu1 %v12616_v60 }
 0x339   :  { %3842 = vmatmul.bf16.gmra.mxu3 %v12584_v23  ;;  %v5130_v32 = vmax.f32 %v3694_v29, 0.0 }
 0x33a   :  { %v3598_v48 = vpop.f32.mrf.mxu2 }
 0x33b   :  { %v3599_v34 = vadd.f32 %v3598_v48, %v11081_v5  ;;  %v11171_v10 = vpack.c.bf16 %v5130_v32, %v5123_v56  ;;  %v7745_v5 = vld [vmem:[#allocation2 + $0x358] sm:$0xf]  ;;  %v7522_v56 = vor.u32 %v9389_v39, %v7521_v16  ;;  %v9445_v32 = vld [vmem:[#allocation2 + $0x370] sm:$0xf0] }
 0x33c   :  { %v3647_v38 = vpop.f32.mrf.mxu3  ;;  %v3698_v40 = vpop.f32.mrf.mxu0 }
 0x33d   :  { %12630 = vst [vmem:[#allocation93_spill] sm:$0xff] %v11171_v10  ;;  %v3648_v9 = vadd.f32 %v3647_v38, %v3599_v34  ;;  %v11173_v58 = vpop.f32.mrf.mxu1  ;;  %v9623_v34 = vld [vmem:[#allocation2 + $0x904] sm:$0xf]  ;;  %v8467_v38 = vld [vmem:[#allocation2 + $0x91c] sm:$0xf0]  ;;  %4064 = vmatpush.bf16.msrb.mxu0 %v7522_v56 }
 0x33e   :  { %v9438_v10 = vld [vmem:[#allocation2 + $0x338] sm:$0xf0]  ;;  %v7465_v56 = vld [vmem:[#allocation2 + $0x128] sm:$0xf] }
 0x33f   :  { %v3697_v45 = vadd.f32 %v3696_v53, %v3648_v9 }
 0x341   :  { %v5137_v53 = vmax.f32 %v3697_v45, 0.0 }
 0x342   :  { %v3600_v36 = vpop.f32.mrf.mxu2 }
 0x343   :  { %v3601_v52 = vadd.f32 %v3600_v36, %v11089_v31  ;;  %v7746_v31 = vor.u32 %v9445_v32, %v7745_v5  ;;  %v8470_v36 = vor.u32 %v9623_v34, %v8467_v38  ;;  %v9375_v32 = vld [vmem:[#allocation2 + $0x140] sm:$0xf0] }
 0x344   :  { %v3649_v4 = vpop.f32.mrf.mxu3  ;;  %v3701_v33 = vpop.f32.mrf.mxu0  ;;  %v7466_v38 = vor.u32 %v9375_v32, %v7465_v56 }
 0x345   :  { %v3650_v29 = vadd.f32 %v3649_v4, %v3601_v52  ;;  %v11176_v12 = vpop.f32.mrf.mxu1  ;;  %4113 = vmatpush.bf16.msrb.mxu1 %v7746_v31  ;;  %v9382_v52 = vld [vmem:[#allocation2 + $0x178] sm:$0xf0]  ;;  %v7717_v4 = vld [vmem:[#allocation2 + $0x320] sm:$0xf]  ;;  %3972 = vmatpush.bf16.msrb.mxu2 %v8470_v36  ;;  %v7689_v31 = vld [vmem:[#allocation2 + $0x2e8] sm:$0xf] }
 0x346   :  { %v7718_v45 = vor.u32 %v9438_v10, %v7717_v4  ;;  %v9424_v4 = vld [vmem:[#allocation2 + $0x2c8] sm:$0xf0] }
 0x347   :  { %v3699_v48 = vadd.f32 %v3698_v40, %v3650_v29  ;;  %3798 = vmatmul.bf16.gmra.mxu2 %v12589_v24  ;;  %3896 = vmatmul.bf16.gmra.mxu0 %v12561_v42  ;;  %v7493_v40 = vld [vmem:[#allocation2 + $0x160] sm:$0xf] }
 0x348   :  { %3945 = vmatmul.bf16.gmra.mxu1 %v12619_v51  ;;  %v7494_v39 = vor.u32 %v9382_v52, %v7493_v40  ;;  %v7661_v40 = vld [vmem:[#allocation2 + $0x2b0] sm:$0xf] }
 0x349   :  { %3847 = vmatmul.bf16.gmra.mxu3 %v12588_v46  ;;  %v5144_v21 = vmax.f32 %v3699_v48, 0.0  ;;  %4114 = vmatpush.bf16.msrb.mxu1 %v7718_v45  ;;  %v9431_v46 = vld [vmem:[#allocation2 + $0x300] sm:$0xf0] }
 0x34a   :  { %v3603_v9 = vpop.f32.mrf.mxu2  ;;  %4065 = vmatpush.bf16.msrb.mxu0 %v7494_v39 }
 0x34b   :  { %v3604_v29 = vadd.f32 %v3603_v9, %v11092_v3  ;;  %v11183_v42 = vpack.c.bf16 %v5144_v21, %v5137_v53  ;;  %v7690_v3 = vor.u32 %v9431_v46, %v7689_v31  ;;  %v7437_v53 = vld [vmem:[#allocation2 + $0xf0] sm:$0xf]  ;;  %v9368_v21 = vld [vmem:[#allocation2 + $0x108] sm:$0xf0]  ;;  %v9361_v46 = vld [vmem:[#allocation2 + $0xd0] sm:$0xf0] }
 0x34c   :  { %v3652_v16 = vpop.f32.mrf.mxu3  ;;  %v3703_v51 = vpop.f32.mrf.mxu0  ;;  %v7438_v52 = vor.u32 %v9368_v21, %v7437_v53  ;;  %v12632_v31 = vld [vmem:[#allocation60_spill] sm:$0xff]  ;;  %v8439_v21 = vld [vmem:[#allocation2 + $0x8e4] sm:$0xf0] }
 0x34d   :  { %12631 = vst [vmem:[#allocation94_spill] sm:$0xff] %v11183_v42  ;;  %v3653_v5 = vadd.f32 %v3652_v16, %v3604_v29  ;;  %v11185_v48 = vpop.f32.mrf.mxu1  ;;  %4115 = vmatpush.bf16.msrb.mxu1 %v7690_v3  ;;  %v7662_v16 = vor.u32 %v9424_v4, %v7661_v40  ;;  %v9616_v53 = vld [vmem:[#allocation2 + $0x8cc] sm:$0xf] }
 0x34e   :  { %4066 = vmatpush.bf16.msrb.mxu0 %v7466_v38 }
 0x34f   :  { %v3702_v34 = vadd.f32 %v3701_v33, %v3653_v5  ;;  %v7409_v33 = vld [vmem:[#allocation2 + $0xb8] sm:$0xf] }
 0x350   :  { %v7633_v5 = vld [vmem:[#allocation2 + $0x278] sm:$0xf]  ;;  %v7410_v32 = vor.u32 %v9361_v46, %v7409_v33  ;;  %v9410_v33 = vld [vmem:[#allocation2 + $0x258] sm:$0xf0] }
 0x351   :  { %4116 = vmatpush.bf16.msrb.mxu1 %v7662_v16  ;;  %v5151_v3 = vmax.f32 %v3702_v34, 0.0 }
 0x352   :  { %v3605_v9 = vpop.f32.mrf.mxu2  ;;  %4067 = vmatpush.bf16.msrb.mxu0 %v7438_v52  ;;  %v7605_v52 = vld [vmem:[#allocation2 + $0x240] sm:$0xf] }
 0x353   :  { %v3606_v10 = vadd.f32 %v3605_v9, %v11100_v20  ;;  %v9417_v20 = vld [vmem:[#allocation2 + $0x290] sm:$0xf0]  ;;  %v7606_v34 = vor.u32 %v9410_v33, %v7605_v52  ;;  %v7549_v52 = vld [vmem:[#allocation2 + $0x1d0] sm:$0xf]  ;;  %v9396_v33 = vld [vmem:[#allocation2 + $0x1e8] sm:$0xf0] }
 0x354   :  { %v3654_v36 = vpop.f32.mrf.mxu3  ;;  %v3706_v29 = vpop.f32.mrf.mxu0  ;;  %v7634_v38 = vor.u32 %v9417_v20, %v7633_v5  ;;  %v9347_v20 = vld [vmem:[#allocation2 + $0x60] sm:$0xf0] }
 0x355   :  { %v3655_v39 = vadd.f32 %v3654_v36, %v3606_v10  ;;  %v11188_v45 = vpop.f32.mrf.mxu1  ;;  %v8442_v10 = vor.u32 %v9616_v53, %v8439_v21  ;;  %v9354_v36 = vld [vmem:[#allocation2 + $0x98] sm:$0xf0] }
 0x356   :  { %4068 = vmatpush.bf16.msrb.mxu0 %v7410_v32  ;;  %4117 = vmatpush.bf16.msrb.mxu1 %v7634_v38  ;;  %v7353_v32 = vld [vmem:[#allocation2 + $0x48] sm:$0xf] }
 0x357   :  { %v3704_v56 = vadd.f32 %v3703_v51, %v3655_v39  ;;  %3803 = vmatmul.bf16.gmra.mxu2 %v12594_v43  ;;  %3901 = vmatmul.bf16.gmra.mxu0 %v12595_v19  ;;  %v7381_v51 = vld [vmem:[#allocation2 + $0x80] sm:$0xf]  ;;  %v7577_v38 = vld [vmem:[#allocation2 + $0x208] sm:$0xf]  ;;  %v7354_v21 = vor.u32 %v9347_v20, %v7353_v32  ;;  %v9403_v19 = vld [vmem:[#allocation2 + $0x220] sm:$0xf0] }
 0x358   :  { %3950 = vmatmul.bf16.gmra.mxu1 %v12632_v31  ;;  %v7382_v39 = vor.u32 %v9354_v36, %v7381_v51  ;;  %3973 = vmatpush.bf16.msrb.mxu2 %v8442_v10  ;;  %v8663_v51 = vld [vmem:[#allocation2 + $0xaa4] sm:$0xf0]  ;;  %v7325_v10 = vld [vmem:[#allocation2 + $0x10] sm:$0xf]  ;;  %v9340_v36 = vld [vmem:[#allocation2 + $0x28] sm:$0xf0] }
 0x359   :  { %3852 = vmatmul.bf16.gmra.mxu3 %v12593_v44  ;;  %v5158_v9 = vmax.f32 %v3704_v56, 0.0  ;;  %v12634_v20 = vld [vmem:[#allocation34_spill] sm:$0xff] }
 0x35a   :  { %v3608_v40 = vpop.f32.mrf.mxu2  ;;  %4069 = vmatpush.bf16.msrb.mxu0 %v7382_v39  ;;  %4118 = vmatpush.bf16.msrb.mxu1 %v7606_v34  ;;  %v7326_v39 = vor.u32 %v9340_v36, %v7325_v10  ;;  %v9606_v31 = vld [vmem:[#allocation2 + $0x878] sm:$0xf0] }
 0x35b   :  { %v3609_v4 = vadd.f32 %v3608_v40, %v11103_v30  ;;  %v11195_v46 = vpack.c.bf16 %v5158_v9, %v5151_v3  ;;  %v7578_v30 = vor.u32 %v9403_v19, %v7577_v38  ;;  %v9672_v40 = vld [vmem:[#allocation2 + $0xa8c] sm:$0xf]  ;;  %v12635_v38 = vld [vmem:[#allocation65_spill] sm:$0xff] }
 0x35c   :  { %v3657_v16 = vpop.f32.mrf.mxu3  ;;  %v3708_v42 = vpop.f32.mrf.mxu0  ;;  %v8666_v9 = vor.u32 %v9672_v40, %v8663_v51  ;;  %v7969_v40 = vld [vmem:[#allocation2 + $0x518] sm:$0xf]  ;;  %v9501_v51 = vld [vmem:[#allocation2 + $0x530] sm:$0xf0]  ;;  %v9662_v44 = vld [vmem:[#allocation2 + $0xa38] sm:$0xf0] }
 0x35d   :  { %12633 = vst [vmem:[#allocation95_spill] sm:$0xff] %v11195_v46  ;;  %v3658_v5 = vadd.f32 %v3657_v16, %v3609_v4  ;;  %v11197_v56 = vpop.f32.mrf.mxu1 }
 0x35e   :  { %4070 = vmatpush.bf16.msrb.mxu0 %v7354_v21  ;;  %4119 = vmatpush.bf16.msrb.mxu1 %v7578_v30  ;;  %v12636_v21 = vld [vmem:[#allocation63_spill] sm:$0xff] }
 0x35f   :  { %v3707_v53 = vadd.f32 %v3706_v29, %v3658_v5  ;;  %4022 = vmatpush.bf16.msrb.mxu3 %v8666_v9  ;;  %v7550_v29 = vor.u32 %v9396_v33, %v7549_v52  ;;  %v7970_v9 = vor.u32 %v9501_v51, %v7969_v40  ;;  %v12638_v51 = vld [vmem:[#allocation38_spill] sm:$0xff] }
 0x361   :  { %4162 = vmatpush.bf16.msra.mxu2 %v7970_v9 }
 0x362   :  { %v3610_v3 = vpop.f32.mrf.mxu2  ;;  %4071 = vmatpush.bf16.msrb.mxu0 %v7326_v39  ;;  %4120 = vmatpush.bf16.msrb.mxu1 %v7550_v29 }
 0x363   :  { %v3611_v4 = vadd.f32 %v3610_v3, %v11111_v25  ;;  %v5165_v25 = vmax.f32 %v3707_v53, 0.0 }
 0x364   :  { %v3659_v16 = vpop.f32.mrf.mxu3  ;;  %v3711_v34 = vpop.f32.mrf.mxu0 }
 0x365   :  { %v3660_v5 = vadd.f32 %v3659_v16, %v3611_v4  ;;  %v11200_v32 = vpop.f32.mrf.mxu1 }
 0x367   :  { %v3709_v19 = vadd.f32 %v3708_v42, %v3660_v5  ;;  %3808 = vmatmul.bf16.gmra.mxu2 %v12634_v20  ;;  %3906 = vmatmul.bf16.gmra.mxu0 %v12635_v38 }
 0x368   :  { %3955 = vmatmul.bf16.gmra.mxu1 %v10582_v49 }
 0x369   :  { %3857 = vmatmul.bf16.gmra.mxu3 %v12636_v21  ;;  %v5172_v30 = vmax.f32 %v3709_v19, 0.0 }
 0x36a   :  { %v3613_v3 = vpop.f32.mrf.mxu2 }
 0x36b   :  { %v3614_v10 = vadd.f32 %v3613_v3, %v11114_v61  ;;  %v11207_v52 = vpack.c.bf16 %v5172_v30, %v5165_v25  ;;  %v12639_v61 = vld [vmem:[#allocation69_spill] sm:$0xff]  ;;  %v12640_v25 = vld [vmem:[#allocation67_spill] sm:$0xff]  ;;  %v7941_v30 = vld [vmem:[#allocation2 + $0x4e0] sm:$0xf] }
 0x36c   :  { %v3662_v36 = vpop.f32.mrf.mxu3  ;;  %v3713_v42 = vpop.f32.mrf.mxu0  ;;  %v9494_v3 = vld [vmem:[#allocation2 + $0x4f8] sm:$0xf0] }
 0x36d   :  { %12637 = vst [vmem:[#allocation34_spill] sm:$0xff] %v11207_v52  ;;  %v3663_v4 = vadd.f32 %v3662_v36, %v3614_v10  ;;  %v11209_v16 = vpop.f32.mrf.mxu1  ;;  %v7942_v10 = vor.u32 %v9494_v3, %v7941_v30 }
 0x36f   :  { %v3712_v39 = vadd.f32 %v3711_v34, %v3663_v4  ;;  %4163 = vmatpush.bf16.msra.mxu2 %v7942_v10  ;;  %v12642_v10 = vld [vmem:[#allocation42_spill] sm:$0xff] }
 0x371   :  { %v5179_v34 = vmax.f32 %v3712_v39, 0.0 }
 0x372   :  { %v3615_v33 = vpop.f32.mrf.mxu2 }
 0x373   :  { %v3616_v29 = vadd.f32 %v3615_v33, %v11122_v54 }
 0x374   :  { %v3664_v53 = vpop.f32.mrf.mxu3  ;;  %v3716_v5 = vpop.f32.mrf.mxu0 }
 0x375   :  { %v3665_v19 = vadd.f32 %v3664_v53, %v3616_v29  ;;  %v11212_v46 = vpop.f32.mrf.mxu1 }
 0x377   :  { %v3714_v40 = vadd.f32 %v3713_v42, %v3665_v19  ;;  %3813 = vmatmul.bf16.gmra.mxu2 %v12638_v51  ;;  %3911 = vmatmul.bf16.gmra.mxu0 %v12639_v61  ;;  %v11223_v61 = vld [vmem:[#allocation5] sm:$0xff] }
 0x378   :  { %3960 = vmatmul.bf16.gmra.mxu1 %v10630_v2  ;;  %v11226_v2 = vperm.slane %v11223_v61, 3 }
 0x379   :  { %3862 = vmatmul.bf16.gmra.mxu3 %v12640_v25  ;;  %v5186_v9 = vmax.f32 %v3714_v40, 0.0 }
 0x37a   :  { %v3618_v54 = vpop.f32.mrf.mxu2 }
 0x37b   :  { %v3619_v36 = vadd.f32 %v3618_v54, %v11125_v11  ;;  %v11219_v33 = vpack.c.bf16 %v5186_v9, %v5179_v34  ;;  %v3731_v34 = vadd.f32 %v11128_v35, %v11226_v2  ;;  %v12643_v54 = vld [vmem:[#allocation23_spill] sm:$0xff] }
 0x37c   :  { %v3667_v4 = vpop.f32.mrf.mxu3  ;;  %v3718_v42 = vpop.f32.mrf.mxu0 }
 0x37d   :  { %12641 = vst [vmem:[#allocation96_spill] sm:$0xff] %v11219_v33  ;;  %v3668_v29 = vadd.f32 %v3667_v4, %v3619_v36  ;;  %v11221_v53 = vpop.f32.mrf.mxu1  ;;  %v7913_v36 = vld [vmem:[#allocation2 + $0x4a8] sm:$0xf]  ;;  %v9487_v4 = vld [vmem:[#allocation2 + $0x4c0] sm:$0xf0] }
 0x37f   :  { %v3717_v19 = vadd.f32 %v3716_v5, %v3668_v29  ;;  %v12644_v5 = vld [vmem:[#allocation71_spill] sm:$0xff]  ;;  %v7914_v29 = vor.u32 %v9487_v4, %v7913_v36 }
 0x381   :  { %4164 = vmatpush.bf16.msra.mxu2 %v7914_v29 }
 0x382   :  { %v3620_v52 = vpop.f32.mrf.mxu2 }
 0x383   :  { %v3621_v39 = vadd.f32 %v3620_v52, %v11134_v22  ;;  %v5193_v22 = vmax.f32 %v3717_v19, 0.0 }
 0x384   :  { %v3669_v40 = vpop.f32.mrf.mxu3  ;;  %v3877_v30 = vpop.f32.mrf.mxu0 }
 0x385   :  { %v3670_v11 = vadd.f32 %v3669_v40, %v3621_v39  ;;  %v3926_v3 = vpop.f32.mrf.mxu1 }
 0x387   :  { %v3719_v9 = vadd.f32 %v3718_v42, %v3670_v11  ;;  %3974 = vmatmul.bf16.vlgmr.msrb.gmra.mxu2 %v12642_v10  ;;  %4072 = vmatmul.bf16.vlgmr.msrb.gmra.mxu0 %v12643_v54 }
 0x388   :  { %4121 = vmatmul.bf16.vlgmr.msrb.gmra.mxu1 %v12625_v59 }
 0x389   :  { %8703 = vmatmul.msk.bf16.vlgmr.msrb.gmra.mxu3 %vm2667_vm0, %v12644_v5  ;;  %v5200_v52 = vmax.f32 %v3719_v9, 0.0  ;;  %v3733_v5 = vadd.f32 %v11137_v1, %v11226_v2  ;;  %v7885_v1 = vld [vmem:[#allocation2 + $0x470] sm:$0xf] }
 0x38a   :  { %v3779_v39 = vpop.f32.mrf.mxu2 }
 0x38b   :  { %v3780_v40 = vadd.f32 %v3779_v39, %v3731_v34  ;;  %v11236_v35 = vpack.c.bf16 %v5200_v52, %v5193_v22  ;;  %v3736_v34 = vadd.f32 %v11140_v18, %v11226_v2  ;;  %v12646_v52 = vld [vmem:[#allocation46_spill] sm:$0xff] }
 0x38c   :  { %v3828_v33 = vpop.f32.mrf.mxu3  ;;  %v3879_v42 = vpop.f32.mrf.mxu0 }
 0x38d   :  { %12645 = vst [vmem:[#allocation97_spill] sm:$0xff] %v11236_v35  ;;  %v3829_v11 = vadd.f32 %v3828_v33, %v3780_v40  ;;  %v3928_v25 = vpop.f32.mrf.mxu1  ;;  %v12647_v33 = vld [vmem:[#allocation27_spill] sm:$0xff] }
 0x38f   :  { %v3878_v54 = vadd.f32 %v3877_v30, %v3829_v11  ;;  %v12648_v30 = vld [vmem:[#allocation72_spill] sm:$0xff]  ;;  %v3738_v11 = vadd.f32 %v11149_v6, %v11226_v2  ;;  %v7857_v6 = vld [vmem:[#allocation2 + $0x438] sm:$0xf] }
 0x391   :  { %v11240_v38 = vadd.f32 %v3926_v3, %v3878_v54  ;;  %v9480_v3 = vld [vmem:[#allocation2 + $0x488] sm:$0xf0] }
 0x392   :  { %v3781_v59 = vpop.f32.mrf.mxu2 }
 0x393   :  { %v3782_v49 = vadd.f32 %v3781_v59, %v3733_v5  ;;  %v7886_v59 = vor.u32 %v9480_v3, %v7885_v1  ;;  %v12649_v3 = vld [vmem:[#allocation50_spill] sm:$0xff] }
 0x394   :  { %v3830_v19 = vpop.f32.mrf.mxu3  ;;  %v3882_v9 = vpop.f32.mrf.mxu0 }
 0x395   :  { %v3831_v36 = vadd.f32 %v3830_v19, %v3782_v49  ;;  %v3931_v4 = vpop.f32.mrf.mxu1  ;;  %4165 = vmatpush.bf16.msra.mxu2 %v7886_v59  ;;  %v12650_v59 = vld [vmem:[#allocation31_spill] sm:$0xff] }
 0x397   :  { %v3880_v22 = vadd.f32 %v3879_v42, %v3831_v36  ;;  %3979 = vmatmul.bf16.gmra.mxu2 %v12646_v52  ;;  %4077 = vmatmul.bf16.gmra.mxu0 %v12647_v33 }
 0x398   :  { %4126 = vmatmul.bf16.gmra.mxu1 %v12577_v7 }
 0x399   :  { %8704 = vmatmul.msk.bf16.gmra.mxu3 %vm2667_vm0, %v12648_v30  ;;  %v11249_v54 = vadd.f32 %v3928_v25, %v3880_v22 }
 0x39a   :  { %v3784_v49 = vpop.f32.mrf.mxu2 }
 0x39b   :  { %v3785_v5 = vadd.f32 %v3784_v49, %v3736_v34  ;;  %v3741_v34 = vadd.f32 %v11152_v15, %v11226_v2 }
 0x39c   :  { %v3833_v29 = vpop.f32.mrf.mxu3  ;;  %v3884_v18 = vpop.f32.mrf.mxu0 }
 0x39d   :  { %v3834_v39 = vadd.f32 %v3833_v29, %v3785_v5  ;;  %v3933_v40 = vpop.f32.mrf.mxu1 }
 0x39f   :  { %v3883_v42 = vadd.f32 %v3882_v9, %v3834_v39  ;;  %v12651_v9 = vld [vmem:[#allocation73_spill] sm:$0xff] }
 0x3a1   :  { %v11253_v19 = vadd.f32 %v3931_v4, %v3883_v42  ;;  %v9473_v4 = vld [vmem:[#allocation2 + $0x450] sm:$0xf0] }
 0x3a2   :  { %v3786_v36 = vpop.f32.mrf.mxu2  ;;  %v7858_v49 = vor.u32 %v9473_v4, %v7857_v6  ;;  %v12652_v4 = vld [vmem:[#allocation54_spill] sm:$0xff] }
 0x3a3   :  { %v3787_v35 = vadd.f32 %v3786_v36, %v3738_v11  ;;  %v3743_v11 = vadd.f32 %v11161_v47, %v11226_v2  ;;  %v7829_v47 = vld [vmem:[#allocation2 + $0x400] sm:$0xf] }
 0x3a4   :  { %v3835_v33 = vpop.f32.mrf.mxu3  ;;  %v3887_v7 = vpop.f32.mrf.mxu0  ;;  %4166 = vmatpush.bf16.msra.mxu2 %v7858_v49  ;;  %v12653_v49 = vld [vmem:[#allocation35_spill] sm:$0xff] }
 0x3a5   :  { %v3836_v1 = vadd.f32 %v3835_v33, %v3787_v35  ;;  %v3936_v25 = vpop.f32.mrf.mxu1 }
 0x3a7   :  { %v3885_v22 = vadd.f32 %v3884_v18, %v3836_v1  ;;  %3984 = vmatmul.bf16.gmra.mxu2 %v12649_v3  ;;  %4082 = vmatmul.bf16.gmra.mxu0 %v12650_v59 }
 0x3a8   :  { %4131 = vmatmul.bf16.gmra.mxu1 %v12581_v0 }
 0x3a9   :  { %8705 = vmatmul.msk.bf16.gmra.mxu3 %vm2667_vm0, %v12651_v9  ;;  %v11262_v5 = vadd.f32 %v3933_v40, %v3885_v22 }
 0x3aa   :  { %v3789_v35 = vpop.f32.mrf.mxu2 }
 0x3ab   :  { %v3790_v33 = vadd.f32 %v3789_v35, %v3741_v34  ;;  %v3746_v34 = vadd.f32 %v11164_v26, %v11226_v2 }
 0x3ac   :  { %v3838_v29 = vpop.f32.mrf.mxu3  ;;  %v3889_v15 = vpop.f32.mrf.mxu0 }
 0x3ad   :  { %v3839_v18 = vadd.f32 %v3838_v29, %v3790_v33  ;;  %v3938_v39 = vpop.f32.mrf.mxu1 }
 0x3af   :  { %v3888_v42 = vadd.f32 %v3887_v7, %v3839_v18  ;;  %v12654_v7 = vld [vmem:[#allocation74_spill] sm:$0xff] }
 0x3b1   :  { %v11266_v36 = vadd.f32 %v3936_v25, %v3888_v42  ;;  %v9466_v25 = vld [vmem:[#allocation2 + $0x418] sm:$0xf0] }
 0x3b2   :  { %v3791_v1 = vpop.f32.mrf.mxu2  ;;  %v7830_v35 = vor.u32 %v9466_v25, %v7829_v47  ;;  %v9557_v25 = vld [vmem:[#allocation2 + $0x6f0] sm:$0xf0] }
 0x3b3   :  { %v3792_v59 = vadd.f32 %v3791_v1, %v3743_v11  ;;  %v3748_v11 = vadd.f32 %v11173_v58, %v11226_v2 }
 0x3b4   :  { %v3840_v0 = vpop.f32.mrf.mxu3  ;;  %v3892_v9 = vpop.f32.mrf.mxu0  ;;  %4167 = vmatpush.bf16.msra.mxu2 %v7830_v35  ;;  %v3751_v35 = vadd.f32 %v11176_v12, %v11226_v2 }
 0x3b5   :  { %v3841_v6 = vadd.f32 %v3840_v0, %v3792_v59  ;;  %v3941_v40 = vpop.f32.mrf.mxu1 }
 0x3b7   :  { %v3890_v22 = vadd.f32 %v3889_v15, %v3841_v6  ;;  %3989 = vmatmul.bf16.gmra.mxu2 %v12652_v4  ;;  %4087 = vmatmul.bf16.gmra.mxu0 %v12653_v49 }
 0x3b8   :  { %4136 = vmatmul.bf16.gmra.mxu1 %v12585_v37 }
 0x3b9   :  { %8706 = vmatmul.msk.bf16.gmra.mxu3 %vm2667_vm0, %v12654_v7  ;;  %v11275_v33 = vadd.f32 %v3938_v39, %v3890_v22  ;;  %v8193_v22 = vld [vmem:[#allocation2 + $0x6d8] sm:$0xf] }
 0x3ba   :  { %v3794_v0 = vpop.f32.mrf.mxu2  ;;  %v8194_v58 = vor.u32 %v9557_v25, %v8193_v22  ;;  %v9550_v22 = vld [vmem:[#allocation2 + $0x6b8] sm:$0xf0]  ;;  %v8389_v25 = vld [vmem:[#allocation2 + $0x860] sm:$0xf] }
 0x3bb   :  { %v3795_v59 = vadd.f32 %v3794_v0, %v3746_v34  ;;  %v8417_v34 = vld [vmem:[#allocation2 + $0x898] sm:$0xf] }
 0x3bc   :  { %v3843_v29 = vpop.f32.mrf.mxu3  ;;  %v3894_v26 = vpop.f32.mrf.mxu0  ;;  %4211 = vmatpush.bf16.msra.mxu3 %v8194_v58 }
 0x3bd   :  { %v3844_v15 = vadd.f32 %v3843_v29, %v3795_v59  ;;  %v3943_v18 = vpop.f32.mrf.mxu1  ;;  %v12655_v59 = vld [vmem:[#allocation58_spill] sm:$0xff]  ;;  %v8641_v29 = vld [vmem:[#allocation2 + $0xa58] sm:$0xf] }
 0x3bf   :  { %v3893_v42 = vadd.f32 %v3892_v9, %v3844_v15  ;;  %v12656_v9 = vld [vmem:[#allocation24_spill] sm:$0xff] }
 0x3c0   :  { %v9669_v15 = vld [vmem:[#allocation2 + $0xa70] sm:$0xf0] }
 0x3c1   :  { %v11279_v1 = vadd.f32 %v3941_v40, %v3893_v42  ;;  %v9613_v40 = vld [vmem:[#allocation2 + $0x8b0] sm:$0xf0]  ;;  %v12657_v42 = vld [vmem:[#allocation75_spill] sm:$0xff] }
 0x3c2   :  { %v3796_v6 = vpop.f32.mrf.mxu2 }
 0x3c3   :  { %v3797_v49 = vadd.f32 %v3796_v6, %v3748_v11  ;;  %v8418_v11 = vor.u32 %v9613_v40, %v8417_v34  ;;  %v8642_v6 = vor.u32 %v9669_v15, %v8641_v29  ;;  %v8390_v34 = vor.u32 %v9606_v31, %v8389_v25  ;;  %v8361_v15 = vld [vmem:[#allocation2 + $0x828] sm:$0xf]  ;;  %v8109_v31 = vld [vmem:[#allocation2 + $0x630] sm:$0xf]  ;;  %v9592_v25 = vld [vmem:[#allocation2 + $0x808] sm:$0xf0] }
 0x3c4   :  { %v3845_v37 = vpop.f32.mrf.mxu3  ;;  %v3897_v7 = vpop.f32.mrf.mxu0 }
 0x3c5   :  { %v3846_v47 = vadd.f32 %v3845_v37, %v3797_v49  ;;  %v3946_v39 = vpop.f32.mrf.mxu1  ;;  %v7801_v37 = vld [vmem:[#allocation2 + $0x3c8] sm:$0xf]  ;;  %v9459_v49 = vld [vmem:[#allocation2 + $0x3e0] sm:$0xf0]  ;;  %4260 = vmatpush.bf16.msra.mxu0 %v8418_v11  ;;  %4309 = vmatpush.bf16.msra.mxu1 %v8642_v6 }
 0x3c6   :  { %v7802_v30 = vor.u32 %v9459_v49, %v7801_v37  ;;  %v8585_v11 = vld [vmem:[#allocation2 + $0x9e8] sm:$0xf] }
 0x3c7   :  { %v3895_v0 = vadd.f32 %v3894_v26, %v3846_v47  ;;  %3994 = vmatmul.bf16.gmra.mxu2 %v12655_v59  ;;  %4092 = vmatmul.bf16.gmra.mxu0 %v12656_v9  ;;  %v8165_v47 = vld [vmem:[#allocation2 + $0x6a0] sm:$0xf] }
 0x3c8   :  { %4141 = vmatmul.bf16.gmra.mxu1 %v12589_v24  ;;  %4168 = vmatpush.bf16.msra.mxu2 %v7802_v30  ;;  %v8613_v24 = vld [vmem:[#allocation2 + $0xa20] sm:$0xf]  ;;  %v9655_v30 = vld [vmem:[#allocation2 + $0xa00] sm:$0xf0] }
 0x3c9   :  { %8707 = vmatmul.msk.bf16.gmra.mxu3 %vm2667_vm0, %v12657_v42  ;;  %v11288_v12 = vadd.f32 %v3943_v18, %v3895_v0  ;;  %v8166_v42 = vor.u32 %v9550_v22, %v8165_v47  ;;  %v8614_v40 = vor.u32 %v9662_v44, %v8613_v24  ;;  %4261 = vmatpush.bf16.msra.mxu0 %v8390_v34  ;;  %v8137_v18 = vld [vmem:[#allocation2 + $0x668] sm:$0xf]  ;;  %v9543_v0 = vld [vmem:[#allocation2 + $0x680] sm:$0xf0]  ;;  %v8557_v34 = vld [vmem:[#allocation2 + $0x9b0] sm:$0xf] }
 0x3ca   :  { %v3799_v26 = vpop.f32.mrf.mxu2  ;;  %v8138_v49 = vor.u32 %v9543_v0, %v8137_v18  ;;  %v3753_v47 = vadd.f32 %v11185_v48, %v11226_v2 }
 0x3cb   :  { %v3800_v9 = vadd.f32 %v3799_v26, %v3751_v35  ;;  %4212 = vmatpush.bf16.msra.mxu3 %v8166_v42  ;;  %4310 = vmatpush.bf16.msra.mxu1 %v8614_v40  ;;  %v9599_v35 = vld [vmem:[#allocation2 + $0x840] sm:$0xf0]  ;;  %v8586_v26 = vor.u32 %v9655_v30, %v8585_v11  ;;  %v9648_v40 = vld [vmem:[#allocation2 + $0x9c8] sm:$0xf0] }
 0x3cc   :  { %v3848_v21 = vpop.f32.mrf.mxu3  ;;  %v3899_v59 = vpop.f32.mrf.mxu0  ;;  %v8362_v6 = vor.u32 %v9599_v35, %v8361_v15  ;;  %v8558_v0 = vor.u32 %v9648_v40, %v8557_v34  ;;  %v3756_v35 = vadd.f32 %v11188_v45, %v11226_v2  ;;  %v12658_v30 = vld [vmem:[#allocation62_spill] sm:$0xff] }
 0x3cd   :  { %v3849_v29 = vadd.f32 %v3848_v21, %v3800_v9  ;;  %v3948_v58 = vpop.f32.mrf.mxu1  ;;  %v9536_v21 = vld [vmem:[#allocation2 + $0x648] sm:$0xf0]  ;;  %v8333_v9 = vld [vmem:[#allocation2 + $0x7f0] sm:$0xf]  ;;  %v8053_v34 = vld [vmem:[#allocation2 + $0x5c0] sm:$0xf] }
 0x3ce   :  { %4262 = vmatpush.bf16.msra.mxu0 %v8362_v6  ;;  %v8110_v22 = vor.u32 %v9536_v21, %v8109_v31  ;;  %v8334_v18 = vor.u32 %v9592_v25, %v8333_v9  ;;  %v12659_v6 = vld [vmem:[#allocation28_spill] sm:$0xff]  ;;  %v9522_v40 = vld [vmem:[#allocation2 + $0x5d8] sm:$0xf0] }
 0x3cf   :  { %v3898_v37 = vadd.f32 %v3897_v7, %v3849_v29  ;;  %4213 = vmatpush.bf16.msra.mxu3 %v8138_v49  ;;  %4311 = vmatpush.bf16.msra.mxu1 %v8586_v26  ;;  %v8305_v49 = vld [vmem:[#allocation2 + $0x7b8] sm:$0xf]  ;;  %v9641_v31 = vld [vmem:[#allocation2 + $0x990] sm:$0xf0]  ;;  %v7773_v9 = vld [vmem:[#allocation2 + $0x390] sm:$0xf] }
 0x3d0   :  { %v12660_v21 = vld [vmem:[#allocation76_spill] sm:$0xff] }
 0x3d1   :  { %v11292_v24 = vadd.f32 %v3946_v39, %v3898_v37  ;;  %v8081_v39 = vld [vmem:[#allocation2 + $0x5f8] sm:$0xf]  ;;  %v9529_v37 = vld [vmem:[#allocation2 + $0x610] sm:$0xf0] }
 0x3d2   :  { %v3801_v44 = vpop.f32.mrf.mxu2  ;;  %4263 = vmatpush.bf16.msra.mxu0 %v8334_v18  ;;  %v8082_v26 = vor.u32 %v9529_v37, %v8081_v39  ;;  %v8277_v18 = vld [vmem:[#allocation2 + $0x780] sm:$0xf]  ;;  %v8054_v39 = vor.u32 %v9522_v40, %v8053_v34  ;;  %v9578_v37 = vld [vmem:[#allocation2 + $0x798] sm:$0xf0]  ;;  %v3758_v34 = vadd.f32 %v11197_v56, %v11226_v2  ;;  %v7997_v40 = vld [vmem:[#allocation2 + $0x550] sm:$0xf] }
 0x3d3   :  { %v3802_v42 = vadd.f32 %v3801_v44, %v3753_v47  ;;  %4214 = vmatpush.bf16.msra.mxu3 %v8110_v22  ;;  %4312 = vmatpush.bf16.msra.mxu1 %v8558_v0  ;;  %v9585_v47 = vld [vmem:[#allocation2 + $0x7d0] sm:$0xf0]  ;;  %v8529_v44 = vld [vmem:[#allocation2 + $0x978] sm:$0xf] }
 0x3d4   :  { %v3850_v7 = vpop.f32.mrf.mxu3  ;;  %v3902_v29 = vpop.f32.mrf.mxu0  ;;  %v8530_v22 = vor.u32 %v9641_v31, %v8529_v44  ;;  %v8249_v31 = vld [vmem:[#allocation2 + $0x748] sm:$0xf] }
 0x3d5   :  { %v3851_v15 = vadd.f32 %v3850_v7, %v3802_v42  ;;  %v3951_v48 = vpop.f32.mrf.mxu1  ;;  %v9452_v42 = vld [vmem:[#allocation2 + $0x3a8] sm:$0xf0]  ;;  %v8306_v7 = vor.u32 %v9585_v47, %v8305_v49  ;;  %v8278_v49 = vor.u32 %v9578_v37, %v8277_v18 }
 0x3d6   :  { %v7774_v25 = vor.u32 %v9452_v42, %v7773_v9  ;;  %v9508_v18 = vld [vmem:[#allocation2 + $0x568] sm:$0xf0] }
 0x3d7   :  { %v3900_v11 = vadd.f32 %v3899_v59, %v3851_v15  ;;  %3999 = vmatmul.bf16.gmra.mxu2 %v12658_v30  ;;  %4097 = vmatmul.bf16.gmra.mxu0 %v12659_v6  ;;  %v8501_v6 = vld [vmem:[#allocation2 + $0x940] sm:$0xf]  ;;  %v9564_v37 = vld [vmem:[#allocation2 + $0x728] sm:$0xf0] }
 0x3d8   :  { %4146 = vmatmul.bf16.gmra.mxu1 %v12594_v43  ;;  %4215 = vmatpush.bf16.msra.mxu3 %v8082_v26  ;;  %v9634_v43 = vld [vmem:[#allocation2 + $0x958] sm:$0xf0] }
 0x3d9   :  { %8708 = vmatmul.msk.bf16.gmra.mxu3 %vm2667_vm0, %v12660_v21  ;;  %v11301_v45 = vadd.f32 %v3948_v58, %v3900_v11  ;;  %4264 = vmatpush.bf16.msra.mxu0 %v8306_v7  ;;  %v8502_v47 = vor.u32 %v9634_v43, %v8501_v6  ;;  %v8025_v58 = vld [vmem:[#allocation2 + $0x588] sm:$0xf]  ;;  %v9515_v11 = vld [vmem:[#allocation2 + $0x5a0] sm:$0xf0] }
 0x3da   :  { %v3804_v59 = vpop.f32.mrf.mxu2  ;;  %4313 = vmatpush.bf16.msra.mxu1 %v8530_v22  ;;  %4169 = vmatpush.bf16.msra.mxu2 %v7774_v25  ;;  %v8026_v42 = vor.u32 %v9515_v11, %v8025_v58  ;;  %v8473_v7 = vld [vmem:[#allocation2 + $0x908] sm:$0xf]  ;;  %v9627_v22 = vld [vmem:[#allocation2 + $0x920] sm:$0xf0] }
 0x3db   :  { %v3805_v0 = vadd.f32 %v3804_v59, %v3756_v35  ;;  %v9571_v35 = vld [vmem:[#allocation2 + $0x760] sm:$0xf0]  ;;  %v8474_v59 = vor.u32 %v9627_v22, %v8473_v7 }
 0x3dc   :  { %v3853_v15 = vpop.f32.mrf.mxu3  ;;  %v3904_v21 = vpop.f32.mrf.mxu0  ;;  %4216 = vmatpush.bf16.msra.mxu3 %v8054_v39  ;;  %v8250_v25 = vor.u32 %v9571_v35, %v8249_v31  ;;  %v7998_v39 = vor.u32 %v9508_v18, %v7997_v40  ;;  %v9676_v35 = vld [vmem:[#allocation2 + $0xaa8] sm:$0xf0]  ;;  %v3763_v18 = vadd.f32 %v11209_v16, %v11226_v2 }
 0x3dd   :  { %v3854_v44 = vadd.f32 %v3853_v15, %v3805_v0  ;;  %v3953_v26 = vpop.f32.mrf.mxu1  ;;  %4265 = vmatpush.bf16.msra.mxu0 %v8278_v49  ;;  %v8221_v0 = vld [vmem:[#allocation2 + $0x710] sm:$0xf] }
 0x3de   :  { %4314 = vmatpush.bf16.msra.mxu1 %v8502_v47  ;;  %v8445_v49 = vld [vmem:[#allocation2 + $0x8d0] sm:$0xf]  ;;  %v9620_v47 = vld [vmem:[#allocation2 + $0x8e8] sm:$0xf0]  ;;  %v8222_v58 = vor.u32 %v9564_v37, %v8221_v0 }
 0x3df   :  { %v3903_v9 = vadd.f32 %v3902_v29, %v3854_v44  ;;  %v8446_v11 = vor.u32 %v9620_v47, %v8445_v49  ;;  %v3766_v47 = vadd.f32 %v11212_v46, %v11226_v2  ;;  %v3768_v46 = vadd.f32 %v11221_v53, %v11226_v2 }
 0x3e0   :  { %4217 = vmatpush.bf16.msra.mxu3 %v8026_v42  ;;  %v8669_v42 = vld [vmem:[#allocation2 + $0xa90] sm:$0xf] }
 0x3e1   :  { %v11305_v43 = vadd.f32 %v3951_v48, %v3903_v9  ;;  %4266 = vmatpush.bf16.msra.mxu0 %v8250_v25  ;;  %v3761_v48 = vadd.f32 %v11200_v32, %v11226_v2  ;;  %v8670_v7 = vor.u32 %v9676_v35, %v8669_v42  ;;  %v11332_v35 = vperm.slane %v11223_v61, 4  ;;  %v12663_v2 = vld [vmem:[#allocation41_spill] sm:$0xff] }
 0x3e2   :  { %v3806_v6 = vpop.f32.mrf.mxu2  ;;  %4315 = vmatpush.bf16.msra.mxu1 %v8474_v59 }
 0x3e3   :  { %v3807_v15 = vadd.f32 %v3806_v6, %v3758_v34  ;;  %4365 = vmatpush.bf16.msrb.mxu2 %v8670_v7 }
 0x3e4   :  { %v3855_v29 = vpop.f32.mrf.mxu3  ;;  %v3907_v44 = vpop.f32.mrf.mxu0  ;;  %4218 = vmatpush.bf16.msra.mxu3 %v7998_v39 }
 0x3e5   :  { %v3856_v31 = vadd.f32 %v3855_v29, %v3807_v15  ;;  %v3956_v56 = vpop.f32.mrf.mxu1  ;;  %4267 = vmatpush.bf16.msra.mxu0 %v8222_v58 }
 0x3e6   :  { %4316 = vmatpush.bf16.msra.mxu1 %v8446_v11 }
 0x3e7   :  { %v3905_v9 = vadd.f32 %v3904_v21, %v3856_v31  ;;  %4004 = vmatmul.bf16.gmra.mxu2 %v10586_v17  ;;  %4102 = vmatmul.bf16.gmra.mxu0 %v12598_v62 }
 0x3e8   :  { %4151 = vmatmul.bf16.gmra.mxu1 %v12634_v20 }
 0x3e9   :  { %8709 = vmatmul.msk.bf16.gmra.mxu3 %vm2667_vm0, %v10772_v41  ;;  %v11314_v22 = vadd.f32 %v3953_v26, %v3905_v9 }
 0x3ea   :  { %v3809_v25 = vpop.f32.mrf.mxu2 }
 0x3eb   :  { %v3810_v59 = vadd.f32 %v3809_v25, %v3761_v48 }
 0x3ec   :  { %v3858_v34 = vpop.f32.mrf.mxu3  ;;  %v3909_v32 = vpop.f32.mrf.mxu0 }
 0x3ed   :  { %v3859_v21 = vadd.f32 %v3858_v34, %v3810_v59  ;;  %v3958_v6 = vpop.f32.mrf.mxu1 }
 0x3ef   :  { %v3908_v40 = vadd.f32 %v3907_v44, %v3859_v21 }
 0x3f1   :  { %v11318_v0 = vadd.f32 %v3956_v56, %v3908_v40 }
 0x3f2   :  { %v3811_v15 = vpop.f32.mrf.mxu2 }
 0x3f3   :  { %v3812_v29 = vadd.f32 %v3811_v15, %v3763_v18 }
 0x3f4   :  { %v3860_v39 = vpop.f32.mrf.mxu3  ;;  %v3912_v37 = vpop.f32.mrf.mxu0 }
 0x3f5   :  { %v3861_v49 = vadd.f32 %v3860_v39, %v3812_v29  ;;  %v3961_v26 = vpop.f32.mrf.mxu1  ;;  %v12661_v29 = vld [vmem:[#allocation39_spill] sm:$0xff]  ;;  %v12662_v39 = vld [vmem:[#allocation40_spill] sm:$0xff] }
 0x3f7   :  { %v3910_v58 = vadd.f32 %v3909_v32, %v3861_v49  ;;  %4009 = vmatmul.bf16.gmra.mxu2 %v10634_v8  ;;  %4107 = vmatmul.bf16.gmra.mxu0 %v12602_v14 }
 0x3f8   :  { %4156 = vmatmul.bf16.gmra.mxu1 %v12638_v51 }
 0x3f9   :  { %8710 = vmatmul.msk.bf16.gmra.mxu3 %vm2667_vm0, %v10791_v28  ;;  %v11327_v16 = vadd.f32 %v3958_v6, %v3910_v58 }
 0x3fa   :  { %v3814_v44 = vpop.f32.mrf.mxu2 }
 0x3fb   :  { %v3815_v11 = vadd.f32 %v3814_v44, %v3766_v47 }
 0x3fc   :  { %v3863_v31 = vpop.f32.mrf.mxu3  ;;  %v3914_v56 = vpop.f32.mrf.mxu0 }
 0x3fd   :  { %v3864_v48 = vadd.f32 %v3863_v31, %v3815_v11  ;;  %v3963_v9 = vpop.f32.mrf.mxu1 }
 0x3ff   :  { %v3913_v42 = vadd.f32 %v3912_v37, %v3864_v48 }
 0x401   :  { %v11334_v7 = vadd.f32 %v3961_v26, %v3913_v42 }
 0x402   :  { %v3816_v25 = vpop.f32.mrf.mxu2 }
 0x403   :  { %v3817_v59 = vadd.f32 %v3816_v25, %v3768_v46 }
 0x404   :  { %v3865_v34 = vpop.f32.mrf.mxu3  ;;  %v4073_v32 = vpop.f32.mrf.mxu0 }
 0x405   :  { %v3866_v21 = vadd.f32 %v3865_v34, %v3817_v59  ;;  %v4074_v6 = vadd.f32 %v4073_v32, %v11332_v35  ;;  %v4122_v40 = vpop.f32.mrf.mxu1  ;;  %v12664_v32 = vld [vmem:[#allocation45_spill] sm:$0xff] }
 0x407   :  { %v3915_v18 = vadd.f32 %v3914_v56, %v3866_v21  ;;  %v11337_v15 = vadd.f32 %v4122_v40, %v4074_v6  ;;  %4170 = vmatmul.bf16.vlgmr.msra.gmra.mxu2 %v12661_v29  ;;  %4268 = vmatmul.bf16.vlgmr.msra.gmra.mxu0 %v12662_v39 }
 0x408   :  { %4317 = vmatmul.bf16.vlgmr.msra.gmra.mxu1 %v12642_v10 }
 0x409   :  { %4219 = vmatmul.bf16.vlgmr.msra.gmra.mxu3 %v12663_v2  ;;  %v11343_v61 = vadd.f32 %v3963_v9, %v3915_v18 }
 0x40a   :  { %v3975_v53 = vpop.f32.mrf.mxu2 }
 0x40b   :  { %v3976_v37 = vadd.f32 %v3975_v53, %v11240_v38 }
 0x40c   :  { %v4024_v49 = vpop.f32.mrf.mxu3  ;;  %v4075_v26 = vpop.f32.mrf.mxu0 }
 0x40d   :  { %v4025_v47 = vadd.f32 %v4024_v49, %v3976_v37  ;;  %v4076_v58 = vadd.f32 %v4075_v26, %v11332_v35  ;;  %v4124_v44 = vpop.f32.mrf.mxu1 }
 0x40f   :  { %v11347_v11 = vadd.f32 %v4124_v44, %v4076_v58  ;;  %v5096_v59 = vmax.f32 %v4025_v47, 0.0 }
 0x412   :  { %v3977_v31 = vpop.f32.mrf.mxu2 }
 0x413   :  { %v3978_v56 = vadd.f32 %v3977_v31, %v11249_v54 }
 0x414   :  { %v4026_v48 = vpop.f32.mrf.mxu3  ;;  %v4078_v42 = vpop.f32.mrf.mxu0 }
 0x415   :  { %v4027_v46 = vadd.f32 %v4026_v48, %v3978_v56  ;;  %v4079_v9 = vadd.f32 %v4078_v42, %v11332_v35  ;;  %v4127_v25 = vpop.f32.mrf.mxu1 }
 0x417   :  { %v5103_v34 = vmax.f32 %v4027_v46, 0.0  ;;  %v11351_v38 = vadd.f32 %v4127_v25, %v4079_v9  ;;  %4175 = vmatmul.bf16.gmra.mxu2 %v12576_v55  ;;  %4273 = vmatmul.bf16.gmra.mxu0 %v12610_v13 }
 0x418   :  { %4322 = vmatmul.bf16.gmra.mxu1 %v12646_v52 }
 0x419   :  { %4224 = vmatmul.bf16.gmra.mxu3 %v12664_v32  ;;  %v11357_v21 = vpack.c.bf16 %v5103_v34, %v5096_v59 }
 0x41a   :  { %v3980_v54 = vpop.f32.mrf.mxu2 }
 0x41b   :  { %12665 = vst [vmem:[#allocation41_spill] sm:$0xff] %v11357_v21  ;;  %v3981_v6 = vadd.f32 %v3980_v54, %v11253_v19 }
 0x41c   :  { %v4029_v40 = vpop.f32.mrf.mxu3  ;;  %v4080_v18 = vpop.f32.mrf.mxu0 }
 0x41d   :  { %v4030_v53 = vadd.f32 %v4029_v40, %v3981_v6  ;;  %v4081_v37 = vadd.f32 %v4080_v18, %v11332_v35  ;;  %v4129_v49 = vpop.f32.mrf.mxu1 }
 0x41f   :  { %v11361_v26 = vadd.f32 %v4129_v49, %v4081_v37  ;;  %v5110_v46 = vmax.f32 %v4030_v53, 0.0 }
 0x422   :  { %v3982_v47 = vpop.f32.mrf.mxu2 }
 0x423   :  { %v3983_v58 = vadd.f32 %v3982_v47, %v11262_v5 }
 0x424   :  { %v4031_v44 = vpop.f32.mrf.mxu3  ;;  %v4083_v31 = vpop.f32.mrf.mxu0 }
 0x425   :  { %v4032_v56 = vadd.f32 %v4031_v44, %v3983_v58  ;;  %v4084_v48 = vadd.f32 %v4083_v31, %v11332_v35  ;;  %v4132_v42 = vpop.f32.mrf.mxu1 }
 0x427   :  { %v5117_v9 = vmax.f32 %v4032_v56, 0.0  ;;  %v11365_v19 = vadd.f32 %v4132_v42, %v4084_v48  ;;  %4180 = vmatmul.bf16.gmra.mxu2 %v12580_v63  ;;  %4278 = vmatmul.bf16.gmra.mxu0 %v12613_v50 }
 0x428   :  { %4327 = vmatmul.bf16.gmra.mxu1 %v12649_v3 }
 0x429   :  { %4229 = vmatmul.bf16.gmra.mxu3 %v12553_v27  ;;  %v11371_v25 = vpack.c.bf16 %v5117_v9, %v5110_v46 }
 0x42a   :  { %v3985_v5 = vpop.f32.mrf.mxu2 }
 0x42b   :  { %12666 = vst [vmem:[#allocation45_spill] sm:$0xff] %v11371_v25  ;;  %v3986_v59 = vadd.f32 %v3985_v5, %v11266_v36 }
 0x42c   :  { %v4034_v34 = vpop.f32.mrf.mxu3  ;;  %v4085_v54 = vpop.f32.mrf.mxu0 }
 0x42d   :  { %v4035_v6 = vadd.f32 %v4034_v34, %v3986_v59  ;;  %v4086_v40 = vadd.f32 %v4085_v54, %v11332_v35  ;;  %v4134_v18 = vpop.f32.mrf.mxu1 }
 0x42f   :  { %v11375_v53 = vadd.f32 %v4134_v18, %v4086_v40  ;;  %v5124_v48 = vmax.f32 %v4035_v6, 0.0 }
 0x432   :  { %v3987_v37 = vpop.f32.mrf.mxu2 }
 0x433   :  { %v3988_v49 = vadd.f32 %v3987_v37, %v11275_v33 }
 0x434   :  { %v4036_v47 = vpop.f32.mrf.mxu3  ;;  %v4088_v58 = vpop.f32.mrf.mxu0 }
 0x435   :  { %v4037_v44 = vadd.f32 %v4036_v47, %v3988_v49  ;;  %v4089_v31 = vadd.f32 %v4088_v58, %v11332_v35  ;;  %v4137_v56 = vpop.f32.mrf.mxu1 }
 0x437   :  { %v5131_v42 = vmax.f32 %v4037_v44, 0.0  ;;  %v11379_v36 = vadd.f32 %v4137_v56, %v4089_v31  ;;  %4185 = vmatmul.bf16.gmra.mxu2 %v12584_v23  ;;  %4283 = vmatmul.bf16.gmra.mxu0 %v12616_v60  ;;  %v9386_v56 = vld [vmem:[#allocation2 + $0x19c] sm:$0xf]  ;;  %v7943_v60 = vld [vmem:[#allocation2 + $0x4fc] sm:$0xf0] }
 0x438   :  { %4332 = vmatmul.bf16.gmra.mxu1 %v12652_v4 }
 0x439   :  { %4234 = vmatmul.bf16.gmra.mxu3 %v12557_v57  ;;  %v11385_v46 = vpack.c.bf16 %v5131_v42, %v5124_v48  ;;  %v7523_v48 = vld [vmem:[#allocation2 + $0x1b4] sm:$0xf0] }
 0x43a   :  { %v3990_v33 = vpop.f32.mrf.mxu2 }
 0x43b   :  { %12667 = vst [vmem:[#allocation98_spill] sm:$0xff] %v11385_v46  ;;  %v3991_v9 = vadd.f32 %v3990_v33, %v11279_v1  ;;  %v9442_v1 = vld [vmem:[#allocation2 + $0x35c] sm:$0xf] }
 0x43c   :  { %v4039_v5 = vpop.f32.mrf.mxu3  ;;  %v4090_v59 = vpop.f32.mrf.mxu0 }
 0x43d   :  { %v4040_v34 = vadd.f32 %v4039_v5, %v3991_v9  ;;  %v4091_v54 = vadd.f32 %v4090_v59, %v11332_v35  ;;  %v4139_v6 = vpop.f32.mrf.mxu1  ;;  %v12668_v5 = vld [vmem:[#allocation55_spill] sm:$0xff]  ;;  %v12669_v59 = vld [vmem:[#allocation56_spill] sm:$0xff] }
 0x43f   :  { %v11389_v40 = vadd.f32 %v4139_v6, %v4091_v54  ;;  %v5138_v42 = vmax.f32 %v4040_v34, 0.0  ;;  %v7526_v54 = vor.u32 %v9386_v56, %v7523_v48  ;;  %v7747_v6 = vld [vmem:[#allocation2 + $0x374] sm:$0xf0] }
 0x441   :  { %4407 = vmatpush.bf16.msrb.mxu3 %v7526_v54 }
 0x442   :  { %v3992_v18 = vpop.f32.mrf.mxu2 }
 0x443   :  { %v3993_v37 = vadd.f32 %v3992_v18, %v11288_v12  ;;  %v9498_v12 = vld [vmem:[#allocation2 + $0x51c] sm:$0xf] }
 0x444   :  { %v4041_v49 = vpop.f32.mrf.mxu3  ;;  %v4093_v47 = vpop.f32.mrf.mxu0  ;;  %v12670_v18 = vld [vmem:[#allocation57_spill] sm:$0xff] }
 0x445   :  { %v4042_v58 = vadd.f32 %v4041_v49, %v3993_v37  ;;  %v4094_v44 = vadd.f32 %v4093_v47, %v11332_v35  ;;  %v4142_v31 = vpop.f32.mrf.mxu1  ;;  %v12671_v37 = vld [vmem:[#allocation58_spill] sm:$0xff]  ;;  %v7750_v49 = vor.u32 %v9442_v1, %v7747_v6  ;;  %v7971_v47 = vld [vmem:[#allocation2 + $0x534] sm:$0xf0] }
 0x446   :  { %v7974_v46 = vor.u32 %v9498_v12, %v7971_v47  ;;  %v9372_v12 = vld [vmem:[#allocation2 + $0x12c] sm:$0xf] }
 0x447   :  { %v5145_v33 = vmax.f32 %v4042_v58, 0.0  ;;  %v11393_v9 = vadd.f32 %v4142_v31, %v4094_v44  ;;  %4190 = vmatmul.bf16.gmra.mxu2 %v12668_v5  ;;  %4288 = vmatmul.bf16.gmra.mxu0 %v12669_v59  ;;  %v9379_v58 = vld [vmem:[#allocation2 + $0x164] sm:$0xf]  ;;  %v7495_v44 = vld [vmem:[#allocation2 + $0x17c] sm:$0xf0] }
 0x448   :  { %4337 = vmatmul.bf16.gmra.mxu1 %v12671_v37  ;;  %4456 = vmatpush.bf16.msrb.mxu0 %v7750_v49  ;;  %v9435_v31 = vld [vmem:[#allocation2 + $0x324] sm:$0xf]  ;;  %v7498_v48 = vor.u32 %v9379_v58, %v7495_v44  ;;  %v7719_v59 = vld [vmem:[#allocation2 + $0x33c] sm:$0xf0]  ;;  %v7467_v49 = vld [vmem:[#allocation2 + $0x144] sm:$0xf0] }
 0x449   :  { %4239 = vmatmul.bf16.gmra.mxu3 %v12670_v18  ;;  %v11399_v25 = vpack.c.bf16 %v5145_v33, %v5138_v42  ;;  %4505 = vmatpush.bf16.msrb.mxu1 %v7974_v46  ;;  %v9491_v18 = vld [vmem:[#allocation2 + $0x4e4] sm:$0xf]  ;;  %v7722_v1 = vor.u32 %v9435_v31, %v7719_v59  ;;  %v9428_v47 = vld [vmem:[#allocation2 + $0x2ec] sm:$0xf]  ;;  %v7691_v46 = vld [vmem:[#allocation2 + $0x304] sm:$0xf0] }
 0x44a   :  { %v3995_v34 = vpop.f32.mrf.mxu2  ;;  %v7946_v6 = vor.u32 %v9491_v18, %v7943_v60  ;;  %4408 = vmatpush.bf16.msrb.mxu3 %v7498_v48  ;;  %v7694_v58 = vor.u32 %v9428_v47, %v7691_v46  ;;  %v7915_v44 = vld [vmem:[#allocation2 + $0x4c4] sm:$0xf0]  ;;  %v7439_v18 = vld [vmem:[#allocation2 + $0x10c] sm:$0xf0] }
 0x44b   :  { %12672 = vst [vmem:[#allocation99_spill] sm:$0xff] %v11399_v25  ;;  %v3996_v21 = vadd.f32 %v3995_v34, %v11292_v24  ;;  %v7470_v24 = vor.u32 %v9372_v12, %v7467_v49  ;;  %v9484_v34 = vld [vmem:[#allocation2 + $0x4ac] sm:$0xf] }
 0x44c   :  { %v4044_v56 = vpop.f32.mrf.mxu3  ;;  %v4095_v37 = vpop.f32.mrf.mxu0  ;;  %4457 = vmatpush.bf16.msrb.mxu0 %v7722_v1  ;;  %v7918_v59 = vor.u32 %v9484_v34, %v7915_v44  ;;  %v7663_v1 = vld [vmem:[#allocation2 + $0x2cc] sm:$0xf0]  ;;  %v9358_v34 = vld [vmem:[#allocation2 + $0xbc] sm:$0xf] }
 0x44d   :  { %v4045_v54 = vadd.f32 %v4044_v56, %v3996_v21  ;;  %v4096_v42 = vadd.f32 %v4095_v37, %v11332_v35  ;;  %v4144_v33 = vpop.f32.mrf.mxu1  ;;  %4506 = vmatpush.bf16.msrb.mxu1 %v7946_v6  ;;  %v9365_v21 = vld [vmem:[#allocation2 + $0xf4] sm:$0xf]  ;;  %v7887_v6 = vld [vmem:[#allocation2 + $0x48c] sm:$0xf0]  ;;  %v9414_v44 = vld [vmem:[#allocation2 + $0x27c] sm:$0xf] }
 0x44e   :  { %4409 = vmatpush.bf16.msrb.mxu3 %v7470_v24  ;;  %v9421_v37 = vld [vmem:[#allocation2 + $0x2b4] sm:$0xf]  ;;  %v7442_v48 = vor.u32 %v9365_v21, %v7439_v18 }
 0x44f   :  { %v11403_v25 = vadd.f32 %v4144_v33, %v4096_v42  ;;  %v9477_v42 = vld [vmem:[#allocation2 + $0x474] sm:$0xf]  ;;  %v7666_v12 = vor.u32 %v9421_v37, %v7663_v1  ;;  %v5152_v4 = vmax.f32 %v4045_v54, 0.0  ;;  %v7635_v37 = vld [vmem:[#allocation2 + $0x294] sm:$0xf0] }
 0x450   :  { %4458 = vmatpush.bf16.msrb.mxu0 %v7694_v58  ;;  %v7890_v46 = vor.u32 %v9477_v42, %v7887_v6  ;;  %v7411_v58 = vld [vmem:[#allocation2 + $0xd4] sm:$0xf0]  ;;  %v12674_v21 = vld [vmem:[#allocation60_spill] sm:$0xff] }
 0x451   :  { %4507 = vmatpush.bf16.msrb.mxu1 %v7918_v59  ;;  %v12673_v59 = vld [vmem:[#allocation59_spill] sm:$0xff]  ;;  %v7414_v18 = vor.u32 %v9358_v34, %v7411_v58  ;;  %v7859_v1 = vld [vmem:[#allocation2 + $0x454] sm:$0xf0]  ;;  %v7607_v58 = vld [vmem:[#allocation2 + $0x25c] sm:$0xf0] }
 0x452   :  { %v3997_v60 = vpop.f32.mrf.mxu2  ;;  %4410 = vmatpush.bf16.msrb.mxu3 %v7442_v48  ;;  %v7638_v48 = vor.u32 %v9414_v44, %v7635_v37 }
 0x453   :  { %v3998_v31 = vadd.f32 %v3997_v60, %v11301_v45 }
 0x454   :  { %v4046_v56 = vpop.f32.mrf.mxu3  ;;  %v4098_v33 = vpop.f32.mrf.mxu0  ;;  %4459 = vmatpush.bf16.msrb.mxu0 %v7666_v12  ;;  %v7383_v12 = vld [vmem:[#allocation2 + $0x9c] sm:$0xf0] }
 0x455   :  { %v4047_v49 = vadd.f32 %v4046_v56, %v3998_v31  ;;  %v4099_v47 = vadd.f32 %v4098_v33, %v11332_v35  ;;  %v4147_v24 = vpop.f32.mrf.mxu1  ;;  %v9470_v31 = vld [vmem:[#allocation2 + $0x43c] sm:$0xf]  ;;  %4508 = vmatpush.bf16.msrb.mxu1 %v7890_v46  ;;  %v9351_v33 = vld [vmem:[#allocation2 + $0x84] sm:$0xf] }
 0x456   :  { %v12675_v56 = vld [vmem:[#allocation61_spill] sm:$0xff]  ;;  %4411 = vmatpush.bf16.msrb.mxu3 %v7414_v18  ;;  %v7862_v42 = vor.u32 %v9470_v31, %v7859_v1  ;;  %v7386_v34 = vor.u32 %v9351_v33, %v7383_v12  ;;  %v7355_v31 = vld [vmem:[#allocation2 + $0x64] sm:$0xf0]  ;;  %v9456_v33 = vld [vmem:[#allocation2 + $0x3cc] sm:$0xf] }
 0x457   :  { %v5159_v45 = vmax.f32 %v4047_v49, 0.0  ;;  %v11407_v60 = vadd.f32 %v4147_v24, %v4099_v47  ;;  %4195 = vmatmul.bf16.gmra.mxu2 %v12673_v59  ;;  %4293 = vmatmul.bf16.gmra.mxu0 %v12674_v21  ;;  %v9407_v49 = vld [vmem:[#allocation2 + $0x244] sm:$0xf] }
 0x458   :  { %4342 = vmatmul.bf16.gmra.mxu1 %v12658_v30  ;;  %4460 = vmatpush.bf16.msrb.mxu0 %v7638_v48  ;;  %v9463_v21 = vld [vmem:[#allocation2 + $0x404] sm:$0xf]  ;;  %v7610_v44 = vor.u32 %v9407_v49, %v7607_v58  ;;  %v9400_v48 = vld [vmem:[#allocation2 + $0x20c] sm:$0xf]  ;;  %v7551_v58 = vld [vmem:[#allocation2 + $0x1ec] sm:$0xf0] }
 0x459   :  { %4244 = vmatmul.bf16.gmra.mxu3 %v12675_v56  ;;  %v11413_v54 = vpack.c.bf16 %v5159_v45, %v5152_v4  ;;  %v7831_v56 = vld [vmem:[#allocation2 + $0x41c] sm:$0xf0]  ;;  %4509 = vmatpush.bf16.msrb.mxu1 %v7862_v42  ;;  %v9344_v45 = vld [vmem:[#allocation2 + $0x4c] sm:$0xf]  ;;  %v7327_v42 = vld [vmem:[#allocation2 + $0x2c] sm:$0xf0] }
 0x45a   :  { %v4000_v6 = vpop.f32.mrf.mxu2  ;;  %4412 = vmatpush.bf16.msrb.mxu3 %v7386_v34  ;;  %v7834_v4 = vor.u32 %v9463_v21, %v7831_v56 }
 0x45b   :  { %12676 = vst [vmem:[#allocation100_spill] sm:$0xff] %v11413_v54  ;;  %v4001_v47 = vadd.f32 %v4000_v6, %v11305_v43  ;;  %v7358_v43 = vor.u32 %v9344_v45, %v7355_v31  ;;  %v7579_v6 = vld [vmem:[#allocation2 + $0x224] sm:$0xf0] }
 0x45c   :  { %v4049_v24 = vpop.f32.mrf.mxu3  ;;  %v4100_v30 = vpop.f32.mrf.mxu0  ;;  %4461 = vmatpush.bf16.msrb.mxu0 %v7610_v44  ;;  %v7582_v12 = vor.u32 %v9400_v48, %v7579_v6  ;;  %v7803_v54 = vld [vmem:[#allocation2 + $0x3e4] sm:$0xf0]  ;;  %v9449_v44 = vld [vmem:[#allocation2 + $0x394] sm:$0xf] }
 0x45d   :  { %v4050_v37 = vadd.f32 %v4049_v24, %v4001_v47  ;;  %v4101_v46 = vadd.f32 %v4100_v30, %v11332_v35  ;;  %v4149_v18 = vpop.f32.mrf.mxu1  ;;  %4510 = vmatpush.bf16.msrb.mxu1 %v7834_v4  ;;  %v7806_v49 = vor.u32 %v9456_v33, %v7803_v54  ;;  %v9337_v30 = vld [vmem:[#allocation2 + $0x14] sm:$0xf] }
 0x45e   :  { %4413 = vmatpush.bf16.msrb.mxu3 %v7358_v43  ;;  %v9393_v24 = vld [vmem:[#allocation2 + $0x1d4] sm:$0xf]  ;;  %v7330_v34 = vor.u32 %v9337_v30, %v7327_v42  ;;  %v9554_v30 = vld [vmem:[#allocation2 + $0x6dc] sm:$0xf]  ;;  %v8195_v42 = vld [vmem:[#allocation2 + $0x6f4] sm:$0xf0] }
 0x45f   :  { %v11417_v1 = vadd.f32 %v4149_v18, %v4101_v46  ;;  %v7775_v46 = vld [vmem:[#allocation2 + $0x3ac] sm:$0xf0]  ;;  %v7554_v45 = vor.u32 %v9393_v24, %v7551_v58  ;;  %v5166_v43 = vmax.f32 %v4050_v37, 0.0  ;;  %v8198_v24 = vor.u32 %v9554_v30, %v8195_v42 }
 0x460   :  { %4462 = vmatpush.bf16.msrb.mxu0 %v7582_v12  ;;  %v7778_v54 = vor.u32 %v9449_v44, %v7775_v46  ;;  %v12678_v12 = vld [vmem:[#allocation64_spill] sm:$0xff] }
 0x461   :  { %4511 = vmatpush.bf16.msrb.mxu1 %v7806_v49  ;;  %4554 = vmatpush.bf16.msra.mxu2 %v8198_v24  ;;  %v12681_v24 = vld [vmem:[#allocation67_spill] sm:$0xff] }
 0x462   :  { %v4002_v47 = vpop.f32.mrf.mxu2  ;;  %4414 = vmatpush.bf16.msrb.mxu3 %v7330_v34 }
 0x463   :  { %v4003_v21 = vadd.f32 %v4002_v47, %v11314_v22  ;;  %v12677_v22 = vld [vmem:[#allocation63_spill] sm:$0xff]  ;;  %v12679_v47 = vld [vmem:[#allocation65_spill] sm:$0xff] }
 0x464   :  { %v4051_v56 = vpop.f32.mrf.mxu3  ;;  %v4103_v18 = vpop.f32.mrf.mxu0  ;;  %4463 = vmatpush.bf16.msrb.mxu0 %v7554_v45 }
 0x465   :  { %v4052_v31 = vadd.f32 %v4051_v56, %v4003_v21  ;;  %v4104_v48 = vadd.f32 %v4103_v18, %v11332_v35  ;;  %v4152_v4 = vpop.f32.mrf.mxu1  ;;  %4512 = vmatpush.bf16.msrb.mxu1 %v7778_v54 }
 0x467   :  { %v5173_v6 = vmax.f32 %v4052_v31, 0.0  ;;  %v11421_v33 = vadd.f32 %v4152_v4, %v4104_v48  ;;  %4200 = vmatmul.bf16.gmra.mxu2 %v12677_v22  ;;  %4298 = vmatmul.bf16.gmra.mxu0 %v12678_v12 }
 0x468   :  { %4347 = vmatmul.bf16.gmra.mxu1 %v10586_v17 }
 0x469   :  { %4249 = vmatmul.bf16.gmra.mxu3 %v12679_v47  ;;  %v11427_v49 = vpack.c.bf16 %v5173_v6, %v5166_v43 }
 0x46a   :  { %v4005_v21 = vpop.f32.mrf.mxu2 }
 0x46b   :  { %12680 = vst [vmem:[#allocation63_spill] sm:$0xff] %v11427_v49  ;;  %v4006_v37 = vadd.f32 %v4005_v21, %v11318_v0  ;;  %v12682_v21 = vld [vmem:[#allocation68_spill] sm:$0xff] }
 0x46c   :  { %v4054_v56 = vpop.f32.mrf.mxu3  ;;  %v4105_v34 = vpop.f32.mrf.mxu0 }
 0x46d   :  { %v4055_v58 = vadd.f32 %v4054_v56, %v4006_v37  ;;  %v4106_v44 = vadd.f32 %v4105_v34, %v11332_v35  ;;  %v4154_v46 = vpop.f32.mrf.mxu1  ;;  %v12683_v37 = vld [vmem:[#allocation69_spill] sm:$0xff]  ;;  %v9547_v56 = vld [vmem:[#allocation2 + $0x6a4] sm:$0xf] }
 0x46f   :  { %v11431_v18 = vadd.f32 %v4154_v46, %v4106_v44  ;;  %v5180_v30 = vmax.f32 %v4055_v58, 0.0 }
 0x472   :  { %v4007_v45 = vpop.f32.mrf.mxu2 }
 0x473   :  { %v4008_v31 = vadd.f32 %v4007_v45, %v11327_v16  ;;  %v8167_v16 = vld [vmem:[#allocation2 + $0x6bc] sm:$0xf0] }
 0x474   :  { %v4056_v48 = vpop.f32.mrf.mxu3  ;;  %v4108_v4 = vpop.f32.mrf.mxu0  ;;  %v8170_v34 = vor.u32 %v9547_v56, %v8167_v16 }
 0x475   :  { %v4057_v54 = vadd.f32 %v4056_v48, %v4008_v31  ;;  %v4109_v43 = vadd.f32 %v4108_v4, %v11332_v35  ;;  %v4157_v6 = vpop.f32.mrf.mxu1 }
 0x476   :  { %4555 = vmatpush.bf16.msra.mxu2 %v8170_v34  ;;  %v12687_v34 = vld [vmem:[#allocation23_spill] sm:$0xff] }
 0x477   :  { %v5187_v0 = vmax.f32 %v4057_v54, 0.0  ;;  %v11435_v42 = vadd.f32 %v4157_v6, %v4109_v43  ;;  %4205 = vmatmul.bf16.gmra.mxu2 %v12681_v24  ;;  %4303 = vmatmul.bf16.gmra.mxu0 %v12682_v21 }
 0x478   :  { %4352 = vmatmul.bf16.gmra.mxu1 %v10634_v8 }
 0x479   :  { %4254 = vmatmul.bf16.gmra.mxu3 %v12683_v37  ;;  %v11441_v44 = vpack.c.bf16 %v5187_v0, %v5180_v30 }
 0x47a   :  { %v4010_v46 = vpop.f32.mrf.mxu2 }
 0x47b   :  { %12684 = vst [vmem:[#allocation65_spill] sm:$0xff] %v11441_v44  ;;  %v4011_v45 = vadd.f32 %v4010_v46, %v11334_v7  ;;  %v12685_v44 = vld [vmem:[#allocation71_spill] sm:$0xff]  ;;  %v12686_v7 = vld [vmem:[#allocation25_spill] sm:$0xff] }
 0x47c   :  { %v4059_v58 = vpop.f32.mrf.mxu3  ;;  %v4110_v31 = vpop.f32.mrf.mxu0  ;;  %v8139_v46 = vld [vmem:[#allocation2 + $0x684] sm:$0xf0] }
 0x47d   :  { %v4060_v48 = vadd.f32 %v4059_v58, %v4011_v45  ;;  %v4111_v4 = vadd.f32 %v4110_v31, %v11332_v35  ;;  %v4159_v54 = vpop.f32.mrf.mxu1  ;;  %v9540_v35 = vld [vmem:[#allocation2 + $0x66c] sm:$0xf] }
 0x47e   :  { %v8142_v45 = vor.u32 %v9540_v35, %v8139_v46  ;;  %v12691_v46 = vld [vmem:[#allocation27_spill] sm:$0xff] }
 0x47f   :  { %v11445_v43 = vadd.f32 %v4159_v54, %v4111_v4  ;;  %v5194_v0 = vmax.f32 %v4060_v48, 0.0 }
 0x480   :  { %4556 = vmatpush.bf16.msra.mxu2 %v8142_v45 }
 0x482   :  { %v4012_v6 = vpop.f32.mrf.mxu2 }
 0x483   :  { %v4013_v49 = vadd.f32 %v4012_v6, %v11343_v61 }
 0x484   :  { %v4061_v21 = vpop.f32.mrf.mxu3  ;;  %v4269_v8 = vpop.f32.mrf.mxu0 }
 0x485   :  { %v4062_v56 = vadd.f32 %v4061_v21, %v4013_v49  ;;  %v4318_v30 = vpop.f32.mrf.mxu1 }
 0x487   :  { %v5201_v16 = vmax.f32 %v4062_v56, 0.0  ;;  %8711 = vmatmul.msk.bf16.vlgmr.msrb.gmra.mxu2 %vm2667_vm0, %v12685_v44  ;;  %4464 = vmatmul.bf16.vlgmr.msrb.gmra.mxu0 %v12686_v7 }
 0x488   :  { %4513 = vmatmul.bf16.vlgmr.msrb.gmra.mxu1 %v12661_v29 }
 0x489   :  { %4415 = vmatmul.bf16.vlgmr.msrb.gmra.mxu3 %v12687_v34  ;;  %v11453_v58 = vpack.c.bf16 %v5201_v16, %v5194_v0  ;;  %v12689_v16 = vld [vmem:[#allocation72_spill] sm:$0xff] }
 0x48a   :  { %v4171_v61 = vpop.f32.mrf.mxu2 }
 0x48b   :  { %12688 = vst [vmem:[#allocation101_spill] sm:$0xff] %v11453_v58  ;;  %v4172_v49 = vadd.f32 %v4171_v61, %v11337_v15  ;;  %v12690_v15 = vld [vmem:[#allocation29_spill] sm:$0xff] }
 0x48c   :  { %v4220_v21 = vpop.f32.mrf.mxu3  ;;  %v4271_v31 = vpop.f32.mrf.mxu0 }
 0x48d   :  { %v4221_v48 = vadd.f32 %v4220_v21, %v4172_v49  ;;  %v4320_v4 = vpop.f32.mrf.mxu1 }
 0x48f   :  { %v4270_v54 = vadd.f32 %v4269_v8, %v4221_v48  ;;  %v9533_v8 = vld [vmem:[#allocation2 + $0x634] sm:$0xf] }
 0x491   :  { %v11456_v6 = vadd.f32 %v4318_v30, %v4270_v54  ;;  %v8111_v30 = vld [vmem:[#allocation2 + $0x64c] sm:$0xf0] }
 0x492   :  { %v4173_v56 = vpop.f32.mrf.mxu2  ;;  %v8114_v45 = vor.u32 %v9533_v8, %v8111_v30  ;;  %v12694_v30 = vld [vmem:[#allocation31_spill] sm:$0xff] }
 0x493   :  { %v4174_v7 = vadd.f32 %v4173_v56, %v11347_v11 }
 0x494   :  { %v4222_v29 = vpop.f32.mrf.mxu3  ;;  %v4274_v34 = vpop.f32.mrf.mxu0  ;;  %4557 = vmatpush.bf16.msra.mxu2 %v8114_v45 }
 0x495   :  { %v4223_v37 = vadd.f32 %v4222_v29, %v4174_v7  ;;  %v4323_v35 = vpop.f32.mrf.mxu1 }
 0x497   :  { %v4272_v0 = vadd.f32 %v4271_v31, %v4223_v37  ;;  %8712 = vmatmul.msk.bf16.gmra.mxu2 %vm2667_vm0, %v12689_v16  ;;  %4469 = vmatmul.bf16.gmra.mxu0 %v12690_v15 }
 0x498   :  { %4518 = vmatmul.bf16.gmra.mxu1 %v12576_v55 }
 0x499   :  { %4420 = vmatmul.bf16.gmra.mxu3 %v12691_v46  ;;  %v11464_v61 = vadd.f32 %v4320_v4, %v4272_v0  ;;  %v12692_v0 = vld [vmem:[#allocation73_spill] sm:$0xff] }
 0x49a   :  { %v4176_v11 = vpop.f32.mrf.mxu2 }
 0x49b   :  { %v4177_v49 = vadd.f32 %v4176_v11, %v11351_v38  ;;  %v12693_v38 = vld [vmem:[#allocation33_spill] sm:$0xff] }
 0x49c   :  { %v4225_v29 = vpop.f32.mrf.mxu3  ;;  %v4276_v37 = vpop.f32.mrf.mxu0 }
 0x49d   :  { %v4226_v7 = vadd.f32 %v4225_v29, %v4177_v49  ;;  %v4325_v21 = vpop.f32.mrf.mxu1 }
 0x49f   :  { %v4275_v31 = vadd.f32 %v4274_v34, %v4226_v7  ;;  %v9526_v34 = vld [vmem:[#allocation2 + $0x5fc] sm:$0xf] }
 0x4a1   :  { %v11467_v48 = vadd.f32 %v4323_v35, %v4275_v31  ;;  %v8083_v35 = vld [vmem:[#allocation2 + $0x614] sm:$0xf0] }
 0x4a2   :  { %v4178_v54 = vpop.f32.mrf.mxu2  ;;  %v8086_v45 = vor.u32 %v9526_v34, %v8083_v35  ;;  %v12697_v35 = vld [vmem:[#allocation35_spill] sm:$0xff] }
 0x4a3   :  { %v4179_v56 = vadd.f32 %v4178_v54, %v11361_v26 }
 0x4a4   :  { %v4227_v58 = vpop.f32.mrf.mxu3  ;;  %v4279_v15 = vpop.f32.mrf.mxu0  ;;  %4558 = vmatpush.bf16.msra.mxu2 %v8086_v45 }
 0x4a5   :  { %v4228_v55 = vadd.f32 %v4227_v58, %v4179_v56  ;;  %v4328_v8 = vpop.f32.mrf.mxu1 }
 0x4a7   :  { %v4277_v4 = vadd.f32 %v4276_v37, %v4228_v55  ;;  %8713 = vmatmul.msk.bf16.gmra.mxu2 %vm2667_vm0, %v12692_v0  ;;  %4474 = vmatmul.bf16.gmra.mxu0 %v12693_v38 }
 0x4a8   :  { %4523 = vmatmul.bf16.gmra.mxu1 %v12580_v63 }
 0x4a9   :  { %4425 = vmatmul.bf16.gmra.mxu3 %v12694_v30  ;;  %v11475_v11 = vadd.f32 %v4325_v21, %v4277_v4  ;;  %v12695_v4 = vld [vmem:[#allocation74_spill] sm:$0xff] }
 0x4aa   :  { %v4181_v26 = vpop.f32.mrf.mxu2 }
 0x4ab   :  { %v4182_v49 = vadd.f32 %v4181_v26, %v11365_v19  ;;  %v12696_v19 = vld [vmem:[#allocation37_spill] sm:$0xff] }
 0x4ac   :  { %v4230_v58 = vpop.f32.mrf.mxu3  ;;  %v4281_v55 = vpop.f32.mrf.mxu0 }
 0x4ad   :  { %v4231_v29 = vadd.f32 %v4230_v58, %v4182_v49  ;;  %v4330_v37 = vpop.f32.mrf.mxu1 }
 0x4af   :  { %v4280_v7 = vadd.f32 %v4279_v15, %v4231_v29  ;;  %v9519_v15 = vld [vmem:[#allocation2 + $0x5c4] sm:$0xf] }
 0x4b1   :  { %v11478_v31 = vadd.f32 %v4328_v8, %v4280_v7  ;;  %v8055_v8 = vld [vmem:[#allocation2 + $0x5dc] sm:$0xf0] }
 0x4b2   :  { %v4183_v54 = vpop.f32.mrf.mxu2  ;;  %v8058_v45 = vor.u32 %v9519_v15, %v8055_v8  ;;  %v9666_v8 = vld [vmem:[#allocation2 + $0xa5c] sm:$0xf] }
 0x4b3   :  { %v4184_v56 = vadd.f32 %v4183_v54, %v11375_v53 }
 0x4b4   :  { %v4232_v38 = vpop.f32.mrf.mxu3  ;;  %v4284_v63 = vpop.f32.mrf.mxu0  ;;  %4559 = vmatpush.bf16.msra.mxu2 %v8058_v45  ;;  %v12699_v45 = vld [vmem:[#allocation26_spill] sm:$0xff] }
 0x4b5   :  { %v4233_v30 = vadd.f32 %v4232_v38, %v4184_v56  ;;  %v4333_v34 = vpop.f32.mrf.mxu1 }
 0x4b7   :  { %v4282_v21 = vadd.f32 %v4281_v55, %v4233_v30  ;;  %8714 = vmatmul.msk.bf16.gmra.mxu2 %vm2667_vm0, %v12695_v4  ;;  %4479 = vmatmul.bf16.gmra.mxu0 %v12696_v19 }
 0x4b8   :  { %4528 = vmatmul.bf16.gmra.mxu1 %v12584_v23 }
 0x4b9   :  { %4430 = vmatmul.bf16.gmra.mxu3 %v12697_v35  ;;  %v11486_v26 = vadd.f32 %v4330_v37, %v4282_v21  ;;  %v9610_v37 = vld [vmem:[#allocation2 + $0x89c] sm:$0xf]  ;;  %v8419_v21 = vld [vmem:[#allocation2 + $0x8b4] sm:$0xf0] }
 0x4ba   :  { %v4186_v53 = vpop.f32.mrf.mxu2 }
 0x4bb   :  { %v4187_v49 = vadd.f32 %v4186_v53, %v11379_v36  ;;  %v12698_v36 = vld [vmem:[#allocation75_spill] sm:$0xff]  ;;  %v8422_v53 = vor.u32 %v9610_v37, %v8419_v21 }
 0x4bc   :  { %v4235_v38 = vpop.f32.mrf.mxu3  ;;  %v4286_v30 = vpop.f32.mrf.mxu0 }
 0x4bd   :  { %v4236_v58 = vadd.f32 %v4235_v38, %v4187_v49  ;;  %v4335_v55 = vpop.f32.mrf.mxu1  ;;  %v8027_v49 = vld [vmem:[#allocation2 + $0x5a4] sm:$0xf0]  ;;  %4603 = vmatpush.bf16.msra.mxu3 %v8422_v53 }
 0x4bf   :  { %v4285_v29 = vadd.f32 %v4284_v63, %v4236_v58  ;;  %v8643_v63 = vld [vmem:[#allocation2 + $0xa74] sm:$0xf0] }
 0x4c0   :  { %v8646_v38 = vor.u32 %v9666_v8, %v8643_v63  ;;  %v9596_v8 = vld [vmem:[#allocation2 + $0x82c] sm:$0xf] }
 0x4c1   :  { %v11489_v7 = vadd.f32 %v4333_v34, %v4285_v29  ;;  %v12700_v34 = vld [vmem:[#allocation24_spill] sm:$0xff] }
 0x4c2   :  { %v4188_v54 = vpop.f32.mrf.mxu2  ;;  %4652 = vmatpush.bf16.msra.mxu0 %v8646_v38 }
 0x4c3   :  { %v4189_v56 = vadd.f32 %v4188_v54, %v11389_v40  ;;  %v9512_v40 = vld [vmem:[#allocation2 + $0x58c] sm:$0xf]  ;;  %v9659_v54 = vld [vmem:[#allocation2 + $0xa24] sm:$0xf] }
 0x4c4   :  { %v4237_v19 = vpop.f32.mrf.mxu3  ;;  %v4289_v23 = vpop.f32.mrf.mxu0 }
 0x4c5   :  { %v4238_v35 = vadd.f32 %v4237_v19, %v4189_v56  ;;  %v4338_v15 = vpop.f32.mrf.mxu1  ;;  %v8030_v19 = vor.u32 %v9512_v40, %v8027_v49  ;;  %v8587_v40 = vld [vmem:[#allocation2 + $0xa04] sm:$0xf0] }
 0x4c7   :  { %v4287_v46 = vadd.f32 %v4286_v30, %v4238_v35  ;;  %8715 = vmatmul.msk.bf16.gmra.mxu2 %vm2667_vm0, %v12698_v36  ;;  %4484 = vmatmul.bf16.gmra.mxu0 %v12699_v45  ;;  %v9603_v35 = vld [vmem:[#allocation2 + $0x864] sm:$0xf]  ;;  %v8391_v30 = vld [vmem:[#allocation2 + $0x87c] sm:$0xf0] }
 0x4c8   :  { %4533 = vmatmul.bf16.gmra.mxu1 %v12668_v5  ;;  %4560 = vmatpush.bf16.msra.mxu2 %v8030_v19  ;;  %v8394_v21 = vor.u32 %v9603_v35, %v8391_v30  ;;  %v8615_v45 = vld [vmem:[#allocation2 + $0xa3c] sm:$0xf0]  ;;  %v9589_v19 = vld [vmem:[#allocation2 + $0x7f4] sm:$0xf] }
 0x4c9   :  { %4435 = vmatmul.bf16.gmra.mxu3 %v12700_v34  ;;  %v11497_v58 = vadd.f32 %v4335_v55, %v4287_v46  ;;  %v8618_v5 = vor.u32 %v9659_v54, %v8615_v45  ;;  %v8363_v46 = vld [vmem:[#allocation2 + $0x844] sm:$0xf0]  ;;  %v9652_v55 = vld [vmem:[#allocation2 + $0x9ec] sm:$0xf]  ;;  %v9645_v35 = vld [vmem:[#allocation2 + $0x9b4] sm:$0xf] }
 0x4ca   :  { %v4191_v29 = vpop.f32.mrf.mxu2  ;;  %4604 = vmatpush.bf16.msra.mxu3 %v8394_v21  ;;  %v8366_v63 = vor.u32 %v9596_v8, %v8363_v46  ;;  %v8590_v49 = vor.u32 %v9652_v55, %v8587_v40  ;;  %v8307_v8 = vld [vmem:[#allocation2 + $0x7d4] sm:$0xf0]  ;;  %v12701_v55 = vld [vmem:[#allocation76_spill] sm:$0xff] }
 0x4cb   :  { %v4192_v56 = vadd.f32 %v4191_v29, %v11393_v9  ;;  %4653 = vmatpush.bf16.msra.mxu0 %v8618_v5  ;;  %v8335_v29 = vld [vmem:[#allocation2 + $0x80c] sm:$0xf0] }
 0x4cc   :  { %v4240_v37 = vpop.f32.mrf.mxu3  ;;  %v4291_v34 = vpop.f32.mrf.mxu0  ;;  %v8338_v54 = vor.u32 %v9589_v19, %v8335_v29  ;;  %v8559_v5 = vld [vmem:[#allocation2 + $0x9cc] sm:$0xf0] }
 0x4cd   :  { %v4241_v12 = vadd.f32 %v4240_v37, %v4192_v56  ;;  %v4340_v17 = vpop.f32.mrf.mxu1  ;;  %v8562_v37 = vor.u32 %v9645_v35, %v8559_v5  ;;  %v12703_v40 = vld [vmem:[#allocation28_spill] sm:$0xff] }
 0x4ce   :  { %4605 = vmatpush.bf16.msra.mxu3 %v8366_v63 }
 0x4cf   :  { %v4290_v53 = vadd.f32 %v4289_v23, %v4241_v12  ;;  %4654 = vmatpush.bf16.msra.mxu0 %v8590_v49  ;;  %v9582_v12 = vld [vmem:[#allocation2 + $0x7bc] sm:$0xf]  ;;  %v9505_v49 = vld [vmem:[#allocation2 + $0x554] sm:$0xf] }
 0x4d0   :  { %v8310_v63 = vor.u32 %v9582_v12, %v8307_v8  ;;  %v8503_v12 = vld [vmem:[#allocation2 + $0x95c] sm:$0xf0] }
 0x4d1   :  { %v11500_v38 = vadd.f32 %v4338_v15, %v4290_v53  ;;  %v9638_v15 = vld [vmem:[#allocation2 + $0x97c] sm:$0xf] }
 0x4d2   :  { %v4193_v9 = vpop.f32.mrf.mxu2  ;;  %4606 = vmatpush.bf16.msra.mxu3 %v8338_v54  ;;  %v12702_v53 = vld [vmem:[#allocation30_spill] sm:$0xff] }
 0x4d3   :  { %v4194_v45 = vadd.f32 %v4193_v9, %v11403_v25  ;;  %4655 = vmatpush.bf16.msra.mxu0 %v8562_v37  ;;  %v8531_v25 = vld [vmem:[#allocation2 + $0x994] sm:$0xf0]  ;;  %v7999_v9 = vld [vmem:[#allocation2 + $0x56c] sm:$0xf0]  ;;  %v9631_v54 = vld [vmem:[#allocation2 + $0x944] sm:$0xf] }
 0x4d4   :  { %v4242_v30 = vpop.f32.mrf.mxu3  ;;  %v4294_v56 = vpop.f32.mrf.mxu0  ;;  %v8534_v19 = vor.u32 %v9638_v15, %v8531_v25  ;;  %v8002_v29 = vor.u32 %v9505_v49, %v7999_v9  ;;  %v9568_v15 = vld [vmem:[#allocation2 + $0x74c] sm:$0xf]  ;;  %v8475_v49 = vld [vmem:[#allocation2 + $0x924] sm:$0xf0] }
 0x4d5   :  { %v4243_v21 = vadd.f32 %v4242_v30, %v4194_v45  ;;  %v4343_v23 = vpop.f32.mrf.mxu1  ;;  %v8279_v30 = vld [vmem:[#allocation2 + $0x79c] sm:$0xf0] }
 0x4d6   :  { %4607 = vmatpush.bf16.msra.mxu3 %v8310_v63  ;;  %4561 = vmatpush.bf16.msra.mxu2 %v8002_v29  ;;  %v9561_v29 = vld [vmem:[#allocation2 + $0x714] sm:$0xf] }
 0x4d7   :  { %v4292_v46 = vadd.f32 %v4291_v34, %v4243_v21  ;;  %8716 = vmatmul.msk.bf16.gmra.mxu2 %vm2667_vm0, %v12701_v55  ;;  %4489 = vmatmul.bf16.gmra.mxu0 %v12702_v53  ;;  %v9575_v34 = vld [vmem:[#allocation2 + $0x784] sm:$0xf]  ;;  %v8506_v53 = vor.u32 %v9631_v54, %v8503_v12 }
 0x4d8   :  { %4538 = vmatmul.bf16.gmra.mxu1 %v12673_v59  ;;  %4656 = vmatpush.bf16.msra.mxu0 %v8534_v19  ;;  %v8282_v21 = vor.u32 %v9575_v34, %v8279_v30  ;;  %v9617_v34 = vld [vmem:[#allocation2 + $0x8d4] sm:$0xf] }
 0x4d9   :  { %4440 = vmatmul.bf16.gmra.mxu3 %v12703_v40  ;;  %v11508_v35 = vadd.f32 %v4340_v17, %v4292_v46  ;;  %v8251_v17 = vld [vmem:[#allocation2 + $0x764] sm:$0xf0]  ;;  %v9624_v46 = vld [vmem:[#allocation2 + $0x90c] sm:$0xf] }
 0x4da   :  { %v4196_v45 = vpop.f32.mrf.mxu2  ;;  %4608 = vmatpush.bf16.msra.mxu3 %v8282_v21  ;;  %v8254_v25 = vor.u32 %v9568_v15, %v8251_v17  ;;  %v8478_v9 = vor.u32 %v9624_v46, %v8475_v49  ;;  %v8671_v21 = vld [vmem:[#allocation2 + $0xaac] sm:$0xf0]  ;;  %v9390_v46 = vld [vmem:[#allocation2 + $0x1b8] sm:$0xf0] }
 0x4db   :  { %v4197_v5 = vadd.f32 %v4196_v45, %v11407_v60  ;;  %v8223_v45 = vld [vmem:[#allocation2 + $0x72c] sm:$0xf0] }
 0x4dc   :  { %v4245_v37 = vpop.f32.mrf.mxu3  ;;  %v4296_v8 = vpop.f32.mrf.mxu0  ;;  %4657 = vmatpush.bf16.msra.mxu0 %v8506_v53  ;;  %v8447_v53 = vld [vmem:[#allocation2 + $0x8ec] sm:$0xf0] }
 0x4dd   :  { %v4246_v59 = vadd.f32 %v4245_v37, %v4197_v5  ;;  %v4345_v40 = vpop.f32.mrf.mxu1  ;;  %v8226_v5 = vor.u32 %v9561_v29, %v8223_v45  ;;  %v9673_v37 = vld [vmem:[#allocation2 + $0xa94] sm:$0xf] }
 0x4de   :  { %4609 = vmatpush.bf16.msra.mxu3 %v8254_v25 }
 0x4df   :  { %v4295_v63 = vadd.f32 %v4294_v56, %v4246_v59  ;;  %v8450_v59 = vor.u32 %v9617_v34, %v8447_v53  ;;  %v8674_v56 = vor.u32 %v9673_v37, %v8671_v21 }
 0x4e0   :  { %4658 = vmatpush.bf16.msra.mxu0 %v8478_v9 }
 0x4e1   :  { %v11511_v19 = vadd.f32 %v4343_v23, %v4295_v63  ;;  %4708 = vmatpush.bf16.msra.mxu1 %v8674_v56 }
 0x4e2   :  { %v4198_v60 = vpop.f32.mrf.mxu2  ;;  %4610 = vmatpush.bf16.msra.mxu3 %v8226_v5 }
 0x4e3   :  { %v4199_v30 = vadd.f32 %v4198_v60, %v11417_v1  ;;  %v7529_v1 = vld [vmem:[#allocation2 + $0x1a0] sm:$0xf] }
 0x4e4   :  { %v4247_v54 = vpop.f32.mrf.mxu3  ;;  %v4299_v12 = vpop.f32.mrf.mxu0  ;;  %4659 = vmatpush.bf16.msra.mxu0 %v8450_v59  ;;  %v7530_v63 = vor.u32 %v9390_v46, %v7529_v1 }
 0x4e5   :  { %v4248_v15 = vadd.f32 %v4247_v54, %v4199_v30  ;;  %v4348_v17 = vpop.f32.mrf.mxu1 }
 0x4e6   :  { %4750 = vmatpush.bf16.msrb.mxu2 %v7530_v63 }
 0x4e7   :  { %v4297_v23 = vadd.f32 %v4296_v8, %v4248_v15  ;;  %8717 = vmatmul.msk.bf16.gmra.mxu2 %vm2667_vm0, %v10772_v41  ;;  %4494 = vmatmul.bf16.gmra.mxu0 %v12634_v20 }
 0x4e8   :  { %4543 = vmatmul.bf16.gmra.mxu1 %v12677_v22 }
 0x4e9   :  { %4445 = vmatmul.bf16.gmra.mxu3 %v12598_v62  ;;  %v11519_v25 = vadd.f32 %v4345_v40, %v4297_v23 }
 0x4ea   :  { %v4201_v49 = vpop.f32.mrf.mxu2 }
 0x4eb   :  { %v4202_v9 = vadd.f32 %v4201_v49, %v11421_v33  ;;  %v7501_v33 = vld [vmem:[#allocation2 + $0x168] sm:$0xf] }
 0x4ec   :  { %v4250_v60 = vpop.f32.mrf.mxu3  ;;  %v4301_v8 = vpop.f32.mrf.mxu0 }
 0x4ed   :  { %v4251_v29 = vadd.f32 %v4250_v60, %v4202_v9  ;;  %v4350_v45 = vpop.f32.mrf.mxu1 }
 0x4ef   :  { %v4300_v34 = vadd.f32 %v4299_v12, %v4251_v29  ;;  %v9383_v12 = vld [vmem:[#allocation2 + $0x180] sm:$0xf0] }
 0x4f0   :  { %v7502_v56 = vor.u32 %v9383_v12, %v7501_v33 }
 0x4f1   :  { %v11522_v30 = vadd.f32 %v4348_v17, %v4300_v34 }
 0x4f2   :  { %v4203_v54 = vpop.f32.mrf.mxu2  ;;  %4751 = vmatpush.bf16.msrb.mxu2 %v7502_v56 }
 0x4f3   :  { %v4204_v5 = vadd.f32 %v4203_v54, %v11431_v18 }
 0x4f4   :  { %v4252_v53 = vpop.f32.mrf.mxu3  ;;  %v4304_v37 = vpop.f32.mrf.mxu0 }
 0x4f5   :  { %v4253_v21 = vadd.f32 %v4252_v53, %v4204_v5  ;;  %v4353_v59 = vpop.f32.mrf.mxu1 }
 0x4f7   :  { %v4302_v40 = vadd.f32 %v4301_v8, %v4253_v21  ;;  %8718 = vmatmul.msk.bf16.gmra.mxu2 %vm2667_vm0, %v10791_v28  ;;  %4499 = vmatmul.bf16.gmra.mxu0 %v12638_v51 }
 0x4f8   :  { %4548 = vmatmul.bf16.gmra.mxu1 %v12681_v24 }
 0x4f9   :  { %4450 = vmatmul.bf16.gmra.mxu3 %v12602_v14  ;;  %v11530_v15 = vadd.f32 %v4350_v45, %v4302_v40 }
 0x4fa   :  { %v4206_v18 = vpop.f32.mrf.mxu2 }
 0x4fb   :  { %v4207_v17 = vadd.f32 %v4206_v18, %v11435_v42  ;;  %v9850_v42 = vld [vmem:[#allocation5] sm:$0xff] }
 0x4fc   :  { %v4255_v23 = vpop.f32.mrf.mxu3  ;;  %v4306_v1 = vpop.f32.mrf.mxu0  ;;  %v11543_v53 = vperm.slane %v9850_v42, 5 }
 0x4fd   :  { %v4256_v46 = vadd.f32 %v4255_v23, %v4207_v17  ;;  %v4355_v63 = vpop.f32.mrf.mxu1 }
 0x4ff   :  { %v4305_v49 = vadd.f32 %v4304_v37, %v4256_v46  ;;  %v7473_v37 = vld [vmem:[#allocation2 + $0x130] sm:$0xf] }
 0x501   :  { %v11533_v9 = vadd.f32 %v4353_v59, %v4305_v49 }
 0x502   :  { %v4208_v60 = vpop.f32.mrf.mxu2 }
 0x503   :  { %v4209_v8 = vadd.f32 %v4208_v60, %v11445_v43  ;;  %v9376_v43 = vld [vmem:[#allocation2 + $0x148] sm:$0xf0] }
 0x504   :  { %v4257_v29 = vpop.f32.mrf.mxu3  ;;  %v4465_v34 = vpop.f32.mrf.mxu0  ;;  %v7474_v21 = vor.u32 %v9376_v43, %v7473_v37 }
 0x505   :  { %v4258_v54 = vadd.f32 %v4257_v29, %v4209_v8  ;;  %v11536_v5 = vpop.f32.mrf.mxu1 }
 0x506   :  { %4752 = vmatpush.bf16.msrb.mxu2 %v7474_v21 }
 0x507   :  { %v4307_v45 = vadd.f32 %v4306_v1, %v4258_v54  ;;  %4562 = vmatmul.bf16.vlgmr.msra.gmra.mxu2 %v12663_v2  ;;  %4660 = vmatmul.bf16.vlgmr.msra.gmra.mxu0 %v12642_v10  ;;  %v8173_v10 = vld [vmem:[#allocation2 + $0x6a8] sm:$0xf] }
 0x508   :  { %8719 = vmatmul.msk.bf16.vlgmr.msra.gmra.mxu1 %vm2667_vm0, %v12685_v44 }
 0x509   :  { %4611 = vmatmul.bf16.vlgmr.msra.gmra.mxu3 %v12662_v39  ;;  %v11545_v59 = vadd.f32 %v4355_v63, %v4307_v45 }
 0x50a   :  { %v4367_v40 = vpop.f32.mrf.mxu2 }
 0x50b   :  { %v4368_v33 = vadd.f32 %v4367_v40, %v11456_v6 }
 0x50c   :  { %v4416_v12 = vpop.f32.mrf.mxu3  ;;  %v4467_v18 = vpop.f32.mrf.mxu0 }
 0x50d   :  { %v4417_v56 = vadd.f32 %v4416_v12, %v11543_v53  ;;  %v11549_v17 = vpop.f32.mrf.mxu1  ;;  %v5097_v8 = vmax.f32 %v4368_v33, 0.0 }
 0x50f   :  { %v11551_v23 = vadd.f32 %v4465_v34, %v4417_v56  ;;  %v9369_v34 = vld [vmem:[#allocation2 + $0x110] sm:$0xf0] }
 0x512   :  { %v4369_v1 = vpop.f32.mrf.mxu2 }
 0x513   :  { %v4370_v46 = vadd.f32 %v4369_v1, %v11464_v61  ;;  %v7445_v61 = vld [vmem:[#allocation2 + $0xf8] sm:$0xf] }
 0x514   :  { %v4418_v49 = vpop.f32.mrf.mxu3  ;;  %v4470_v63 = vpop.f32.mrf.mxu0  ;;  %v7446_v42 = vor.u32 %v9369_v34, %v7445_v61 }
 0x515   :  { %v4419_v60 = vadd.f32 %v4418_v49, %v11543_v53  ;;  %v5104_v29 = vmax.f32 %v4370_v46, 0.0  ;;  %v11555_v54 = vpop.f32.mrf.mxu1 }
 0x516   :  { %4753 = vmatpush.bf16.msrb.mxu2 %v7446_v42 }
 0x517   :  { %v11557_v6 = vadd.f32 %v4467_v18, %v4419_v60  ;;  %v11559_v45 = vpack.c.bf16 %v5104_v29, %v5097_v8  ;;  %4567 = vmatmul.bf16.gmra.mxu2 %v12664_v32  ;;  %4665 = vmatmul.bf16.gmra.mxu0 %v12646_v52 }
 0x518   :  { %8720 = vmatmul.msk.bf16.gmra.mxu1 %vm2667_vm0, %v12689_v16 }
 0x519   :  { %12704 = vst [vmem:[#allocation102_spill] sm:$0xff] %v11559_v45  ;;  %4616 = vmatmul.bf16.gmra.mxu3 %v12610_v13 }
 0x51a   :  { %v4372_v37 = vpop.f32.mrf.mxu2 }
 0x51b   :  { %v4373_v43 = vadd.f32 %v4372_v37, %v11467_v48 }
 0x51c   :  { %v4421_v21 = vpop.f32.mrf.mxu3  ;;  %v4472_v33 = vpop.f32.mrf.mxu0 }
 0x51d   :  { %v4422_v40 = vadd.f32 %v4421_v21, %v11543_v53  ;;  %v11568_v12 = vpop.f32.mrf.mxu1  ;;  %v5111_v8 = vmax.f32 %v4373_v43, 0.0 }
 0x51f   :  { %v11570_v56 = vadd.f32 %v4470_v63, %v4422_v40  ;;  %v9362_v63 = vld [vmem:[#allocation2 + $0xd8] sm:$0xf0] }
 0x522   :  { %v4374_v18 = vpop.f32.mrf.mxu2 }
 0x523   :  { %v4375_v1 = vadd.f32 %v4374_v18, %v11475_v11  ;;  %v7417_v11 = vld [vmem:[#allocation2 + $0xc0] sm:$0xf] }
 0x524   :  { %v4423_v46 = vpop.f32.mrf.mxu3  ;;  %v4475_v60 = vpop.f32.mrf.mxu0  ;;  %v7418_v42 = vor.u32 %v9362_v63, %v7417_v11 }
 0x525   :  { %v4424_v49 = vadd.f32 %v4423_v46, %v11543_v53  ;;  %v5118_v29 = vmax.f32 %v4375_v1, 0.0  ;;  %v11574_v61 = vpop.f32.mrf.mxu1 }
 0x526   :  { %4754 = vmatpush.bf16.msrb.mxu2 %v7418_v42  ;;  %v12706_v42 = vld [vmem:[#allocation54_spill] sm:$0xff] }
 0x527   :  { %v11576_v48 = vadd.f32 %v4472_v33, %v4424_v49  ;;  %4572 = vmatmul.bf16.gmra.mxu2 %v12553_v27  ;;  %4670 = vmatmul.bf16.gmra.mxu0 %v12649_v3  ;;  %v11580_v34 = vpack.c.bf16 %v5118_v29, %v5111_v8 }
 0x528   :  { %8721 = vmatmul.msk.bf16.gmra.mxu1 %vm2667_vm0, %v12692_v0  ;;  %v12709_v0 = vld [vmem:[#allocation57_spill] sm:$0xff] }
 0x529   :  { %12705 = vst [vmem:[#allocation103_spill] sm:$0xff] %v11580_v34  ;;  %4621 = vmatmul.bf16.gmra.mxu3 %v12613_v50  ;;  %v9502_v50 = vld [vmem:[#allocation2 + $0x538] sm:$0xf0] }
 0x52a   :  { %v4377_v37 = vpop.f32.mrf.mxu2 }
 0x52b   :  { %v4378_v43 = vadd.f32 %v4377_v37, %v11478_v31 }
 0x52c   :  { %v4426_v21 = vpop.f32.mrf.mxu3  ;;  %v4477_v33 = vpop.f32.mrf.mxu0 }
 0x52d   :  { %v4427_v40 = vadd.f32 %v4426_v21, %v11543_v53  ;;  %v11587_v18 = vpop.f32.mrf.mxu1  ;;  %v5125_v11 = vmax.f32 %v4378_v43, 0.0  ;;  %v9355_v21 = vld [vmem:[#allocation2 + $0xa0] sm:$0xf0] }
 0x52f   :  { %v11589_v1 = vadd.f32 %v4475_v60, %v4427_v40  ;;  %v12708_v60 = vld [vmem:[#allocation52_spill] sm:$0xff] }
 0x532   :  { %v4379_v46 = vpop.f32.mrf.mxu2 }
 0x533   :  { %v4380_v49 = vadd.f32 %v4379_v46, %v11486_v26  ;;  %v7389_v26 = vld [vmem:[#allocation2 + $0x88] sm:$0xf] }
 0x534   :  { %v4428_v8 = vpop.f32.mrf.mxu3  ;;  %v4480_v34 = vpop.f32.mrf.mxu0  ;;  %v7390_v40 = vor.u32 %v9355_v21, %v7389_v26 }
 0x535   :  { %v4429_v29 = vadd.f32 %v4428_v8, %v11543_v53  ;;  %v5132_v63 = vmax.f32 %v4380_v49, 0.0  ;;  %v11593_v45 = vpop.f32.mrf.mxu1 }
 0x536   :  { %4755 = vmatpush.bf16.msrb.mxu2 %v7390_v40  ;;  %v7753_v40 = vld [vmem:[#allocation2 + $0x360] sm:$0xf] }
 0x537   :  { %v11595_v31 = vadd.f32 %v4477_v33, %v4429_v29  ;;  %4577 = vmatmul.bf16.gmra.mxu2 %v12557_v57  ;;  %4675 = vmatmul.bf16.gmra.mxu0 %v12706_v42  ;;  %v11599_v37 = vpack.c.bf16 %v5132_v63, %v5125_v11 }
 0x538   :  { %8722 = vmatmul.msk.bf16.gmra.mxu1 %vm2667_vm0, %v12695_v4 }
 0x539   :  { %12707 = vst [vmem:[#allocation104_spill] sm:$0xff] %v11599_v37  ;;  %4626 = vmatmul.bf16.gmra.mxu3 %v12708_v60 }
 0x53a   :  { %v4382_v43 = vpop.f32.mrf.mxu2 }
 0x53b   :  { %v4383_v46 = vadd.f32 %v4382_v43, %v11489_v7  ;;  %v9446_v43 = vld [vmem:[#allocation2 + $0x378] sm:$0xf0] }
 0x53c   :  { %v4431_v49 = vpop.f32.mrf.mxu3  ;;  %v4482_v8 = vpop.f32.mrf.mxu0 }
 0x53d   :  { %v4432_v33 = vadd.f32 %v4431_v49, %v11543_v53  ;;  %v11606_v29 = vpop.f32.mrf.mxu1  ;;  %v5139_v26 = vmax.f32 %v4383_v46, 0.0  ;;  %v7977_v49 = vld [vmem:[#allocation2 + $0x520] sm:$0xf] }
 0x53e   :  { %v7978_v46 = vor.u32 %v9502_v50, %v7977_v49 }
 0x53f   :  { %v11608_v11 = vadd.f32 %v4480_v34, %v4432_v33  ;;  %v12710_v34 = vld [vmem:[#allocation58_spill] sm:$0xff]  ;;  %v7754_v33 = vor.u32 %v9446_v43, %v7753_v40  ;;  %v7725_v40 = vld [vmem:[#allocation2 + $0x328] sm:$0xf] }
 0x540   :  { %4848 = vmatpush.bf16.msrb.mxu0 %v7978_v46  ;;  %v9439_v43 = vld [vmem:[#allocation2 + $0x340] sm:$0xf0]  ;;  %v8145_v46 = vld [vmem:[#allocation2 + $0x670] sm:$0xf] }
 0x541   :  { %4799 = vmatpush.bf16.msrb.mxu3 %v7754_v33 }
 0x542   :  { %v4384_v63 = vpop.f32.mrf.mxu2 }
 0x543   :  { %v4385_v37 = vadd.f32 %v4384_v63, %v11497_v58  ;;  %v8201_v58 = vld [vmem:[#allocation2 + $0x6e0] sm:$0xf]  ;;  %v9558_v63 = vld [vmem:[#allocation2 + $0x6f8] sm:$0xf0] }
 0x544   :  { %v4433_v42 = vpop.f32.mrf.mxu3  ;;  %v4485_v60 = vpop.f32.mrf.mxu0 }
 0x545   :  { %v4434_v4 = vadd.f32 %v4433_v42, %v11543_v53  ;;  %v5146_v21 = vmax.f32 %v4385_v37, 0.0  ;;  %v11612_v3 = vpop.f32.mrf.mxu1  ;;  %v12712_v42 = vld [vmem:[#allocation56_spill] sm:$0xff] }
 0x546   :  { %v9348_v37 = vld [vmem:[#allocation2 + $0x68] sm:$0xf0] }
 0x547   :  { %v11614_v7 = vadd.f32 %v4482_v8, %v4434_v4  ;;  %4582 = vmatmul.bf16.gmra.mxu2 %v12709_v0  ;;  %4680 = vmatmul.bf16.gmra.mxu0 %v12710_v34  ;;  %v11618_v52 = vpack.c.bf16 %v5146_v21, %v5139_v26  ;;  %v7361_v4 = vld [vmem:[#allocation2 + $0x50] sm:$0xf]  ;;  %v8202_v8 = vor.u32 %v9558_v63, %v8201_v58  ;;  %v7949_v34 = vld [vmem:[#allocation2 + $0x4e8] sm:$0xf] }
 0x548   :  { %8723 = vmatmul.msk.bf16.gmra.mxu1 %vm2667_vm0, %v12698_v36  ;;  %v7362_v16 = vor.u32 %v9348_v37, %v7361_v4  ;;  %v9551_v36 = vld [vmem:[#allocation2 + $0x6c0] sm:$0xf0]  ;;  %v7697_v4 = vld [vmem:[#allocation2 + $0x2f0] sm:$0xf]  ;;  %v9488_v37 = vld [vmem:[#allocation2 + $0x4c8] sm:$0xf0] }
 0x549   :  { %12711 = vst [vmem:[#allocation57_spill] sm:$0xff] %v11618_v52  ;;  %4631 = vmatmul.bf16.gmra.mxu3 %v12712_v42  ;;  %4897 = vmatpush.bf16.msrb.mxu1 %v8202_v8  ;;  %v7726_v52 = vor.u32 %v9439_v43, %v7725_v40  ;;  %v9495_v42 = vld [vmem:[#allocation2 + $0x500] sm:$0xf0]  ;;  %v8174_v58 = vor.u32 %v9551_v36, %v8173_v10  ;;  %v9544_v8 = vld [vmem:[#allocation2 + $0x688] sm:$0xf0] }
 0x54a   :  { %v4387_v13 = vpop.f32.mrf.mxu2  ;;  %4756 = vmatpush.bf16.msrb.mxu2 %v7362_v16  ;;  %v7950_v49 = vor.u32 %v9495_v42, %v7949_v34  ;;  %v8146_v43 = vor.u32 %v9544_v8, %v8145_v46  ;;  %v7669_v10 = vld [vmem:[#allocation2 + $0x2b8] sm:$0xf]  ;;  %v9425_v36 = vld [vmem:[#allocation2 + $0x2d0] sm:$0xf0] }
 0x54b   :  { %v4388_v26 = vadd.f32 %v4387_v13, %v11500_v38  ;;  %4800 = vmatpush.bf16.msrb.mxu3 %v7726_v52  ;;  %v9432_v13 = vld [vmem:[#allocation2 + $0x308] sm:$0xf0]  ;;  %v7921_v38 = vld [vmem:[#allocation2 + $0x4b0] sm:$0xf]  ;;  %v7893_v52 = vld [vmem:[#allocation2 + $0x478] sm:$0xf]  ;;  %v7670_v34 = vor.u32 %v9425_v36, %v7669_v10 }
 0x54c   :  { %v4436_v21 = vpop.f32.mrf.mxu3  ;;  %v4487_v50 = vpop.f32.mrf.mxu0  ;;  %4849 = vmatpush.bf16.msrb.mxu0 %v7950_v49  ;;  %v7698_v16 = vor.u32 %v9432_v13, %v7697_v4  ;;  %v7922_v40 = vor.u32 %v9488_v37, %v7921_v38  ;;  %v9481_v42 = vld [vmem:[#allocation2 + $0x490] sm:$0xf0]  ;;  %v8117_v49 = vld [vmem:[#allocation2 + $0x638] sm:$0xf]  ;;  %v12714_v10 = vld [vmem:[#allocation62_spill] sm:$0xff] }
 0x54d   :  { %v4437_v44 = vadd.f32 %v4436_v21, %v11543_v53  ;;  %v11625_v33 = vpop.f32.mrf.mxu1  ;;  %4898 = vmatpush.bf16.msrb.mxu1 %v8174_v58  ;;  %v9537_v58 = vld [vmem:[#allocation2 + $0x650] sm:$0xf0]  ;;  %v7894_v39 = vor.u32 %v9481_v42, %v7893_v52  ;;  %v5153_v37 = vmax.f32 %v4388_v26, 0.0  ;;  %v8089_v52 = vld [vmem:[#allocation2 + $0x600] sm:$0xf] }
 0x54e   :  { %v8118_v38 = vor.u32 %v9537_v58, %v8117_v49  ;;  %v9530_v42 = vld [vmem:[#allocation2 + $0x618] sm:$0xf0] }
 0x54f   :  { %v11627_v63 = vadd.f32 %v4485_v60, %v4437_v44  ;;  %4801 = vmatpush.bf16.msrb.mxu3 %v7698_v16  ;;  %v8090_v49 = vor.u32 %v9530_v42, %v8089_v52 }
 0x550   :  { %4850 = vmatpush.bf16.msrb.mxu0 %v7922_v40  ;;  %v9418_v40 = vld [vmem:[#allocation2 + $0x298] sm:$0xf0] }
 0x551   :  { %4899 = vmatpush.bf16.msrb.mxu1 %v8146_v43  ;;  %v7865_v43 = vld [vmem:[#allocation2 + $0x440] sm:$0xf] }
 0x552   :  { %v4389_v21 = vpop.f32.mrf.mxu2 }
 0x553   :  { %v4390_v44 = vadd.f32 %v4389_v21, %v11508_v35  ;;  %4802 = vmatpush.bf16.msrb.mxu3 %v7670_v34  ;;  %v7641_v35 = vld [vmem:[#allocation2 + $0x280] sm:$0xf]  ;;  %v12713_v21 = vld [vmem:[#allocation61_spill] sm:$0xff] }
 0x554   :  { %v4438_v60 = vpop.f32.mrf.mxu3  ;;  %v4490_v13 = vpop.f32.mrf.mxu0  ;;  %4851 = vmatpush.bf16.msrb.mxu0 %v7894_v39  ;;  %v7642_v36 = vor.u32 %v9418_v40, %v7641_v35  ;;  %v7333_v39 = vld [vmem:[#allocation2 + $0x18] sm:$0xf]  ;;  %v9411_v35 = vld [vmem:[#allocation2 + $0x260] sm:$0xf0]  ;;  %v7837_v40 = vld [vmem:[#allocation2 + $0x408] sm:$0xf] }
 0x555   :  { %v4439_v4 = vadd.f32 %v4438_v60, %v11543_v53  ;;  %v5160_v16 = vmax.f32 %v4390_v44, 0.0  ;;  %v11631_v46 = vpop.f32.mrf.mxu1  ;;  %4900 = vmatpush.bf16.msrb.mxu1 %v8118_v38  ;;  %v9474_v60 = vld [vmem:[#allocation2 + $0x458] sm:$0xf0]  ;;  %v12716_v44 = vld [vmem:[#allocation60_spill] sm:$0xff]  ;;  %v7613_v38 = vld [vmem:[#allocation2 + $0x248] sm:$0xf] }
 0x556   :  { %v7866_v34 = vor.u32 %v9474_v60, %v7865_v43 }
 0x557   :  { %v11633_v8 = vadd.f32 %v4487_v50, %v4439_v4  ;;  %4587 = vmatmul.bf16.gmra.mxu2 %v12713_v21  ;;  %4685 = vmatmul.bf16.gmra.mxu0 %v12714_v10  ;;  %v11637_v26 = vpack.c.bf16 %v5160_v16, %v5153_v37  ;;  %v9341_v50 = vld [vmem:[#allocation2 + $0x30] sm:$0xf0]  ;;  %v9467_v10 = vld [vmem:[#allocation2 + $0x420] sm:$0xf0] }
 0x558   :  { %8724 = vmatmul.msk.bf16.gmra.mxu1 %vm2667_vm0, %v12701_v55  ;;  %v7334_v58 = vor.u32 %v9341_v50, %v7333_v39  ;;  %4803 = vmatpush.bf16.msrb.mxu3 %v7642_v36  ;;  %v9523_v55 = vld [vmem:[#allocation2 + $0x5e0] sm:$0xf0]  ;;  %v7838_v60 = vor.u32 %v9467_v10, %v7837_v40  ;;  %v7585_v39 = vld [vmem:[#allocation2 + $0x210] sm:$0xf]  ;;  %v9397_v10 = vld [vmem:[#allocation2 + $0x1f0] sm:$0xf0] }
 0x559   :  { %12715 = vst [vmem:[#allocation61_spill] sm:$0xff] %v11637_v26  ;;  %4636 = vmatmul.bf16.gmra.mxu3 %v12716_v44  ;;  %4852 = vmatpush.bf16.msrb.mxu0 %v7866_v34  ;;  %v7614_v26 = vor.u32 %v9411_v35, %v7613_v38  ;;  %v8061_v44 = vld [vmem:[#allocation2 + $0x5c8] sm:$0xf]  ;;  %v7809_v50 = vld [vmem:[#allocation2 + $0x3d0] sm:$0xf] }
 0x55a   :  { %v4392_v4 = vpop.f32.mrf.mxu2  ;;  %4901 = vmatpush.bf16.msrb.mxu1 %v8090_v49  ;;  %4757 = vmatpush.bf16.msrb.mxu2 %v7334_v58  ;;  %v8062_v52 = vor.u32 %v9523_v55, %v8061_v44  ;;  %v9460_v49 = vld [vmem:[#allocation2 + $0x3e8] sm:$0xf0]  ;;  %v8033_v58 = vld [vmem:[#allocation2 + $0x590] sm:$0xf]  ;;  %v7557_v55 = vld [vmem:[#allocation2 + $0x1d8] sm:$0xf] }
 0x55b   :  { %v4393_v37 = vadd.f32 %v4392_v4, %v11511_v19  ;;  %v9404_v19 = vld [vmem:[#allocation2 + $0x228] sm:$0xf0]  ;;  %v7810_v38 = vor.u32 %v9460_v49, %v7809_v50  ;;  %v7558_v44 = vor.u32 %v9397_v10, %v7557_v55  ;;  %v9453_v40 = vld [vmem:[#allocation2 + $0x3b0] sm:$0xf0] }
 0x55c   :  { %v4441_v16 = vpop.f32.mrf.mxu3  ;;  %v4492_v43 = vpop.f32.mrf.mxu0  ;;  %4804 = vmatpush.bf16.msrb.mxu3 %v7614_v26  ;;  %v7586_v34 = vor.u32 %v9404_v19, %v7585_v39  ;;  %v9516_v4 = vld [vmem:[#allocation2 + $0x5a8] sm:$0xf0]  ;;  %v7781_v26 = vld [vmem:[#allocation2 + $0x398] sm:$0xf] }
 0x55d   :  { %v4442_v51 = vadd.f32 %v4441_v16, %v11543_v53  ;;  %v11644_v36 = vpop.f32.mrf.mxu1  ;;  %4853 = vmatpush.bf16.msrb.mxu0 %v7838_v60  ;;  %v8034_v35 = vor.u32 %v9516_v4, %v8033_v58  ;;  %v8005_v60 = vld [vmem:[#allocation2 + $0x558] sm:$0xf]  ;;  %v7782_v24 = vor.u32 %v9453_v40, %v7781_v26  ;;  %v5167_v49 = vmax.f32 %v4393_v37, 0.0  ;;  %v8425_v37 = vld [vmem:[#allocation2 + $0x8a0] sm:$0xf] }
 0x55e   :  { %4902 = vmatpush.bf16.msrb.mxu1 %v8062_v52  ;;  %v9509_v52 = vld [vmem:[#allocation2 + $0x570] sm:$0xf0] }
 0x55f   :  { %v11646_v42 = vadd.f32 %v4490_v13, %v4442_v51  ;;  %v8006_v50 = vor.u32 %v9509_v52, %v8005_v60 }
 0x560   :  { %4805 = vmatpush.bf16.msrb.mxu3 %v7586_v34 }
 0x561   :  { %4854 = vmatpush.bf16.msrb.mxu0 %v7810_v38 }
 0x562   :  { %v4394_v16 = vpop.f32.mrf.mxu2  ;;  %4903 = vmatpush.bf16.msrb.mxu1 %v8034_v35  ;;  %v12719_v35 = vld [vmem:[#allocation64_spill] sm:$0xff] }
 0x563   :  { %v4395_v51 = vadd.f32 %v4394_v16, %v11519_v25  ;;  %v12717_v25 = vld [vmem:[#allocation66_spill] sm:$0xff] }
 0x564   :  { %v4443_v13 = vpop.f32.mrf.mxu3  ;;  %v4495_v19 = vpop.f32.mrf.mxu0  ;;  %4806 = vmatpush.bf16.msrb.mxu3 %v7558_v44  ;;  %v9614_v16 = vld [vmem:[#allocation2 + $0x8b8] sm:$0xf0] }
 0x565   :  { %v4444_v39 = vadd.f32 %v4443_v13, %v11543_v53  ;;  %v5174_v34 = vmax.f32 %v4395_v51, 0.0  ;;  %v11650_v58 = vpop.f32.mrf.mxu1  ;;  %4855 = vmatpush.bf16.msrb.mxu0 %v7782_v24  ;;  %v8426_v55 = vor.u32 %v9614_v16, %v8425_v37  ;;  %v12720_v16 = vld [vmem:[#allocation69_spill] sm:$0xff] }
 0x566   :  { %4904 = vmatpush.bf16.msrb.mxu1 %v8006_v50 }
 0x567   :  { %v11652_v4 = vadd.f32 %v4492_v43, %v4444_v39  ;;  %4592 = vmatmul.bf16.gmra.mxu2 %v12679_v47  ;;  %4690 = vmatmul.bf16.gmra.mxu0 %v12717_v25  ;;  %v11656_v38 = vpack.c.bf16 %v5174_v34, %v5167_v49  ;;  %v12724_v25 = vld [vmem:[#allocation23_spill] sm:$0xff] }
 0x568   :  { %8725 = vmatmul.msk.bf16.gmra.mxu1 %vm2667_vm0, %v10772_v41  ;;  %4946 = vmatpush.bf16.msra.mxu2 %v8426_v55  ;;  %v12721_v55 = vld [vmem:[#allocation70_spill] sm:$0xff]  ;;  %v12725_v41 = vld [vmem:[#allocation39_spill] sm:$0xff] }
 0x569   :  { %12718 = vst [vmem:[#allocation105_spill] sm:$0xff] %v11656_v38  ;;  %4641 = vmatmul.bf16.gmra.mxu3 %v12719_v35  ;;  %v12728_v35 = vld [vmem:[#allocation27_spill] sm:$0xff] }
 0x56a   :  { %v4397_v10 = vpop.f32.mrf.mxu2 }
 0x56b   :  { %v4398_v43 = vadd.f32 %v4397_v10, %v11522_v30 }
 0x56c   :  { %v4446_v26 = vpop.f32.mrf.mxu3  ;;  %v4497_v51 = vpop.f32.mrf.mxu0 }
 0x56d   :  { %v4447_v24 = vadd.f32 %v4446_v26, %v11543_v53  ;;  %v11663_v13 = vpop.f32.mrf.mxu1  ;;  %v5181_v49 = vmax.f32 %v4398_v43, 0.0 }
 0x56f   :  { %v11665_v44 = vadd.f32 %v4495_v19, %v4447_v24  ;;  %v12723_v19 = vld [vmem:[#allocation68_spill] sm:$0xff] }
 0x572   :  { %v4399_v40 = vpop.f32.mrf.mxu2 }
 0x573   :  { %v4400_v60 = vadd.f32 %v4399_v40, %v11530_v15 }
 0x574   :  { %v4448_v52 = vpop.f32.mrf.mxu3  ;;  %v4500_v50 = vpop.f32.mrf.mxu0 }
 0x575   :  { %v4449_v39 = vadd.f32 %v4448_v52, %v11543_v53  ;;  %v5188_v34 = vmax.f32 %v4400_v60, 0.0  ;;  %v11669_v37 = vpop.f32.mrf.mxu1  ;;  %v8397_v60 = vld [vmem:[#allocation2 + $0x868] sm:$0xf]  ;;  %v9607_v52 = vld [vmem:[#allocation2 + $0x880] sm:$0xf0] }
 0x577   :  { %v11671_v30 = vadd.f32 %v4497_v51, %v4449_v39  ;;  %4597 = vmatmul.bf16.gmra.mxu2 %v12720_v16  ;;  %4695 = vmatmul.bf16.gmra.mxu0 %v12721_v55  ;;  %v11675_v10 = vpack.c.bf16 %v5188_v34, %v5181_v49  ;;  %v8398_v49 = vor.u32 %v9607_v52, %v8397_v60  ;;  %v12727_v60 = vld [vmem:[#allocation25_spill] sm:$0xff] }
 0x578   :  { %8726 = vmatmul.msk.bf16.gmra.mxu1 %vm2667_vm0, %v10791_v28 }
 0x579   :  { %12722 = vst [vmem:[#allocation69_spill] sm:$0xff] %v11675_v10  ;;  %4646 = vmatmul.bf16.gmra.mxu3 %v12723_v19  ;;  %4947 = vmatpush.bf16.msra.mxu2 %v8398_v49 }
 0x57a   :  { %v4402_v15 = vpop.f32.mrf.mxu2 }
 0x57b   :  { %v4403_v26 = vadd.f32 %v4402_v15, %v11533_v9 }
 0x57c   :  { %v4451_v43 = vpop.f32.mrf.mxu3  ;;  %v4502_v40 = vpop.f32.mrf.mxu0 }
 0x57d   :  { %v4452_v24 = vadd.f32 %v4451_v43, %v11543_v53  ;;  %v11682_v51 = vpop.f32.mrf.mxu1  ;;  %v5195_v9 = vmax.f32 %v4403_v26, 0.0 }
 0x57f   :  { %v11684_v39 = vadd.f32 %v4500_v50, %v4452_v24  ;;  %v4515_v50 = vadd.f32 %v11536_v5, %v11551_v23  ;;  %v4517_v5 = vadd.f32 %v11549_v17, %v11557_v6  ;;  %v8341_v17 = vld [vmem:[#allocation2 + $0x7f8] sm:$0xf]  ;;  %v9593_v6 = vld [vmem:[#allocation2 + $0x810] sm:$0xf0] }
 0x582   :  { %v4404_v34 = vpop.f32.mrf.mxu2 }
 0x583   :  { %v4405_v10 = vadd.f32 %v4404_v34, %v11545_v59  ;;  %v9600_v59 = vld [vmem:[#allocation2 + $0x848] sm:$0xf0] }
 0x584   :  { %v4453_v38 = vpop.f32.mrf.mxu3  ;;  %v4661_v28 = vpop.f32.mrf.mxu0 }
 0x585   :  { %v4454_v55 = vadd.f32 %v4453_v38, %v11543_v53  ;;  %v5202_v15 = vmax.f32 %v4405_v10, 0.0  ;;  %v4710_v19 = vpop.f32.mrf.mxu1  ;;  %v8369_v53 = vld [vmem:[#allocation2 + $0x830] sm:$0xf] }
 0x586   :  { %v8370_v10 = vor.u32 %v9600_v59, %v8369_v53  ;;  %v4520_v53 = vadd.f32 %v11555_v54, %v11570_v56  ;;  %v12730_v59 = vld [vmem:[#allocation29_spill] sm:$0xff] }
 0x587   :  { %v11688_v43 = vadd.f32 %v4502_v40, %v4454_v55  ;;  %4758 = vmatmul.bf16.vlgmr.msrb.gmra.mxu2 %v12724_v25  ;;  %4856 = vmatmul.bf16.vlgmr.msrb.gmra.mxu0 %v12725_v41  ;;  %v11694_v24 = vpack.c.bf16 %v5202_v15, %v5195_v9 }
 0x588   :  { %4905 = vmatmul.bf16.vlgmr.msrb.gmra.mxu1 %v12663_v2  ;;  %4948 = vmatpush.bf16.msra.mxu2 %v8370_v10 }
 0x589   :  { %12726 = vst [vmem:[#allocation23_spill] sm:$0xff] %v11694_v24  ;;  %4807 = vmatmul.bf16.vlgmr.msrb.gmra.mxu3 %v12727_v60 }
 0x58a   :  { %v4563_v38 = vpop.f32.mrf.mxu2 }
 0x58b   :  { %v4564_v26 = vadd.f32 %v4563_v38, %v4515_v50  ;;  %v12729_v50 = vld [vmem:[#allocation43_spill] sm:$0xff]  ;;  %v8342_v38 = vor.u32 %v9593_v6, %v8341_v17 }
 0x58c   :  { %v4612_v55 = vpop.f32.mrf.mxu3  ;;  %v4663_v40 = vpop.f32.mrf.mxu0 }
 0x58d   :  { %v4613_v25 = vadd.f32 %v4612_v55, %v4564_v26  ;;  %v4712_v52 = vpop.f32.mrf.mxu1  ;;  %4949 = vmatpush.bf16.msra.mxu2 %v8342_v38 }
 0x58f   :  { %v4662_v41 = vadd.f32 %v4661_v28, %v4613_v25 }
 0x591   :  { %v4711_v49 = vadd.f32 %v4710_v19, %v4662_v41 }
 0x592   :  { %v4565_v23 = vpop.f32.mrf.mxu2 }
 0x593   :  { %v4566_v34 = vadd.f32 %v4565_v23, %v4517_v5  ;;  %v5098_v10 = vmax.f32 %v4711_v49, 0.0 }
 0x594   :  { %v4614_v9 = vpop.f32.mrf.mxu3  ;;  %v4666_v15 = vpop.f32.mrf.mxu0 }
 0x595   :  { %v4615_v2 = vadd.f32 %v4614_v9, %v4566_v34  ;;  %v4715_v60 = vpop.f32.mrf.mxu1 }
 0x597   :  { %v4664_v24 = vadd.f32 %v4663_v40, %v4615_v2  ;;  %4763 = vmatmul.bf16.gmra.mxu2 %v12728_v35  ;;  %4861 = vmatmul.bf16.gmra.mxu0 %v12729_v50  ;;  %v12731_v50 = vld [vmem:[#allocation31_spill] sm:$0xff] }
 0x598   :  { %4910 = vmatmul.bf16.gmra.mxu1 %v12664_v32  ;;  %v4522_v32 = vadd.f32 %v11568_v12, %v11576_v48  ;;  %v8313_v12 = vld [vmem:[#allocation2 + $0x7c0] sm:$0xf]  ;;  %v9586_v48 = vld [vmem:[#allocation2 + $0x7d8] sm:$0xf0] }
 0x599   :  { %4812 = vmatmul.bf16.gmra.mxu3 %v12730_v59  ;;  %v4713_v28 = vadd.f32 %v4712_v52, %v4664_v24  ;;  %v4525_v59 = vadd.f32 %v11574_v61, %v11589_v1  ;;  %v8314_v17 = vor.u32 %v9586_v48, %v8313_v12 }
 0x59a   :  { %v4568_v19 = vpop.f32.mrf.mxu2 }
 0x59b   :  { %v5105_v26 = vmax.f32 %v4713_v28, 0.0  ;;  %v4569_v55 = vadd.f32 %v4568_v19, %v4520_v53  ;;  %v12732_v53 = vld [vmem:[#allocation47_spill] sm:$0xff]  ;;  %v12733_v28 = vld [vmem:[#allocation33_spill] sm:$0xff]  ;;  %4950 = vmatpush.bf16.msra.mxu2 %v8314_v17 }
 0x59c   :  { %v4617_v40 = vpop.f32.mrf.mxu3  ;;  %v4668_v25 = vpop.f32.mrf.mxu0 }
 0x59d   :  { %v11706_v35 = vpack.c.bf16 %v5105_v26, %v5098_v10  ;;  %v4618_v41 = vadd.f32 %v4617_v40, %v4569_v55  ;;  %v4717_v5 = vpop.f32.mrf.mxu1 }
 0x59f   :  { %v4667_v54 = vadd.f32 %v4666_v15, %v4618_v41 }
 0x5a1   :  { %v4716_v56 = vadd.f32 %v4715_v60, %v4667_v54 }
 0x5a2   :  { %v4570_v24 = vpop.f32.mrf.mxu2 }
 0x5a3   :  { %v4571_v52 = vadd.f32 %v4570_v24, %v4522_v32  ;;  %v5112_v6 = vmax.f32 %v4716_v56, 0.0 }
 0x5a4   :  { %v4619_v23 = vpop.f32.mrf.mxu3  ;;  %v4671_v34 = vpop.f32.mrf.mxu0 }
 0x5a5   :  { %v4620_v9 = vadd.f32 %v4619_v23, %v4571_v52  ;;  %v4720_v49 = vpop.f32.mrf.mxu1  ;;  %v12734_v23 = vld [vmem:[#allocation35_spill] sm:$0xff] }
 0x5a7   :  { %v4669_v2 = vadd.f32 %v4668_v25, %v4620_v9  ;;  %4768 = vmatmul.bf16.gmra.mxu2 %v12731_v50  ;;  %4866 = vmatmul.bf16.gmra.mxu0 %v12732_v53  ;;  %v12735_v9 = vld [vmem:[#allocation51_spill] sm:$0xff]  ;;  %v12736_v50 = vld [vmem:[#allocation37_spill] sm:$0xff] }
 0x5a8   :  { %4915 = vmatmul.bf16.gmra.mxu1 %v12553_v27  ;;  %v4527_v27 = vadd.f32 %v11587_v18, %v11595_v31  ;;  %v8285_v18 = vld [vmem:[#allocation2 + $0x788] sm:$0xf]  ;;  %v9579_v31 = vld [vmem:[#allocation2 + $0x7a0] sm:$0xf0] }
 0x5a9   :  { %4817 = vmatmul.bf16.gmra.mxu3 %v12733_v28  ;;  %v4718_v15 = vadd.f32 %v4717_v5, %v4669_v2  ;;  %v4530_v2 = vadd.f32 %v11593_v45, %v11608_v11  ;;  %v8286_v53 = vor.u32 %v9579_v31, %v8285_v18  ;;  %v9663_v18 = vld [vmem:[#allocation2 + $0xa40] sm:$0xf0]  ;;  %v8785_v31 = vld [vmem:[#allocation7 + $0x60] sm:$0xf] }
 0x5aa   :  { %v4573_v60 = vpop.f32.mrf.mxu2 }
 0x5ab   :  { %v4574_v19 = vadd.f32 %v4573_v60, %v4525_v59  ;;  %v5119_v10 = vmax.f32 %v4718_v15, 0.0  ;;  %4951 = vmatpush.bf16.msra.mxu2 %v8286_v53 }
 0x5ac   :  { %v4622_v38 = vpop.f32.mrf.mxu3  ;;  %v4673_v26 = vpop.f32.mrf.mxu0 }
 0x5ad   :  { %v4623_v55 = vadd.f32 %v4622_v38, %v4574_v19  ;;  %v4722_v40 = vpop.f32.mrf.mxu1  ;;  %v11716_v25 = vpack.c.bf16 %v5119_v10, %v5112_v6 }
 0x5af   :  { %v4672_v61 = vadd.f32 %v4671_v34, %v4623_v55 }
 0x5b1   :  { %v4721_v1 = vadd.f32 %v4720_v49, %v4672_v61  ;;  %v8649_v61 = vld [vmem:[#allocation2 + $0xa60] sm:$0xf] }
 0x5b2   :  { %v4575_v41 = vpop.f32.mrf.mxu2 }
 0x5b3   :  { %v4576_v5 = vadd.f32 %v4575_v41, %v4527_v27  ;;  %v5126_v59 = vmax.f32 %v4721_v1, 0.0  ;;  %v9670_v1 = vld [vmem:[#allocation2 + $0xa78] sm:$0xf0]  ;;  %v8793_v27 = vld [vmem:[#allocation7 + $0x70] sm:$0xf] }
 0x5b4   :  { %v4624_v54 = vpop.f32.mrf.mxu3  ;;  %v4676_v32 = vpop.f32.mrf.mxu0 }
 0x5b5   :  { %v4625_v24 = vadd.f32 %v4624_v54, %v4576_v5  ;;  %v4725_v56 = vpop.f32.mrf.mxu1  ;;  %v12737_v5 = vld [vmem:[#allocation24_spill] sm:$0xff]  ;;  %v12738_v54 = vld [vmem:[#allocation55_spill] sm:$0xff] }
 0x5b7   :  { %v4674_v52 = vadd.f32 %v4673_v26, %v4625_v24  ;;  %4773 = vmatmul.bf16.gmra.mxu2 %v12734_v23  ;;  %4871 = vmatmul.bf16.gmra.mxu0 %v12735_v9  ;;  %v8650_v24 = vor.u32 %v9670_v1, %v8649_v61  ;;  %v8257_v23 = vld [vmem:[#allocation2 + $0x750] sm:$0xf]  ;;  %v9572_v9 = vld [vmem:[#allocation2 + $0x768] sm:$0xf0]  ;;  %v4537_v61 = vadd.f32 %v11625_v33, %v11633_v8 }
 0x5b8   :  { %4920 = vmatmul.bf16.gmra.mxu1 %v12557_v57  ;;  %v4532_v57 = vadd.f32 %v11606_v29, %v11614_v7  ;;  %v12739_v29 = vld [vmem:[#allocation26_spill] sm:$0xff]  ;;  %v12740_v8 = vld [vmem:[#allocation28_spill] sm:$0xff] }
 0x5b9   :  { %4822 = vmatmul.bf16.gmra.mxu3 %v12736_v50  ;;  %v4723_v34 = vadd.f32 %v4722_v40, %v4674_v52  ;;  %v8258_v50 = vor.u32 %v9572_v9, %v8257_v23  ;;  %v9642_v23 = vld [vmem:[#allocation2 + $0x998] sm:$0xf0]  ;;  %v8761_v9 = vld [vmem:[#allocation7 + $0x30] sm:$0xf] }
 0x5ba   :  { %v4578_v49 = vpop.f32.mrf.mxu2  ;;  %4995 = vmatpush.bf16.msra.mxu3 %v8650_v24 }
 0x5bb   :  { %v4579_v28 = vadd.f32 %v4578_v49, %v4530_v2  ;;  %v5133_v12 = vmax.f32 %v4723_v34, 0.0  ;;  %v8621_v34 = vld [vmem:[#allocation2 + $0xa28] sm:$0xf]  ;;  %4952 = vmatpush.bf16.msra.mxu2 %v8258_v50  ;;  %v4540_v50 = vadd.f32 %v11631_v46, %v11646_v42 }
 0x5bc   :  { %v4627_v15 = vpop.f32.mrf.mxu3  ;;  %v4678_v48 = vpop.f32.mrf.mxu0 }
 0x5bd   :  { %v4628_v60 = vadd.f32 %v4627_v15, %v4579_v28  ;;  %v4727_v17 = vpop.f32.mrf.mxu1  ;;  %v11726_v6 = vpack.c.bf16 %v5133_v12, %v5126_v59  ;;  %v9691_v59 = vld [vmem:[#allocation7 + $0x64] sm:$0xf0] }
 0x5bf   :  { %v4677_v45 = vadd.f32 %v4676_v32, %v4628_v60  ;;  %v4535_v32 = vadd.f32 %v11612_v3, %v11627_v63  ;;  %v8622_v63 = vor.u32 %v9663_v18, %v8621_v34  ;;  %v9685_v18 = vld [vmem:[#allocation7 + $0x34] sm:$0xf0] }
 0x5c1   :  { %v4726_v11 = vadd.f32 %v4725_v56, %v4677_v45  ;;  %v9693_v56 = vld [vmem:[#allocation7 + $0x74] sm:$0xf0]  ;;  %4996 = vmatpush.bf16.msra.mxu3 %v8622_v63  ;;  %v9656_v45 = vld [vmem:[#allocation2 + $0xa08] sm:$0xf0]  ;;  %v9565_v63 = vld [vmem:[#allocation2 + $0x730] sm:$0xf0] }
 0x5c2   :  { %v4580_v19 = vpop.f32.mrf.mxu2  ;;  %v8794_v7 = vor.u32 %v9693_v56, %v8793_v27  ;;  %v8565_v27 = vld [vmem:[#allocation2 + $0x9b8] sm:$0xf]  ;;  %v9687_v56 = vld [vmem:[#allocation7 + $0x44] sm:$0xf0] }
 0x5c3   :  { %v4581_v38 = vadd.f32 %v4580_v19, %v4532_v57  ;;  %v5140_v49 = vmax.f32 %v4726_v11, 0.0  ;;  %v8777_v57 = vld [vmem:[#allocation7 + $0x50] sm:$0xf]  ;;  %v9689_v11 = vld [vmem:[#allocation7 + $0x54] sm:$0xf0] }
 0x5c4   :  { %v4629_v10 = vpop.f32.mrf.mxu3  ;;  %v4681_v26 = vpop.f32.mrf.mxu0  ;;  %5939 = vmatpush.bf16.msra.mxu1 %v8794_v7 }
 0x5c5   :  { %v4630_v55 = vadd.f32 %v4629_v10, %v4581_v38  ;;  %v4730_v40 = vpop.f32.mrf.mxu1  ;;  %v8778_v10 = vor.u32 %v9689_v11, %v8777_v57  ;;  %v9683_v57 = vld [vmem:[#allocation7 + $0x24] sm:$0xf0] }
 0x5c7   :  { %v4679_v41 = vadd.f32 %v4678_v48, %v4630_v55  ;;  %4778 = vmatmul.bf16.gmra.mxu2 %v12737_v5  ;;  %4876 = vmatmul.bf16.gmra.mxu0 %v12738_v54  ;;  %v8769_v5 = vld [vmem:[#allocation7 + $0x40] sm:$0xf] }
 0x5c8   :  { %4925 = vmatmul.bf16.gmra.mxu1 %v12709_v0  ;;  %v8786_v0 = vor.u32 %v9691_v59, %v8785_v31  ;;  %v8770_v7 = vor.u32 %v9687_v56, %v8769_v5  ;;  %v12742_v31 = vld [vmem:[#allocation30_spill] sm:$0xff] }
 0x5c9   :  { %4827 = vmatmul.bf16.gmra.mxu3 %v12739_v29  ;;  %v4728_v52 = vadd.f32 %v4727_v17, %v4679_v41  ;;  %v8593_v17 = vld [vmem:[#allocation2 + $0x9f0] sm:$0xf]  ;;  %v9649_v41 = vld [vmem:[#allocation2 + $0x9d0] sm:$0xf0] }
 0x5ca   :  { %v4583_v2 = vpop.f32.mrf.mxu2  ;;  %5940 = vmatpush.bf16.msra.mxu1 %v8786_v0  ;;  %v8594_v38 = vor.u32 %v9656_v45, %v8593_v17  ;;  %v8566_v24 = vor.u32 %v9649_v41, %v8565_v27  ;;  %v9635_v0 = vld [vmem:[#allocation2 + $0x960] sm:$0xf0]  ;;  %v8745_v27 = vld [vmem:[#allocation7 + $0x10] sm:$0xf] }
 0x5cb   :  { %v4584_v53 = vadd.f32 %v4583_v2, %v4535_v32  ;;  %v5147_v28 = vmax.f32 %v4728_v52, 0.0  ;;  %v12741_v2 = vld [vmem:[#allocation59_spill] sm:$0xff] }
 0x5cc   :  { %v4632_v3 = vpop.f32.mrf.mxu3  ;;  %v4683_v15 = vpop.f32.mrf.mxu0  ;;  %4997 = vmatpush.bf16.msra.mxu3 %v8594_v38 }
 0x5cd   :  { %v4633_v12 = vadd.f32 %v4632_v3, %v4584_v53  ;;  %v4732_v48 = vpop.f32.mrf.mxu1  ;;  %v11736_v60 = vpack.c.bf16 %v5147_v28, %v5140_v49  ;;  %v8762_v49 = vor.u32 %v9685_v18, %v8761_v9  ;;  %v8229_v3 = vld [vmem:[#allocation2 + $0x718] sm:$0xf] }
 0x5ce   :  { %5941 = vmatpush.bf16.msra.mxu1 %v8778_v10  ;;  %v8230_v28 = vor.u32 %v9565_v63, %v8229_v3  ;;  %v9709_v3 = vld [vmem:[#allocation7 + $0xf4] sm:$0xf0] }
 0x5cf   :  { %v4682_v19 = vadd.f32 %v4681_v26, %v4633_v12  ;;  %v8753_v12 = vld [vmem:[#allocation7 + $0x20] sm:$0xf] }
 0x5d0   :  { %4998 = vmatpush.bf16.msra.mxu3 %v8566_v24  ;;  %4953 = vmatpush.bf16.msra.mxu2 %v8230_v28  ;;  %v4542_v24 = vadd.f32 %v11644_v36, %v11652_v4  ;;  %v4545_v4 = vadd.f32 %v11650_v58, %v11665_v44 }
 0x5d1   :  { %v4731_v55 = vadd.f32 %v4730_v40, %v4682_v19  ;;  %v8537_v40 = vld [vmem:[#allocation2 + $0x980] sm:$0xf] }
 0x5d2   :  { %v4585_v1 = vpop.f32.mrf.mxu2  ;;  %5942 = vmatpush.bf16.msra.mxu1 %v8770_v7  ;;  %v8538_v34 = vor.u32 %v9642_v23, %v8537_v40  ;;  %v8453_v7 = vld [vmem:[#allocation2 + $0x8d8] sm:$0xf] }
 0x5d3   :  { %v4586_v54 = vadd.f32 %v4585_v1, %v4537_v61  ;;  %v5154_v17 = vmax.f32 %v4731_v55, 0.0  ;;  %v8481_v61 = vld [vmem:[#allocation2 + $0x910] sm:$0xf]  ;;  %v9628_v1 = vld [vmem:[#allocation2 + $0x928] sm:$0xf0] }
 0x5d4   :  { %v4634_v32 = vpop.f32.mrf.mxu3  ;;  %v4686_v29 = vpop.f32.mrf.mxu0  ;;  %4999 = vmatpush.bf16.msra.mxu3 %v8538_v34  ;;  %v8482_v5 = vor.u32 %v9628_v1, %v8481_v61  ;;  %v9681_v55 = vld [vmem:[#allocation7 + $0x14] sm:$0xf0]  ;;  %v9679_v34 = vld [vmem:[#allocation7 + $0x4] sm:$0xf0]  ;;  %v12744_v61 = vld [vmem:[#allocation38_spill] sm:$0xff] }
 0x5d5   :  { %v4635_v26 = vadd.f32 %v4634_v32, %v4586_v54  ;;  %v4735_v52 = vpop.f32.mrf.mxu1  ;;  %v8746_v54 = vor.u32 %v9681_v55, %v8745_v27  ;;  %v8677_v40 = vld [vmem:[#allocation2 + $0xa98] sm:$0xf]  ;;  %v8849_v1 = vld [vmem:[#allocation7 + $0xe0] sm:$0xf] }
 0x5d6   :  { %5943 = vmatpush.bf16.msra.mxu1 %v8762_v49 }
 0x5d7   :  { %v4684_v33 = vadd.f32 %v4683_v15, %v4635_v26  ;;  %4783 = vmatmul.bf16.gmra.mxu2 %v12740_v8  ;;  %4881 = vmatmul.bf16.gmra.mxu0 %v12741_v2  ;;  %v8509_v15 = vld [vmem:[#allocation2 + $0x948] sm:$0xf]  ;;  %v9621_v26 = vld [vmem:[#allocation2 + $0x8f0] sm:$0xf0]  ;;  %v8737_v2 = vld [vmem:[#allocation7] sm:$0xf] }
 0x5d8   :  { %4930 = vmatmul.bf16.gmra.mxu1 %v12713_v21  ;;  %v8510_v42 = vor.u32 %v9635_v0, %v8509_v15  ;;  %v8754_v21 = vor.u32 %v9683_v57, %v8753_v12  ;;  %v9677_v8 = vld [vmem:[#allocation2 + $0xab0] sm:$0xf0] }
 0x5d9   :  { %4832 = vmatmul.bf16.gmra.mxu3 %v12742_v31  ;;  %v4733_v53 = vadd.f32 %v4732_v48, %v4684_v33  ;;  %v8454_v33 = vor.u32 %v9621_v26, %v8453_v7 }
 0x5da   :  { %v4588_v59 = vpop.f32.mrf.mxu2  ;;  %5000 = vmatpush.bf16.msra.mxu3 %v8510_v42  ;;  %5944 = vmatpush.bf16.msra.mxu1 %v8754_v21 }
 0x5db   :  { %v4589_v45 = vadd.f32 %v4588_v59, %v4540_v50  ;;  %v5161_v19 = vmax.f32 %v4733_v53, 0.0  ;;  %v8857_v53 = vld [vmem:[#allocation7 + $0xf0] sm:$0xf] }
 0x5dc   :  { %v4637_v46 = vpop.f32.mrf.mxu3  ;;  %v4688_v38 = vpop.f32.mrf.mxu0  ;;  %v8858_v59 = vor.u32 %v9709_v3, %v8857_v53 }
 0x5dd   :  { %v4638_v11 = vadd.f32 %v4637_v46, %v4589_v45  ;;  %v4737_v48 = vpop.f32.mrf.mxu1  ;;  %v11746_v10 = vpack.c.bf16 %v5161_v19, %v5154_v17 }
 0x5de   :  { %5001 = vmatpush.bf16.msra.mxu3 %v8482_v5  ;;  %5945 = vmatpush.bf16.msra.mxu1 %v8746_v54 }
 0x5df   :  { %v4687_v41 = vadd.f32 %v4686_v29, %v4638_v11  ;;  %v8678_v29 = vor.u32 %v9677_v8, %v8677_v40  ;;  %5988 = vmatpush.bf16.msrb.mxu2 %v8858_v59  ;;  %v12743_v11 = vld [vmem:[#allocation67_spill] sm:$0xff] }
 0x5e1   :  { %v4736_v32 = vadd.f32 %v4735_v52, %v4687_v41  ;;  %v8738_v52 = vor.u32 %v9679_v34, %v8737_v2  ;;  %5051 = vmatpush.bf16.msra.mxu0 %v8678_v29  ;;  %v12746_v29 = vld [vmem:[#allocation71_spill] sm:$0xff]  ;;  %v9851_v34 = vld [vmem:[#allocation5] sm:$0xff] }
 0x5e2   :  { %v4590_v56 = vpop.f32.mrf.mxu2  ;;  %5002 = vmatpush.bf16.msra.mxu3 %v8454_v33 }
 0x5e3   :  { %v4591_v23 = vadd.f32 %v4590_v56, %v4542_v24  ;;  %5946 = vmatpush.bf16.msra.mxu1 %v8738_v52  ;;  %v5168_v28 = vmax.f32 %v4736_v32, 0.0  ;;  %v12748_v52 = vld [vmem:[#allocation79_spill] sm:$0xff] }
 0x5e4   :  { %v4639_v9 = vpop.f32.mrf.mxu3  ;;  %v4691_v50 = vpop.f32.mrf.mxu0 }
 0x5e5   :  { %v4640_v18 = vadd.f32 %v4639_v9, %v4591_v23  ;;  %v4740_v31 = vpop.f32.mrf.mxu1 }
 0x5e7   :  { %v4689_v36 = vadd.f32 %v4688_v38, %v4640_v18  ;;  %4788 = vmatmul.bf16.gmra.mxu2 %v12598_v62  ;;  %4886 = vmatmul.bf16.gmra.mxu0 %v12677_v22  ;;  %v11773_v18 = vperm.slane %v9851_v34, 6 }
 0x5e8   :  { %4935 = vmatmul.bf16.gmra.mxu1 %v12679_v47  ;;  %v4547_v47 = vadd.f32 %v11663_v13, %v11671_v30  ;;  %v9707_v13 = vld [vmem:[#allocation7 + $0xe4] sm:$0xf0] }
 0x5e9   :  { %4837 = vmatmul.bf16.gmra.mxu3 %v12634_v20  ;;  %v4738_v49 = vadd.f32 %v4737_v48, %v4689_v36  ;;  %v4550_v48 = vadd.f32 %v11669_v37, %v11684_v39  ;;  %v8850_v27 = vor.u32 %v9707_v13, %v8849_v1 }
 0x5ea   :  { %v4593_v63 = vpop.f32.mrf.mxu2 }
 0x5eb   :  { %v4594_v15 = vadd.f32 %v4593_v63, %v4545_v4  ;;  %v5175_v12 = vmax.f32 %v4738_v49, 0.0  ;;  %5989 = vmatpush.bf16.msrb.mxu2 %v8850_v27 }
 0x5ec   :  { %v4642_v0 = vpop.f32.mrf.mxu3  ;;  %v4693_v62 = vpop.f32.mrf.mxu0 }
 0x5ed   :  { %v4643_v22 = vadd.f32 %v4642_v0, %v4594_v15  ;;  %v4742_v17 = vpop.f32.mrf.mxu1  ;;  %v11756_v45 = vpack.c.bf16 %v5175_v12, %v5168_v28 }
 0x5ef   :  { %v4692_v58 = vadd.f32 %v4691_v50, %v4643_v22  ;;  %v12745_v50 = vld [vmem:[#allocation40_spill] sm:$0xff] }
 0x5f1   :  { %v4741_v20 = vadd.f32 %v4740_v31, %v4692_v58  ;;  %v12747_v31 = vld [vmem:[#allocation42_spill] sm:$0xff] }
 0x5f2   :  { %v4595_v44 = vpop.f32.mrf.mxu2 }
 0x5f3   :  { %v4596_v46 = vadd.f32 %v4595_v44, %v4547_v47  ;;  %v5182_v5 = vmax.f32 %v4741_v20, 0.0 }
 0x5f4   :  { %v4644_v42 = vpop.f32.mrf.mxu3  ;;  %v4696_v57 = vpop.f32.mrf.mxu0 }
 0x5f5   :  { %v4645_v19 = vadd.f32 %v4644_v42, %v4596_v46  ;;  %v4745_v38 = vpop.f32.mrf.mxu1 }
 0x5f7   :  { %v4694_v21 = vadd.f32 %v4693_v62, %v4645_v19  ;;  %4793 = vmatmul.bf16.gmra.mxu2 %v12602_v14  ;;  %4891 = vmatmul.bf16.gmra.mxu0 %v12743_v11  ;;  %v12751_v19 = vld [vmem:[#allocation72_spill] sm:$0xff]  ;;  %v8833_v11 = vld [vmem:[#allocation7 + $0xc0] sm:$0xf] }
 0x5f8   :  { %4940 = vmatmul.bf16.gmra.mxu1 %v12720_v16  ;;  %v4552_v16 = vadd.f32 %v11682_v51, %v11688_v43  ;;  %v8841_v51 = vld [vmem:[#allocation7 + $0xd0] sm:$0xf]  ;;  %v9705_v43 = vld [vmem:[#allocation7 + $0xd4] sm:$0xf0] }
 0x5f9   :  { %4842 = vmatmul.bf16.gmra.mxu3 %v12744_v61  ;;  %v4743_v30 = vadd.f32 %v4742_v17, %v4694_v21  ;;  %v8842_v4 = vor.u32 %v9705_v43, %v8841_v51  ;;  %v12753_v21 = vld [vmem:[#allocation49_spill] sm:$0xff] }
 0x5fa   :  { %v4598_v41 = vpop.f32.mrf.mxu2 }
 0x5fb   :  { %v4599_v55 = vadd.f32 %v4598_v41, %v4550_v48  ;;  %v5189_v32 = vmax.f32 %v4743_v30, 0.0  ;;  %5990 = vmatpush.bf16.msrb.mxu2 %v8842_v4  ;;  %v9703_v48 = vld [vmem:[#allocation7 + $0xc4] sm:$0xf0] }
 0x5fc   :  { %v4647_v54 = vpop.f32.mrf.mxu3  ;;  %v4698_v14 = vpop.f32.mrf.mxu0  ;;  %v8834_v61 = vor.u32 %v9703_v48, %v8833_v11 }
 0x5fd   :  { %v4648_v24 = vadd.f32 %v4647_v54, %v4599_v55  ;;  %v4747_v56 = vpop.f32.mrf.mxu1  ;;  %v11766_v7 = vpack.c.bf16 %v5189_v32, %v5182_v5 }
 0x5ff   :  { %v4697_v37 = vadd.f32 %v4696_v57, %v4648_v24  ;;  %v12750_v57 = vld [vmem:[#allocation44_spill] sm:$0xff]  ;;  %5991 = vmatpush.bf16.msrb.mxu2 %v8834_v61 }
 0x601   :  { %v4746_v39 = vadd.f32 %v4745_v38, %v4697_v37  ;;  %v12752_v38 = vld [vmem:[#allocation46_spill] sm:$0xff] }
 0x602   :  { %v4600_v26 = vpop.f32.mrf.mxu2 }
 0x603   :  { %v4601_v40 = vadd.f32 %v4600_v26, %v4552_v16  ;;  %v5196_v53 = vmax.f32 %v4746_v39, 0.0 }
 0x604   :  { %v4649_v23 = vpop.f32.mrf.mxu3  ;;  %v4857_v9 = vpop.f32.mrf.mxu0 }
 0x605   :  { %v4650_v33 = vadd.f32 %v4649_v23, %v4601_v40  ;;  %v4906_v8 = vpop.f32.mrf.mxu1  ;;  %v12754_v40 = vld [vmem:[#allocation48_spill] sm:$0xff]  ;;  %v12755_v23 = vld [vmem:[#allocation73_spill] sm:$0xff] }
 0x607   :  { %v4699_v2 = vadd.f32 %v4698_v14, %v4650_v33  ;;  %4954 = vmatmul.bf16.vlgmr.msra.gmra.mxu2 %v12745_v50  ;;  %8727 = vmatmul.msk.bf16.vlgmr.msra.gmra.mxu0 %vm2667_vm0, %v12746_v29  ;;  %v12757_v33 = vld [vmem:[#allocation53_spill] sm:$0xff] }
 0x608   :  { %5947 = vmatmul.bf16.vlgmr.msra.gmra.mxu1 %v12748_v52 }
 0x609   :  { %5003 = vmatmul.bf16.vlgmr.msra.gmra.mxu3 %v12747_v31  ;;  %v4748_v36 = vadd.f32 %v4747_v56, %v4699_v2  ;;  %v9701_v2 = vld [vmem:[#allocation7 + $0xb4] sm:$0xf0] }
 0x60a   :  { %v4759_v49 = vpop.f32.mrf.mxu2 }
 0x60b   :  { %v4760_v3 = vadd.f32 %v4759_v49, %v11773_v18  ;;  %v5203_v59 = vmax.f32 %v4748_v36, 0.0 }
 0x60c   :  { %v4808_v63 = vpop.f32.mrf.mxu3  ;;  %v4859_v28 = vpop.f32.mrf.mxu0 }
 0x60d   :  { %v4809_v15 = vadd.f32 %v4808_v63, %v4760_v3  ;;  %v4908_v0 = vpop.f32.mrf.mxu1  ;;  %v11778_v12 = vpack.c.bf16 %v5203_v59, %v5196_v53 }
 0x60f   :  { %12749 = vst [vmem:[#allocation39_spill] sm:$0xff] %v11778_v12  ;;  %v4858_v62 = vadd.f32 %v4857_v9, %v4809_v15  ;;  %v12756_v9 = vld [vmem:[#allocation50_spill] sm:$0xff] }
 0x611   :  { %v11780_v22 = vadd.f32 %v4906_v8, %v4858_v62  ;;  %v8825_v8 = vld [vmem:[#allocation7 + $0xb0] sm:$0xf] }
 0x612   :  { %v4761_v17 = vpop.f32.mrf.mxu2  ;;  %v8826_v50 = vor.u32 %v9701_v2, %v8825_v8  ;;  %v9049_v8 = vld [vmem:[#allocation7 + $0x270] sm:$0xf]  ;;  %v9757_v2 = vld [vmem:[#allocation7 + $0x274] sm:$0xf0] }
 0x613   :  { %v4762_v58 = vadd.f32 %v4761_v17, %v11773_v18  ;;  %v12758_v17 = vld [vmem:[#allocation52_spill] sm:$0xff] }
 0x614   :  { %v4810_v20 = vpop.f32.mrf.mxu3  ;;  %v4862_v47 = vpop.f32.mrf.mxu0  ;;  %5992 = vmatpush.bf16.msrb.mxu2 %v8826_v50  ;;  %v12764_v50 = vld [vmem:[#allocation58_spill] sm:$0xff] }
 0x615   :  { %v4811_v44 = vadd.f32 %v4810_v20, %v4762_v58  ;;  %v4911_v46 = vpop.f32.mrf.mxu1  ;;  %v12759_v58 = vld [vmem:[#allocation74_spill] sm:$0xff] }
 0x616   :  { %v12760_v20 = vld [vmem:[#allocation54_spill] sm:$0xff] }
 0x617   :  { %v4860_v42 = vadd.f32 %v4859_v28, %v4811_v44  ;;  %4959 = vmatmul.bf16.gmra.mxu2 %v12750_v57  ;;  %8728 = vmatmul.msk.bf16.gmra.mxu0 %vm2667_vm0, %v12751_v19  ;;  %v8817_v44 = vld [vmem:[#allocation7 + $0xa0] sm:$0xf] }
 0x618   :  { %5952 = vmatmul.bf16.gmra.mxu1 %v12753_v21 }
 0x619   :  { %5008 = vmatmul.bf16.gmra.mxu3 %v12752_v38  ;;  %v11788_v1 = vadd.f32 %v4908_v0, %v4860_v42 }
 0x61a   :  { %v4764_v13 = vpop.f32.mrf.mxu2 }
 0x61b   :  { %v4765_v30 = vadd.f32 %v4764_v13, %v11773_v18 }
 0x61c   :  { %v4813_v27 = vpop.f32.mrf.mxu3  ;;  %v4864_v41 = vpop.f32.mrf.mxu0 }
 0x61d   :  { %v4814_v5 = vadd.f32 %v4813_v27, %v4765_v30  ;;  %v4913_v55 = vpop.f32.mrf.mxu1 }
 0x61f   :  { %v4863_v54 = vadd.f32 %v4862_v47, %v4814_v5  ;;  %v12761_v47 = vld [vmem:[#allocation80_spill] sm:$0xff] }
 0x621   :  { %v11791_v32 = vadd.f32 %v4911_v46, %v4863_v54  ;;  %v9699_v46 = vld [vmem:[#allocation7 + $0xa4] sm:$0xf0] }
 0x622   :  { %v4766_v14 = vpop.f32.mrf.mxu2  ;;  %v8818_v42 = vor.u32 %v9699_v46, %v8817_v44 }
 0x623   :  { %v4767_v24 = vadd.f32 %v4766_v14, %v11773_v18 }
 0x624   :  { %v4815_v56 = vpop.f32.mrf.mxu3  ;;  %v4867_v37 = vpop.f32.mrf.mxu0  ;;  %5993 = vmatpush.bf16.msrb.mxu2 %v8818_v42 }
 0x625   :  { %v4816_v39 = vadd.f32 %v4815_v56, %v4767_v24  ;;  %v4916_v16 = vpop.f32.mrf.mxu1  ;;  %v8921_v56 = vld [vmem:[#allocation7 + $0x170] sm:$0xf] }
 0x627   :  { %v4865_v26 = vadd.f32 %v4864_v41, %v4816_v39  ;;  %4964 = vmatmul.bf16.gmra.mxu2 %v12754_v40  ;;  %8729 = vmatmul.msk.bf16.gmra.mxu0 %vm2667_vm0, %v12755_v23  ;;  %v8985_v39 = vld [vmem:[#allocation7 + $0x1f0] sm:$0xf]  ;;  %v12763_v40 = vld [vmem:[#allocation75_spill] sm:$0xff] }
 0x628   :  { %5957 = vmatmul.bf16.gmra.mxu1 %v12757_v33 }
 0x629   :  { %5013 = vmatmul.bf16.gmra.mxu3 %v12756_v9  ;;  %v11799_v29 = vadd.f32 %v4913_v55, %v4865_v26  ;;  %v12762_v26 = vld [vmem:[#allocation56_spill] sm:$0xff]  ;;  %v9741_v9 = vld [vmem:[#allocation7 + $0x1f4] sm:$0xf0] }
 0x62a   :  { %v4769_v34 = vpop.f32.mrf.mxu2 }
 0x62b   :  { %v4770_v31 = vadd.f32 %v4769_v34, %v11773_v18  ;;  %v12765_v34 = vld [vmem:[#allocation82_spill] sm:$0xff] }
 0x62c   :  { %v4818_v51 = vpop.f32.mrf.mxu3  ;;  %v4869_v43 = vpop.f32.mrf.mxu0 }
 0x62d   :  { %v4819_v36 = vadd.f32 %v4818_v51, %v4770_v31  ;;  %v4918_v4 = vpop.f32.mrf.mxu1  ;;  %v8809_v31 = vld [vmem:[#allocation7 + $0x90] sm:$0xf]  ;;  %v9697_v51 = vld [vmem:[#allocation7 + $0x94] sm:$0xf0] }
 0x62f   :  { %v4868_v49 = vadd.f32 %v4867_v37, %v4819_v36  ;;  %v9725_v37 = vld [vmem:[#allocation7 + $0x174] sm:$0xf0]  ;;  %v9050_v36 = vor.u32 %v9757_v2, %v9049_v8  ;;  %v9025_v2 = vld [vmem:[#allocation7 + $0x240] sm:$0xf] }
 0x630   :  { %v8922_v23 = vor.u32 %v9725_v37, %v8921_v56 }
 0x631   :  { %v11802_v53 = vadd.f32 %v4916_v16, %v4868_v49  ;;  %6135 = vmatpush.bf16.msrb.mxu1 %v9050_v36 }
 0x632   :  { %v4771_v3 = vpop.f32.mrf.mxu2  ;;  %6037 = vmatpush.bf16.msrb.mxu3 %v8922_v23 }
 0x633   :  { %v4772_v63 = vadd.f32 %v4771_v3, %v11773_v18 }
 0x634   :  { %v4820_v59 = vpop.f32.mrf.mxu3  ;;  %v4872_v28 = vpop.f32.mrf.mxu0 }
 0x635   :  { %v4821_v15 = vadd.f32 %v4820_v59, %v4772_v63  ;;  %v4921_v0 = vpop.f32.mrf.mxu1  ;;  %v8913_v63 = vld [vmem:[#allocation7 + $0x160] sm:$0xf]  ;;  %v9723_v59 = vld [vmem:[#allocation7 + $0x164] sm:$0xf0] }
 0x637   :  { %v4870_v62 = vadd.f32 %v4869_v43, %v4821_v15  ;;  %4969 = vmatmul.bf16.gmra.mxu2 %v12758_v17  ;;  %8730 = vmatmul.msk.bf16.gmra.mxu0 %vm2667_vm0, %v12759_v58  ;;  %v8986_v43 = vor.u32 %v9741_v9, %v8985_v39  ;;  %v9739_v17 = vld [vmem:[#allocation7 + $0x1e4] sm:$0xf0]  ;;  %v9041_v58 = vld [vmem:[#allocation7 + $0x260] sm:$0xf] }
 0x638   :  { %5962 = vmatmul.bf16.gmra.mxu1 %v12761_v47 }
 0x639   :  { %5018 = vmatmul.bf16.gmra.mxu3 %v12760_v20  ;;  %v11810_v57 = vadd.f32 %v4918_v4, %v4870_v62  ;;  %v8810_v4 = vor.u32 %v9697_v51, %v8809_v31  ;;  %6086 = vmatpush.bf16.msrb.mxu0 %v8986_v43  ;;  %v8914_v62 = vor.u32 %v9723_v59, %v8913_v63  ;;  %v9755_v20 = vld [vmem:[#allocation7 + $0x264] sm:$0xf0]  ;;  %v8953_v63 = vld [vmem:[#allocation7 + $0x1b0] sm:$0xf] }
 0x63a   :  { %v4774_v19 = vpop.f32.mrf.mxu2  ;;  %v9042_v42 = vor.u32 %v9755_v20, %v9041_v58  ;;  %v9749_v58 = vld [vmem:[#allocation7 + $0x234] sm:$0xf0]  ;;  %v12768_v20 = vld [vmem:[#allocation62_spill] sm:$0xff] }
 0x63b   :  { %v4775_v38 = vadd.f32 %v4774_v19, %v11773_v18  ;;  %5994 = vmatpush.bf16.msrb.mxu2 %v8810_v4  ;;  %6038 = vmatpush.bf16.msrb.mxu3 %v8914_v62  ;;  %v9733_v62 = vld [vmem:[#allocation7 + $0x1b4] sm:$0xf0] }
 0x63c   :  { %v4823_v11 = vpop.f32.mrf.mxu3  ;;  %v4874_v48 = vpop.f32.mrf.mxu0  ;;  %6136 = vmatpush.bf16.msrb.mxu1 %v9042_v42  ;;  %v8801_v42 = vld [vmem:[#allocation7 + $0x80] sm:$0xf] }
 0x63d   :  { %v4824_v61 = vadd.f32 %v4823_v11, %v4775_v38  ;;  %v4923_v13 = vpop.f32.mrf.mxu1  ;;  %v8905_v11 = vld [vmem:[#allocation7 + $0x150] sm:$0xf] }
 0x63f   :  { %v4873_v30 = vadd.f32 %v4872_v28, %v4824_v61  ;;  %v8977_v28 = vld [vmem:[#allocation7 + $0x1e0] sm:$0xf]  ;;  %v8969_v61 = vld [vmem:[#allocation7 + $0x1d0] sm:$0xf] }
 0x640   :  { %v8978_v46 = vor.u32 %v9739_v17, %v8977_v28  ;;  %v12766_v28 = vld [vmem:[#allocation60_spill] sm:$0xff] }
 0x641   :  { %v11813_v27 = vadd.f32 %v4921_v0, %v4873_v30  ;;  %v9017_v17 = vld [vmem:[#allocation7 + $0x230] sm:$0xf] }
 0x642   :  { %v4776_v41 = vpop.f32.mrf.mxu2  ;;  %6087 = vmatpush.bf16.msrb.mxu0 %v8978_v46  ;;  %v12769_v46 = vld [vmem:[#allocation84_spill] sm:$0xff] }
 0x643   :  { %v4777_v5 = vadd.f32 %v4776_v41, %v11773_v18  ;;  %v9737_v41 = vld [vmem:[#allocation7 + $0x1d4] sm:$0xf0] }
 0x644   :  { %v4825_v55 = vpop.f32.mrf.mxu3  ;;  %v4877_v54 = vpop.f32.mrf.mxu0 }
 0x645   :  { %v4826_v14 = vadd.f32 %v4825_v55, %v4777_v5  ;;  %v4926_v24 = vpop.f32.mrf.mxu1  ;;  %v9033_v5 = vld [vmem:[#allocation7 + $0x250] sm:$0xf]  ;;  %v9753_v55 = vld [vmem:[#allocation7 + $0x254] sm:$0xf0] }
 0x646   :  { %v9034_v56 = vor.u32 %v9753_v55, %v9033_v5  ;;  %v8945_v5 = vld [vmem:[#allocation7 + $0x1a0] sm:$0xf] }
 0x647   :  { %v4875_v16 = vadd.f32 %v4874_v48, %v4826_v14  ;;  %4974 = vmatmul.bf16.gmra.mxu2 %v12762_v26  ;;  %8731 = vmatmul.msk.bf16.gmra.mxu0 %vm2667_vm0, %v12763_v40  ;;  %v9721_v48 = vld [vmem:[#allocation7 + $0x154] sm:$0xf0]  ;;  %v8970_v14 = vor.u32 %v9737_v41, %v8969_v61  ;;  %v9719_v26 = vld [vmem:[#allocation7 + $0x144] sm:$0xf0]  ;;  %v8961_v40 = vld [vmem:[#allocation7 + $0x1c0] sm:$0xf] }
 0x648   :  { %5967 = vmatmul.bf16.gmra.mxu1 %v12765_v34  ;;  %v8906_v30 = vor.u32 %v9721_v48, %v8905_v11  ;;  %v8954_v11 = vor.u32 %v9733_v62, %v8953_v63  ;;  %v9018_v48 = vor.u32 %v9749_v58, %v9017_v17  ;;  %v9715_v41 = vld [vmem:[#allocation7 + $0x124] sm:$0xf0]  ;;  %v8929_v17 = vld [vmem:[#allocation7 + $0x180] sm:$0xf] }
 0x649   :  { %5023 = vmatmul.bf16.gmra.mxu3 %v12764_v50  ;;  %v11821_v49 = vadd.f32 %v4923_v13, %v4875_v16  ;;  %6088 = vmatpush.bf16.msrb.mxu0 %v8970_v14  ;;  %v8897_v16 = vld [vmem:[#allocation7 + $0x140] sm:$0xf]  ;;  %v9751_v50 = vld [vmem:[#allocation7 + $0x244] sm:$0xf0] }
 0x64a   :  { %v4779_v3 = vpop.f32.mrf.mxu2  ;;  %6039 = vmatpush.bf16.msrb.mxu3 %v8906_v30  ;;  %6137 = vmatpush.bf16.msrb.mxu1 %v9034_v56  ;;  %v8898_v8 = vor.u32 %v9719_v26, %v8897_v16  ;;  %v9026_v43 = vor.u32 %v9751_v50, %v9025_v2  ;;  %v8881_v30 = vld [vmem:[#allocation7 + $0x120] sm:$0xf]  ;;  %v9747_v26 = vld [vmem:[#allocation7 + $0x224] sm:$0xf0]  ;;  %v9713_v2 = vld [vmem:[#allocation7 + $0x114] sm:$0xf0] }
 0x64b   :  { %v4780_v15 = vadd.f32 %v4779_v3, %v11773_v18  ;;  %v9717_v3 = vld [vmem:[#allocation7 + $0x134] sm:$0xf0]  ;;  %v8882_v56 = vor.u32 %v9715_v41, %v8881_v30  ;;  %v9009_v16 = vld [vmem:[#allocation7 + $0x220] sm:$0xf]  ;;  %v8937_v50 = vld [vmem:[#allocation7 + $0x190] sm:$0xf] }
 0x64c   :  { %v4828_v0 = vpop.f32.mrf.mxu3  ;;  %v4879_v44 = vpop.f32.mrf.mxu0  ;;  %v9711_v62 = vld [vmem:[#allocation7 + $0x104] sm:$0xf0] }
 0x64d   :  { %v4829_v19 = vadd.f32 %v4828_v0, %v4780_v15  ;;  %v4928_v38 = vpop.f32.mrf.mxu1  ;;  %v12767_v15 = vld [vmem:[#allocation76_spill] sm:$0xff] }
 0x64e   :  { %6040 = vmatpush.bf16.msrb.mxu3 %v8898_v8  ;;  %6138 = vmatpush.bf16.msrb.mxu1 %v9026_v43 }
 0x64f   :  { %v4878_v13 = vadd.f32 %v4877_v54, %v4829_v19  ;;  %v9735_v54 = vld [vmem:[#allocation7 + $0x1c4] sm:$0xf0] }
 0x650   :  { %v8962_v51 = vor.u32 %v9735_v54, %v8961_v40  ;;  %v9695_v19 = vld [vmem:[#allocation7 + $0x84] sm:$0xf0]  ;;  %v8873_v54 = vld [vmem:[#allocation7 + $0x110] sm:$0xf] }
 0x651   :  { %v11824_v37 = vadd.f32 %v4926_v24, %v4878_v13  ;;  %v8889_v24 = vld [vmem:[#allocation7 + $0x130] sm:$0xf]  ;;  %v8802_v61 = vor.u32 %v9695_v19, %v8801_v42  ;;  %v8874_v43 = vor.u32 %v9713_v2, %v8873_v54  ;;  %v8993_v19 = vld [vmem:[#allocation7 + $0x200] sm:$0xf] }
 0x652   :  { %v4781_v39 = vpop.f32.mrf.mxu2  ;;  %6089 = vmatpush.bf16.msrb.mxu0 %v8962_v51  ;;  %v8890_v0 = vor.u32 %v9717_v3, %v8889_v24  ;;  %6139 = vmatpush.bf16.msrb.mxu1 %v9018_v48  ;;  %v9001_v24 = vld [vmem:[#allocation7 + $0x210] sm:$0xf]  ;;  %v9745_v3 = vld [vmem:[#allocation7 + $0x214] sm:$0xf0] }
 0x653   :  { %v4782_v23 = vadd.f32 %v4781_v39, %v11773_v18  ;;  %5995 = vmatpush.bf16.msrb.mxu2 %v8802_v61  ;;  %v9731_v39 = vld [vmem:[#allocation7 + $0x1a4] sm:$0xf0] }
 0x654   :  { %v4830_v9 = vpop.f32.mrf.mxu3  ;;  %v4882_v31 = vpop.f32.mrf.mxu0  ;;  %6041 = vmatpush.bf16.msrb.mxu3 %v8890_v0  ;;  %v8865_v0 = vld [vmem:[#allocation7 + $0x100] sm:$0xf]  ;;  %v9743_v61 = vld [vmem:[#allocation7 + $0x204] sm:$0xf0] }
 0x655   :  { %v4831_v36 = vadd.f32 %v4830_v9, %v4782_v23  ;;  %v4931_v4 = vpop.f32.mrf.mxu1  ;;  %v8946_v23 = vor.u32 %v9731_v39, %v8945_v5  ;;  %v9010_v9 = vor.u32 %v9747_v26, %v9009_v16  ;;  %v8866_v42 = vor.u32 %v9711_v62, %v8865_v0  ;;  %v12770_v5 = vld [vmem:[#allocation64_spill] sm:$0xff]  ;;  %v9773_v16 = vld [vmem:[#allocation7 + $0x2f4] sm:$0xf0]  ;;  %v12775_v62 = vld [vmem:[#allocation78_spill] sm:$0xff] }
 0x656   :  { %6090 = vmatpush.bf16.msrb.mxu0 %v8954_v11  ;;  %v9113_v39 = vld [vmem:[#allocation7 + $0x2f0] sm:$0xf] }
 0x657   :  { %v4880_v59 = vadd.f32 %v4879_v44, %v4831_v36  ;;  %4979 = vmatmul.bf16.gmra.mxu2 %v12766_v28  ;;  %8732 = vmatmul.msk.bf16.gmra.mxu0 %vm2667_vm0, %v12767_v15  ;;  %v9729_v36 = vld [vmem:[#allocation7 + $0x194] sm:$0xf0]  ;;  %v9114_v26 = vor.u32 %v9773_v16, %v9113_v39  ;;  %v12774_v0 = vld [vmem:[#allocation68_spill] sm:$0xff] }
 0x658   :  { %5972 = vmatmul.bf16.gmra.mxu1 %v12769_v46  ;;  %6042 = vmatpush.bf16.msrb.mxu3 %v8882_v56  ;;  %v8938_v63 = vor.u32 %v9729_v36, %v8937_v50  ;;  %v12773_v56 = vld [vmem:[#allocation85_spill] sm:$0xff] }
 0x659   :  { %5028 = vmatmul.bf16.gmra.mxu3 %v12768_v20  ;;  %v11832_v44 = vadd.f32 %v4928_v38, %v4880_v59  ;;  %6140 = vmatpush.bf16.msrb.mxu1 %v9010_v9  ;;  %v9002_v59 = vor.u32 %v9745_v3, %v9001_v24 }
 0x65a   :  { %v4784_v13 = vpop.f32.mrf.mxu2  ;;  %6091 = vmatpush.bf16.msrb.mxu0 %v8946_v23  ;;  %6184 = vmatpush.bf16.msra.mxu2 %v9114_v26 }
 0x65b   :  { %v4785_v55 = vadd.f32 %v4784_v13, %v11773_v18 }
 0x65c   :  { %v4833_v14 = vpop.f32.mrf.mxu3  ;;  %v4884_v40 = vpop.f32.mrf.mxu0  ;;  %6043 = vmatpush.bf16.msrb.mxu3 %v8874_v43 }
 0x65d   :  { %v4834_v8 = vadd.f32 %v4833_v14, %v4785_v55  ;;  %v4933_v38 = vpop.f32.mrf.mxu1  ;;  %6141 = vmatpush.bf16.msrb.mxu1 %v9002_v59  ;;  %v12771_v55 = vld [vmem:[#allocation77_spill] sm:$0xff]  ;;  %v12772_v14 = vld [vmem:[#allocation66_spill] sm:$0xff] }
 0x65e   :  { %6092 = vmatpush.bf16.msrb.mxu0 %v8938_v63 }
 0x65f   :  { %v4883_v51 = vadd.f32 %v4882_v31, %v4834_v8  ;;  %v9727_v31 = vld [vmem:[#allocation7 + $0x184] sm:$0xf0] }
 0x660   :  { %v8930_v48 = vor.u32 %v9727_v31, %v8929_v17  ;;  %6044 = vmatpush.bf16.msrb.mxu3 %v8866_v42  ;;  %v12776_v17 = vld [vmem:[#allocation70_spill] sm:$0xff] }
 0x661   :  { %v11835_v28 = vadd.f32 %v4931_v4, %v4883_v51  ;;  %v8994_v4 = vor.u32 %v9743_v61, %v8993_v19 }
 0x662   :  { %v4786_v15 = vpop.f32.mrf.mxu2  ;;  %6093 = vmatpush.bf16.msrb.mxu0 %v8930_v48  ;;  %v9771_v48 = vld [vmem:[#allocation7 + $0x2e4] sm:$0xf0] }
 0x663   :  { %v4787_v58 = vadd.f32 %v4786_v15, %v11773_v18  ;;  %6142 = vmatpush.bf16.msrb.mxu1 %v8994_v4 }
 0x664   :  { %v4835_v20 = vpop.f32.mrf.mxu3  ;;  %v4887_v11 = vpop.f32.mrf.mxu0 }
 0x665   :  { %v4836_v13 = vadd.f32 %v4835_v20, %v4787_v58  ;;  %v4936_v30 = vpop.f32.mrf.mxu1  ;;  %v12777_v58 = vld [vmem:[#allocation86_spill] sm:$0xff] }
 0x667   :  { %v4885_v41 = vadd.f32 %v4884_v40, %v4836_v13  ;;  %4984 = vmatmul.bf16.gmra.mxu2 %v12770_v5  ;;  %8733 = vmatmul.msk.bf16.gmra.mxu0 %vm2667_vm0, %v12771_v55 }
 0x668   :  { %5977 = vmatmul.bf16.gmra.mxu1 %v12773_v56  ;;  %v8755_v56 = vld [vmem:[#allocation7 + $0x28] sm:$0xf0] }
 0x669   :  { %5033 = vmatmul.bf16.gmra.mxu3 %v12772_v14  ;;  %v11843_v23 = vadd.f32 %v4933_v38, %v4885_v41 }
 0x66a   :  { %v4789_v9 = vpop.f32.mrf.mxu2 }
 0x66b   :  { %v4790_v8 = vadd.f32 %v4789_v9, %v11773_v18 }
 0x66c   :  { %v4838_v54 = vpop.f32.mrf.mxu3  ;;  %v4889_v40 = vpop.f32.mrf.mxu0 }
 0x66d   :  { %v4839_v2 = vadd.f32 %v4838_v54, %v4790_v8  ;;  %v4938_v50 = vpop.f32.mrf.mxu1  ;;  %v12778_v54 = vld [vmem:[#allocation87_spill] sm:$0xff] }
 0x66f   :  { %v4888_v51 = vadd.f32 %v4887_v11, %v4839_v2  ;;  %v9105_v11 = vld [vmem:[#allocation7 + $0x2e0] sm:$0xf]  ;;  %v12780_v2 = vld [vmem:[#allocation91_spill] sm:$0xff] }
 0x670   :  { %v9106_v13 = vor.u32 %v9771_v48, %v9105_v11 }
 0x671   :  { %v11846_v43 = vadd.f32 %v4936_v30, %v4888_v51  ;;  %v9097_v51 = vld [vmem:[#allocation7 + $0x2d0] sm:$0xf] }
 0x672   :  { %v4791_v36 = vpop.f32.mrf.mxu2  ;;  %6185 = vmatpush.bf16.msra.mxu2 %v9106_v13  ;;  %v12782_v13 = vld [vmem:[#allocation88_spill] sm:$0xff] }
 0x673   :  { %v4792_v24 = vadd.f32 %v4791_v36, %v11773_v18  ;;  %v9769_v36 = vld [vmem:[#allocation7 + $0x2d4] sm:$0xf0] }
 0x674   :  { %v4840_v3 = vpop.f32.mrf.mxu3  ;;  %v4892_v63 = vpop.f32.mrf.mxu0 }
 0x675   :  { %v4841_v59 = vadd.f32 %v4840_v3, %v4792_v24  ;;  %v4941_v15 = vpop.f32.mrf.mxu1 }
 0x677   :  { %v4890_v38 = vadd.f32 %v4889_v40, %v4841_v59  ;;  %4989 = vmatmul.bf16.gmra.mxu2 %v12774_v0  ;;  %8734 = vmatmul.msk.bf16.gmra.mxu0 %vm2667_vm0, %v12775_v62  ;;  %v12779_v40 = vld [vmem:[#allocation41_spill] sm:$0xff] }
 0x678   :  { %5982 = vmatmul.bf16.gmra.mxu1 %v12777_v58  ;;  %v8787_v58 = vld [vmem:[#allocation7 + $0x68] sm:$0xf0] }
 0x679   :  { %5038 = vmatmul.bf16.gmra.mxu3 %v12776_v17  ;;  %v11854_v20 = vadd.f32 %v4938_v50, %v4890_v38  ;;  %v12781_v50 = vld [vmem:[#allocation102_spill] sm:$0xff] }
 0x67a   :  { %v4794_v42 = vpop.f32.mrf.mxu2 }
 0x67b   :  { %v4795_v31 = vadd.f32 %v4794_v42, %v11773_v18 }
 0x67c   :  { %v4843_v19 = vpop.f32.mrf.mxu3  ;;  %v4894_v61 = vpop.f32.mrf.mxu0 }
 0x67d   :  { %v4844_v30 = vadd.f32 %v4843_v19, %v4795_v31  ;;  %v4943_v4 = vpop.f32.mrf.mxu1 }
 0x67f   :  { %v4893_v41 = vadd.f32 %v4892_v63, %v4844_v30  ;;  %v12783_v30 = vld [vmem:[#allocation45_spill] sm:$0xff] }
 0x681   :  { %v11857_v5 = vadd.f32 %v4941_v15, %v4893_v41 }
 0x682   :  { %v4796_v55 = vpop.f32.mrf.mxu2 }
 0x683   :  { %v4797_v14 = vadd.f32 %v4796_v55, %v11773_v18  ;;  %v9098_v18 = vor.u32 %v9769_v36, %v9097_v51 }
 0x684   :  { %v4845_v39 = vpop.f32.mrf.mxu3  ;;  %v5053_v16 = vpop.f32.mrf.mxu0 }
 0x685   :  { %v4846_v26 = vadd.f32 %v4845_v39, %v4797_v14  ;;  %v11860_v9 = vpop.f32.mrf.mxu1  ;;  %6186 = vmatpush.bf16.msra.mxu2 %v9098_v18  ;;  %v9089_v14 = vld [vmem:[#allocation7 + $0x2c0] sm:$0xf]  ;;  %v9767_v39 = vld [vmem:[#allocation7 + $0x2c4] sm:$0xf0] }
 0x687   :  { %v4895_v8 = vadd.f32 %v4894_v61, %v4846_v26  ;;  %5996 = vmatmul.bf16.vlgmr.msrb.gmra.mxu2 %v12778_v54  ;;  %6094 = vmatmul.bf16.vlgmr.msrb.gmra.mxu0 %v12779_v40  ;;  %v9761_v40 = vld [vmem:[#allocation7 + $0x294] sm:$0xf0] }
 0x688   :  { %6143 = vmatmul.bf16.vlgmr.msrb.gmra.mxu1 %v12781_v50 }
 0x689   :  { %6045 = vmatmul.bf16.vlgmr.msrb.gmra.mxu3 %v12780_v2  ;;  %v11866_v24 = vadd.f32 %v4943_v4, %v4895_v8  ;;  %v12785_v4 = vld [vmem:[#allocation103_spill] sm:$0xff] }
 0x68a   :  { %v4955_v3 = vpop.f32.mrf.mxu2 }
 0x68b   :  { %v4956_v63 = vadd.f32 %v4955_v3, %v11780_v22  ;;  %v12784_v22 = vld [vmem:[#allocation92_spill] sm:$0xff] }
 0x68c   :  { %v5004_v59 = vpop.f32.mrf.mxu3  ;;  %v5055_v15 = vpop.f32.mrf.mxu0 }
 0x68d   :  { %v5005_v38 = vadd.f32 %v5004_v59, %v4956_v63  ;;  %v11869_v0 = vpop.f32.mrf.mxu1 }
 0x68f   :  { %v5054_v62 = vadd.f32 %v5053_v16, %v5005_v38 }
 0x691   :  { %v5099_v41 = vmax.f32 %v5054_v62, 0.0 }
 0x692   :  { %v4957_v17 = vpop.f32.mrf.mxu2 }
 0x693   :  { %v4958_v42 = vadd.f32 %v4957_v17, %v11788_v1  ;;  %v9090_v1 = vor.u32 %v9767_v39, %v9089_v14  ;;  %v9765_v39 = vld [vmem:[#allocation7 + $0x2b4] sm:$0xf0] }
 0x694   :  { %v5006_v31 = vpop.f32.mrf.mxu3  ;;  %v5058_v19 = vpop.f32.mrf.mxu0 }
 0x695   :  { %v5007_v11 = vadd.f32 %v5006_v31, %v4958_v42  ;;  %v11872_v48 = vpop.f32.mrf.mxu1  ;;  %6187 = vmatpush.bf16.msra.mxu2 %v9090_v1 }
 0x697   :  { %v5056_v61 = vadd.f32 %v5055_v15, %v5007_v11  ;;  %6001 = vmatmul.bf16.gmra.mxu2 %v12782_v13  ;;  %6099 = vmatmul.bf16.gmra.mxu0 %v12783_v30  ;;  %v12787_v11 = vld [vmem:[#allocation89_spill] sm:$0xff] }
 0x698   :  { %6148 = vmatmul.bf16.gmra.mxu1 %v12785_v4 }
 0x699   :  { %6050 = vmatmul.bf16.gmra.mxu3 %v12784_v22  ;;  %v5106_v55 = vmax.f32 %v5056_v61, 0.0  ;;  %v12788_v61 = vld [vmem:[#allocation98_spill] sm:$0xff]  ;;  %v9065_v22 = vld [vmem:[#allocation7 + $0x290] sm:$0xf] }
 0x69a   :  { %v4960_v16 = vpop.f32.mrf.mxu2 }
 0x69b   :  { %v11878_v26 = vpack.c.bf16 %v5106_v55, %v5099_v41  ;;  %v4961_v8 = vadd.f32 %v4960_v16, %v11791_v32  ;;  %v12789_v32 = vld [vmem:[#allocation93_spill] sm:$0xff]  ;;  %v12790_v41 = vld [vmem:[#allocation104_spill] sm:$0xff] }
 0x69c   :  { %v5009_v51 = vpop.f32.mrf.mxu3  ;;  %v5060_v36 = vpop.f32.mrf.mxu0 }
 0x69d   :  { %12786 = vst [vmem:[#allocation25_spill] sm:$0xff] %v11878_v26  ;;  %v5010_v3 = vadd.f32 %v5009_v51, %v4961_v8  ;;  %v11881_v18 = vpop.f32.mrf.mxu1 }
 0x69f   :  { %v5059_v63 = vadd.f32 %v5058_v19, %v5010_v3  ;;  %v9081_v19 = vld [vmem:[#allocation7 + $0x2b0] sm:$0xf] }
 0x6a1   :  { %v5113_v55 = vmax.f32 %v5059_v63, 0.0 }
 0x6a2   :  { %v4962_v59 = vpop.f32.mrf.mxu2 }
 0x6a3   :  { %v4963_v15 = vadd.f32 %v4962_v59, %v11799_v29  ;;  %v9082_v29 = vor.u32 %v9765_v39, %v9081_v19  ;;  %v12791_v39 = vld [vmem:[#allocation90_spill] sm:$0xff] }
 0x6a4   :  { %v5011_v38 = vpop.f32.mrf.mxu3  ;;  %v5063_v62 = vpop.f32.mrf.mxu0 }
 0x6a5   :  { %v5012_v17 = vadd.f32 %v5011_v38, %v4963_v15  ;;  %v11884_v42 = vpop.f32.mrf.mxu1  ;;  %6188 = vmatpush.bf16.msra.mxu2 %v9082_v29 }
 0x6a7   :  { %v5061_v31 = vadd.f32 %v5060_v36, %v5012_v17  ;;  %6006 = vmatmul.bf16.gmra.mxu2 %v12787_v11  ;;  %6104 = vmatmul.bf16.gmra.mxu0 %v12788_v61 }
 0x6a8   :  { %6153 = vmatmul.bf16.gmra.mxu1 %v12790_v41 }
 0x6a9   :  { %6055 = vmatmul.bf16.gmra.mxu3 %v12789_v32  ;;  %v5120_v14 = vmax.f32 %v5061_v31, 0.0 }
 0x6aa   :  { %v4965_v16 = vpop.f32.mrf.mxu2 }
 0x6ab   :  { %v4966_v1 = vadd.f32 %v4965_v16, %v11802_v53  ;;  %v11891_v51 = vpack.c.bf16 %v5120_v14, %v5113_v55  ;;  %v12792_v53 = vld [vmem:[#allocation99_spill] sm:$0xff]  ;;  %v12793_v55 = vld [vmem:[#allocation94_spill] sm:$0xff]  ;;  %v12794_v14 = vld [vmem:[#allocation57_spill] sm:$0xff] }
 0x6ac   :  { %v5014_v8 = vpop.f32.mrf.mxu3  ;;  %v5065_v36 = vpop.f32.mrf.mxu0 }
 0x6ad   :  { %v5015_v3 = vadd.f32 %v5014_v8, %v4966_v1  ;;  %v11893_v59 = vpop.f32.mrf.mxu1  ;;  %v9763_v1 = vld [vmem:[#allocation7 + $0x2a4] sm:$0xf0] }
 0x6af   :  { %v5064_v15 = vadd.f32 %v5063_v62, %v5015_v3  ;;  %v9073_v62 = vld [vmem:[#allocation7 + $0x2a0] sm:$0xf] }
 0x6b1   :  { %v5127_v16 = vmax.f32 %v5064_v15, 0.0 }
 0x6b2   :  { %v4967_v38 = vpop.f32.mrf.mxu2 }
 0x6b3   :  { %v4968_v17 = vadd.f32 %v4967_v38, %v11810_v57  ;;  %v9074_v57 = vor.u32 %v9763_v1, %v9073_v62  ;;  %v9177_v62 = vld [vmem:[#allocation7 + $0x370] sm:$0xf]  ;;  %v9789_v1 = vld [vmem:[#allocation7 + $0x374] sm:$0xf0] }
 0x6b4   :  { %v5016_v63 = vpop.f32.mrf.mxu3  ;;  %v5068_v31 = vpop.f32.mrf.mxu0 }
 0x6b5   :  { %v5017_v61 = vadd.f32 %v5016_v63, %v4968_v17  ;;  %v11896_v41 = vpop.f32.mrf.mxu1  ;;  %6189 = vmatpush.bf16.msra.mxu2 %v9074_v57  ;;  %v9178_v57 = vor.u32 %v9789_v1, %v9177_v62  ;;  %v9787_v62 = vld [vmem:[#allocation7 + $0x364] sm:$0xf0]  ;;  %v9690_v1 = vld [vmem:[#allocation7 + $0x64] sm:$0xf] }
 0x6b7   :  { %v5066_v19 = vadd.f32 %v5065_v36, %v5017_v61  ;;  %6011 = vmatmul.bf16.gmra.mxu2 %v12791_v39  ;;  %6109 = vmatmul.bf16.gmra.mxu0 %v12792_v53 }
 0x6b8   :  { %6158 = vmatmul.bf16.gmra.mxu1 %v12794_v14  ;;  %6233 = vmatpush.bf16.msra.mxu3 %v9178_v57 }
 0x6b9   :  { %6060 = vmatmul.bf16.gmra.mxu3 %v12793_v55  ;;  %v5134_v29 = vmax.f32 %v5066_v19, 0.0 }
 0x6ba   :  { %v4970_v8 = vpop.f32.mrf.mxu2 }
 0x6bb   :  { %v4971_v3 = vadd.f32 %v4970_v8, %v11813_v27  ;;  %v11903_v17 = vpack.c.bf16 %v5134_v29, %v5127_v16  ;;  %v9692_v27 = vld [vmem:[#allocation7 + $0x74] sm:$0xf] }
 0x6bc   :  { %v5019_v38 = vpop.f32.mrf.mxu3  ;;  %v5070_v61 = vpop.f32.mrf.mxu0  ;;  %v12795_v16 = vld [vmem:[#allocation81_spill] sm:$0xff]  ;;  %v12796_v29 = vld [vmem:[#allocation100_spill] sm:$0xff] }
 0x6bd   :  { %v5020_v36 = vadd.f32 %v5019_v38, %v4971_v3  ;;  %v11905_v63 = vpop.f32.mrf.mxu1  ;;  %v8795_v3 = vld [vmem:[#allocation7 + $0x78] sm:$0xf0]  ;;  %v9708_v38 = vld [vmem:[#allocation7 + $0xf4] sm:$0xf] }
 0x6bf   :  { %v5069_v53 = vadd.f32 %v5068_v31, %v5020_v36  ;;  %v8859_v31 = vld [vmem:[#allocation7 + $0xf8] sm:$0xf0]  ;;  %v12797_v36 = vld [vmem:[#allocation95_spill] sm:$0xff] }
 0x6c2   :  { %v4972_v55 = vpop.f32.mrf.mxu2 }
 0x6c3   :  { %v4973_v14 = vadd.f32 %v4972_v55, %v11821_v49  ;;  %v12798_v49 = vld [vmem:[#allocation61_spill] sm:$0xff]  ;;  %v8798_v55 = vor.u32 %v9692_v27, %v8795_v3  ;;  %v8851_v27 = vld [vmem:[#allocation7 + $0xe8] sm:$0xf0] }
 0x6c4   :  { %v5021_v15 = vpop.f32.mrf.mxu3  ;;  %v5073_v19 = vpop.f32.mrf.mxu0 }
 0x6c5   :  { %v5022_v32 = vadd.f32 %v5021_v15, %v4973_v14  ;;  %v11908_v30 = vpop.f32.mrf.mxu1  ;;  %v8862_v14 = vor.u32 %v9708_v38, %v8859_v31  ;;  %v5141_v15 = vmax.f32 %v5069_v53, 0.0  ;;  %6282 = vmatpush.bf16.msra.mxu0 %v8798_v55  ;;  %v9785_v31 = vld [vmem:[#allocation7 + $0x354] sm:$0xf0] }
 0x6c7   :  { %v5071_v8 = vadd.f32 %v5070_v61, %v5022_v32  ;;  %6016 = vmatmul.bf16.gmra.mxu2 %v12795_v16  ;;  %6114 = vmatmul.bf16.gmra.mxu0 %v12796_v29  ;;  %v9066_v61 = vor.u32 %v9761_v40, %v9065_v22  ;;  %v9169_v29 = vld [vmem:[#allocation7 + $0x360] sm:$0xf]  ;;  %v9161_v22 = vld [vmem:[#allocation7 + $0x350] sm:$0xf] }
 0x6c8   :  { %6163 = vmatmul.bf16.gmra.mxu1 %v12798_v49  ;;  %v9706_v49 = vld [vmem:[#allocation7 + $0xe4] sm:$0xf] }
 0x6c9   :  { %6065 = vmatmul.bf16.gmra.mxu3 %v12797_v36  ;;  %v5148_v4 = vmax.f32 %v5071_v8, 0.0  ;;  %6331 = vmatpush.bf16.msra.mxu1 %v8862_v14  ;;  %v9170_v36 = vor.u32 %v9787_v62, %v9169_v29  ;;  %v8790_v8 = vor.u32 %v9690_v1, %v8787_v58  ;;  %v8854_v57 = vor.u32 %v9706_v49, %v8851_v27  ;;  %v8779_v14 = vld [vmem:[#allocation7 + $0x58] sm:$0xf0]  ;;  %v9153_v58 = vld [vmem:[#allocation7 + $0x340] sm:$0xf] }
 0x6ca   :  { %v4975_v32 = vpop.f32.mrf.mxu2  ;;  %6190 = vmatpush.bf16.msra.mxu2 %v9066_v61  ;;  %v9162_v29 = vor.u32 %v9785_v31, %v9161_v22  ;;  %v8843_v62 = vld [vmem:[#allocation7 + $0xd8] sm:$0xf0]  ;;  %v8771_v27 = vld [vmem:[#allocation7 + $0x48] sm:$0xf0] }
 0x6cb   :  { %v4976_v50 = vadd.f32 %v4975_v32, %v11824_v37  ;;  %v11915_v3 = vpack.c.bf16 %v5148_v4, %v5141_v15  ;;  %6234 = vmatpush.bf16.msra.mxu3 %v9170_v36  ;;  %6283 = vmatpush.bf16.msra.mxu0 %v8790_v8  ;;  %v9688_v37 = vld [vmem:[#allocation7 + $0x54] sm:$0xf]  ;;  %v9702_v8 = vld [vmem:[#allocation7 + $0xc4] sm:$0xf] }
 0x6cc   :  { %v5024_v2 = vpop.f32.mrf.mxu3  ;;  %v5075_v53 = vpop.f32.mrf.mxu0  ;;  %v9704_v32 = vld [vmem:[#allocation7 + $0xd4] sm:$0xf]  ;;  %v8782_v4 = vor.u32 %v9688_v37, %v8779_v14  ;;  %v9781_v14 = vld [vmem:[#allocation7 + $0x334] sm:$0xf0] }
 0x6cd   :  { %v5025_v38 = vadd.f32 %v5024_v2, %v4976_v50  ;;  %v11917_v40 = vpop.f32.mrf.mxu1  ;;  %6332 = vmatpush.bf16.msra.mxu1 %v8854_v57  ;;  %v8846_v15 = vor.u32 %v9704_v32, %v8843_v62  ;;  %v9783_v2 = vld [vmem:[#allocation7 + $0x344] sm:$0xf0]  ;;  %v9686_v50 = vld [vmem:[#allocation7 + $0x44] sm:$0xf]  ;;  %v9684_v32 = vld [vmem:[#allocation7 + $0x34] sm:$0xf] }
 0x6ce   :  { %v9154_v1 = vor.u32 %v9783_v2, %v9153_v58  ;;  %v9700_v58 = vld [vmem:[#allocation7 + $0xb4] sm:$0xf]  ;;  %v8827_v2 = vld [vmem:[#allocation7 + $0xb8] sm:$0xf0] }
 0x6cf   :  { %v5074_v55 = vadd.f32 %v5073_v19, %v5025_v38  ;;  %6235 = vmatpush.bf16.msra.mxu3 %v9162_v29  ;;  %6284 = vmatpush.bf16.msra.mxu0 %v8782_v4  ;;  %v8835_v19 = vld [vmem:[#allocation7 + $0xc8] sm:$0xf0]  ;;  %v8774_v38 = vor.u32 %v9686_v50, %v8771_v27  ;;  %v9145_v29 = vld [vmem:[#allocation7 + $0x330] sm:$0xf]  ;;  %v12801_v50 = vld [vmem:[#allocation34_spill] sm:$0xff] }
 0x6d0   :  { %v8838_v22 = vor.u32 %v9702_v8, %v8835_v19  ;;  %v12799_v4 = vld [vmem:[#allocation83_spill] sm:$0xff]  ;;  %v9057_v19 = vld [vmem:[#allocation7 + $0x280] sm:$0xf] }
 0x6d1   :  { %6333 = vmatpush.bf16.msra.mxu1 %v8846_v15  ;;  %v9146_v15 = vor.u32 %v9781_v14, %v9145_v29  ;;  %v5155_v27 = vmax.f32 %v5074_v55, 0.0  ;;  %v9779_v29 = vld [vmem:[#allocation7 + $0x324] sm:$0xf0]  ;;  %v9682_v14 = vld [vmem:[#allocation7 + $0x24] sm:$0xf] }
 0x6d2   :  { %v4977_v61 = vpop.f32.mrf.mxu2 }
 0x6d3   :  { %v4978_v36 = vadd.f32 %v4977_v61, %v11832_v44  ;;  %6236 = vmatpush.bf16.msra.mxu3 %v9154_v1  ;;  %6285 = vmatpush.bf16.msra.mxu0 %v8774_v38  ;;  %v12800_v44 = vld [vmem:[#allocation63_spill] sm:$0xff]  ;;  %v8763_v61 = vld [vmem:[#allocation7 + $0x38] sm:$0xf0]  ;;  %v8830_v1 = vor.u32 %v9700_v58, %v8827_v2 }
 0x6d4   :  { %v5026_v49 = vpop.f32.mrf.mxu3  ;;  %v5078_v57 = vpop.f32.mrf.mxu0  ;;  %v9759_v38 = vld [vmem:[#allocation7 + $0x284] sm:$0xf0] }
 0x6d5   :  { %v5027_v31 = vadd.f32 %v5026_v49, %v4978_v36  ;;  %v11920_v37 = vpop.f32.mrf.mxu1  ;;  %6334 = vmatpush.bf16.msra.mxu1 %v8838_v22  ;;  %v12802_v36 = vld [vmem:[#allocation105_spill] sm:$0xff]  ;;  %v8766_v49 = vor.u32 %v9684_v32, %v8763_v61  ;;  %v9058_v22 = vor.u32 %v9759_v38, %v9057_v19  ;;  %v8819_v32 = vld [vmem:[#allocation7 + $0xa8] sm:$0xf0] }
 0x6d7   :  { %v5076_v62 = vadd.f32 %v5075_v53, %v5027_v31  ;;  %6021 = vmatmul.bf16.gmra.mxu2 %v12799_v4  ;;  %6119 = vmatmul.bf16.gmra.mxu0 %v12800_v44  ;;  %v9137_v31 = vld [vmem:[#allocation7 + $0x320] sm:$0xf] }
 0x6d8   :  { %6168 = vmatmul.bf16.gmra.mxu1 %v12802_v36  ;;  %6237 = vmatpush.bf16.msra.mxu3 %v9146_v15  ;;  %v9698_v36 = vld [vmem:[#allocation7 + $0xa4] sm:$0xf] }
 0x6d9   :  { %6070 = vmatmul.bf16.gmra.mxu3 %v12801_v50  ;;  %v5162_v8 = vmax.f32 %v5076_v62, 0.0  ;;  %6286 = vmatpush.bf16.msra.mxu0 %v8766_v49  ;;  %v9138_v50 = vor.u32 %v9779_v29, %v9137_v31  ;;  %v8758_v62 = vor.u32 %v9682_v14, %v8755_v56  ;;  %v8822_v15 = vor.u32 %v9698_v36, %v8819_v32  ;;  %v9129_v49 = vld [vmem:[#allocation7 + $0x310] sm:$0xf]  ;;  %v9696_v31 = vld [vmem:[#allocation7 + $0x94] sm:$0xf] }
 0x6da   :  { %v4980_v53 = vpop.f32.mrf.mxu2  ;;  %6335 = vmatpush.bf16.msra.mxu1 %v8830_v1  ;;  %6191 = vmatpush.bf16.msra.mxu2 %v9058_v22  ;;  %v9777_v1 = vld [vmem:[#allocation7 + $0x314] sm:$0xf0]  ;;  %v8811_v29 = vld [vmem:[#allocation7 + $0x98] sm:$0xf0]  ;;  %v9775_v56 = vld [vmem:[#allocation7 + $0x304] sm:$0xf0] }
 0x6db   :  { %v4981_v44 = vadd.f32 %v4980_v53, %v11835_v28  ;;  %v11927_v61 = vpack.c.bf16 %v5162_v8, %v5155_v27  ;;  %v9680_v28 = vld [vmem:[#allocation7 + $0x14] sm:$0xf]  ;;  %v9130_v38 = vor.u32 %v9777_v1, %v9129_v49  ;;  %v8747_v53 = vld [vmem:[#allocation7 + $0x18] sm:$0xf0]  ;;  %v8814_v8 = vor.u32 %v9696_v31, %v8811_v29  ;;  %v8739_v32 = vld [vmem:[#allocation7 + $0x8] sm:$0xf0] }
 0x6dc   :  { %v5029_v12 = vpop.f32.mrf.mxu3  ;;  %v5080_v55 = vpop.f32.mrf.mxu0  ;;  %6238 = vmatpush.bf16.msra.mxu3 %v9138_v50  ;;  %v8750_v27 = vor.u32 %v9680_v28, %v8747_v53  ;;  %v12803_v53 = vld [vmem:[#allocation32_spill] sm:$0xff]  ;;  %v12804_v31 = vld [vmem:[#allocation65_spill] sm:$0xff] }
 0x6dd   :  { %v5030_v58 = vadd.f32 %v5029_v12, %v4981_v44  ;;  %v11929_v2 = vpop.f32.mrf.mxu1  ;;  %6287 = vmatpush.bf16.msra.mxu0 %v8758_v62  ;;  %v9121_v12 = vld [vmem:[#allocation7 + $0x300] sm:$0xf]  ;;  %v9678_v44 = vld [vmem:[#allocation7 + $0x4] sm:$0xf]  ;;  %v12806_v29 = vld [vmem:[#allocation69_spill] sm:$0xff] }
 0x6de   :  { %6336 = vmatpush.bf16.msra.mxu1 %v8822_v15  ;;  %v9122_v14 = vor.u32 %v9775_v56, %v9121_v12  ;;  %v9694_v62 = vld [vmem:[#allocation7 + $0x84] sm:$0xf]  ;;  %v8923_v12 = vld [vmem:[#allocation7 + $0x178] sm:$0xf0] }
 0x6df   :  { %v5079_v19 = vadd.f32 %v5078_v57, %v5030_v58  ;;  %v8803_v57 = vld [vmem:[#allocation7 + $0x88] sm:$0xf0]  ;;  %v8742_v58 = vor.u32 %v9678_v44, %v8739_v32 }
 0x6e0   :  { %6239 = vmatpush.bf16.msra.mxu3 %v9130_v38  ;;  %v8806_v49 = vor.u32 %v9694_v62, %v8803_v57 }
 0x6e1   :  { %6288 = vmatpush.bf16.msra.mxu0 %v8750_v27  ;;  %v5169_v27 = vmax.f32 %v5079_v19, 0.0 }
 0x6e2   :  { %v4982_v22 = vpop.f32.mrf.mxu2  ;;  %6337 = vmatpush.bf16.msra.mxu1 %v8814_v8 }
 0x6e3   :  { %v4983_v50 = vadd.f32 %v4982_v22, %v11843_v23  ;;  %v12805_v23 = vld [vmem:[#allocation96_spill] sm:$0xff] }
 0x6e4   :  { %v5031_v36 = vpop.f32.mrf.mxu3  ;;  %v5083_v15 = vpop.f32.mrf.mxu0  ;;  %6240 = vmatpush.bf16.msra.mxu3 %v9122_v14  ;;  %v9724_v22 = vld [vmem:[#allocation7 + $0x174] sm:$0xf] }
 0x6e5   :  { %v5032_v1 = vadd.f32 %v5031_v36, %v4983_v50  ;;  %v11932_v28 = vpop.f32.mrf.mxu1  ;;  %6289 = vmatpush.bf16.msra.mxu0 %v8742_v58  ;;  %v8926_v44 = vor.u32 %v9724_v22, %v8923_v12  ;;  %v12807_v12 = vld [vmem:[#allocation36_spill] sm:$0xff] }
 0x6e6   :  { %6338 = vmatpush.bf16.msra.mxu1 %v8806_v49 }
 0x6e7   :  { %v5081_v38 = vadd.f32 %v5080_v55, %v5032_v1  ;;  %6026 = vmatmul.bf16.gmra.mxu2 %v12803_v53  ;;  %6124 = vmatmul.bf16.gmra.mxu0 %v12804_v31 }
 0x6e8   :  { %6173 = vmatmul.bf16.gmra.mxu1 %v12806_v29  ;;  %6380 = vmatpush.bf16.msrb.mxu2 %v8926_v44  ;;  %v8915_v44 = vld [vmem:[#allocation7 + $0x168] sm:$0xf0] }
 0x6e9   :  { %6075 = vmatmul.bf16.gmra.mxu3 %v12805_v23  ;;  %v5176_v8 = vmax.f32 %v5081_v38, 0.0 }
 0x6ea   :  { %v4985_v56 = vpop.f32.mrf.mxu2 }
 0x6eb   :  { %v4986_v50 = vadd.f32 %v4985_v56, %v11846_v43  ;;  %v11939_v14 = vpack.c.bf16 %v5176_v8, %v5169_v27  ;;  %v12808_v43 = vld [vmem:[#allocation101_spill] sm:$0xff]  ;;  %v12810_v8 = vld [vmem:[#allocation23_spill] sm:$0xff] }
 0x6ec   :  { %v5034_v36 = vpop.f32.mrf.mxu3  ;;  %v5085_v55 = vpop.f32.mrf.mxu0  ;;  %v12809_v27 = vld [vmem:[#allocation97_spill] sm:$0xff]  ;;  %v9722_v56 = vld [vmem:[#allocation7 + $0x164] sm:$0xf] }
 0x6ed   :  { %v5035_v32 = vadd.f32 %v5034_v36, %v4986_v50  ;;  %v11941_v62 = vpop.f32.mrf.mxu1  ;;  %v8918_v36 = vor.u32 %v9722_v56, %v8915_v44 }
 0x6ef   :  { %v5084_v57 = vadd.f32 %v5083_v15, %v5035_v32  ;;  %6381 = vmatpush.bf16.msrb.mxu2 %v8918_v36 }
 0x6f1   :  { %v5183_v15 = vmax.f32 %v5084_v57, 0.0 }
 0x6f2   :  { %v4987_v58 = vpop.f32.mrf.mxu2 }
 0x6f3   :  { %v4988_v49 = vadd.f32 %v4987_v58, %v11854_v20 }
 0x6f4   :  { %v5036_v19 = vpop.f32.mrf.mxu3  ;;  %v5088_v1 = vpop.f32.mrf.mxu0 }
 0x6f5   :  { %v5037_v38 = vadd.f32 %v5036_v19, %v4988_v49  ;;  %v11944_v31 = vpop.f32.mrf.mxu1 }
 0x6f7   :  { %v5086_v22 = vadd.f32 %v5085_v55, %v5037_v38  ;;  %6031 = vmatmul.bf16.gmra.mxu2 %v12807_v12  ;;  %6129 = vmatmul.bf16.gmra.mxu0 %v12808_v43 }
 0x6f8   :  { %6178 = vmatmul.bf16.gmra.mxu1 %v12810_v8 }
 0x6f9   :  { %6080 = vmatmul.bf16.gmra.mxu3 %v12809_v27  ;;  %v5190_v50 = vmax.f32 %v5086_v22, 0.0  ;;  %v11955_v27 = vld [vmem:[#allocation8] sm:$0x3] }
 0x6fa   :  { %v4990_v20 = vpop.f32.mrf.mxu2  ;;  %v11959_v56 = vperm.slane %v11955_v27, 0 }
 0x6fb   :  { %v4991_v32 = vadd.f32 %v4990_v20, %v11857_v5  ;;  %v11951_v49 = vpack.c.bf16 %v5190_v50, %v5183_v15  ;;  %v8907_v15 = vld [vmem:[#allocation7 + $0x158] sm:$0xf0] }
 0x6fc   :  { %v5039_v58 = vpop.f32.mrf.mxu3  ;;  %v5090_v55 = vpop.f32.mrf.mxu0 }
 0x6fd   :  { %v5040_v19 = vadd.f32 %v5039_v58, %v4991_v32  ;;  %v11953_v38 = vpop.f32.mrf.mxu1 }
 0x6ff   :  { %v5089_v43 = vadd.f32 %v5088_v1, %v5040_v19  ;;  %v9720_v1 = vld [vmem:[#allocation7 + $0x154] sm:$0xf] }
 0x700   :  { %v8910_v20 = vor.u32 %v9720_v1, %v8907_v15 }
 0x702   :  { %v4992_v8 = vpop.f32.mrf.mxu2  ;;  %6382 = vmatpush.bf16.msrb.mxu2 %v8910_v20 }
 0x703   :  { %v4993_v29 = vadd.f32 %v4992_v8, %v11866_v24  ;;  %v5949_v24 = vadd.f32 %v11860_v9, %v11959_v56  ;;  %v5197_v8 = vmax.f32 %v5089_v43, 0.0 }
 0x704   :  { %v5041_v57 = vpop.f32.mrf.mxu3  ;;  %v6095_v22 = vpop.f32.mrf.mxu0 }
 0x705   :  { %v5042_v5 = vadd.f32 %v5041_v57, %v4993_v29  ;;  %v6144_v44 = vpop.f32.mrf.mxu1 }
 0x707   :  { %v5091_v36 = vadd.f32 %v5090_v55, %v5042_v5  ;;  %6192 = vmatmul.bf16.vlgmr.msra.gmra.mxu2 %v11706_v35  ;;  %6290 = vmatmul.bf16.vlgmr.msra.gmra.mxu0 %v12748_v52 }
 0x708   :  { %6339 = vmatmul.bf16.vlgmr.msra.gmra.mxu1 %v12778_v54  ;;  %v5951_v54 = vadd.f32 %v11869_v0, %v11959_v56  ;;  %v5954_v0 = vadd.f32 %v11872_v48, %v11959_v56 }
 0x709   :  { %6241 = vmatmul.bf16.vlgmr.msra.gmra.mxu3 %v11878_v26  ;;  %v5204_v50 = vmax.f32 %v5091_v36, 0.0 }
 0x70a   :  { %v5997_v32 = vpop.f32.mrf.mxu2 }
 0x70b   :  { %v5998_v29 = vadd.f32 %v5997_v32, %v5949_v24  ;;  %v11967_v55 = vpack.c.bf16 %v5204_v50, %v5197_v8  ;;  %v8899_v8 = vld [vmem:[#allocation7 + $0x148] sm:$0xf0] }
 0x70c   :  { %v6046_v58 = vpop.f32.mrf.mxu3  ;;  %v6097_v19 = vpop.f32.mrf.mxu0 }
 0x70d   :  { %v6047_v52 = vadd.f32 %v6046_v58, %v5998_v29  ;;  %v6146_v57 = vpop.f32.mrf.mxu1 }
 0x70f   :  { %v6096_v5 = vadd.f32 %v6095_v22, %v6047_v52  ;;  %v9718_v22 = vld [vmem:[#allocation7 + $0x144] sm:$0xf]  ;;  %v5956_v52 = vadd.f32 %v11881_v18, %v11959_v56  ;;  %v5959_v18 = vadd.f32 %v11884_v42, %v11959_v56 }
 0x711   :  { %v11971_v26 = vadd.f32 %v6144_v44, %v6096_v5  ;;  %v8902_v44 = vor.u32 %v9718_v22, %v8899_v8 }
 0x712   :  { %v5999_v23 = vpop.f32.mrf.mxu2 }
 0x713   :  { %v6000_v9 = vadd.f32 %v5999_v23, %v5951_v54  ;;  %6383 = vmatpush.bf16.msrb.mxu2 %v8902_v44 }
 0x714   :  { %v6048_v43 = vpop.f32.mrf.mxu3  ;;  %v6100_v36 = vpop.f32.mrf.mxu0 }
 0x715   :  { %v6049_v1 = vadd.f32 %v6048_v43, %v6000_v9  ;;  %v6149_v15 = vpop.f32.mrf.mxu1 }
 0x717   :  { %v6098_v24 = vadd.f32 %v6097_v19, %v6049_v1  ;;  %6197 = vmatmul.bf16.gmra.mxu2 %v11716_v25  ;;  %6295 = vmatmul.bf16.gmra.mxu0 %v12753_v21 }
 0x718   :  { %6344 = vmatmul.bf16.gmra.mxu1 %v12782_v13 }
 0x719   :  { %6246 = vmatmul.bf16.gmra.mxu3 %v11891_v51  ;;  %v11979_v23 = vadd.f32 %v6146_v57, %v6098_v24  ;;  %v8891_v24 = vld [vmem:[#allocation7 + $0x138] sm:$0xf0] }
 0x71a   :  { %v6002_v50 = vpop.f32.mrf.mxu2 }
 0x71b   :  { %v6003_v20 = vadd.f32 %v6002_v50, %v5954_v0 }
 0x71c   :  { %v6051_v32 = vpop.f32.mrf.mxu3  ;;  %v6102_v29 = vpop.f32.mrf.mxu0 }
 0x71d   :  { %v6052_v58 = vadd.f32 %v6051_v32, %v6003_v20  ;;  %v6151_v19 = vpop.f32.mrf.mxu1 }
 0x71f   :  { %v6101_v21 = vadd.f32 %v6100_v36, %v6052_v58  ;;  %v9716_v36 = vld [vmem:[#allocation7 + $0x134] sm:$0xf] }
 0x721   :  { %v11983_v13 = vadd.f32 %v6149_v15, %v6101_v21  ;;  %v8894_v15 = vor.u32 %v9716_v36, %v8891_v24 }
 0x722   :  { %v6004_v5 = vpop.f32.mrf.mxu2 }
 0x723   :  { %v6005_v54 = vadd.f32 %v6004_v5, %v5956_v52  ;;  %6384 = vmatpush.bf16.msrb.mxu2 %v8894_v15 }
 0x724   :  { %v6053_v9 = vpop.f32.mrf.mxu3  ;;  %v6105_v48 = vpop.f32.mrf.mxu0 }
 0x725   :  { %v6054_v43 = vadd.f32 %v6053_v9, %v6005_v54  ;;  %v6154_v57 = vpop.f32.mrf.mxu1  ;;  %v9714_v9 = vld [vmem:[#allocation7 + $0x124] sm:$0xf] }
 0x727   :  { %v6103_v1 = vadd.f32 %v6102_v29, %v6054_v43  ;;  %6202 = vmatmul.bf16.gmra.mxu2 %v11726_v6  ;;  %6300 = vmatmul.bf16.gmra.mxu0 %v12757_v33  ;;  %v5961_v29 = vadd.f32 %v11893_v59, %v11959_v56  ;;  %v5964_v59 = vadd.f32 %v11896_v41, %v11959_v56 }
 0x728   :  { %6349 = vmatmul.bf16.gmra.mxu1 %v12787_v11 }
 0x729   :  { %6251 = vmatmul.bf16.gmra.mxu3 %v11903_v17  ;;  %v11991_v22 = vadd.f32 %v6151_v19, %v6103_v1 }
 0x72a   :  { %v6007_v8 = vpop.f32.mrf.mxu2 }
 0x72b   :  { %v6008_v0 = vadd.f32 %v6007_v8, %v5959_v18 }
 0x72c   :  { %v6056_v44 = vpop.f32.mrf.mxu3  ;;  %v6107_v50 = vpop.f32.mrf.mxu0 }
 0x72d   :  { %v6057_v20 = vadd.f32 %v6056_v44, %v6008_v0  ;;  %v6156_v32 = vpop.f32.mrf.mxu1  ;;  %v5966_v0 = vadd.f32 %v11905_v63, %v11959_v56  ;;  %v9115_v63 = vld [vmem:[#allocation7 + $0x2f8] sm:$0xf0] }
 0x72f   :  { %v6106_v33 = vadd.f32 %v6105_v48, %v6057_v20  ;;  %v8883_v48 = vld [vmem:[#allocation7 + $0x128] sm:$0xf0] }
 0x730   :  { %v8886_v43 = vor.u32 %v9714_v9, %v8883_v48  ;;  %v8875_v9 = vld [vmem:[#allocation7 + $0x118] sm:$0xf0] }
 0x731   :  { %v11995_v11 = vadd.f32 %v6154_v57, %v6106_v33 }
 0x732   :  { %v6009_v58 = vpop.f32.mrf.mxu2  ;;  %6385 = vmatpush.bf16.msrb.mxu2 %v8886_v43  ;;  %v5969_v43 = vadd.f32 %v11908_v30, %v11959_v56 }
 0x733   :  { %v6010_v21 = vadd.f32 %v6009_v58, %v5961_v29  ;;  %v9740_v29 = vld [vmem:[#allocation7 + $0x1f4] sm:$0xf]  ;;  %v8987_v58 = vld [vmem:[#allocation7 + $0x1f8] sm:$0xf0] }
 0x734   :  { %v6058_v52 = vpop.f32.mrf.mxu3  ;;  %v6110_v42 = vpop.f32.mrf.mxu0 }
 0x735   :  { %v6059_v5 = vadd.f32 %v6058_v52, %v6010_v21  ;;  %v6159_v19 = vpop.f32.mrf.mxu1  ;;  %v9756_v21 = vld [vmem:[#allocation7 + $0x274] sm:$0xf] }
 0x737   :  { %v6108_v54 = vadd.f32 %v6107_v50, %v6059_v5  ;;  %6207 = vmatmul.bf16.gmra.mxu2 %v11736_v60  ;;  %6305 = vmatmul.bf16.gmra.mxu0 %v12761_v47  ;;  %v9051_v5 = vld [vmem:[#allocation7 + $0x278] sm:$0xf0] }
 0x738   :  { %6354 = vmatmul.bf16.gmra.mxu1 %v12791_v39  ;;  %v9054_v48 = vor.u32 %v9756_v21, %v9051_v5 }
 0x739   :  { %6256 = vmatmul.bf16.gmra.mxu3 %v11915_v3  ;;  %v12003_v57 = vadd.f32 %v6156_v32, %v6108_v54  ;;  %v9772_v54 = vld [vmem:[#allocation7 + $0x2f4] sm:$0xf] }
 0x73a   :  { %v6012_v1 = vpop.f32.mrf.mxu2  ;;  %6478 = vmatpush.bf16.msrb.mxu0 %v9054_v48 }
 0x73b   :  { %v6013_v36 = vadd.f32 %v6012_v1, %v5964_v59  ;;  %v9118_v59 = vor.u32 %v9772_v54, %v9115_v63  ;;  %v9035_v63 = vld [vmem:[#allocation7 + $0x258] sm:$0xf0] }
 0x73c   :  { %v6061_v24 = vpop.f32.mrf.mxu3  ;;  %v6112_v18 = vpop.f32.mrf.mxu0 }
 0x73d   :  { %v6062_v15 = vadd.f32 %v6061_v24, %v6013_v36  ;;  %v6161_v8 = vpop.f32.mrf.mxu1  ;;  %6527 = vmatpush.bf16.msrb.mxu1 %v9118_v59  ;;  %v9738_v24 = vld [vmem:[#allocation7 + $0x1e4] sm:$0xf] }
 0x73f   :  { %v6111_v47 = vadd.f32 %v6110_v42, %v6062_v15  ;;  %v8990_v42 = vor.u32 %v9740_v29, %v8987_v58  ;;  %v9754_v15 = vld [vmem:[#allocation7 + $0x264] sm:$0xf] }
 0x741   :  { %v12007_v39 = vadd.f32 %v6159_v19, %v6111_v47  ;;  %v9712_v19 = vld [vmem:[#allocation7 + $0x114] sm:$0xf]  ;;  %6429 = vmatpush.bf16.msrb.mxu3 %v8990_v42 }
 0x742   :  { %v6014_v44 = vpop.f32.mrf.mxu2  ;;  %v8878_v1 = vor.u32 %v9712_v19, %v8875_v9  ;;  %v9752_v42 = vld [vmem:[#allocation7 + $0x254] sm:$0xf]  ;;  %v9099_v9 = vld [vmem:[#allocation7 + $0x2d8] sm:$0xf0] }
 0x743   :  { %v6015_v50 = vadd.f32 %v6014_v44, %v5966_v0  ;;  %v9043_v44 = vld [vmem:[#allocation7 + $0x268] sm:$0xf0]  ;;  %v9768_v19 = vld [vmem:[#allocation7 + $0x2d4] sm:$0xf]  ;;  %v9038_v48 = vor.u32 %v9752_v42, %v9035_v63 }
 0x744   :  { %v6063_v20 = vpop.f32.mrf.mxu3  ;;  %v6115_v41 = vpop.f32.mrf.mxu0  ;;  %6386 = vmatpush.bf16.msrb.mxu2 %v8878_v1  ;;  %v9046_v29 = vor.u32 %v9754_v15, %v9043_v44  ;;  %v9102_v59 = vor.u32 %v9768_v19, %v9099_v9  ;;  %v9750_v15 = vld [vmem:[#allocation7 + $0x244] sm:$0xf]  ;;  %v9764_v63 = vld [vmem:[#allocation7 + $0x2b4] sm:$0xf]  ;;  %v9083_v19 = vld [vmem:[#allocation7 + $0x2b8] sm:$0xf0] }
 0x745   :  { %v6064_v33 = vadd.f32 %v6063_v20, %v6015_v50  ;;  %v6164_v32 = vpop.f32.mrf.mxu1  ;;  %v9770_v50 = vld [vmem:[#allocation7 + $0x2e4] sm:$0xf]  ;;  %v9107_v20 = vld [vmem:[#allocation7 + $0x2e8] sm:$0xf0] }
 0x746   :  { %v9110_v30 = vor.u32 %v9770_v50, %v9107_v20  ;;  %6479 = vmatpush.bf16.msrb.mxu0 %v9046_v29  ;;  %v9766_v44 = vld [vmem:[#allocation7 + $0x2c4] sm:$0xf]  ;;  %v9091_v50 = vld [vmem:[#allocation7 + $0x2c8] sm:$0xf0] }
 0x747   :  { %v6113_v52 = vadd.f32 %v6112_v18, %v6064_v33  ;;  %6212 = vmatmul.bf16.gmra.mxu2 %v11746_v10  ;;  %6310 = vmatmul.bf16.gmra.mxu0 %v12765_v34  ;;  %v8979_v18 = vld [vmem:[#allocation7 + $0x1e8] sm:$0xf0]  ;;  %v9710_v9 = vld [vmem:[#allocation7 + $0x104] sm:$0xf] }
 0x748   :  { %6359 = vmatmul.bf16.gmra.mxu1 %v12795_v16  ;;  %v8982_v16 = vor.u32 %v9738_v24, %v8979_v18  ;;  %v9734_v24 = vld [vmem:[#allocation7 + $0x1c4] sm:$0xf]  ;;  %v8963_v18 = vld [vmem:[#allocation7 + $0x1c8] sm:$0xf0] }
 0x749   :  { %6261 = vmatmul.bf16.gmra.mxu3 %v11927_v61  ;;  %v12015_v36 = vadd.f32 %v6161_v8, %v6113_v52  ;;  %6528 = vmatpush.bf16.msrb.mxu1 %v9110_v30  ;;  %v9736_v8 = vld [vmem:[#allocation7 + $0x1d4] sm:$0xf]  ;;  %v8971_v52 = vld [vmem:[#allocation7 + $0x1d8] sm:$0xf0]  ;;  %v9094_v30 = vor.u32 %v9766_v44, %v9091_v50  ;;  %v9762_v44 = vld [vmem:[#allocation7 + $0x2a4] sm:$0xf] }
 0x74a   :  { %v6017_v34 = vpop.f32.mrf.mxu2  ;;  %6430 = vmatpush.bf16.msrb.mxu3 %v8982_v16  ;;  %v8974_v54 = vor.u32 %v9736_v8, %v8971_v52  ;;  %6480 = vmatpush.bf16.msrb.mxu0 %v9038_v48  ;;  %v9027_v16 = vld [vmem:[#allocation7 + $0x248] sm:$0xf0]  ;;  %v8955_v8 = vld [vmem:[#allocation7 + $0x1b8] sm:$0xf0]  ;;  %v9748_v52 = vld [vmem:[#allocation7 + $0x234] sm:$0xf] }
 0x74b   :  { %v6018_v47 = vadd.f32 %v6017_v34, %v5969_v43  ;;  %v5971_v43 = vadd.f32 %v11917_v40, %v11959_v56  ;;  %v9030_v29 = vor.u32 %v9750_v15, %v9027_v16  ;;  %v8867_v48 = vld [vmem:[#allocation7 + $0x108] sm:$0xf0] }
 0x74c   :  { %v6066_v0 = vpop.f32.mrf.mxu3  ;;  %v6117_v33 = vpop.f32.mrf.mxu0  ;;  %v8947_v15 = vld [vmem:[#allocation7 + $0x1a8] sm:$0xf0] }
 0x74d   :  { %v6067_v58 = vadd.f32 %v6066_v0, %v6018_v47  ;;  %v6166_v21 = vpop.f32.mrf.mxu1  ;;  %6529 = vmatpush.bf16.msrb.mxu1 %v9102_v59  ;;  %v8966_v0 = vor.u32 %v9734_v24, %v8963_v18  ;;  %v9730_v18 = vld [vmem:[#allocation7 + $0x1a4] sm:$0xf]  ;;  %v9011_v16 = vld [vmem:[#allocation7 + $0x228] sm:$0xf0] }
 0x74e   :  { %6431 = vmatpush.bf16.msrb.mxu3 %v8974_v54  ;;  %6481 = vmatpush.bf16.msrb.mxu0 %v9030_v29  ;;  %v9019_v54 = vld [vmem:[#allocation7 + $0x238] sm:$0xf0]  ;;  %v9075_v50 = vld [vmem:[#allocation7 + $0x2a8] sm:$0xf0] }
 0x74f   :  { %v6116_v5 = vadd.f32 %v6115_v41, %v6067_v58  ;;  %v9022_v59 = vor.u32 %v9748_v52, %v9019_v54  ;;  %v9744_v52 = vld [vmem:[#allocation7 + $0x214] sm:$0xf]  ;;  %v9003_v54 = vld [vmem:[#allocation7 + $0x218] sm:$0xf0] }
 0x751   :  { %v12019_v1 = vadd.f32 %v6164_v32, %v6116_v5  ;;  %6530 = vmatpush.bf16.msrb.mxu1 %v9094_v30  ;;  %v9732_v32 = vld [vmem:[#allocation7 + $0x1b4] sm:$0xf] }
 0x752   :  { %v6019_v34 = vpop.f32.mrf.mxu2  ;;  %6432 = vmatpush.bf16.msrb.mxu3 %v8966_v0  ;;  %v8958_v5 = vor.u32 %v9732_v32, %v8955_v8  ;;  %6482 = vmatpush.bf16.msrb.mxu0 %v9022_v59  ;;  %v8939_v8 = vld [vmem:[#allocation7 + $0x198] sm:$0xf0]  ;;  %v5976_v59 = vadd.f32 %v11929_v2, %v11959_v56 }
 0x753   :  { %v6020_v47 = vadd.f32 %v6019_v34, %v5971_v43  ;;  %v9086_v43 = vor.u32 %v9764_v63, %v9083_v19  ;;  %v5974_v34 = vadd.f32 %v11920_v37, %v11959_v56  ;;  %v9078_v37 = vor.u32 %v9762_v44, %v9075_v50  ;;  %v9760_v63 = vld [vmem:[#allocation7 + $0x294] sm:$0xf]  ;;  %v9067_v19 = vld [vmem:[#allocation7 + $0x298] sm:$0xf0] }
 0x754   :  { %v6068_v41 = vpop.f32.mrf.mxu3  ;;  %v6120_v20 = vpop.f32.mrf.mxu0 }
 0x755   :  { %v6069_v58 = vadd.f32 %v6068_v41, %v6020_v47  ;;  %v6169_v40 = vpop.f32.mrf.mxu1  ;;  %6531 = vmatpush.bf16.msrb.mxu1 %v9086_v43  ;;  %v9746_v47 = vld [vmem:[#allocation7 + $0x224] sm:$0xf] }
 0x756   :  { %6433 = vmatpush.bf16.msrb.mxu3 %v8958_v5  ;;  %v9014_v30 = vor.u32 %v9746_v47, %v9011_v16 }
 0x757   :  { %v6118_v42 = vadd.f32 %v6117_v33, %v6069_v58  ;;  %6217 = vmatmul.bf16.gmra.mxu2 %v11756_v45  ;;  %6315 = vmatmul.bf16.gmra.mxu0 %v12769_v46  ;;  %v8870_v33 = vor.u32 %v9710_v9, %v8867_v48  ;;  %v9006_v9 = vor.u32 %v9744_v52, %v9003_v54 }
 0x758   :  { %6364 = vmatmul.bf16.gmra.mxu1 %v12799_v4  ;;  %v8950_v4 = vor.u32 %v9730_v18, %v8947_v15  ;;  %6483 = vmatpush.bf16.msrb.mxu0 %v9014_v30  ;;  %v9070_v48 = vor.u32 %v9760_v63, %v9067_v19  ;;  %v9742_v18 = vld [vmem:[#allocation7 + $0x204] sm:$0xf] }
 0x759   :  { %6266 = vmatmul.bf16.gmra.mxu3 %v11939_v14  ;;  %v12027_v24 = vadd.f32 %v6166_v21, %v6118_v42  ;;  %6387 = vmatpush.bf16.msrb.mxu2 %v8870_v33  ;;  %v9728_v21 = vld [vmem:[#allocation7 + $0x194] sm:$0xf]  ;;  %v9726_v33 = vld [vmem:[#allocation7 + $0x184] sm:$0xf] }
 0x75a   :  { %v6022_v46 = vpop.f32.mrf.mxu2  ;;  %6434 = vmatpush.bf16.msrb.mxu3 %v8950_v4  ;;  %6532 = vmatpush.bf16.msrb.mxu1 %v9078_v37  ;;  %v8942_v5 = vor.u32 %v9728_v21, %v8939_v8  ;;  %v9059_v4 = vld [vmem:[#allocation7 + $0x288] sm:$0xf0]  ;;  %v12811_v37 = vld [vmem:[#allocation85_spill] sm:$0xff]  ;;  %v5979_v8 = vadd.f32 %v11932_v28, %v11959_v56 }
 0x75b   :  { %v6023_v41 = vadd.f32 %v6022_v46, %v5974_v34  ;;  %v8931_v46 = vld [vmem:[#allocation7 + $0x188] sm:$0xf0]  ;;  %v9179_v21 = vld [vmem:[#allocation7 + $0x378] sm:$0xf0] }
 0x75c   :  { %v6071_v0 = vpop.f32.mrf.mxu3  ;;  %v6122_v29 = vpop.f32.mrf.mxu0  ;;  %6484 = vmatpush.bf16.msrb.mxu0 %v9006_v9  ;;  %v8934_v47 = vor.u32 %v9726_v33, %v8931_v46 }
 0x75d   :  { %v6072_v58 = vadd.f32 %v6071_v0, %v6023_v41  ;;  %v6171_v32 = vpop.f32.mrf.mxu1  ;;  %v8995_v41 = vld [vmem:[#allocation7 + $0x208] sm:$0xf0]  ;;  %v9758_v0 = vld [vmem:[#allocation7 + $0x284] sm:$0xf] }
 0x75e   :  { %6435 = vmatpush.bf16.msrb.mxu3 %v8942_v5  ;;  %6533 = vmatpush.bf16.msrb.mxu1 %v9070_v48  ;;  %v8998_v44 = vor.u32 %v9742_v18, %v8995_v41  ;;  %v9062_v50 = vor.u32 %v9758_v0, %v9059_v4  ;;  %v9786_v41 = vld [vmem:[#allocation7 + $0x364] sm:$0xf]  ;;  %v9171_v0 = vld [vmem:[#allocation7 + $0x368] sm:$0xf0] }
 0x75f   :  { %v6121_v42 = vadd.f32 %v6120_v20, %v6072_v58  ;;  %v9788_v58 = vld [vmem:[#allocation7 + $0x374] sm:$0xf] }
 0x760   :  { %6485 = vmatpush.bf16.msrb.mxu0 %v8998_v44  ;;  %v9182_v52 = vor.u32 %v9788_v58, %v9179_v21  ;;  %v9174_v44 = vor.u32 %v9786_v41, %v9171_v0  ;;  %v5986_v21 = vadd.f32 %v11953_v38, %v11959_v56  ;;  %v12816_v38 = vld [vmem:[#allocation41_spill] sm:$0xff] }
 0x761   :  { %v12031_v43 = vadd.f32 %v6169_v40, %v6121_v42 }
 0x762   :  { %v6024_v34 = vpop.f32.mrf.mxu2  ;;  %6436 = vmatpush.bf16.msrb.mxu3 %v8934_v47  ;;  %6534 = vmatpush.bf16.msrb.mxu1 %v9062_v50  ;;  %v12813_v47 = vld [vmem:[#allocation86_spill] sm:$0xff] }
 0x763   :  { %v6025_v15 = vadd.f32 %v6024_v34, %v5976_v59  ;;  %6576 = vmatpush.bf16.msra.mxu2 %v9182_v52  ;;  %v5981_v59 = vadd.f32 %v11941_v62, %v11959_v56  ;;  %v5984_v62 = vadd.f32 %v11944_v31, %v11959_v56  ;;  %v9163_v56 = vld [vmem:[#allocation7 + $0x358] sm:$0xf0] }
 0x764   :  { %v6073_v20 = vpop.f32.mrf.mxu3  ;;  %v6125_v16 = vpop.f32.mrf.mxu0 }
 0x765   :  { %v6074_v30 = vadd.f32 %v6073_v20, %v6025_v15  ;;  %v6174_v2 = vpop.f32.mrf.mxu1  ;;  %v12812_v20 = vld [vmem:[#allocation39_spill] sm:$0xff] }
 0x767   :  { %v6123_v40 = vadd.f32 %v6122_v29, %v6074_v30  ;;  %6222 = vmatmul.bf16.gmra.mxu2 %v11766_v7  ;;  %6320 = vmatmul.bf16.gmra.mxu0 %v12811_v37 }
 0x768   :  { %6369 = vmatmul.bf16.gmra.mxu1 %v12803_v53  ;;  %6577 = vmatpush.bf16.msra.mxu2 %v9174_v44 }
 0x769   :  { %6271 = vmatmul.bf16.gmra.mxu3 %v11951_v49  ;;  %v12039_v42 = vadd.f32 %v6171_v32, %v6123_v40 }
 0x76a   :  { %v6027_v5 = vpop.f32.mrf.mxu2 }
 0x76b   :  { %v6028_v54 = vadd.f32 %v6027_v5, %v5979_v8 }
 0x76c   :  { %v6076_v63 = vpop.f32.mrf.mxu3  ;;  %v6127_v29 = vpop.f32.mrf.mxu0 }
 0x76d   :  { %v6077_v19 = vadd.f32 %v6076_v63, %v6028_v54  ;;  %v6176_v9 = vpop.f32.mrf.mxu1 }
 0x76f   :  { %v6126_v48 = vadd.f32 %v6125_v16, %v6077_v19 }
 0x771   :  { %v12043_v53 = vadd.f32 %v6174_v2, %v6126_v48 }
 0x772   :  { %v6029_v34 = vpop.f32.mrf.mxu2 }
 0x773   :  { %v6030_v33 = vadd.f32 %v6029_v34, %v5981_v59  ;;  %v12814_v59 = vld [vmem:[#allocation91_spill] sm:$0xff]  ;;  %v12815_v34 = vld [vmem:[#allocation102_spill] sm:$0xff] }
 0x774   :  { %v6078_v46 = vpop.f32.mrf.mxu3  ;;  %v6130_v28 = vpop.f32.mrf.mxu0 }
 0x775   :  { %v6079_v18 = vadd.f32 %v6078_v46, %v6030_v33  ;;  %v6179_v32 = vpop.f32.mrf.mxu1 }
 0x777   :  { %v6128_v15 = vadd.f32 %v6127_v29, %v6079_v18  ;;  %6227 = vmatmul.bf16.gmra.mxu2 %v12812_v20  ;;  %6325 = vmatmul.bf16.gmra.mxu0 %v12813_v47 }
 0x778   :  { %6374 = vmatmul.bf16.gmra.mxu1 %v12807_v12  ;;  %v12056_v12 = vperm.slane %v11955_v27, 1  ;;  %v9784_v27 = vld [vmem:[#allocation7 + $0x354] sm:$0xf] }
 0x779   :  { %6276 = vmatmul.bf16.gmra.mxu3 %v11967_v55  ;;  %v12051_v4 = vadd.f32 %v6176_v9, %v6128_v15  ;;  %v9166_v33 = vor.u32 %v9784_v27, %v9163_v56 }
 0x77a   :  { %v6032_v16 = vpop.f32.mrf.mxu2 }
 0x77b   :  { %v6033_v50 = vadd.f32 %v6032_v16, %v5984_v62  ;;  %6578 = vmatpush.bf16.msra.mxu2 %v9166_v33 }
 0x77c   :  { %v6081_v30 = vpop.f32.mrf.mxu3  ;;  %v6132_v2 = vpop.f32.mrf.mxu0 }
 0x77d   :  { %v6082_v40 = vadd.f32 %v6081_v30, %v6033_v50  ;;  %v6181_v37 = vpop.f32.mrf.mxu1 }
 0x77f   :  { %v6131_v58 = vadd.f32 %v6130_v28, %v6082_v40 }
 0x781   :  { %v12058_v31 = vadd.f32 %v6179_v32, %v6131_v58 }
 0x782   :  { %v6034_v8 = vpop.f32.mrf.mxu2 }
 0x783   :  { %v6035_v52 = vadd.f32 %v6034_v8, %v5986_v21  ;;  %v12817_v21 = vld [vmem:[#allocation92_spill] sm:$0xff]  ;;  %v12818_v8 = vld [vmem:[#allocation103_spill] sm:$0xff] }
 0x784   :  { %v6083_v5 = vpop.f32.mrf.mxu3  ;;  %v6291_v54 = vpop.f32.mrf.mxu0 }
 0x785   :  { %v6084_v63 = vadd.f32 %v6083_v5, %v6035_v52  ;;  %v6292_v29 = vadd.f32 %v6291_v54, %v12056_v12  ;;  %v6340_v19 = vpop.f32.mrf.mxu1  ;;  %v12819_v52 = vld [vmem:[#allocation45_spill] sm:$0xff]  ;;  %v9782_v5 = vld [vmem:[#allocation7 + $0x344] sm:$0xf] }
 0x787   :  { %v6133_v9 = vadd.f32 %v6132_v2, %v6084_v63  ;;  %v12061_v48 = vadd.f32 %v6340_v19, %v6292_v29  ;;  %6388 = vmatmul.bf16.vlgmr.msrb.gmra.mxu2 %v12814_v59  ;;  %6486 = vmatmul.bf16.vlgmr.msrb.gmra.mxu0 %v12815_v34 }
 0x788   :  { %6535 = vmatmul.bf16.vlgmr.msrb.gmra.mxu1 %v11706_v35 }
 0x789   :  { %6437 = vmatmul.bf16.vlgmr.msrb.gmra.mxu3 %v12816_v38  ;;  %v12067_v46 = vadd.f32 %v6181_v37, %v6133_v9 }
 0x78a   :  { %v6193_v28 = vpop.f32.mrf.mxu2 }
 0x78b   :  { %v6194_v18 = vadd.f32 %v6193_v28, %v11971_v26 }
 0x78c   :  { %v6242_v32 = vpop.f32.mrf.mxu3  ;;  %v6293_v15 = vpop.f32.mrf.mxu0 }
 0x78d   :  { %v6243_v47 = vadd.f32 %v6242_v32, %v6194_v18  ;;  %v6294_v62 = vadd.f32 %v6293_v15, %v12056_v12  ;;  %v6342_v41 = vpop.f32.mrf.mxu1 }
 0x78f   :  { %v12071_v0 = vadd.f32 %v6342_v41, %v6294_v62  ;;  %v6625_v37 = vmax.f32 %v6243_v47, 0.0 }
 0x792   :  { %v6195_v16 = vpop.f32.mrf.mxu2 }
 0x793   :  { %v6196_v35 = vadd.f32 %v6195_v16, %v11979_v23  ;;  %v9155_v23 = vld [vmem:[#allocation7 + $0x348] sm:$0xf0]  ;;  %v12820_v16 = vld [vmem:[#allocation93_spill] sm:$0xff] }
 0x794   :  { %v6244_v44 = vpop.f32.mrf.mxu3  ;;  %v6296_v50 = vpop.f32.mrf.mxu0  ;;  %v9158_v63 = vor.u32 %v9782_v5, %v9155_v23 }
 0x795   :  { %v6245_v30 = vadd.f32 %v6244_v44, %v6196_v35  ;;  %v6297_v2 = vadd.f32 %v6296_v50, %v12056_v12  ;;  %v6345_v40 = vpop.f32.mrf.mxu1  ;;  %v12821_v35 = vld [vmem:[#allocation104_spill] sm:$0xff]  ;;  %v12822_v44 = vld [vmem:[#allocation98_spill] sm:$0xff] }
 0x796   :  { %6579 = vmatpush.bf16.msra.mxu2 %v9158_v63  ;;  %v9780_v50 = vld [vmem:[#allocation7 + $0x334] sm:$0xf] }
 0x797   :  { %v6627_v26 = vmax.f32 %v6245_v30, 0.0  ;;  %v12075_v58 = vadd.f32 %v6345_v40, %v6297_v2  ;;  %6393 = vmatmul.bf16.gmra.mxu2 %v12817_v21  ;;  %6491 = vmatmul.bf16.gmra.mxu0 %v12818_v8 }
 0x798   :  { %6540 = vmatmul.bf16.gmra.mxu1 %v11716_v25 }
 0x799   :  { %6442 = vmatmul.bf16.gmra.mxu3 %v12819_v52  ;;  %v12081_v54 = vpack.c.bf16 %v6627_v26, %v6625_v37 }
 0x79a   :  { %v6198_v29 = vpop.f32.mrf.mxu2 }
 0x79b   :  { %v6199_v19 = vadd.f32 %v6198_v29, %v11983_v13 }
 0x79c   :  { %v6247_v9 = vpop.f32.mrf.mxu3  ;;  %v6298_v59 = vpop.f32.mrf.mxu0 }
 0x79d   :  { %v6248_v34 = vadd.f32 %v6247_v9, %v6199_v19  ;;  %v6299_v38 = vadd.f32 %v6298_v59, %v12056_v12  ;;  %v6347_v27 = vpop.f32.mrf.mxu1 }
 0x79f   :  { %v12085_v56 = vadd.f32 %v6347_v27, %v6299_v38  ;;  %v6629_v62 = vmax.f32 %v6248_v34, 0.0 }
 0x7a2   :  { %v6200_v33 = vpop.f32.mrf.mxu2 }
 0x7a3   :  { %v6201_v25 = vadd.f32 %v6200_v33, %v11991_v22  ;;  %v9147_v22 = vld [vmem:[#allocation7 + $0x338] sm:$0xf0] }
 0x7a4   :  { %v6249_v28 = vpop.f32.mrf.mxu3  ;;  %v6301_v18 = vpop.f32.mrf.mxu0  ;;  %v9150_v30 = vor.u32 %v9780_v50, %v9147_v22  ;;  %v12823_v33 = vld [vmem:[#allocation94_spill] sm:$0xff] }
 0x7a5   :  { %v6250_v32 = vadd.f32 %v6249_v28, %v6201_v25  ;;  %v6302_v15 = vadd.f32 %v6301_v18, %v12056_v12  ;;  %v6350_v47 = vpop.f32.mrf.mxu1  ;;  %v12824_v25 = vld [vmem:[#allocation57_spill] sm:$0xff]  ;;  %v12825_v28 = vld [vmem:[#allocation99_spill] sm:$0xff] }
 0x7a6   :  { %6580 = vmatpush.bf16.msra.mxu2 %v9150_v30  ;;  %v9778_v18 = vld [vmem:[#allocation7 + $0x324] sm:$0xf] }
 0x7a7   :  { %v6631_v13 = vmax.f32 %v6250_v32, 0.0  ;;  %v12089_v41 = vadd.f32 %v6350_v47, %v6302_v15  ;;  %6398 = vmatmul.bf16.gmra.mxu2 %v12820_v16  ;;  %6496 = vmatmul.bf16.gmra.mxu0 %v12821_v35 }
 0x7a8   :  { %6545 = vmatmul.bf16.gmra.mxu1 %v11726_v6 }
 0x7a9   :  { %6447 = vmatmul.bf16.gmra.mxu3 %v12822_v44  ;;  %v12095_v2 = vpack.c.bf16 %v6631_v13, %v6629_v62 }
 0x7aa   :  { %v6203_v40 = vpop.f32.mrf.mxu2 }
 0x7ab   :  { %v6204_v37 = vadd.f32 %v6203_v40, %v11995_v11 }
 0x7ac   :  { %v6252_v26 = vpop.f32.mrf.mxu3  ;;  %v6303_v21 = vpop.f32.mrf.mxu0 }
 0x7ad   :  { %v6253_v8 = vadd.f32 %v6252_v26, %v6204_v37  ;;  %v6304_v52 = vadd.f32 %v6303_v21, %v12056_v12  ;;  %v6352_v5 = vpop.f32.mrf.mxu1 }
 0x7af   :  { %v12099_v23 = vadd.f32 %v6352_v5, %v6304_v52  ;;  %v6633_v38 = vmax.f32 %v6253_v8, 0.0 }
 0x7b2   :  { %v6205_v63 = vpop.f32.mrf.mxu2 }
 0x7b3   :  { %v6206_v6 = vadd.f32 %v6205_v63, %v12003_v57  ;;  %v9139_v57 = vld [vmem:[#allocation7 + $0x328] sm:$0xf0] }
 0x7b4   :  { %v6254_v29 = vpop.f32.mrf.mxu3  ;;  %v6306_v19 = vpop.f32.mrf.mxu0  ;;  %v9142_v32 = vor.u32 %v9778_v18, %v9139_v57  ;;  %v12826_v63 = vld [vmem:[#allocation95_spill] sm:$0xff] }
 0x7b5   :  { %v6255_v9 = vadd.f32 %v6254_v29, %v6206_v6  ;;  %v6307_v59 = vadd.f32 %v6306_v19, %v12056_v12  ;;  %v6355_v34 = vpop.f32.mrf.mxu1  ;;  %v12827_v6 = vld [vmem:[#allocation61_spill] sm:$0xff]  ;;  %v12828_v19 = vld [vmem:[#allocation100_spill] sm:$0xff] }
 0x7b6   :  { %6581 = vmatpush.bf16.msra.mxu2 %v9142_v32  ;;  %v9797_v29 = vld [vmem:[#allocation10 + $0x38] sm:$0xff]  ;;  %v9795_v32 = vld [vmem:[#allocation10 + $0x28] sm:$0xff] }
 0x7b7   :  { %v6635_v11 = vmax.f32 %v6255_v9, 0.0  ;;  %v12103_v27 = vadd.f32 %v6355_v34, %v6307_v59  ;;  %6403 = vmatmul.bf16.gmra.mxu2 %v12823_v33  ;;  %6501 = vmatmul.bf16.gmra.mxu0 %v12824_v25  ;;  %v9131_v9 = vld [vmem:[#allocation7 + $0x318] sm:$0xf0]  ;;  %v9796_v25 = vld [vmem:[#allocation10 + $0x30] sm:$0xff] }
 0x7b8   :  { %6550 = vmatmul.bf16.gmra.mxu1 %v11736_v60  ;;  %6805 = vmatpush.bf16.msra.mxu3 %v9797_v29 }
 0x7b9   :  { %6452 = vmatmul.bf16.gmra.mxu3 %v12825_v28  ;;  %v12109_v15 = vpack.c.bf16 %v6635_v11, %v6633_v38 }
 0x7ba   :  { %v6208_v47 = vpop.f32.mrf.mxu2 }
 0x7bb   :  { %v6209_v62 = vadd.f32 %v6208_v47, %v12007_v39 }
 0x7bc   :  { %v6257_v13 = vpop.f32.mrf.mxu3  ;;  %v6308_v16 = vpop.f32.mrf.mxu0  ;;  %6806 = vmatpush.bf16.msra.mxu3 %v9796_v25  ;;  %v9790_v25 = vld [vmem:[#allocation10] sm:$0xff] }
 0x7bd   :  { %v6258_v35 = vadd.f32 %v6257_v13, %v6209_v62  ;;  %v6309_v44 = vadd.f32 %v6308_v16, %v12056_v12  ;;  %v6357_v50 = vpop.f32.mrf.mxu1  ;;  %v9794_v13 = vld [vmem:[#allocation10 + $0x20] sm:$0xff] }
 0x7bf   :  { %v12113_v22 = vadd.f32 %v6357_v50, %v6309_v44  ;;  %v6637_v52 = vmax.f32 %v6258_v35, 0.0 }
 0x7c0   :  { %6807 = vmatpush.bf16.msra.mxu3 %v9795_v32 }
 0x7c2   :  { %v6210_v30 = vpop.f32.mrf.mxu2 }
 0x7c3   :  { %v6211_v60 = vadd.f32 %v6210_v30, %v12015_v36  ;;  %v9776_v36 = vld [vmem:[#allocation7 + $0x314] sm:$0xf] }
 0x7c4   :  { %v6259_v40 = vpop.f32.mrf.mxu3  ;;  %v6311_v37 = vpop.f32.mrf.mxu0  ;;  %v9134_v59 = vor.u32 %v9776_v36, %v9131_v9  ;;  %6808 = vmatpush.bf16.msra.mxu3 %v9794_v13 }
 0x7c5   :  { %v6260_v26 = vadd.f32 %v6259_v40, %v6211_v60  ;;  %v6312_v21 = vadd.f32 %v6311_v37, %v12056_v12  ;;  %v6360_v8 = vpop.f32.mrf.mxu1  ;;  %v12829_v40 = vld [vmem:[#allocation34_spill] sm:$0xff]  ;;  %v12830_v37 = vld [vmem:[#allocation105_spill] sm:$0xff] }
 0x7c6   :  { %6582 = vmatpush.bf16.msra.mxu2 %v9134_v59 }
 0x7c7   :  { %v6639_v39 = vmax.f32 %v6260_v26, 0.0  ;;  %v12117_v5 = vadd.f32 %v6360_v8, %v6312_v21  ;;  %6408 = vmatmul.bf16.gmra.mxu2 %v12826_v63  ;;  %6506 = vmatmul.bf16.gmra.mxu0 %v12827_v6  ;;  %v9793_v26 = vld [vmem:[#allocation10 + $0x18] sm:$0xff]  ;;  %v12831_v21 = vld [vmem:[#allocation63_spill] sm:$0xff] }
 0x7c8   :  { %6555 = vmatmul.bf16.gmra.mxu1 %v11746_v10  ;;  %v9123_v8 = vld [vmem:[#allocation7 + $0x308] sm:$0xf0]  ;;  %6809 = vmatpush.bf16.msra.mxu3 %v9793_v26 }
 0x7c9   :  { %6457 = vmatmul.bf16.gmra.mxu3 %v12828_v19  ;;  %v12123_v34 = vpack.c.bf16 %v6639_v39, %v6637_v52  ;;  %v9792_v19 = vld [vmem:[#allocation10 + $0x10] sm:$0xff] }
 0x7ca   :  { %v6213_v38 = vpop.f32.mrf.mxu2 }
 0x7cb   :  { %v6214_v11 = vadd.f32 %v6213_v38, %v12019_v1  ;;  %v9791_v38 = vld [vmem:[#allocation10 + $0x8] sm:$0xff] }
 0x7cc   :  { %v6262_v33 = vpop.f32.mrf.mxu3  ;;  %v12126_v28 = vpop.f32.mrf.mxu0  ;;  %6810 = vmatpush.bf16.msra.mxu3 %v9792_v19 }
 0x7cd   :  { %v6263_v18 = vadd.f32 %v6262_v33, %v6214_v11  ;;  %v12128_v57 = vpop.f32.mrf.mxu1 }
 0x7cf   :  { %v6641_v50 = vmax.f32 %v6263_v18, 0.0 }
 0x7d0   :  { %6811 = vmatpush.bf16.msra.mxu3 %v9791_v38  ;;  %v12836_v38 = vld [vmem:[#allocation23_spill] sm:$0xff] }
 0x7d2   :  { %v6215_v10 = vpop.f32.mrf.mxu2 }
 0x7d3   :  { %v6216_v47 = vadd.f32 %v6215_v10, %v12027_v24  ;;  %v9774_v24 = vld [vmem:[#allocation7 + $0x304] sm:$0xf] }
 0x7d4   :  { %v6264_v62 = vpop.f32.mrf.mxu3  ;;  %v6316_v16 = vpop.f32.mrf.mxu0  ;;  %v9126_v52 = vor.u32 %v9774_v24, %v9123_v8  ;;  %6812 = vmatpush.bf16.msra.mxu3 %v9790_v25 }
 0x7d5   :  { %v6265_v35 = vadd.f32 %v6264_v62, %v6216_v47  ;;  %v6317_v1 = vadd.f32 %v6316_v16, %v12056_v12  ;;  %v6365_v44 = vpop.f32.mrf.mxu1  ;;  %v12832_v16 = vld [vmem:[#allocation96_spill] sm:$0xff] }
 0x7d6   :  { %6583 = vmatpush.bf16.msra.mxu2 %v9126_v52 }
 0x7d7   :  { %v6643_v30 = vmax.f32 %v6265_v35, 0.0  ;;  %v12132_v60 = vadd.f32 %v6365_v44, %v6317_v1  ;;  %6413 = vmatmul.bf16.gmra.mxu2 %v12829_v40  ;;  %6511 = vmatmul.bf16.gmra.mxu0 %v12830_v37  ;;  %v12833_v35 = vld [vmem:[#allocation69_spill] sm:$0xff] }
 0x7d8   :  { %6560 = vmatmul.bf16.gmra.mxu1 %v11756_v45  ;;  %v12834_v1 = vld [vmem:[#allocation65_spill] sm:$0xff] }
 0x7d9   :  { %6462 = vmatmul.bf16.gmra.mxu3 %v12831_v21  ;;  %v12138_v39 = vpack.c.bf16 %v6643_v30, %v6641_v50 }
 0x7da   :  { %v6218_v63 = vpop.f32.mrf.mxu2 }
 0x7db   :  { %v6219_v6 = vadd.f32 %v6218_v63, %v12031_v43 }
 0x7dc   :  { %v6267_v29 = vpop.f32.mrf.mxu3  ;;  %v12141_v36 = vpop.f32.mrf.mxu0 }
 0x7dd   :  { %v6268_v9 = vadd.f32 %v6267_v29, %v6219_v6  ;;  %v12143_v59 = vpop.f32.mrf.mxu1 }
 0x7df   :  { %v6645_v47 = vmax.f32 %v6268_v9, 0.0 }
 0x7e2   :  { %v6220_v45 = vpop.f32.mrf.mxu2 }
 0x7e3   :  { %v6221_v11 = vadd.f32 %v6220_v45, %v12039_v42  ;;  %v12837_v45 = vld [vmem:[#allocation101_spill] sm:$0xff] }
 0x7e4   :  { %v6269_v33 = vpop.f32.mrf.mxu3  ;;  %v6321_v18 = vpop.f32.mrf.mxu0 }
 0x7e5   :  { %v6270_v32 = vadd.f32 %v6269_v33, %v6221_v11  ;;  %v6322_v43 = vadd.f32 %v6321_v18, %v12056_v12  ;;  %v6370_v10 = vpop.f32.mrf.mxu1  ;;  %v9805_v11 = vld [vmem:[#allocation10 + $0x78] sm:$0xff] }
 0x7e6   :  { %6854 = vmatpush.bf16.msra.mxu0 %v9805_v11 }
 0x7e7   :  { %v6647_v62 = vmax.f32 %v6270_v32, 0.0  ;;  %v12147_v13 = vadd.f32 %v6370_v10, %v6322_v43  ;;  %6418 = vmatmul.bf16.gmra.mxu2 %v12832_v16  ;;  %6516 = vmatmul.bf16.gmra.mxu0 %v12833_v35 }
 0x7e8   :  { %6565 = vmatmul.bf16.gmra.mxu1 %v11766_v7 }
 0x7e9   :  { %6467 = vmatmul.bf16.gmra.mxu3 %v12834_v1  ;;  %v12153_v42 = vpack.c.bf16 %v6647_v62, %v6645_v47  ;;  %v12838_v1 = vld [vmem:[#allocation25_spill] sm:$0xff] }
 0x7ea   :  { %v6223_v44 = vpop.f32.mrf.mxu2 }
 0x7eb   :  { %v6224_v50 = vadd.f32 %v6223_v44, %v12043_v53  ;;  %v12835_v53 = vld [vmem:[#allocation97_spill] sm:$0xff] }
 0x7ec   :  { %v6272_v30 = vpop.f32.mrf.mxu3  ;;  %v12156_v40 = vpop.f32.mrf.mxu0 }
 0x7ed   :  { %v6273_v37 = vadd.f32 %v6272_v30, %v6224_v50  ;;  %v12158_v26 = vpop.f32.mrf.mxu1 }
 0x7ef   :  { %v6649_v29 = vmax.f32 %v6273_v37, 0.0 }
 0x7f2   :  { %v6225_v21 = vpop.f32.mrf.mxu2 }
 0x7f3   :  { %v6226_v24 = vadd.f32 %v6225_v21, %v12051_v4 }
 0x7f4   :  { %v6274_v8 = vpop.f32.mrf.mxu3  ;;  %v6326_v52 = vpop.f32.mrf.mxu0 }
 0x7f5   :  { %v6275_v63 = vadd.f32 %v6274_v8, %v6226_v24  ;;  %v6327_v6 = vadd.f32 %v6326_v52, %v12056_v12  ;;  %v6375_v7 = vpop.f32.mrf.mxu1 }
 0x7f7   :  { %v6651_v19 = vmax.f32 %v6275_v63, 0.0  ;;  %v12162_v9 = vadd.f32 %v6375_v7, %v6327_v6  ;;  %6423 = vmatmul.bf16.gmra.mxu2 %v12835_v53  ;;  %6521 = vmatmul.bf16.gmra.mxu0 %v12836_v38 }
 0x7f8   :  { %6570 = vmatmul.bf16.gmra.mxu1 %v12812_v20  ;;  %v9804_v20 = vld [vmem:[#allocation10 + $0x70] sm:$0xff] }
 0x7f9   :  { %6472 = vmatmul.bf16.gmra.mxu3 %v12837_v45  ;;  %v12168_v4 = vpack.c.bf16 %v6651_v19, %v6649_v29  ;;  %6855 = vmatpush.bf16.msra.mxu0 %v9804_v20 }
 0x7fa   :  { %v6228_v33 = vpop.f32.mrf.mxu2 }
 0x7fb   :  { %v6229_v25 = vadd.f32 %v6228_v33, %v12058_v31 }
 0x7fc   :  { %v6277_v18 = vpop.f32.mrf.mxu3 }
 0x7fd   :  { %v6278_v32 = vadd.f32 %v6277_v18, %v6229_v25 }
 0x7ff   :  { %v6653_v16 = vmax.f32 %v6278_v32, 0.0 }
 0x802   :  { %v6230_v43 = vpop.f32.mrf.mxu2 }
 0x803   :  { %v6231_v10 = vadd.f32 %v6230_v43, %v12067_v46 }
 0x804   :  { %v6279_v47 = vpop.f32.mrf.mxu3 }
 0x805   :  { %v6280_v62 = vadd.f32 %v6279_v47, %v6231_v10 }
 0x807   :  { %v6655_v35 = vmax.f32 %v6280_v62, 0.0  ;;  %6584 = vmatmul.bf16.vlgmr.msra.gmra.mxu2 %v12838_v1  ;;  %v9798_v1 = vld [vmem:[#allocation10 + $0x40] sm:$0xff] }
 0x809   :  { %6813 = vmatmul.bf16.vlgmr.msra.gmra.mxu3 %v12081_v54  ;;  %v12174_v44 = vpack.c.bf16 %v6655_v35, %v6653_v16  ;;  %v9803_v54 = vld [vmem:[#allocation10 + $0x68] sm:$0xff] }
 0x80a   :  { %v6389_v50 = vpop.f32.mrf.mxu2  ;;  %6856 = vmatpush.bf16.msra.mxu0 %v9803_v54  ;;  %v9813_v54 = vld [vmem:[#allocation13 + $0x38] sm:$0xff] }
 0x80b   :  { %v6390_v31 = vadd.f32 %v6389_v50, %v12061_v48  ;;  %6995 = vmatpush.bf16.msra.mxu1 %v9813_v54 }
 0x80c   :  { %v6438_v30 = vpop.f32.mrf.mxu3 }
 0x80d   :  { %v12177_v37 = vadd.f32 %v6438_v30, %v6390_v31 }
 0x812   :  { %v6391_v21 = vpop.f32.mrf.mxu2 }
 0x813   :  { %v6392_v46 = vadd.f32 %v6391_v21, %v12071_v0 }
 0x814   :  { %v6440_v24 = vpop.f32.mrf.mxu3 }
 0x815   :  { %v12180_v8 = vadd.f32 %v6440_v24, %v6392_v46 }
 0x817   :  { %6589 = vmatmul.bf16.gmra.mxu2 %v11891_v51  ;;  %v9802_v51 = vld [vmem:[#allocation10 + $0x60] sm:$0xff] }
 0x818   :  { %6857 = vmatpush.bf16.msra.mxu0 %v9802_v51 }
 0x819   :  { %6818 = vmatmul.bf16.gmra.mxu3 %v12095_v2 }
 0x81a   :  { %v6394_v52 = vpop.f32.mrf.mxu2 }
 0x81b   :  { %v6395_v63 = vadd.f32 %v6394_v52, %v12075_v58 }
 0x81c   :  { %v6443_v6 = vpop.f32.mrf.mxu3 }
 0x81d   :  { %v12185_v48 = vadd.f32 %v6443_v6, %v6395_v63 }
 0x822   :  { %v6396_v7 = vpop.f32.mrf.mxu2 }
 0x823   :  { %v6397_v29 = vadd.f32 %v6396_v7, %v12085_v56 }
 0x824   :  { %v6445_v19 = vpop.f32.mrf.mxu3 }
 0x825   :  { %v12188_v0 = vadd.f32 %v6445_v19, %v6397_v29 }
 0x827   :  { %6594 = vmatmul.bf16.gmra.mxu2 %v11903_v17  ;;  %v9801_v17 = vld [vmem:[#allocation10 + $0x58] sm:$0xff] }
 0x828   :  { %6858 = vmatpush.bf16.msra.mxu0 %v9801_v17 }
 0x829   :  { %6823 = vmatmul.bf16.gmra.mxu3 %v12109_v15 }
 0x82a   :  { %v6399_v2 = vpop.f32.mrf.mxu2 }
 0x82b   :  { %v6400_v53 = vadd.f32 %v6399_v2, %v12089_v41 }
 0x82c   :  { %v6448_v38 = vpop.f32.mrf.mxu3 }
 0x82d   :  { %v12193_v58 = vadd.f32 %v6448_v38, %v6400_v53 }
 0x832   :  { %v6401_v45 = vpop.f32.mrf.mxu2 }
 0x833   :  { %v6402_v11 = vadd.f32 %v6401_v45, %v12099_v23  ;;  %v9812_v45 = vld [vmem:[#allocation13 + $0x30] sm:$0xff] }
 0x834   :  { %v6450_v33 = vpop.f32.mrf.mxu3  ;;  %6996 = vmatpush.bf16.msra.mxu1 %v9812_v45 }
 0x835   :  { %v12196_v56 = vadd.f32 %v6450_v33, %v6402_v11 }
 0x837   :  { %6599 = vmatmul.bf16.gmra.mxu2 %v11915_v3  ;;  %v9800_v3 = vld [vmem:[#allocation10 + $0x50] sm:$0xff] }
 0x838   :  { %6859 = vmatpush.bf16.msra.mxu0 %v9800_v3 }
 0x839   :  { %6828 = vmatmul.bf16.gmra.mxu3 %v12123_v34 }
 0x83a   :  { %v6404_v15 = vpop.f32.mrf.mxu2 }
 0x83b   :  { %v6405_v25 = vadd.f32 %v6404_v15, %v12103_v27 }
 0x83c   :  { %v6453_v18 = vpop.f32.mrf.mxu3 }
 0x83d   :  { %v12201_v41 = vadd.f32 %v6453_v18, %v6405_v25 }
 0x842   :  { %v6406_v32 = vpop.f32.mrf.mxu2 }
 0x843   :  { %v6407_v43 = vadd.f32 %v6406_v32, %v12113_v22  ;;  %v9799_v22 = vld [vmem:[#allocation10 + $0x48] sm:$0xff] }
 0x844   :  { %v6455_v10 = vpop.f32.mrf.mxu3  ;;  %6860 = vmatpush.bf16.msra.mxu0 %v9799_v22 }
 0x845   :  { %v12204_v23 = vadd.f32 %v6455_v10, %v6407_v43 }
 0x847   :  { %6604 = vmatmul.bf16.gmra.mxu2 %v11927_v61  ;;  %v12218_v61 = vpop.f32.mrf.mxu0 }
 0x848   :  { %6861 = vmatpush.bf16.msra.mxu0 %v9798_v1  ;;  %v9811_v1 = vld [vmem:[#allocation13 + $0x28] sm:$0xff] }
 0x849   :  { %6833 = vmatmul.bf16.gmra.mxu3 %v12138_v39  ;;  %v12220_v39 = vpop.f32.mrf.mxu1  ;;  %6997 = vmatpush.bf16.msra.mxu1 %v9811_v1 }
 0x84a   :  { %v6409_v34 = vpop.f32.mrf.mxu2 }
 0x84b   :  { %v12209_v47 = vadd.f32 %v6409_v34, %v12117_v5 }
 0x84c   :  { %v6458_v3 = vpop.f32.mrf.mxu3 }
 0x84f   :  { %v6487_v5 = vpop.f32.mrf.mxu0 }
 0x850   :  { %v6488_v63 = vadd.f32 %v6487_v5, %v12177_v37 }
 0x852   :  { %v12211_v27 = vpop.f32.mrf.mxu2 }
 0x857   :  { %6609 = vmatmul.bf16.gmra.mxu2 %v11939_v14  ;;  %v6536_v14 = vpop.f32.mrf.mxu1 }
 0x858   :  { %v6537_v7 = vadd.f32 %v6536_v14, %v6488_v63 }
 0x859   :  { %6838 = vmatmul.bf16.gmra.mxu3 %v12153_v42 }
 0x85a   :  { %v6414_v62 = vpop.f32.mrf.mxu2 }
 0x85b   :  { %v12216_v16 = vadd.f32 %v6414_v62, %v12132_v60  ;;  %v6489_v60 = vpop.f32.mrf.mxu0 }
 0x85c   :  { %v6490_v6 = vadd.f32 %v6489_v60, %v12180_v8  ;;  %v6460_v60 = vpop.f32.mrf.mxu3 }
 0x85f   :  { %v6538_v31 = vpop.f32.mrf.mxu1 }
 0x860   :  { %v6539_v29 = vadd.f32 %v6538_v31, %v6490_v6 }
 0x862   :  { %v12222_v35 = vpop.f32.mrf.mxu2 }
 0x863   :  { %v6492_v30 = vpop.f32.mrf.mxu0 }
 0x864   :  { %v6493_v17 = vadd.f32 %v6492_v30, %v12185_v48 }
 0x867   :  { %6614 = vmatmul.bf16.gmra.mxu2 %v11951_v49 }
 0x869   :  { %6843 = vmatmul.bf16.gmra.mxu3 %v12168_v4  ;;  %v6541_v4 = vpop.f32.mrf.mxu1 }
 0x86a   :  { %v6419_v42 = vpop.f32.mrf.mxu2  ;;  %v6542_v15 = vadd.f32 %v6541_v4, %v6493_v17 }
 0x86b   :  { %v12227_v20 = vadd.f32 %v6419_v42, %v12147_v13  ;;  %v6494_v24 = vpop.f32.mrf.mxu0 }
 0x86c   :  { %v6495_v8 = vadd.f32 %v6494_v24, %v12188_v0 }
 0x871   :  { %v6543_v13 = vpop.f32.mrf.mxu1 }
 0x872   :  { %v12229_v50 = vpop.f32.mrf.mxu2  ;;  %v6544_v18 = vadd.f32 %v6543_v13, %v6495_v8 }
 0x877   :  { %6619 = vmatmul.bf16.gmra.mxu2 %v11967_v55  ;;  %v6497_v55 = vpop.f32.mrf.mxu0 }
 0x878   :  { %v6498_v48 = vadd.f32 %v6497_v55, %v12193_v58 }
 0x879   :  { %6848 = vmatmul.bf16.gmra.mxu3 %v12174_v44  ;;  %v6546_v19 = vpop.f32.mrf.mxu1 }
 0x87a   :  { %v6424_v21 = vpop.f32.mrf.mxu2  ;;  %v6547_v31 = vadd.f32 %v6546_v19, %v6498_v48  ;;  %v6314_v19 = vadd.f32 %v12126_v28, %v12056_v12 }
 0x87b   :  { %v12234_v49 = vadd.f32 %v6424_v21, %v12162_v9 }
 0x87f   :  { %v6499_v11 = vpop.f32.mrf.mxu0 }
 0x880   :  { %v6500_v0 = vadd.f32 %v6499_v11, %v12196_v56  ;;  %v6363_v11 = vadd.f32 %v12128_v57, %v6314_v19  ;;  %v6319_v57 = vadd.f32 %v12141_v36, %v12056_v12 }
 0x881   :  { %v6548_v37 = vpop.f32.mrf.mxu1 }
 0x882   :  { %v12236_v46 = vpop.f32.mrf.mxu2  ;;  %v6549_v4 = vadd.f32 %v6548_v37, %v6500_v0  ;;  %v6412_v37 = vadd.f32 %v12211_v27, %v6363_v11 }
 0x887   :  { %v6502_v32 = vpop.f32.mrf.mxu0 }
 0x888   :  { %v6503_v55 = vadd.f32 %v6502_v32, %v12201_v41  ;;  %v6459_v41 = vadd.f32 %v6458_v3, %v12209_v47  ;;  %v6368_v47 = vadd.f32 %v12143_v59, %v6319_v57  ;;  %v6324_v59 = vadd.f32 %v12156_v40, %v12056_v12  ;;  %v9806_v40 = vld [vmem:[#allocation13] sm:$0xff] }
 0x889   :  { %v6551_v62 = vpop.f32.mrf.mxu1 }
 0x88a   :  { %v6585_v52 = vpop.f32.mrf.mxu2  ;;  %v6417_v48 = vadd.f32 %v12222_v35, %v6368_v47 }
 0x88b   :  { %v6586_v44 = vadd.f32 %v6585_v52, %v6537_v7  ;;  %v9810_v7 = vld [vmem:[#allocation13 + $0x20] sm:$0xff] }
 0x88c   :  { %6998 = vmatpush.bf16.msra.mxu1 %v9810_v7 }
 0x88d   :  { %v6626_v2 = vmax.f32 %v6586_v44, 0.0  ;;  %v6463_v44 = vpop.f32.mrf.mxu3 }
 0x88f   :  { %v6504_v42 = vpop.f32.mrf.mxu0 }
 0x890   :  { %v6505_v56 = vadd.f32 %v6504_v42, %v12204_v23 }
 0x891   :  { %v6553_v30 = vpop.f32.mrf.mxu1 }
 0x892   :  { %v6587_v51 = vpop.f32.mrf.mxu2 }
 0x893   :  { %v6588_v9 = vadd.f32 %v6587_v51, %v6539_v29  ;;  %v6552_v51 = vadd.f32 %v6551_v62, %v6503_v55 }
 0x895   :  { %v6628_v53 = vmax.f32 %v6588_v9, 0.0 }
 0x897   :  { %v6658_v38 = vpack.c.bf16 %v6628_v53, %v6626_v2  ;;  %v6507_v63 = vpop.f32.mrf.mxu0  ;;  %v6554_v53 = vadd.f32 %v6553_v30, %v6505_v56 }
 0x899   :  { %6862 = vmatmul.bf16.vlgmr.msra.gmra.mxu0 %v6658_v38  ;;  %v6556_v29 = vpop.f32.mrf.mxu1  ;;  %v6465_v38 = vpop.f32.mrf.mxu3 }
 0x89a   :  { %v6590_v33 = vpop.f32.mrf.mxu2 }
 0x89b   :  { %v6591_v25 = vadd.f32 %v6590_v33, %v6542_v15 }
 0x89d   :  { %v6630_v34 = vmax.f32 %v6591_v25, 0.0  ;;  %v9809_v25 = vld [vmem:[#allocation13 + $0x18] sm:$0xff] }
 0x89e   :  { %6999 = vmatpush.bf16.msra.mxu1 %v9809_v25 }
 0x89f   :  { %v6509_v9 = vpop.f32.mrf.mxu0 }
 0x8a1   :  { %v6558_v17 = vpop.f32.mrf.mxu1 }
 0x8a2   :  { %v6592_v43 = vpop.f32.mrf.mxu2 }
 0x8a3   :  { %v6593_v10 = vadd.f32 %v6592_v43, %v6544_v18  ;;  %v6461_v18 = vadd.f32 %v6460_v60, %v6412_v37  ;;  %v6508_v43 = vadd.f32 %v6507_v63, %v6459_v41 }
 0x8a5   :  { %v6632_v22 = vmax.f32 %v6593_v10, 0.0  ;;  %v6468_v10 = vpop.f32.mrf.mxu3  ;;  %v6557_v62 = vadd.f32 %v6556_v29, %v6508_v43 }
 0x8a7   :  { %v6660_v5 = vpack.c.bf16 %v6632_v22, %v6630_v34  ;;  %v6512_v28 = vpop.f32.mrf.mxu0  ;;  %v6510_v34 = vadd.f32 %v6509_v9, %v6461_v18 }
 0x8a9   :  { %6867 = vmatmul.bf16.gmra.mxu0 %v6660_v5  ;;  %v6561_v22 = vpop.f32.mrf.mxu1  ;;  %v6559_v5 = vadd.f32 %v6558_v17, %v6510_v34 }
 0x8aa   :  { %v6595_v14 = vpop.f32.mrf.mxu2 }
 0x8ab   :  { %v6596_v21 = vadd.f32 %v6595_v14, %v6547_v31  ;;  %v6464_v31 = vadd.f32 %v6463_v44, %v12216_v16  ;;  %v6373_v16 = vadd.f32 %v12158_v26, %v6324_v59  ;;  %v6329_v26 = vadd.f32 %v12218_v61, %v12056_v12 }
 0x8ad   :  { %v6634_v13 = vmax.f32 %v6596_v21, 0.0  ;;  %v6470_v60 = vpop.f32.mrf.mxu3  ;;  %v9808_v21 = vld [vmem:[#allocation13 + $0x10] sm:$0xff]  ;;  %v6422_v55 = vadd.f32 %v12229_v50, %v6373_v16 }
 0x8ae   :  { %7000 = vmatpush.bf16.msra.mxu1 %v9808_v21 }
 0x8af   :  { %v6514_v14 = vpop.f32.mrf.mxu0 }
 0x8b2   :  { %v6597_v24 = vpop.f32.mrf.mxu2 }
 0x8b3   :  { %v6598_v54 = vadd.f32 %v6597_v24, %v6549_v4  ;;  %v6563_v4 = vpop.f32.mrf.mxu1  ;;  %v6466_v24 = vadd.f32 %v6465_v38, %v6417_v48  ;;  %v6471_v38 = vadd.f32 %v6470_v60, %v6422_v55 }
 0x8b5   :  { %v6636_v52 = vmax.f32 %v6598_v54, 0.0  ;;  %v6513_v54 = vadd.f32 %v6512_v28, %v6464_v31  ;;  %v6473_v35 = vpop.f32.mrf.mxu3 }
 0x8b6   :  { %v6474_v34 = vadd.f32 %v6473_v35, %v12234_v49 }
 0x8b7   :  { %v6662_v6 = vpack.c.bf16 %v6636_v52, %v6634_v13  ;;  %v6515_v13 = vadd.f32 %v6514_v14, %v6466_v24  ;;  %v6517_v52 = vpop.f32.mrf.mxu0  ;;  %v6562_v63 = vadd.f32 %v6561_v22, %v6513_v54 }
 0x8b9   :  { %6872 = vmatmul.bf16.gmra.mxu0 %v6662_v6  ;;  %v6564_v7 = vadd.f32 %v6563_v4, %v6515_v13 }
 0x8ba   :  { %v6600_v58 = vpop.f32.mrf.mxu2 }
 0x8bb   :  { %v6601_v2 = vadd.f32 %v6600_v58, %v6552_v51  ;;  %v6566_v29 = vpop.f32.mrf.mxu1  ;;  %v6469_v51 = vadd.f32 %v6468_v10, %v12227_v20 }
 0x8bd   :  { %v6638_v8 = vmax.f32 %v6601_v2, 0.0  ;;  %v9807_v2 = vld [vmem:[#allocation13 + $0x8] sm:$0xff] }
 0x8be   :  { %7001 = vmatpush.bf16.msra.mxu1 %v9807_v2 }
 0x8c2   :  { %v6602_v45 = vpop.f32.mrf.mxu2  ;;  %7002 = vmatpush.bf16.msra.mxu1 %v9806_v40 }
 0x8c3   :  { %v6603_v33 = vadd.f32 %v6602_v45, %v6554_v53  ;;  %v6519_v53 = vpop.f32.mrf.mxu0  ;;  %v6475_v45 = vpop.f32.mrf.mxu3 }
 0x8c4   :  { %v6568_v17 = vpop.f32.mrf.mxu1  ;;  %v6520_v37 = vadd.f32 %v6519_v53, %v6471_v38 }
 0x8c5   :  { %v6640_v15 = vmax.f32 %v6603_v33, 0.0  ;;  %v6518_v33 = vadd.f32 %v6517_v52, %v6469_v51 }
 0x8c7   :  { %v6664_v23 = vpack.c.bf16 %v6640_v15, %v6638_v8  ;;  %v6567_v50 = vadd.f32 %v6566_v29, %v6518_v33  ;;  %v6569_v15 = vadd.f32 %v6568_v17, %v6520_v37 }
 0x8c9   :  { %6877 = vmatmul.bf16.gmra.mxu0 %v6664_v23  ;;  %v6378_v23 = vadd.f32 %v12220_v39, %v6329_v26 }
 0x8ca   :  { %v6605_v32 = vpop.f32.mrf.mxu2 }
 0x8cb   :  { %v6606_v27 = vadd.f32 %v6605_v32, %v6557_v62  ;;  %v6522_v20 = vpop.f32.mrf.mxu0  ;;  %v6814_v18 = vpop.f32.mrf.mxu3  ;;  %v6427_v28 = vadd.f32 %v12236_v46, %v6378_v23 }
 0x8cc   :  { %v6571_v10 = vpop.f32.mrf.mxu1  ;;  %v6523_v61 = vadd.f32 %v6522_v20, %v6474_v34 }
 0x8cd   :  { %v6642_v42 = vmax.f32 %v6606_v27, 0.0  ;;  %v6476_v57 = vadd.f32 %v6475_v45, %v6427_v28 }
 0x8d2   :  { %v6607_v1 = vpop.f32.mrf.mxu2 }
 0x8d3   :  { %v6608_v3 = vadd.f32 %v6607_v1, %v6559_v5  ;;  %v6524_v62 = vpop.f32.mrf.mxu0  ;;  %v6816_v5 = vpop.f32.mrf.mxu3  ;;  %v6572_v1 = vadd.f32 %v6571_v10, %v6523_v61 }
 0x8d4   :  { %v6525_v27 = vadd.f32 %v6524_v62, %v6476_v57  ;;  %v6573_v47 = vpop.f32.mrf.mxu1 }
 0x8d5   :  { %v6644_v0 = vmax.f32 %v6608_v3, 0.0 }
 0x8d6   :  { %v6574_v3 = vadd.f32 %v6573_v47, %v6525_v27 }
 0x8d7   :  { %v6666_v30 = vpack.c.bf16 %v6644_v0, %v6642_v42 }
 0x8d9   :  { %6882 = vmatmul.bf16.gmra.mxu0 %v6666_v30  ;;  %v12266_v30 = vld [vmem:[#allocation11] ss:$0 sm:$0xff] }
 0x8da   :  { %v6610_v36 = vpop.f32.mrf.mxu2  ;;  %v6815_v21 = vadd.f32 %v12266_v30, %v6814_v18  ;;  %v6817_v24 = vadd.f32 %v12266_v30, %v6816_v5 }
 0x8db   :  { %v6611_v6 = vadd.f32 %v6610_v36, %v6562_v63  ;;  %v6819_v60 = vpop.f32.mrf.mxu3 }
 0x8dd   :  { %v6646_v56 = vmax.f32 %v6611_v6, 0.0 }
 0x8e2   :  { %v6612_v58 = vpop.f32.mrf.mxu2 }
 0x8e3   :  { %v6613_v44 = vadd.f32 %v6612_v58, %v6564_v7  ;;  %v6821_v49 = vpop.f32.mrf.mxu3  ;;  %v6820_v7 = vadd.f32 %v12266_v30, %v6819_v60 }
 0x8e4   :  { %v6822_v29 = vadd.f32 %v12266_v30, %v6821_v49 }
 0x8e5   :  { %v6648_v19 = vmax.f32 %v6613_v44, 0.0 }
 0x8e7   :  { %v6668_v9 = vpack.c.bf16 %v6648_v19, %v6646_v56 }
 0x8e9   :  { %6887 = vmatmul.bf16.gmra.mxu0 %v6668_v9 }
 0x8ea   :  { %v6615_v11 = vpop.f32.mrf.mxu2 }
 0x8eb   :  { %v6616_v8 = vadd.f32 %v6615_v11, %v6567_v50  ;;  %v6824_v4 = vpop.f32.mrf.mxu3 }
 0x8ec   :  { %v6825_v53 = vadd.f32 %v12266_v30, %v6824_v4 }
 0x8ed   :  { %v6650_v32 = vmax.f32 %v6616_v8, 0.0 }
 0x8f2   :  { %v6617_v41 = vpop.f32.mrf.mxu2 }
 0x8f3   :  { %v6618_v25 = vadd.f32 %v6617_v41, %v6569_v15  ;;  %v6826_v35 = vpop.f32.mrf.mxu3 }
 0x8f4   :  { %v6827_v38 = vadd.f32 %v12266_v30, %v6826_v35 }
 0x8f5   :  { %v6652_v43 = vmax.f32 %v6618_v25, 0.0 }
 0x8f7   :  { %v6670_v22 = vpack.c.bf16 %v6652_v43, %v6650_v32 }
 0x8f9   :  { %6892 = vmatmul.bf16.gmra.mxu0 %v6670_v22 }
 0x8fa   :  { %v6620_v12 = vpop.f32.mrf.mxu2 }
 0x8fb   :  { %v6621_v39 = vadd.f32 %v6620_v12, %v6572_v1  ;;  %v6829_v55 = vpop.f32.mrf.mxu3 }
 0x8fc   :  { %v6830_v8 = vadd.f32 %v12266_v30, %v6829_v55 }
 0x8fd   :  { %v6654_v46 = vmax.f32 %v6621_v39, 0.0 }
 0x902   :  { %v6622_v14 = vpop.f32.mrf.mxu2 }
 0x903   :  { %v6623_v48 = vadd.f32 %v6622_v14, %v6574_v3  ;;  %v6831_v2 = vpop.f32.mrf.mxu3 }
 0x904   :  { %v6832_v15 = vadd.f32 %v12266_v30, %v6831_v2 }
 0x905   :  { %v6656_v42 = vmax.f32 %v6623_v48, 0.0 }
 0x907   :  { %v6672_v0 = vpack.c.bf16 %v6656_v42, %v6654_v46 }
 0x909   :  { %6897 = vmatmul.bf16.gmra.mxu0 %v6672_v0 }
 0x90b   :  { %v6834_v26 = vpop.f32.mrf.mxu3 }
 0x90c   :  { %v6835_v34 = vadd.f32 %v12266_v30, %v6834_v26 }
 0x913   :  { %v6836_v41 = vpop.f32.mrf.mxu3 }
 0x914   :  { %v6837_v22 = vadd.f32 %v12266_v30, %v6836_v41 }
 0x916   :  { %v6863_v31 = vpop.f32.mrf.mxu0 }
 0x917   :  { %v6864_v36 = vadd.f32 %v6863_v31, %v6815_v21 }
 0x919   :  { %v6903_v52 = vmax.f32 %v6864_v36, 0.0 }
 0x91b   :  { %v6839_v10 = vpop.f32.mrf.mxu3 }
 0x91c   :  { %v6840_v39 = vadd.f32 %v12266_v30, %v6839_v10 }
 0x91e   :  { %v6865_v54 = vpop.f32.mrf.mxu0 }
 0x91f   :  { %v6866_v13 = vadd.f32 %v6865_v54, %v6817_v24 }
 0x921   :  { %v6904_v59 = vmax.f32 %v6866_v13, 0.0 }
 0x923   :  { %v6919_v63 = vpack.c.bf16 %v6904_v59, %v6903_v52  ;;  %v6841_v5 = vpop.f32.mrf.mxu3 }
 0x924   :  { %v6842_v14 = vadd.f32 %v12266_v30, %v6841_v5 }
 0x925   :  { %7003 = vmatmul.bf16.vlgmr.msra.gmra.mxu1 %v6919_v63 }
 0x926   :  { %v6868_v6 = vpop.f32.mrf.mxu0 }
 0x927   :  { %v6869_v58 = vadd.f32 %v6868_v6, %v6820_v7 }
 0x929   :  { %v6905_v56 = vmax.f32 %v6869_v58, 0.0 }
 0x92b   :  { %v6844_v3 = vpop.f32.mrf.mxu3 }
 0x92c   :  { %v6845_v4 = vadd.f32 %v12266_v30, %v6844_v3 }
 0x92e   :  { %v6870_v16 = vpop.f32.mrf.mxu0 }
 0x92f   :  { %v6871_v44 = vadd.f32 %v6870_v16, %v6822_v29 }
 0x931   :  { %v6906_v19 = vmax.f32 %v6871_v44, 0.0 }
 0x933   :  { %v6920_v51 = vpack.c.bf16 %v6906_v19, %v6905_v56  ;;  %v6846_v31 = vpop.f32.mrf.mxu3 }
 0x934   :  { %v6847_v24 = vadd.f32 %v12266_v30, %v6846_v31 }
 0x935   :  { %7008 = vmatmul.bf16.gmra.mxu1 %v6920_v51 }
 0x936   :  { %v6873_v9 = vpop.f32.mrf.mxu0 }
 0x937   :  { %v6874_v40 = vadd.f32 %v6873_v9, %v6825_v53  ;;  %v9846_v9 = vld [vmem:[#allocation14] ss:$0 sm:$0xff] }
 0x939   :  { %v6907_v33 = vmax.f32 %v6874_v40, 0.0 }
 0x93b   :  { %v6849_v52 = vpop.f32.mrf.mxu3 }
 0x93c   :  { %v6850_v29 = vadd.f32 %v12266_v30, %v6849_v52 }
 0x93e   :  { %v6875_v45 = vpop.f32.mrf.mxu0 }
 0x93f   :  { %v6876_v11 = vadd.f32 %v6875_v45, %v6827_v38 }
 0x941   :  { %v6908_v17 = vmax.f32 %v6876_v11, 0.0 }
 0x943   :  { %v6921_v37 = vpack.c.bf16 %v6908_v17, %v6907_v33  ;;  %v6851_v7 = vpop.f32.mrf.mxu3 }
 0x944   :  { %v6852_v58 = vadd.f32 %v12266_v30, %v6851_v7 }
 0x945   :  { %7013 = vmatmul.bf16.gmra.mxu1 %v6921_v37 }
 0x946   :  { %v6878_v50 = vpop.f32.mrf.mxu0 }
 0x947   :  { %v6879_v20 = vadd.f32 %v6878_v50, %v6830_v8 }
 0x949   :  { %v6909_v18 = vmax.f32 %v6879_v20, 0.0 }
 0x94e   :  { %v6880_v23 = vpop.f32.mrf.mxu0 }
 0x94f   :  { %v6881_v25 = vadd.f32 %v6880_v23, %v6832_v15 }
 0x951   :  { %v6910_v28 = vmax.f32 %v6881_v25, 0.0 }
 0x953   :  { %v6922_v32 = vpack.c.bf16 %v6910_v28, %v6909_v18 }
 0x955   :  { %7018 = vmatmul.bf16.gmra.mxu1 %v6922_v32 }
 0x956   :  { %v6883_v43 = vpop.f32.mrf.mxu0 }
 0x957   :  { %v6884_v57 = vadd.f32 %v6883_v43, %v6835_v34 }
 0x959   :  { %v6911_v62 = vmax.f32 %v6884_v57, 0.0 }
 0x95e   :  { %v6885_v12 = vpop.f32.mrf.mxu0 }
 0x95f   :  { %v6886_v61 = vadd.f32 %v6885_v12, %v6837_v22 }
 0x961   :  { %v6912_v27 = vmax.f32 %v6886_v61, 0.0 }
 0x963   :  { %v6923_v1 = vpack.c.bf16 %v6912_v27, %v6911_v62 }
 0x965   :  { %7023 = vmatmul.bf16.gmra.mxu1 %v6923_v1 }
 0x966   :  { %v6888_v47 = vpop.f32.mrf.mxu0 }
 0x967   :  { %v6889_v48 = vadd.f32 %v6888_v47, %v6840_v39 }
 0x969   :  { %v6913_v0 = vmax.f32 %v6889_v48, 0.0 }
 0x96e   :  { %v6890_v46 = vpop.f32.mrf.mxu0 }
 0x96f   :  { %v6891_v42 = vadd.f32 %v6890_v46, %v6842_v14 }
 0x971   :  { %v6914_v60 = vmax.f32 %v6891_v42, 0.0 }
 0x973   :  { %v6924_v49 = vpack.c.bf16 %v6914_v60, %v6913_v0 }
 0x975   :  { %7028 = vmatmul.bf16.gmra.mxu1 %v6924_v49 }
 0x976   :  { %v6893_v21 = vpop.f32.mrf.mxu0 }
 0x977   :  { %v6894_v36 = vadd.f32 %v6893_v21, %v6845_v4 }
 0x979   :  { %v6915_v59 = vmax.f32 %v6894_v36, 0.0 }
 0x97e   :  { %v6895_v54 = vpop.f32.mrf.mxu0 }
 0x97f   :  { %v6896_v13 = vadd.f32 %v6895_v54, %v6847_v24 }
 0x981   :  { %v6916_v63 = vmax.f32 %v6896_v13, 0.0 }
 0x983   :  { %v6925_v35 = vpack.c.bf16 %v6916_v63, %v6915_v59 }
 0x985   :  { %7033 = vmatmul.bf16.gmra.mxu1 %v6925_v35 }
 0x986   :  { %v6898_v6 = vpop.f32.mrf.mxu0 }
 0x987   :  { %v6899_v16 = vadd.f32 %v6898_v6, %v6850_v29 }
 0x989   :  { %v6917_v56 = vmax.f32 %v6899_v16, 0.0 }
 0x98e   :  { %v6900_v44 = vpop.f32.mrf.mxu0 }
 0x98f   :  { %v6901_v55 = vadd.f32 %v6900_v44, %v6852_v58 }
 0x991   :  { %v6918_v19 = vmax.f32 %v6901_v55, 0.0 }
 0x993   :  { %v6926_v51 = vpack.c.bf16 %v6918_v19, %v6917_v56 }
 0x995   :  { %7038 = vmatmul.bf16.gmra.mxu1 %v6926_v51 }
 0x9a2   :  { %v7004_v2 = vpop.f32.mrf.mxu1 }
 0x9a3   :  { %v7005_v53 = vadd.f32 %v9846_v9, %v7004_v2 }
 0x9a5   :  { %7044 = vst [vmem:[#allocation16] sm:$0xff] %v7005_v53 }
 0x9aa   :  { %v7006_v38 = vpop.f32.mrf.mxu1 }
 0x9ab   :  { %v7007_v40 = vadd.f32 %v9846_v9, %v7006_v38 }
 0x9ad   :  { %7045 = vst [vmem:[#allocation16 + $0x8] sm:$0xff] %v7007_v40 }
 0x9b2   :  { %v7009_v45 = vpop.f32.mrf.mxu1 }
 0x9b3   :  { %v7010_v11 = vadd.f32 %v9846_v9, %v7009_v45 }
 0x9b5   :  { %7046 = vst [vmem:[#allocation16 + $0x10] sm:$0xff] %v7010_v11 }
 0x9ba   :  { %v7011_v33 = vpop.f32.mrf.mxu1 }
 0x9bb   :  { %v7012_v17 = vadd.f32 %v9846_v9, %v7011_v33 }
 0x9bd   :  { %7047 = vst [vmem:[#allocation16 + $0x18] sm:$0xff] %v7012_v17 }
 0x9c2   :  { %v7014_v30 = vpop.f32.mrf.mxu1 }
 0x9c3   :  { %v7015_v37 = vadd.f32 %v9846_v9, %v7014_v30 }
 0x9c5   :  { %7048 = vst [vmem:[#allocation16 + $0x20] sm:$0xff] %v7015_v37 }
 0x9ca   :  { %v7016_v26 = vpop.f32.mrf.mxu1 }
 0x9cb   :  { %v7017_v50 = vadd.f32 %v9846_v9, %v7016_v26 }
 0x9cd   :  { %7049 = vst [vmem:[#allocation16 + $0x28] sm:$0xff] %v7017_v50 }
 0x9d2   :  { %v7019_v8 = vpop.f32.mrf.mxu1 }
 0x9d3   :  { %v7020_v15 = vadd.f32 %v9846_v9, %v7019_v8 }
 0x9d5   :  { %7050 = vst [vmem:[#allocation16 + $0x30] sm:$0xff] %v7020_v15 }
 0x9da   :  { %v7021_v20 = vpop.f32.mrf.mxu1 }
 0x9db   :  { %v7022_v41 = vadd.f32 %v9846_v9, %v7021_v20 }
 0x9dd   :  { %7051 = vst [vmem:[#allocation16 + $0x38] sm:$0xff] %v7022_v41 }
 0x9e2   :  { %v7024_v23 = vpop.f32.mrf.mxu1 }
 0x9e3   :  { %v7025_v25 = vadd.f32 %v9846_v9, %v7024_v23 }
 0x9e5   :  { %7052 = vst [vmem:[#allocation16 + $0x40] sm:$0xff] %v7025_v25 }
 0x9ea   :  { %v7026_v18 = vpop.f32.mrf.mxu1 }
 0x9eb   :  { %v7027_v28 = vadd.f32 %v9846_v9, %v7026_v18 }
 0x9ed   :  { %7053 = vst [vmem:[#allocation16 + $0x48] sm:$0xff] %v7027_v28 }
 0x9f2   :  { %v7029_v32 = vpop.f32.mrf.mxu1 }
 0x9f3   :  { %v7030_v43 = vadd.f32 %v9846_v9, %v7029_v32 }
 0x9f5   :  { %7054 = vst [vmem:[#allocation16 + $0x50] sm:$0xff] %v7030_v43 }
 0x9fa   :  { %v7031_v10 = vpop.f32.mrf.mxu1 }
 0x9fb   :  { %v7032_v34 = vadd.f32 %v9846_v9, %v7031_v10 }
 0x9fd   :  { %7055 = vst [vmem:[#allocation16 + $0x58] sm:$0xff] %v7032_v34 }
 0xa02   :  { %v7034_v22 = vpop.f32.mrf.mxu1 }
 0xa03   :  { %v7035_v57 = vadd.f32 %v9846_v9, %v7034_v22 }
 0xa05   :  { %7056 = vst [vmem:[#allocation16 + $0x60] sm:$0xff] %v7035_v57 }
 0xa0a   :  { %v7036_v12 = vpop.f32.mrf.mxu1 }
 0xa0b   :  { %v7037_v61 = vadd.f32 %v9846_v9, %v7036_v12 }
 0xa0d   :  { %7057 = vst [vmem:[#allocation16 + $0x68] sm:$0xff] %v7037_v61 }
 0xa12   :  { %v7039_v62 = vpop.f32.mrf.mxu1 }
 0xa13   :  { %v7040_v27 = vadd.f32 %v9846_v9, %v7039_v62 }
 0xa15   :  { %7058 = vst [vmem:[#allocation16 + $0x70] sm:$0xff] %v7040_v27 }
 0xa1a   :  { %v7041_v5 = vpop.f32.mrf.mxu1 }
 0xa1b   :  { %v7042_v1 = vadd.f32 %v9846_v9, %v7041_v5 }
 0xa1d   :  { %7059 = vst [vmem:[#allocation16 + $0x78] sm:$0xff] %v7042_v1 }
 0xa1e   :  { %7072 = dma.vmem_to_hbm [thread:$0]  %s7065_s10, 2048, %s7067_s12, [#allocation4], %s10087_s14, %s10087_s14, %s10088_s15  }
 0xa1f   :  { %10078 = dma.done.wait [#allocation4], 2048  }
 0xa20   :  { %10079 = vsyncadd [#allocation4], 4294965248 }
 0xa21   :  { %7077 = vsyncpa [#allocation3], 1 }
 0xa22   :  { %7078 = vsyncpa [#allocation6], 1 }
 0xa23   :  { %7079 = vsyncpa [#allocation9], 1 }
 0xa24   :  { %7080 = vsyncpa [#allocation12], 1 }
 0xa25   :  { %7081 = vsyncpa [#allocation15], 1 }
 0xa26   :  { %7082 = vsyncpa [#allocation4], 1 }

</bundles_post_ra>
